<compile_context>
chip_gen: v5e
topology: v5e:2x2
jax: 0.10.0
libtpu: 0.0.40
codegen_flags: <defaults>
</compile_context>

<pallas_src>
import jax
import jax.numpy as jnp
from jax.experimental import pallas as pl
from jax.experimental.pallas import tpu as pltpu


def _round_up(x, m):
    return (x + m - 1) // m * m


def _choose_tile(dim, max_tile, align, min_blocks=1):
    """Pick a tile size <= max_tile, multiple of `align`.

    Prefers exact divisors of `dim` (no padding pass) and, when possible,
    a choice that yields at least `min_blocks` grid blocks (so both v7x
    TensorCores get work on the parallel axes). Falls back to padding.
    """
    padded = _round_up(dim, align)
    cap = max(align, (min(max_tile, padded) // align) * align)
    divisors = [t for t in range(cap, align - 1, -align) if dim % t == 0]
    for t in divisors:
        if dim // t >= min_blocks and t >= min(cap, 128):
            return t
    if divisors:
        return divisors[0]
    return cap  # no aligned divisor: dim will be padded up to a tile multiple


# ---------------------------------------------------------------------------
# Kernels
# ---------------------------------------------------------------------------

def _ffn_kernel_full_k(x_ref, w_ref, b_ref, o_ref):
    # Full-K path: grid = (M/tm, N/tn), both axes parallel.
    # x_ref: [tm, Kp]  w_ref: [Kp, tn]  b_ref: [1, tn]  o_ref: [tm, tn]
    acc = jnp.dot(x_ref[...], w_ref[...], preferred_element_type=jnp.float32)
    o_ref[...] = (acc + b_ref[...].astype(jnp.float32)).astype(o_ref.dtype)


def _ffn_kernel_ksplit_f32out(x_ref, w_ref, b_ref, o_ref):
    # K-split path with an f32 output: accumulate directly into the resident
    # output block (no scratch). Bias is folded into the k==0 init.
    k = pl.program_id(2)

    @pl.when(k == 0)
    def _():
        o_ref[...] = jnp.broadcast_to(
            b_ref[...].astype(jnp.float32), o_ref.shape)

    o_ref[...] += jnp.dot(x_ref[...], w_ref[...],
                          preferred_element_type=jnp.float32)


def _ffn_kernel_ksplit(x_ref, w_ref, b_ref, o_ref, acc_ref):
    # K-split path with a non-f32 output: f32 VMEM accumulator, bias folded
    # into the k==0 init, single cast + store at k==last.
    k = pl.program_id(2)

    @pl.when(k == 0)
    def _():
        acc_ref[...] = jnp.broadcast_to(
            b_ref[...].astype(jnp.float32), acc_ref.shape)

    acc_ref[...] += jnp.dot(x_ref[...], w_ref[...],
                            preferred_element_type=jnp.float32)

    @pl.when(k == pl.num_programs(2) - 1)
    def _():
        o_ref[...] = acc_ref[...].astype(o_ref.dtype)


# ---------------------------------------------------------------------------
# Wrapper
# ---------------------------------------------------------------------------

def reformer_feed_forward_output(hidden_states, weight, bias, *,
                                 training=False, dropout_prob=0.0,
                                 compute_dtype=None,
                                 tm=512, tn=512, tk=None,
                                 vmem_budget_bytes=24 * 1024 * 1024):
    """hidden_states: [B, S, K]; weight: [N, K] (PyTorch layout); bias: [N].

    Returns [B, S, N] = hidden_states @ weight.T + bias (dropout = identity
    in inference mode). `compute_dtype=jnp.bfloat16` enables bf16 matmul with
    f32 accumulation (recommended for throughput when tolerance allows).
    """
    if training and dropout_prob > 0.0:
        # TODO(synk): implement pltpu.prng_* based dropout for training mode.
        raise NotImplementedError(
            "Only inference mode is supported (dropout is the identity).")

    B, S, K = hidden_states.shape
    N, K_w = weight.shape
    assert K_w == K, (K_w, K)
    M = B * S

    out_dtype = jnp.dtype(hidden_states.dtype)
    in_dtype = jnp.dtype(compute_dtype) if compute_dtype is not None else out_dtype
    in_isize = in_dtype.itemsize
    out_isize = out_dtype.itemsize

    # bf16 packs 2 rows per sublane -> keep the second-minor tile a multiple
    # of 16; f32 needs 8.
    sub_align = 16 if in_isize < 4 else 8

    tm = _choose_tile(M, tm, sub_align, min_blocks=2)
    tn = _choose_tile(N, tn, 128)

    kp_full = _round_up(K, 128)

    # VMEM footprint independent of tk: double-buffered output + bias tiles.
    fixed = 2 * tm * tn * out_isize + 2 * tn * 4
    per_k = 2 * (tm + tn) * in_isize  # x + W tiles, double-buffered

    if tk is None:
        tk_cap_full = max(128, ((vmem_budget_bytes - fixed) // per_k) // 128 * 128)
        if kp_full <= tk_cap_full:
            tk = kp_full                      # full-K: no reduction grid axis
        else:
            acc_bytes = 0 if out_dtype == jnp.float32 else tm * tn * 4
            tk_cap = max(
                128,
                ((vmem_budget_bytes - fixed - acc_bytes) // per_k) // 128 * 128)
            tk = _choose_tile(kp_full, tk_cap, 128)
    else:
        tk = min(_round_up(tk, 128), kp_full)

    Mp = _round_up(M, tm)
    Np = _round_up(N, tn)
    Kp = _round_up(K, tk)
    grid_m, grid_n, grid_k = Mp // tm, Np // tn, Kp // tk
    k_split = grid_k > 1

    # One-time weight transpose to the MXU-native [K, N] orientation.
    # (For inference, callers should pre-transpose / cache this outside the
    # hot path; here it is a single cheap pass over the weights.)
    x2d = hidden_states.reshape(M, K).astype(in_dtype)
    wt = weight.T.astype(in_dtype)          # [K, N]
    b2d = bias.reshape(1, N).astype(jnp.float32)

    # Padding only fires for non-tile-aligned shapes (never for power-of-two
    # Reformer dims thanks to divisor-preferring tile selection).
    if (Mp, Kp) != (M, K):
        x2d = jnp.pad(x2d, ((0, Mp - M), (0, Kp - K)))
    if (Kp, Np) != (K, N):
        wt = jnp.pad(wt, ((0, Kp - K), (0, Np - N)))
    if Np != N:
        b2d = jnp.pad(b2d, ((0, 0), (0, Np - N)))

    if not k_split:
        kernel = _ffn_kernel_full_k
        grid = (grid_m, grid_n)
        in_specs = [
            pl.BlockSpec((tm, tk), lambda i, j: (i, 0)),   # x
            pl.BlockSpec((tk, tn), lambda i, j: (0, j)),   # W^T
            pl.BlockSpec((1, tn), lambda i, j: (0, j)),    # bias
        ]
        out_spec = pl.BlockSpec((tm, tn), lambda i, j: (i, j))
        scratch = []
        dim_sem = ("parallel", "parallel")
    else:
        grid = (grid_m, grid_n, grid_k)
        in_specs = [
            pl.BlockSpec((tm, tk), lambda i, j, k: (i, k)),   # x
            pl.BlockSpec((tk, tn), lambda i, j, k: (k, j)),   # W^T
            pl.BlockSpec((1, tn), lambda i, j, k: (0, j)),    # bias
        ]
        out_spec = pl.BlockSpec((tm, tn), lambda i, j, k: (i, j))
        dim_sem = ("parallel", "parallel", "arbitrary")
        if out_dtype == jnp.float32:
            kernel = _ffn_kernel_ksplit_f32out
            scratch = []
        else:
            kernel = _ffn_kernel_ksplit
            scratch = [pltpu.VMEM((tm, tn), jnp.float32)]

    # Accurate (re-read aware) advisory cost for XLA's scheduler.
    cost = pl.CostEstimate(
        flops=2 * M * N * K,
        transcendentals=0,
        bytes_accessed=int(x2d.size * in_isize * grid_n
                           + wt.size * in_isize * grid_m
                           + b2d.size * 4 * grid_m
                           + Mp * Np * out_isize),
    )

    out = pl.pallas_call(
        kernel,
        out_shape=jax.ShapeDtypeStruct((Mp, Np), out_dtype),
        grid_spec=pltpu.PrefetchScalarGridSpec(
            num_scalar_prefetch=0,
            grid=grid,
            in_specs=in_specs,
            out_specs=out_spec,
            scratch_shapes=scratch,
        ),
        compiler_params=pltpu.CompilerParams(
            dimension_semantics=dim_sem,
            vmem_limit_bytes=48 * 1024 * 1024,
        ),
        cost_estimate=cost,
    )(x2d, wt, b2d)

    if (Mp, Np) != (M, N):
        out = out[:M, :N]
    return out.reshape(B, S, N)


if __name__ == "__main__":
    # Reformer-like config: feed_forward_size=1024 -> hidden_size=512,
    # hidden_dropout_prob=0.1 (identity in inference mode).
    batch, seq = 2, 256
    feed_forward_size, hidden_size = 1024, 512

    key = jax.random.PRNGKey(0)
    k_x, k_w, k_b = jax.random.split(key, 3)

    hidden_states = jax.random.normal(
        k_x, (batch, seq, feed_forward_size), dtype=jnp.float32)
    bound = 1.0 / (feed_forward_size ** 0.5)
    weight = jax.random.uniform(
        k_w, (hidden_size, feed_forward_size),
        minval=-bound, maxval=bound, dtype=jnp.float32)
    bias = jax.random.uniform(
        k_b, (hidden_size,), minval=-bound, maxval=bound, dtype=jnp.float32)

    ref = (hidden_states.reshape(-1, feed_forward_size) @ weight.T + bias
           ).reshape(batch, seq, hidden_size)

    # 1) f32, full-K path (no reduction grid axis, all-parallel grid).
    out = jax.block_until_ready(
        reformer_feed_forward_output(hidden_states, weight, bias))
    assert out.shape == ref.shape and out.dtype == ref.dtype
    # Tolerance covers MXU default-precision f32 matmul rounding.
    assert jnp.allclose(out, ref, atol=1e-2, rtol=1e-2), (
        float(jnp.max(jnp.abs(out - ref))))

    # 2) f32 with a forced K split (exercises the o_ref-resident accumulator).
    out_ks = jax.block_until_ready(
        reformer_feed_forward_output(hidden_states, weight, bias, tk=256))
    assert jnp.allclose(out_ks, ref, atol=1e-2, rtol=1e-2), (
        float(jnp.max(jnp.abs(out_ks - ref))))

    # 3) bf16 compute with f32 accumulation (recommended throughput mode).
    out_bf = jax.block_until_ready(
        reformer_feed_forward_output(hidden_states, weight, bias,
                                     compute_dtype=jnp.bfloat16))
    assert out_bf.dtype == jnp.float32
    assert jnp.allclose(out_bf, ref, atol=5e-2, rtol=5e-2), (
        float(jnp.max(jnp.abs(out_bf - ref))))

    # 4) bf16 in/out with a forced K split (exercises the f32 scratch path).
    out_bf2 = jax.block_until_ready(
        reformer_feed_forward_output(hidden_states.astype(jnp.bfloat16),
                                     weight.astype(jnp.bfloat16), bias,
                                     tk=256))
    assert out_bf2.dtype == jnp.bfloat16
    assert jnp.allclose(out_bf2.astype(jnp.float32), ref,
                        atol=5e-2, rtol=5e-2), (
        float(jnp.max(jnp.abs(out_bf2.astype(jnp.float32) - ref))))

    print("KERNEL_OK")
</pallas_src>

<mosaic_0001>
module attributes {stable_mosaic.version = 11 : i64} {
  func.func @_ffn_kernel_full_k(%arg0: i32, %arg1: i32, %arg2: memref<256x1024xf32, #tpu.memory_space<vmem>>, %arg3: memref<1024x512xf32, #tpu.memory_space<vmem>>, %arg4: memref<1x512xf32, #tpu.memory_space<vmem>>, %arg5: memref<256x512xf32, #tpu.memory_space<vmem>>) attributes {dimension_semantics = [#tpu.dimension_semantics<parallel>, #tpu.dimension_semantics<parallel>], iteration_bounds = array<i64: 2, 1>, scalar_prefetch = 0 : i64, scratch_operands = 0 : i64, tpu.core_type = #tpu.core_type<tc>, window_params = [{transform_indices = @transform_0, window_bounds = array<i64: 256, 1024>}, {transform_indices = @transform_1, window_bounds = array<i64: 1024, 512>}, {transform_indices = @transform_2, window_bounds = array<i64: 1, 512>}, {transform_indices = @transform_3, window_bounds = array<i64: 256, 512>}]} {
    %c0 = arith.constant 0 : index
    %c0_0 = arith.constant 0 : index
    %0 = vector.load %arg2[%c0, %c0_0] : memref<256x1024xf32, #tpu.memory_space<vmem>>, vector<256x1024xf32>
    %c0_1 = arith.constant 0 : index
    %c0_2 = arith.constant 0 : index
    %1 = vector.load %arg3[%c0_1, %c0_2] : memref<1024x512xf32, #tpu.memory_space<vmem>>, vector<1024x512xf32>
    %cst = arith.constant dense<0.000000e+00> : vector<256x512xf32>
    %2 = tpu.matmul %0, %1, %cst {dimension_numbers = #tpu.dot_dimension_numbers<[1], [0], [0], [1], [0, 0, 1, 1], [], []>} : vector<256x1024xf32>, vector<1024x512xf32>, vector<256x512xf32> -> vector<256x512xf32>
    %c0_3 = arith.constant 0 : index
    %c0_4 = arith.constant 0 : index
    %3 = vector.load %arg4[%c0_3, %c0_4] : memref<1x512xf32, #tpu.memory_space<vmem>>, vector<1x512xf32>
    %4 = vector.broadcast %3 : vector<1x512xf32> to vector<256x512xf32>
    %5 = arith.addf %2, %4 : vector<256x512xf32>
    %c0_5 = arith.constant 0 : index
    %c0_6 = arith.constant 0 : index
    %6 = vector.load %arg5[%c0_5, %c0_6] : memref<256x512xf32, #tpu.memory_space<vmem>>, vector<256x512xf32>
    tpu.vector_store %arg5[%c0_5, %c0_6], %5 {strides = array<i32>} : memref<256x512xf32, #tpu.memory_space<vmem>>, vector<256x512xf32>,
    return
  }
  func.func @transform_0(%arg0: i32, %arg1: i32) -> (i32, i32) {
    %c0_i32 = arith.constant 0 : i32
    %c0_i32_0 = arith.constant 0 : i32
    return %arg0, %c0_i32 : i32, i32
  }
  func.func @transform_1(%arg0: i32, %arg1: i32) -> (i32, i32) {
    %c0_i32 = arith.constant 0 : i32
    %c0_i32_0 = arith.constant 0 : i32
    return %c0_i32, %arg1 : i32, i32
  }
  func.func @transform_2(%arg0: i32, %arg1: i32) -> (i32, i32) {
    %c0_i32 = arith.constant 0 : i32
    %c0_i32_0 = arith.constant 0 : i32
    return %c0_i32, %arg1 : i32, i32
  }
  func.func @transform_3(%arg0: i32, %arg1: i32) -> (i32, i32) {
    %c0_i32 = arith.constant 0 : i32
    return %arg0, %arg1 : i32, i32
  }
}

</mosaic_0001>

<bundles_post_ra>
// kernel: tpu_custom_call.1
= control target key start
LH: loop header
LB: loop body
LE: loop exit
PB: predicated region body
PF: predicated region fallthrough
CT: control target
= control target key end

     0   :  { %s7828_s0 = inlined_call_operand.hbm [shape: f32[512,1024], index: 0, kind: input, shape index: {}]   ;;  %s7829_s1 = inlined_call_operand.hbm [shape: f32[1024,512], index: 1, kind: input, shape index: {}]   ;;  %s7830_s2 = inlined_call_operand.hbm [shape: f32[1,512], index: 2, kind: input, shape index: {}]   ;;  %s7831_s3 = inlined_call_operand.hbm [shape: f32[512,512], index: 3, kind: output, shape index: {}]  }
   0x1   :  { %7832 = sst [smem:[#allocation12_spill]] %s7829_s1 }
   0x2   :  { %8 = vsyncpa [#allocation3], 0 }
   0x3   :  { %10 = vsyncpa [#allocation3 + $0x1], 0 }
   0x4   :  { %11 = vsyncpa [#allocation6], 0 }
   0x5   :  { %12 = vsyncpa [#allocation4], 0 }
   0x6   :  { %14 = vsyncpa [#allocation4 + $0x1], 0  ;;  %s5996_s12 = smov 0   ;;  %s5998_s13 = smov 0  }
   0x7   :  { %s6000_s14 = smov 0   ;;  %s6002_s15 = smov 0  }
   0x8   :  { %s6004_s16 = smov 0   ;;  %s6006_s17 = smov 0  }
   0x9 LB: > { %s4905_s18 = sadd.s32 4294967295, %s5966_s17   ;;  %s4906_s19 = sadd.s32 4294967294, %s5966_s17   ;;  %s5966_s17 = sphi %s6006_s17, %s20_s17   ;;  %s5962_s16 = sphi %s6004_s16, %s7845_s16   ;;  %s5958_s15 = sphi %s6002_s15, %s7844_s15   ;;  %s5954_s14 = sphi %s6000_s14, %s7843_s14   ;;  %s5950_s13 = sphi %s5998_s13, %s7842_s13   ;;  %s5946_s12 = sphi %s5996_s12, %s7841_s12  }
   0xa   : > { %p52_p0 = scmp.ne.s32.totalorder %s5950_s13, %s5946_s12  ;;  %p6030_p1 = scmp.eq.s32.totalorder %s4905_s18, 0 }
   0xb   : > { %p6034_p2 = scmp.eq.s32.totalorder %s4905_s18, 1  ;;  %p136_p3 = scmp.eq.s32.totalorder %s4906_s19, 1 }
   0xc   : > { %p6040_p4 = por %p6030_p1, %p52_p0  ;;  %p4907_p5 = scmp.ge.s32.totalorder %s5966_s17, 1 }
   0xd   : > { %p6045_p6 = por %p136_p3, %p52_p0  ;;  %p143_p7 = scmp.lt.s32.totalorder %s5966_s17, 3 }
   0xe   : > { %s7837_s1 = sld [smem:[#allocation12_spill]]  ;;  %s5968_s28 = smov [#allocation5]  }
   0xf   : > { %p6053_p8 = pnand %p4907_p5, %p143_p7  ;;  %s159_s29 = sshll.u32 %s5968_s28, 4  ;;  %s160_s29 = int_to_ptr.vmem [resolvable:$true] %s159_s29 }
  0x10   : > { %p4910_p11 = scmp.ge.s32.totalorder %s5966_s17, 2  ;;  %s174_s5 = sshll.u32 %s7830_s2, 4  ;;  %s175_s5 = int_to_ptr.hbm [resolvable:$true] %s174_s5 }
  0x11   : > { %p4942_p9 = pneg %p6053_p8  ;;  %s5969_s6 = smov 512  }
  0x12   : > { %s5970_s7 = smov 32   ;;  %s5971_s8 = smov [#allocation7]  }
  0x13   : > { %p4943_p10 = pnand %p4942_p9, %p6030_p1  ;;  %s176_s9 = sshll.u32 %s5971_s8, 4  ;;  %s177_s9 = int_to_ptr.vmem [resolvable:$true] %s176_s9 }
  0x14   : > { %s157_s26 = sshll.u32 %s7837_s1, 4  ;;  %s32_s10 = sadd.s32 1, %s5962_s16  ;;  %s158_s26 = int_to_ptr.hbm [resolvable:$true] %s157_s26 }
  0x15   : > { %4945 = dma.hbm_to_vmem [thread:$0]  (!%p4943_p10), %s158_s26, 65536, %s160_s29, [#allocation6], %s5969_s6, %s5969_s6, %s5970_s7  }
  0x16   : > { %4948 = dma.hbm_to_vmem [thread:$0]  (!%p4943_p10), %s175_s5, 64, %s177_s9, [#allocation6]  }
  0x17   : > { %s39_s11 = sadd.s32 1, %s5954_s14  ;;  %p34_p12 = scmp.ge.s32.totalorder %s32_s10, 2 }
  0x18   : > { %p46_p13 = scmp.ne.s32.totalorder %s5954_s14, %s5950_s13  ;;  %p47_p0 = scmp.eq.s32.totalorder %s5966_s17, 0 }
  0x19   : > { %p4959_p3 = scmp.lt.s32.totalorder %s5966_s17, 2  ;;  %s7847_s10 = smov (%p34_p12, %s32_s10), 0 }
  0x1a   : > { %p6073_p5 = por %p47_p0, %p46_p13  ;;  %p6079_p7 = por %p6034_p2, %p46_p13 }
  0x1b   : > { %s36_s24 = ssub.s32 %s5962_s16, %s7847_s10  ;;  %s187_s25 = sand.u32 1, %s5954_s14  }
  0x1c   : > { %p37_p9 = scmp.eq.s32.totalorder %s36_s24, 0  ;;  %s4911_s26 = sshll.u32 %s187_s25, 11 }
  0x1d   : > { %s4927_s28 = sshll.u32 %s5962_s16, 11  ;;  %s191_s7 = scalar_lea.vmem [#allocation2], %s4911_s26 }
  0x1e   : > { %s6088_s29 = scalar_select %p37_p9, %s5954_s14, %s39_s11  }
  0x1f   : > { %s197_s5 = scalar_lea.hbm %s7828_s0, %s4927_s28  ;;  %s200_s8 = sshll.u32 %s191_s7, 4  ;;  %s201_s8 = int_to_ptr.vmem [resolvable:$true] %s200_s8 }
  0x20   : > { %s198_s6 = sshll.u32 %s197_s5, 4  ;;  %p4950_p2 = pnand %p4959_p3, %p6073_p5  ;;  %s199_s6 = int_to_ptr.hbm [resolvable:$true] %s198_s6 }
  0x21   : > { %s188_s21 = scalar_lea.sflag [#allocation3], %s187_s25  ;;  %s5972_s9 = smov 1024  }
  0x22   : > { %s5973_s1 = smov 64   ;;  %212 = sbr.rel (%p6053_p8) target bundleno = 2288 (0x8f0), region = 32 }
  0x23   : > { %4952 = dma.hbm_to_vmem [thread:$0]  (!%p4950_p2), %s199_s6, 32768, %s201_s8, %s188_s21, %s5972_s9, %s5972_s9, %s5973_s1  }
  0x24   : > { %s6100_s11 = sand.u32 (!%p6053_p8), 1, %s5950_s13  }
  0x25   : > { %s4916_s24 = sshll.u32 (!%p6053_p8), %s6100_s11, 11  ;;  %s215_s26 = scalar_lea.sflag (!%p6053_p8), [#allocation3], %s6100_s11 }
  0x26   : > { %s6104_s28 = scalar_lea.vmem (!%p6053_p8), [#allocation2], %s4916_s24 }
  0x27   : > { %5933 = dma.done.wait (%p6040_p4), %s215_s26, 32768  }
  0x28   : > { %5935 = vsyncadd (%p6040_p4), %s215_s26, 4294934528 }
  0x29   : > { %5937 = dma.done.wait (%p6030_p1), [#allocation6], 65600  }
  0x2a   : > { %5939 = vsyncadd (%p6030_p1), [#allocation6], 4294901696  ;;  %v573_v0 = vld [vmem:[#allocation5 + $0x1e0] sm:$0xff]  ;;  %v259_v63 = vld [vmem:[%s6104_s28 + $0x10] sm:$0xff]  ;;  %s4919_s1 = sshll.u32 %s6100_s11, 10  ;;  %s4929_s22 = sshll.u32 %s5958_s15, 10 }
  0x2b   : > { %v701_v1 = vld [vmem:[#allocation5 + $0x5e0] sm:$0xff]  ;;  %1035 = vmatpush.msra.mxu0 %v573_v0  ;;  %s6415_s20 = scalar_lea.vmem [#allocation8], %s4919_s1  ;;  %s4794_s25 = scalar_lea.hbm %s7831_s3, %s4929_s22 }
  0x2c   : > { %v569_v2 = vld [vmem:[#allocation5 + $0x1c0] sm:$0xff]  ;;  %1261 = vmatpush.msra.mxu2 %v701_v1  ;;  %s4795_s30 = sshll.u32 %s6415_s20, 4  ;;  %s4797_s4 = sshll.u32 %s4794_s25, 4  ;;  %s4796_s30 = int_to_ptr.vmem [resolvable:$true] %s4795_s30  ;;  %s4798_s4 = int_to_ptr.hbm [resolvable:$true] %s4797_s4 }
  0x2d   : > { %v637_v3 = vld [vmem:[#allocation5 + $0x3e0] sm:$0xff]  ;;  %1036 = vmatpush.msra.mxu0 %v569_v2  ;;  %s4780_s15 = scalar_lea.sflag [#allocation4], %s6100_s11  ;;  %s5894_s5 = sshra.s32 %s4798_s4, 4  ;;  %s5895_s5 = int_to_ptr.hbm [resolvable:$true] %s5894_s5 }
  0x2e   : > { %v697_v4 = vld [vmem:[#allocation5 + $0x5c0] sm:$0xff]  ;;  %1148 = vmatpush.msra.mxu1 %v637_v3  ;;  %v258_v3 = vld [vmem:[%s6104_s28 + $0x8] sm:$0xff]  ;;  %s5896_s6 = scalar_lea.hbm %s5895_s5, 1024  ;;  %s5900_s21 = scalar_lea.hbm %s7831_s3, 2048 }
  0x2f   : > { %v765_v5 = vld [vmem:[#allocation5 + $0x7e0] sm:$0xff]  ;;  %1262 = vmatpush.msra.mxu2 %v697_v4  ;;  %v260_v4 = vld [vmem:[%s6104_s28 + $0x18] sm:$0xff]  ;;  %p5897_p1 = scmp.ne.s32.totalorder %s5895_s5, %s5896_s6  ;;  %p5901_p10 = scmp.lt.s32.totalorder %s5895_s5, %s7831_s3 }
  0x30   : > { %1374 = vmatpush.msra.mxu3 %v765_v5  ;;  %v565_v6 = vld [vmem:[#allocation5 + $0x1a0] sm:$0xff]  ;;  %p5902_p12 = scmp.lt.s32.totalorder %s5900_s21, %s5896_s6 }
  0x31   : > { %v633_v7 = vld [vmem:[#allocation5 + $0x3c0] sm:$0xff]  ;;  %1037 = vmatpush.msra.mxu0 %v565_v6  ;;  %p5898_p4 = pnand %p5897_p1, %p6079_p7 }
  0x32   : > { %v693_v8 = vld [vmem:[#allocation5 + $0x5a0] sm:$0xff]  ;;  %1149 = vmatpush.msra.mxu1 %v633_v7  ;;  %p5903_p13 = por %p5902_p12, %p5901_p10 }
  0x33   : > { %v761_v9 = vld [vmem:[#allocation5 + $0x7c0] sm:$0xff]  ;;  %1263 = vmatpush.msra.mxu2 %v693_v8  ;;  %p5899_p8 = pneg %p5898_p4 }
  0x34   : > { %v629_v10 = vld [vmem:[#allocation5 + $0x3a0] sm:$0xff]  ;;  %1375 = vmatpush.msra.mxu3 %v761_v9 }
  0x35   : > { %v561_v11 = vld [vmem:[#allocation5 + $0x180] sm:$0xff]  ;;  %1150 = vmatpush.msra.mxu1 %v629_v10  ;;  %p5904_p0 = pnand %p5903_p13, %p5899_p8 }
  0x36   : > { %v689_v12 = vld [vmem:[#allocation5 + $0x580] sm:$0xff]  ;;  %1038 = vmatpush.msra.mxu0 %v561_v11 }
  0x37   : > { %v757_v13 = vld [vmem:[#allocation5 + $0x7a0] sm:$0xff]  ;;  %1264 = vmatpush.msra.mxu2 %v689_v12 }
  0x38   : > { %v625_v14 = vld [vmem:[#allocation5 + $0x380] sm:$0xff]  ;;  %1376 = vmatpush.msra.mxu3 %v757_v13 }
  0x39   : > { %v753_v15 = vld [vmem:[#allocation5 + $0x780] sm:$0xff]  ;;  %1151 = vmatpush.msra.mxu1 %v625_v14 }
  0x3a   : > { %v557_v16 = vld [vmem:[#allocation5 + $0x160] sm:$0xff]  ;;  %1377 = vmatpush.msra.mxu3 %v753_v15  ;;  %v267_v15 = vld [vmem:[%s6104_s28 + $0x50] sm:$0xff] }
  0x3b   : > { %v685_v17 = vld [vmem:[#allocation5 + $0x560] sm:$0xff]  ;;  %1039 = vmatpush.msra.mxu0 %v557_v16 }
  0x3c   : > { %v621_v18 = vld [vmem:[#allocation5 + $0x360] sm:$0xff]  ;;  %1265 = vmatpush.msra.mxu2 %v685_v17 }
  0x3d   : > { %v749_v19 = vld [vmem:[#allocation5 + $0x760] sm:$0xff]  ;;  %1152 = vmatpush.msra.mxu1 %v621_v18  ;;  %v266_v18 = vld [vmem:[%s6104_s28 + $0x48] sm:$0xff] }
  0x3e   : > { %v553_v20 = vld [vmem:[#allocation5 + $0x140] sm:$0xff]  ;;  %1378 = vmatpush.msra.mxu3 %v749_v19  ;;  %v268_v19 = vld [vmem:[%s6104_s28 + $0x58] sm:$0xff] }
  0x3f   : > { %v681_v21 = vld [vmem:[#allocation5 + $0x540] sm:$0xff]  ;;  %1040 = vmatpush.msra.mxu0 %v553_v20 }
  0x40   : > { %v617_v22 = vld [vmem:[#allocation5 + $0x340] sm:$0xff]  ;;  %1266 = vmatpush.msra.mxu2 %v681_v21  ;;  %v275_v21 = vld [vmem:[%s6104_s28 + $0x90] sm:$0xff] }
  0x41   : > { %v745_v23 = vld [vmem:[#allocation5 + $0x740] sm:$0xff]  ;;  %1153 = vmatpush.msra.mxu1 %v617_v22  ;;  %v274_v22 = vld [vmem:[%s6104_s28 + $0x88] sm:$0xff] }
  0x42   : > { %v549_v24 = vld [vmem:[#allocation5 + $0x120] sm:$0xff]  ;;  %1379 = vmatpush.msra.mxu3 %v745_v23  ;;  %v276_v23 = vld [vmem:[%s6104_s28 + $0x98] sm:$0xff] }
  0x43   : > { %v677_v25 = vld [vmem:[#allocation5 + $0x520] sm:$0xff]  ;;  %1041 = vmatpush.msra.mxu0 %v549_v24 }
  0x44   : > { %v613_v26 = vld [vmem:[#allocation5 + $0x320] sm:$0xff]  ;;  %1267 = vmatpush.msra.mxu2 %v677_v25 }
  0x45   : > { %v741_v27 = vld [vmem:[#allocation5 + $0x720] sm:$0xff]  ;;  %1154 = vmatpush.msra.mxu1 %v613_v26 }
  0x46   : > { %v545_v28 = vld [vmem:[#allocation5 + $0x100] sm:$0xff]  ;;  %1380 = vmatpush.msra.mxu3 %v741_v27 }
  0x47   : > { %v673_v29 = vld [vmem:[#allocation5 + $0x500] sm:$0xff]  ;;  %1042 = vmatpush.msra.mxu0 %v545_v28 }
  0x48   : > { %v609_v30 = vld [vmem:[#allocation5 + $0x300] sm:$0xff]  ;;  %1268 = vmatpush.msra.mxu2 %v673_v29  ;;  %v283_v29 = vld [vmem:[%s6104_s28 + $0xd0] sm:$0xff] }
  0x49   : > { %v737_v31 = vld [vmem:[#allocation5 + $0x700] sm:$0xff]  ;;  %1155 = vmatpush.msra.mxu1 %v609_v30  ;;  %v282_v30 = vld [vmem:[%s6104_s28 + $0xc8] sm:$0xff] }
  0x4a   : > { %v541_v32 = vld [vmem:[#allocation5 + $0xe0] sm:$0xff]  ;;  %1381 = vmatpush.msra.mxu3 %v737_v31  ;;  %v284_v31 = vld [vmem:[%s6104_s28 + $0xd8] sm:$0xff] }
  0x4b   : > { %v669_v33 = vld [vmem:[#allocation5 + $0x4e0] sm:$0xff]  ;;  %1043 = vmatpush.msra.mxu0 %v541_v32 }
  0x4c   : > { %v605_v34 = vld [vmem:[#allocation5 + $0x2e0] sm:$0xff]  ;;  %1269 = vmatpush.msra.mxu2 %v669_v33  ;;  %v291_v33 = vld [vmem:[%s6104_s28 + $0x110] sm:$0xff] }
  0x4d   : > { %v733_v35 = vld [vmem:[#allocation5 + $0x6e0] sm:$0xff]  ;;  %1156 = vmatpush.msra.mxu1 %v605_v34  ;;  %v290_v34 = vld [vmem:[%s6104_s28 + $0x108] sm:$0xff] }
  0x4e   : > { %v537_v36 = vld [vmem:[#allocation5 + $0xc0] sm:$0xff]  ;;  %1382 = vmatpush.msra.mxu3 %v733_v35  ;;  %v292_v35 = vld [vmem:[%s6104_s28 + $0x118] sm:$0xff] }
  0x4f   : > { %v665_v37 = vld [vmem:[#allocation5 + $0x4c0] sm:$0xff]  ;;  %1044 = vmatpush.msra.mxu0 %v537_v36 }
  0x50   : > { %v601_v38 = vld [vmem:[#allocation5 + $0x2c0] sm:$0xff]  ;;  %1270 = vmatpush.msra.mxu2 %v665_v37 }
  0x51   : > { %v729_v39 = vld [vmem:[#allocation5 + $0x6c0] sm:$0xff]  ;;  %1157 = vmatpush.msra.mxu1 %v601_v38 }
  0x52   : > { %v533_v40 = vld [vmem:[#allocation5 + $0xa0] sm:$0xff]  ;;  %1383 = vmatpush.msra.mxu3 %v729_v39 }
  0x53   : > { %v661_v41 = vld [vmem:[#allocation5 + $0x4a0] sm:$0xff]  ;;  %1045 = vmatpush.msra.mxu0 %v533_v40 }
  0x54   : > { %v597_v42 = vld [vmem:[#allocation5 + $0x2a0] sm:$0xff]  ;;  %1271 = vmatpush.msra.mxu2 %v661_v41  ;;  %v299_v41 = vld [vmem:[%s6104_s28 + $0x150] sm:$0xff] }
  0x55   : > { %v725_v43 = vld [vmem:[#allocation5 + $0x6a0] sm:$0xff]  ;;  %1158 = vmatpush.msra.mxu1 %v597_v42  ;;  %v298_v42 = vld [vmem:[%s6104_s28 + $0x148] sm:$0xff] }
  0x56   : > { %v529_v44 = vld [vmem:[#allocation5 + $0x80] sm:$0xff]  ;;  %1384 = vmatpush.msra.mxu3 %v725_v43  ;;  %v300_v43 = vld [vmem:[%s6104_s28 + $0x158] sm:$0xff] }
  0x57   : > { %v657_v45 = vld [vmem:[#allocation5 + $0x480] sm:$0xff]  ;;  %1046 = vmatpush.msra.mxu0 %v529_v44 }
  0x58   : > { %v593_v46 = vld [vmem:[#allocation5 + $0x280] sm:$0xff]  ;;  %1272 = vmatpush.msra.mxu2 %v657_v45  ;;  %v307_v45 = vld [vmem:[%s6104_s28 + $0x190] sm:$0xff] }
  0x59   : > { %v721_v47 = vld [vmem:[#allocation5 + $0x680] sm:$0xff]  ;;  %1159 = vmatpush.msra.mxu1 %v593_v46  ;;  %v306_v46 = vld [vmem:[%s6104_s28 + $0x188] sm:$0xff] }
  0x5a   : > { %v525_v48 = vld [vmem:[#allocation5 + $0x60] sm:$0xff]  ;;  %1385 = vmatpush.msra.mxu3 %v721_v47  ;;  %v308_v47 = vld [vmem:[%s6104_s28 + $0x198] sm:$0xff] }
  0x5b   : > { %v653_v49 = vld [vmem:[#allocation5 + $0x460] sm:$0xff]  ;;  %1047 = vmatpush.msra.mxu0 %v525_v48 }
  0x5c   : > { %v589_v50 = vld [vmem:[#allocation5 + $0x260] sm:$0xff]  ;;  %1273 = vmatpush.msra.mxu2 %v653_v49 }
  0x5d   : > { %v717_v51 = vld [vmem:[#allocation5 + $0x660] sm:$0xff]  ;;  %1160 = vmatpush.msra.mxu1 %v589_v50 }
  0x5e   : > { %v521_v52 = vld [vmem:[#allocation5 + $0x40] sm:$0xff]  ;;  %1386 = vmatpush.msra.mxu3 %v717_v51 }
  0x5f   : > { %v649_v53 = vld [vmem:[#allocation5 + $0x440] sm:$0xff]  ;;  %1048 = vmatpush.msra.mxu0 %v521_v52 }
  0x60   : > { %v585_v54 = vld [vmem:[#allocation5 + $0x240] sm:$0xff]  ;;  %1274 = vmatpush.msra.mxu2 %v649_v53  ;;  %v315_v53 = vld [vmem:[%s6104_s28 + $0x1d0] sm:$0xff] }
  0x61   : > { %v713_v55 = vld [vmem:[#allocation5 + $0x640] sm:$0xff]  ;;  %1161 = vmatpush.msra.mxu1 %v585_v54  ;;  %v314_v54 = vld [vmem:[%s6104_s28 + $0x1c8] sm:$0xff] }
  0x62   : > { %v517_v56 = vld [vmem:[#allocation5 + $0x20] sm:$0xff]  ;;  %1387 = vmatpush.msra.mxu3 %v713_v55  ;;  %v316_v55 = vld [vmem:[%s6104_s28 + $0x1d8] sm:$0xff] }
  0x63   : > { %v645_v57 = vld [vmem:[#allocation5 + $0x420] sm:$0xff]  ;;  %1049 = vmatpush.msra.mxu0 %v517_v56 }
  0x64   : > { %v581_v58 = vld [vmem:[#allocation5 + $0x220] sm:$0xff]  ;;  %1275 = vmatpush.msra.mxu2 %v645_v57  ;;  %v323_v57 = vld [vmem:[%s6104_s28 + $0x210] sm:$0xff] }
  0x65   : > { %v709_v59 = vld [vmem:[#allocation5 + $0x620] sm:$0xff]  ;;  %1162 = vmatpush.msra.mxu1 %v581_v58  ;;  %v322_v58 = vld [vmem:[%s6104_s28 + $0x208] sm:$0xff] }
  0x66   : > { %v513_v60 = vld [vmem:[#allocation5] sm:$0xff]  ;;  %1388 = vmatpush.msra.mxu3 %v709_v59  ;;  %v324_v59 = vld [vmem:[%s6104_s28 + $0x218] sm:$0xff] }
  0x67   : > { %v641_v61 = vld [vmem:[#allocation5 + $0x400] sm:$0xff]  ;;  %1050 = vmatpush.msra.mxu0 %v513_v60 }
  0x68   : > { %v257_v62 = vld [vmem:[%s6104_s28] sm:$0xff]  ;;  %1276 = vmatpush.msra.mxu2 %v641_v61 }
  0x69   : > { %v957_v0 = vld [vmem:[#allocation5 + $0xde0] sm:$0xff]  ;;  %1051 = vmatmul.f32.vlgmr.msra.gmra.mxu0 %v257_v62  ;;  %1277 = vmatmul.f32.vlgmr.msra.gmra.mxu2 %v259_v63 }
  0x6a   : > { %v577_v1 = vld [vmem:[#allocation5 + $0x200] sm:$0xff]  ;;  %1713 = vmatpush.msrb.mxu2 %v957_v0 }
  0x6b   : > { %v705_v2 = vld [vmem:[#allocation5 + $0x600] sm:$0xff]  ;;  %1163 = vmatpush.msra.mxu1 %v577_v1  ;;  %v331_v1 = vld [vmem:[%s6104_s28 + $0x250] sm:$0xff] }
  0x6c   : > { %v829_v5 = vld [vmem:[#allocation5 + $0x9e0] sm:$0xff]  ;;  %1389 = vmatpush.msra.mxu3 %v705_v2  ;;  %1164 = vmatmul.f32.vlgmr.msra.gmra.mxu1 %v258_v3  ;;  %v330_v2 = vld [vmem:[%s6104_s28 + $0x248] sm:$0xff]  ;;  %v332_v3 = vld [vmem:[%s6104_s28 + $0x258] sm:$0xff] }
  0x6d   : > { %v1021_v6 = vld [vmem:[#allocation5 + $0xfe0] sm:$0xff]  ;;  %1390 = vmatmul.f32.vlgmr.msra.gmra.mxu3 %v260_v4  ;;  %1487 = vmatpush.msrb.mxu0 %v829_v5  ;;  %v339_v5 = vld [vmem:[%s6104_s28 + $0x290] sm:$0xff] }
  0x6e   : > { %v893_v7 = vld [vmem:[#allocation5 + $0xbe0] sm:$0xff]  ;;  %1826 = vmatpush.msrb.mxu3 %v1021_v6  ;;  %v338_v6 = vld [vmem:[%s6104_s28 + $0x288] sm:$0xff] }
  0x6f   : > { %v953_v8 = vld [vmem:[#allocation5 + $0xdc0] sm:$0xff]  ;;  %1600 = vmatpush.msrb.mxu1 %v893_v7  ;;  %v340_v7 = vld [vmem:[%s6104_s28 + $0x298] sm:$0xff] }
  0x70   : > { %v825_v9 = vld [vmem:[#allocation5 + $0x9c0] sm:$0xff]  ;;  %1714 = vmatpush.msrb.mxu2 %v953_v8 }
  0x71   : > { %v1017_v10 = vld [vmem:[#allocation5 + $0xfc0] sm:$0xff]  ;;  %1488 = vmatpush.msrb.mxu0 %v825_v9  ;;  %1280 = vmatmul.f32.gmra.mxu2 %v267_v15  ;;  %v348_v15 = vld [vmem:[%s6104_s28 + $0x2d8] sm:$0xff] }
  0x72   : > { %v889_v11 = vld [vmem:[#allocation5 + $0xbc0] sm:$0xff]  ;;  %1827 = vmatpush.msrb.mxu3 %v1017_v10 }
  0x73   : > { %v949_v12 = vld [vmem:[#allocation5 + $0xda0] sm:$0xff]  ;;  %1601 = vmatpush.msrb.mxu1 %v889_v11 }
  0x74   : > { %v821_v13 = vld [vmem:[#allocation5 + $0x9a0] sm:$0xff]  ;;  %1715 = vmatpush.msrb.mxu2 %v949_v12  ;;  %1167 = vmatmul.f32.gmra.mxu1 %v266_v18  ;;  %v354_v18 = vld [vmem:[%s6104_s28 + $0x308] sm:$0xff] }
  0x75   : > { %v265_v14 = vld [vmem:[%s6104_s28 + $0x40] sm:$0xff]  ;;  %1489 = vmatpush.msrb.mxu0 %v821_v13  ;;  %1393 = vmatmul.f32.gmra.mxu3 %v268_v19  ;;  %v347_v13 = vld [vmem:[%s6104_s28 + $0x2d0] sm:$0xff]  ;;  %v356_v19 = vld [vmem:[%s6104_s28 + $0x318] sm:$0xff] }
  0x76   : > { %v1013_v16 = vld [vmem:[#allocation5 + $0xfa0] sm:$0xff]  ;;  %1054 = vmatmul.f32.gmra.mxu0 %v265_v14  ;;  %v346_v14 = vld [vmem:[%s6104_s28 + $0x2c8] sm:$0xff] }
  0x77   : > { %v885_v17 = vld [vmem:[#allocation5 + $0xba0] sm:$0xff]  ;;  %1828 = vmatpush.msrb.mxu3 %v1013_v16 }
  0x78   : > { %1602 = vmatpush.msrb.mxu1 %v885_v17  ;;  %v273_v20 = vld [vmem:[%s6104_s28 + $0x80] sm:$0xff]  ;;  %v355_v17 = vld [vmem:[%s6104_s28 + $0x310] sm:$0xff] }
  0x79   : > { %1283 = vmatmul.f32.gmra.mxu2 %v275_v21  ;;  %v945_v24 = vld [vmem:[#allocation5 + $0xd80] sm:$0xff] }
  0x7a   : > { %1716 = vmatpush.msrb.mxu2 %v945_v24  ;;  %v817_v25 = vld [vmem:[#allocation5 + $0x980] sm:$0xff] }
  0x7b   : > { %v1009_v26 = vld [vmem:[#allocation5 + $0xf80] sm:$0xff]  ;;  %1490 = vmatpush.msrb.mxu0 %v817_v25  ;;  %v363_v25 = vld [vmem:[%s6104_s28 + $0x350] sm:$0xff] }
  0x7c   : > { %1170 = vmatmul.f32.gmra.mxu1 %v274_v22  ;;  %v881_v27 = vld [vmem:[#allocation5 + $0xb80] sm:$0xff]  ;;  %1829 = vmatpush.msrb.mxu3 %v1009_v26  ;;  %v362_v26 = vld [vmem:[%s6104_s28 + $0x348] sm:$0xff] }
  0x7d   : > { %1396 = vmatmul.f32.gmra.mxu3 %v276_v23  ;;  %v281_v28 = vld [vmem:[%s6104_s28 + $0xc0] sm:$0xff]  ;;  %1603 = vmatpush.msrb.mxu1 %v881_v27  ;;  %v364_v27 = vld [vmem:[%s6104_s28 + $0x358] sm:$0xff] }
  0x7e   : > { %1057 = vmatmul.f32.gmra.mxu0 %v273_v20  ;;  %v289_v32 = vld [vmem:[%s6104_s28 + $0x100] sm:$0xff] }
  0x7f   : > { %v941_v36 = vld [vmem:[#allocation5 + $0xd60] sm:$0xff] }
  0x80   : > { %1717 = vmatpush.msrb.mxu2 %v941_v36  ;;  %v813_v37 = vld [vmem:[#allocation5 + $0x960] sm:$0xff] }
  0x81   : > { %1286 = vmatmul.f32.gmra.mxu2 %v283_v29  ;;  %v1005_v38 = vld [vmem:[#allocation5 + $0xf60] sm:$0xff]  ;;  %1491 = vmatpush.msrb.mxu0 %v813_v37  ;;  %v371_v29 = vld [vmem:[%s6104_s28 + $0x390] sm:$0xff] }
  0x82   : > { %v877_v39 = vld [vmem:[#allocation5 + $0xb60] sm:$0xff]  ;;  %1830 = vmatpush.msrb.mxu3 %v1005_v38  ;;  %v379_v37 = vld [vmem:[%s6104_s28 + $0x3d0] sm:$0xff]  ;;  %v378_v38 = vld [vmem:[%s6104_s28 + $0x3c8] sm:$0xff] }
  0x83   : > { %v297_v40 = vld [vmem:[%s6104_s28 + $0x140] sm:$0xff]  ;;  %1604 = vmatpush.msrb.mxu1 %v877_v39 }
  0x84   : > { %1173 = vmatmul.f32.gmra.mxu1 %v282_v30  ;;  %v305_v44 = vld [vmem:[%s6104_s28 + $0x180] sm:$0xff]  ;;  %v370_v30 = vld [vmem:[%s6104_s28 + $0x388] sm:$0xff] }
  0x85   : > { %1399 = vmatmul.f32.gmra.mxu3 %v284_v31  ;;  %v937_v48 = vld [vmem:[#allocation5 + $0xd40] sm:$0xff]  ;;  %v372_v31 = vld [vmem:[%s6104_s28 + $0x398] sm:$0xff] }
  0x86   : > { %1060 = vmatmul.f32.gmra.mxu0 %v281_v28  ;;  %1718 = vmatpush.msrb.mxu2 %v937_v48  ;;  %v809_v49 = vld [vmem:[#allocation5 + $0x940] sm:$0xff] }
  0x87   : > { %v1001_v50 = vld [vmem:[#allocation5 + $0xf40] sm:$0xff]  ;;  %1492 = vmatpush.msrb.mxu0 %v809_v49  ;;  %v388_v49 = vld [vmem:[%s6104_s28 + $0x418] sm:$0xff] }
  0x88   : > { %v873_v51 = vld [vmem:[#allocation5 + $0xb40] sm:$0xff]  ;;  %1831 = vmatpush.msrb.mxu3 %v1001_v50 }
  0x89   : > { %1289 = vmatmul.f32.gmra.mxu2 %v291_v33  ;;  %v313_v52 = vld [vmem:[%s6104_s28 + $0x1c0] sm:$0xff]  ;;  %1605 = vmatpush.msrb.mxu1 %v873_v51 }
  0x8a   : > { %v321_v56 = vld [vmem:[%s6104_s28 + $0x200] sm:$0xff] }
  0x8b   : > { %v933_v60 = vld [vmem:[#allocation5 + $0xd20] sm:$0xff] }
  0x8c   : > { %1176 = vmatmul.f32.gmra.mxu1 %v290_v34  ;;  %1719 = vmatpush.msrb.mxu2 %v933_v60  ;;  %v805_v61 = vld [vmem:[#allocation5 + $0x920] sm:$0xff] }
  0x8d   : > { %1402 = vmatmul.f32.gmra.mxu3 %v292_v35  ;;  %v997_v62 = vld [vmem:[#allocation5 + $0xf20] sm:$0xff]  ;;  %1493 = vmatpush.msrb.mxu0 %v805_v61 }
  0x8e   : > { %1063 = vmatmul.f32.gmra.mxu0 %v289_v32  ;;  %v869_v63 = vld [vmem:[#allocation5 + $0xb20] sm:$0xff]  ;;  %1832 = vmatpush.msrb.mxu3 %v997_v62 }
  0x8f   : > { %v329_v0 = vld [vmem:[%s6104_s28 + $0x240] sm:$0xff]  ;;  %1606 = vmatpush.msrb.mxu1 %v869_v63  ;;  %v394_v63 = vld [vmem:[%s6104_s28 + $0x448] sm:$0xff] }
  0x90   : > { %v337_v4 = vld [vmem:[%s6104_s28 + $0x280] sm:$0xff] }
  0x91   : > { %1292 = vmatmul.f32.gmra.mxu2 %v299_v41  ;;  %v929_v8 = vld [vmem:[#allocation5 + $0xd00] sm:$0xff] }
  0x92   : > { %1720 = vmatpush.msrb.mxu2 %v929_v8  ;;  %v801_v9 = vld [vmem:[#allocation5 + $0x900] sm:$0xff] }
  0x93   : > { %v993_v10 = vld [vmem:[#allocation5 + $0xf00] sm:$0xff]  ;;  %1494 = vmatpush.msrb.mxu0 %v801_v9 }
  0x94   : > { %1179 = vmatmul.f32.gmra.mxu1 %v298_v42  ;;  %v865_v11 = vld [vmem:[#allocation5 + $0xb00] sm:$0xff]  ;;  %1833 = vmatpush.msrb.mxu3 %v993_v10 }
  0x95   : > { %1405 = vmatmul.f32.gmra.mxu3 %v300_v43  ;;  %v345_v12 = vld [vmem:[%s6104_s28 + $0x2c0] sm:$0xff]  ;;  %1607 = vmatpush.msrb.mxu1 %v865_v11  ;;  %v402_v11 = vld [vmem:[%s6104_s28 + $0x488] sm:$0xff] }
  0x96   : > { %1066 = vmatmul.f32.gmra.mxu0 %v297_v40  ;;  %v353_v16 = vld [vmem:[%s6104_s28 + $0x300] sm:$0xff]  ;;  %v380_v40 = vld [vmem:[%s6104_s28 + $0x3d8] sm:$0xff] }
  0x97   : > { %v925_v20 = vld [vmem:[#allocation5 + $0xce0] sm:$0xff] }
  0x98   : > { %1721 = vmatpush.msrb.mxu2 %v925_v20  ;;  %v797_v21 = vld [vmem:[#allocation5 + $0x8e0] sm:$0xff] }
  0x99   : > { %1295 = vmatmul.f32.gmra.mxu2 %v307_v45  ;;  %v989_v22 = vld [vmem:[#allocation5 + $0xee0] sm:$0xff]  ;;  %1495 = vmatpush.msrb.mxu0 %v797_v21 }
  0x9a   : > { %1834 = vmatpush.msrb.mxu3 %v989_v22  ;;  %v861_v23 = vld [vmem:[#allocation5 + $0xae0] sm:$0xff]  ;;  %v411_v22 = vld [vmem:[%s6104_s28 + $0x4d0] sm:$0xff] }
  0x9b   : > { %v361_v24 = vld [vmem:[%s6104_s28 + $0x340] sm:$0xff]  ;;  %1608 = vmatpush.msrb.mxu1 %v861_v23 }
  0x9c   : > { %1182 = vmatmul.f32.gmra.mxu1 %v306_v46  ;;  %v369_v28 = vld [vmem:[%s6104_s28 + $0x380] sm:$0xff] }
  0x9d   : > { %1408 = vmatmul.f32.gmra.mxu3 %v308_v47  ;;  %v921_v32 = vld [vmem:[#allocation5 + $0xcc0] sm:$0xff]  ;;  %v386_v47 = vld [vmem:[%s6104_s28 + $0x408] sm:$0xff] }
  0x9e   : > { %1069 = vmatmul.f32.gmra.mxu0 %v305_v44  ;;  %1722 = vmatpush.msrb.mxu2 %v921_v32  ;;  %v793_v33 = vld [vmem:[#allocation5 + $0x8c0] sm:$0xff]  ;;  %v387_v44 = vld [vmem:[%s6104_s28 + $0x410] sm:$0xff] }
  0x9f   : > { %v985_v34 = vld [vmem:[#allocation5 + $0xec0] sm:$0xff]  ;;  %1496 = vmatpush.msrb.mxu0 %v793_v33 }
  0xa0   : > { %1835 = vmatpush.msrb.mxu3 %v985_v34  ;;  %v857_v35 = vld [vmem:[#allocation5 + $0xac0] sm:$0xff]  ;;  %v419_v34 = vld [vmem:[%s6104_s28 + $0x510] sm:$0xff] }
  0xa1   : > { %1298 = vmatmul.f32.gmra.mxu2 %v315_v53  ;;  %v377_v36 = vld [vmem:[%s6104_s28 + $0x3c0] sm:$0xff]  ;;  %1609 = vmatpush.msrb.mxu1 %v857_v35 }
  0xa2   : > { %v1025_v39 = vld [vmem:[#allocation7] sm:$0xf] }
  0xa3   : > { %v6178_v41 = vperm.slane %v1025_v39, 0  ;;  %v385_v43 = vld [vmem:[%s6104_s28 + $0x400] sm:$0xff]  ;;  %v418_v39 = vld [vmem:[%s6104_s28 + $0x508] sm:$0xff] }
  0xa4   : > { %1185 = vmatmul.f32.gmra.mxu1 %v314_v54  ;;  %v917_v50 = vld [vmem:[#allocation5 + $0xca0] sm:$0xff] }
  0xa5   : > { %1411 = vmatmul.f32.gmra.mxu3 %v316_v55  ;;  %1723 = vmatpush.msrb.mxu2 %v917_v50  ;;  %v981_v53 = vld [vmem:[#allocation5 + $0xea0] sm:$0xff] }
  0xa6   : > { %1072 = vmatmul.f32.gmra.mxu0 %v313_v52  ;;  %v789_v52 = vld [vmem:[#allocation5 + $0x8a0] sm:$0xff]  ;;  %1836 = vmatpush.msrb.mxu3 %v981_v53 }
  0xa7   : > { %1497 = vmatpush.msrb.mxu0 %v789_v52  ;;  %v853_v55 = vld [vmem:[#allocation5 + $0xaa0] sm:$0xff] }
  0xa8   : > { %1610 = vmatpush.msrb.mxu1 %v853_v55  ;;  %v409_v21 = vld [vmem:[%s6104_s28 + $0x4c0] sm:$0xff] }
  0xa9   : > { %1301 = vmatmul.f32.gmra.mxu2 %v323_v57  ;;  %v393_v57 = vld [vmem:[%s6104_s28 + $0x440] sm:$0xff] }
  0xaa   : > { %v417_v33 = vld [vmem:[%s6104_s28 + $0x500] sm:$0xff] }
  0xab   : > { %v425_v50 = vld [vmem:[%s6104_s28 + $0x540] sm:$0xff] }
  0xac   : > { %1188 = vmatmul.f32.gmra.mxu1 %v322_v58  ;;  %v395_v58 = vld [vmem:[%s6104_s28 + $0x450] sm:$0xff] }
  0xad   : > { %1414 = vmatmul.f32.gmra.mxu3 %v324_v59 }
  0xae   : > { %1075 = vmatmul.f32.gmra.mxu0 %v321_v56 }
  0xb1   : > { %1304 = vmatmul.f32.gmra.mxu2 %v331_v1  ;;  %v396_v1 = vld [vmem:[%s6104_s28 + $0x458] sm:$0xff] }
  0xb4   : > { %1191 = vmatmul.f32.gmra.mxu1 %v330_v2 }
  0xb5   : > { %1417 = vmatmul.f32.gmra.mxu3 %v332_v3 }
  0xb6   : > { %1078 = vmatmul.f32.gmra.mxu0 %v329_v0 }
  0xb9   : > { %1307 = vmatmul.f32.gmra.mxu2 %v339_v5  ;;  %v401_v5 = vld [vmem:[%s6104_s28 + $0x480] sm:$0xff] }
  0xbc   : > { %1194 = vmatmul.f32.gmra.mxu1 %v338_v6  ;;  %v403_v6 = vld [vmem:[%s6104_s28 + $0x490] sm:$0xff] }
  0xbd   : > { %1420 = vmatmul.f32.gmra.mxu3 %v340_v7 }
  0xbe   : > { %1081 = vmatmul.f32.gmra.mxu0 %v337_v4 }
  0xc1   : > { %1310 = vmatmul.f32.gmra.mxu2 %v347_v13  ;;  %v404_v13 = vld [vmem:[%s6104_s28 + $0x498] sm:$0xff] }
  0xc4   : > { %1197 = vmatmul.f32.gmra.mxu1 %v346_v14  ;;  %v913_v14 = vld [vmem:[#allocation5 + $0xc80] sm:$0xff] }
  0xc5   : > { %1423 = vmatmul.f32.gmra.mxu3 %v348_v15  ;;  %1724 = vmatpush.msrb.mxu2 %v913_v14  ;;  %v841_v14 = vld [vmem:[#allocation5 + $0xa40] sm:$0xff] }
  0xc6   : > { %1084 = vmatmul.f32.gmra.mxu0 %v345_v12 }
  0xc9   : > { %1313 = vmatmul.f32.gmra.mxu2 %v355_v17  ;;  %v977_v17 = vld [vmem:[#allocation5 + $0xe80] sm:$0xff] }
  0xca   : > { %1837 = vmatpush.msrb.mxu3 %v977_v17  ;;  %v443_v17 = vld [vmem:[%s6104_s28 + $0x5d0] sm:$0xff] }
  0xcc   : > { %1200 = vmatmul.f32.gmra.mxu1 %v354_v18 }
  0xcd   : > { %1426 = vmatmul.f32.gmra.mxu3 %v356_v19  ;;  %v849_v19 = vld [vmem:[#allocation5 + $0xa80] sm:$0xff] }
  0xce   : > { %1087 = vmatmul.f32.gmra.mxu0 %v353_v16  ;;  %v785_v16 = vld [vmem:[#allocation5 + $0x880] sm:$0xff]  ;;  %1611 = vmatpush.msrb.mxu1 %v849_v19 }
  0xcf   : > { %1498 = vmatpush.msrb.mxu0 %v785_v16  ;;  %v441_v16 = vld [vmem:[%s6104_s28 + $0x5c0] sm:$0xff] }
  0xd1   : > { %1316 = vmatmul.f32.gmra.mxu2 %v363_v25 }
  0xd4   : > { %1203 = vmatmul.f32.gmra.mxu1 %v362_v26 }
  0xd5   : > { %1429 = vmatmul.f32.gmra.mxu3 %v364_v27  ;;  %v410_v27 = vld [vmem:[%s6104_s28 + $0x4c8] sm:$0xff] }
  0xd6   : > { %1090 = vmatmul.f32.gmra.mxu0 %v361_v24 }
  0xd9   : > { %1319 = vmatmul.f32.gmra.mxu2 %v371_v29  ;;  %v412_v29 = vld [vmem:[%s6104_s28 + $0x4d8] sm:$0xff] }
  0xdc   : > { %1206 = vmatmul.f32.gmra.mxu1 %v370_v30 }
  0xdd   : > { %1432 = vmatmul.f32.gmra.mxu3 %v372_v31 }
  0xde   : > { %1093 = vmatmul.f32.gmra.mxu0 %v369_v28 }
  0xe1   : > { %1322 = vmatmul.f32.gmra.mxu2 %v379_v37 }
  0xe4   : > { %1209 = vmatmul.f32.gmra.mxu1 %v378_v38 }
  0xe5   : > { %1435 = vmatmul.f32.gmra.mxu3 %v380_v40 }
  0xe6   : > { %1096 = vmatmul.f32.gmra.mxu0 %v377_v36  ;;  %v1052_v42 = vpop.f32.mrf.mxu0 }
  0xe7   : > { %v1053_v45 = vadd.f32 %v1052_v42, %v6178_v41  ;;  %v420_v42 = vld [vmem:[%s6104_s28 + $0x518] sm:$0xff] }
  0xe9   : > { %v1165_v46 = vpop.f32.mrf.mxu1  ;;  %1325 = vmatmul.f32.gmra.mxu2 %v387_v44 }
  0xea   : > { %v1166_v48 = vadd.f32 %v1165_v46, %v1053_v45  ;;  %v781_v45 = vld [vmem:[#allocation5 + $0x860] sm:$0xff] }
  0xeb   : > { %v973_v46 = vld [vmem:[#allocation5 + $0xe60] sm:$0xff]  ;;  %1499 = vmatpush.msrb.mxu0 %v781_v45 }
  0xec   : > { %1212 = vmatmul.f32.gmra.mxu1 %v386_v47  ;;  %v1278_v51 = vpop.f32.mrf.mxu2  ;;  %1838 = vmatpush.msrb.mxu3 %v973_v46  ;;  %v837_v45 = vld [vmem:[#allocation5 + $0xa20] sm:$0xff] }
  0xed   : > { %1438 = vmatmul.f32.gmra.mxu3 %v388_v49  ;;  %v1279_v54 = vadd.f32 %v1278_v51, %v1166_v48  ;;  %v845_v48 = vld [vmem:[#allocation5 + $0xa60] sm:$0xff]  ;;  %v427_v51 = vld [vmem:[%s6104_s28 + $0x550] sm:$0xff] }
  0xee   : > { %1099 = vmatmul.f32.gmra.mxu0 %v385_v43  ;;  %v909_v43 = vld [vmem:[#allocation5 + $0xc60] sm:$0xff]  ;;  %1612 = vmatpush.msrb.mxu1 %v845_v48  ;;  %v459_v48 = vld [vmem:[%s6104_s28 + $0x650] sm:$0xff] }
  0xef   : > { %1725 = vmatpush.msrb.mxu2 %v909_v43  ;;  %v965_v43 = vld [vmem:[#allocation5 + $0xe20] sm:$0xff] }
  0xf0   : > { %v1391_v60 = vpop.f32.mrf.mxu3  ;;  %1613 = vmatpush.msrb.mxu1 %v841_v14 }
  0xf1   : > { %v6188_v61 = vadd.f32 %v1391_v60, %v1279_v54  ;;  %v1168_v62 = vpop.f32.mrf.mxu1  ;;  %1328 = vmatmul.f32.gmra.mxu2 %v395_v58  ;;  %v428_v58 = vld [vmem:[%s6104_s28 + $0x558] sm:$0xff] }
  0xf2   : > { %1614 = vmatpush.msrb.mxu1 %v837_v45 }
  0xf3   : > { %v1055_v56 = vpop.f32.mrf.mxu0 }
  0xf4   : > { %v1056_v59 = vadd.f32 %v1055_v56, %v6178_v41  ;;  %1215 = vmatmul.f32.gmra.mxu1 %v394_v63  ;;  %v1281_v2 = vpop.f32.mrf.mxu2  ;;  %v426_v56 = vld [vmem:[%s6104_s28 + $0x548] sm:$0xff]  ;;  %v433_v63 = vld [vmem:[%s6104_s28 + $0x580] sm:$0xff] }
  0xf5   : > { %1441 = vmatmul.f32.gmra.mxu3 %v396_v1 }
  0xf6   : > { %v1169_v0 = vadd.f32 %v1168_v62, %v1056_v59  ;;  %1102 = vmatmul.f32.gmra.mxu0 %v393_v57 }
  0xf8   : > { %v1282_v3 = vadd.f32 %v1281_v2, %v1169_v0  ;;  %v1394_v8 = vpop.f32.mrf.mxu3  ;;  %v435_v0 = vld [vmem:[%s6104_s28 + $0x590] sm:$0xff] }
  0xf9   : > { %v1171_v10 = vpop.f32.mrf.mxu1  ;;  %1331 = vmatmul.f32.gmra.mxu2 %v403_v6 }
  0xfa   : > { %v6195_v9 = vadd.f32 %v1394_v8, %v1282_v3  ;;  %v905_v8 = vld [vmem:[#allocation5 + $0xc40] sm:$0xff] }
  0xfb   : > { %v1058_v4 = vpop.f32.mrf.mxu0  ;;  %1726 = vmatpush.msrb.mxu2 %v905_v8 }
  0xfc   : > { %v1059_v7 = vadd.f32 %v1058_v4, %v6178_v41  ;;  %1218 = vmatmul.f32.gmra.mxu1 %v402_v11  ;;  %v1284_v15 = vpop.f32.mrf.mxu2  ;;  %v777_v11 = vld [vmem:[#allocation5 + $0x840] sm:$0xff] }
  0xfd   : > { %1444 = vmatmul.f32.gmra.mxu3 %v404_v13  ;;  %1500 = vmatpush.msrb.mxu0 %v777_v11  ;;  %v961_v11 = vld [vmem:[#allocation5 + $0xe00] sm:$0xff] }
  0xfe   : > { %v1172_v12 = vadd.f32 %v1171_v10, %v1059_v7  ;;  %1105 = vmatmul.f32.gmra.mxu0 %v401_v5  ;;  %v434_v5 = vld [vmem:[%s6104_s28 + $0x588] sm:$0xff]  ;;  %v436_v7 = vld [vmem:[%s6104_s28 + $0x598] sm:$0xff] }
 0x100   : > { %v1285_v18 = vadd.f32 %v1284_v15, %v1172_v12  ;;  %v1397_v24 = vpop.f32.mrf.mxu3  ;;  %v969_v12 = vld [vmem:[#allocation5 + $0xe40] sm:$0xff] }
 0x101   : > { %v1174_v26 = vpop.f32.mrf.mxu1  ;;  %1334 = vmatmul.f32.gmra.mxu2 %v411_v22  ;;  %1839 = vmatpush.msrb.mxu3 %v969_v12  ;;  %v442_v22 = vld [vmem:[%s6104_s28 + $0x5c8] sm:$0xff] }
 0x102   : > { %v6202_v25 = vadd.f32 %v1397_v24, %v1285_v18  ;;  %v444_v24 = vld [vmem:[%s6104_s28 + $0x5d8] sm:$0xff] }
 0x103   : > { %v1061_v20 = vpop.f32.mrf.mxu0  ;;  %1840 = vmatpush.msrb.mxu3 %v965_v43  ;;  %v574_v43 = vld [vmem:[#allocation5 + $0x1e8] sm:$0xff] }
 0x104   : > { %v1062_v23 = vadd.f32 %v1061_v20, %v6178_v41  ;;  %1221 = vmatmul.f32.gmra.mxu1 %v410_v27  ;;  %v1287_v30 = vpop.f32.mrf.mxu2 }
 0x105   : > { %1447 = vmatmul.f32.gmra.mxu3 %v412_v29  ;;  %v449_v29 = vld [vmem:[%s6104_s28 + $0x600] sm:$0xff] }
 0x106   : > { %v1175_v28 = vadd.f32 %v1174_v26, %v1062_v23  ;;  %1108 = vmatmul.f32.gmra.mxu0 %v409_v21  ;;  %1841 = vmatpush.msrb.mxu3 %v961_v11  ;;  %v698_v11 = vld [vmem:[#allocation5 + $0x5c8] sm:$0xff] }
 0x108   : > { %v1288_v31 = vadd.f32 %v1287_v30, %v1175_v28  ;;  %v1400_v36 = vpop.f32.mrf.mxu3  ;;  %v451_v30 = vld [vmem:[%s6104_s28 + $0x610] sm:$0xff] }
 0x109   : > { %v1177_v38 = vpop.f32.mrf.mxu1  ;;  %1337 = vmatmul.f32.gmra.mxu2 %v419_v34 }
 0x10a   : > { %v6209_v37 = vadd.f32 %v1400_v36, %v1288_v31 }
 0x10b   : > { %v1064_v32 = vpop.f32.mrf.mxu0 }
 0x10c   : > { %v1065_v35 = vadd.f32 %v1064_v32, %v6178_v41  ;;  %1224 = vmatmul.f32.gmra.mxu1 %v418_v39  ;;  %v1290_v44 = vpop.f32.mrf.mxu2  ;;  %v901_v39 = vld [vmem:[#allocation5 + $0xc20] sm:$0xff] }
 0x10d   : > { %1450 = vmatmul.f32.gmra.mxu3 %v420_v42  ;;  %1727 = vmatpush.msrb.mxu2 %v901_v39  ;;  %v773_v42 = vld [vmem:[#allocation5 + $0x820] sm:$0xff]  ;;  %v484_v39 = vld [vmem:[%s6104_s28 + $0x718] sm:$0xff] }
 0x10e   : > { %v1178_v40 = vadd.f32 %v1177_v38, %v1065_v35  ;;  %1111 = vmatmul.f32.gmra.mxu0 %v417_v33  ;;  %v450_v35 = vld [vmem:[%s6104_s28 + $0x608] sm:$0xff]  ;;  %v452_v38 = vld [vmem:[%s6104_s28 + $0x618] sm:$0xff] }
 0x10f   : > { %1501 = vmatpush.msrb.mxu0 %v773_v42 }
 0x110   : > { %v1291_v47 = vadd.f32 %v1290_v44, %v1178_v40  ;;  %v1403_v53 = vpop.f32.mrf.mxu3 }
 0x111   : > { %v1180_v55 = vpop.f32.mrf.mxu1  ;;  %1340 = vmatmul.f32.gmra.mxu2 %v427_v51 }
 0x112   : > { %v6216_v54 = vadd.f32 %v1403_v53, %v1291_v47  ;;  %v457_v47 = vld [vmem:[%s6104_s28 + $0x640] sm:$0xff]  ;;  %v458_v53 = vld [vmem:[%s6104_s28 + $0x648] sm:$0xff] }
 0x113   : > { %v1067_v49 = vpop.f32.mrf.mxu0 }
 0x114   : > { %v1068_v52 = vadd.f32 %v1067_v49, %v6178_v41  ;;  %1227 = vmatmul.f32.gmra.mxu1 %v426_v56  ;;  %v1293_v59 = vpop.f32.mrf.mxu2  ;;  %v460_v56 = vld [vmem:[%s6104_s28 + $0x658] sm:$0xff] }
 0x115   : > { %1453 = vmatmul.f32.gmra.mxu3 %v428_v58 }
 0x116   : > { %v1181_v57 = vadd.f32 %v1180_v55, %v1068_v52  ;;  %1114 = vmatmul.f32.gmra.mxu0 %v425_v50 }
 0x118   : > { %v1294_v60 = vadd.f32 %v1293_v59, %v1181_v57  ;;  %v1406_v2 = vpop.f32.mrf.mxu3 }
 0x119   : > { %v1183_v4 = vpop.f32.mrf.mxu1  ;;  %1343 = vmatmul.f32.gmra.mxu2 %v435_v0 }
 0x11a   : > { %v6223_v3 = vadd.f32 %v1406_v2, %v1294_v60  ;;  %v465_v60 = vld [vmem:[%s6104_s28 + $0x680] sm:$0xff] }
 0x11b   : > { %v1070_v62 = vpop.f32.mrf.mxu0 }
 0x11c   : > { %v1071_v1 = vadd.f32 %v1070_v62, %v6178_v41  ;;  %1230 = vmatmul.f32.gmra.mxu1 %v434_v5  ;;  %v1296_v10 = vpop.f32.mrf.mxu2  ;;  %v467_v62 = vld [vmem:[%s6104_s28 + $0x690] sm:$0xff] }
 0x11d   : > { %1456 = vmatmul.f32.gmra.mxu3 %v436_v7  ;;  %v897_v7 = vld [vmem:[#allocation5 + $0xc00] sm:$0xff] }
 0x11e   : > { %v1184_v6 = vadd.f32 %v1183_v4, %v1071_v1  ;;  %1117 = vmatmul.f32.gmra.mxu0 %v433_v63  ;;  %v466_v4 = vld [vmem:[%s6104_s28 + $0x688] sm:$0xff]  ;;  %1728 = vmatpush.msrb.mxu2 %v897_v7 }
 0x11f   : > { %v498_v7 = vld [vmem:[%s6104_s28 + $0x788] sm:$0xff] }
 0x120   : > { %v1297_v13 = vadd.f32 %v1296_v10, %v1184_v6  ;;  %v1409_v19 = vpop.f32.mrf.mxu3  ;;  %v468_v6 = vld [vmem:[%s6104_s28 + $0x698] sm:$0xff]  ;;  %v769_v10 = vld [vmem:[#allocation5 + $0x800] sm:$0xff] }
 0x121   : > { %v1186_v21 = vpop.f32.mrf.mxu1  ;;  %1346 = vmatmul.f32.gmra.mxu2 %v443_v17  ;;  %1502 = vmatpush.msrb.mxu0 %v769_v10  ;;  %v500_v10 = vld [vmem:[%s6104_s28 + $0x798] sm:$0xff] }
 0x122   : > { %v6230_v20 = vadd.f32 %v1409_v19, %v1297_v13  ;;  %v833_v13 = vld [vmem:[#allocation5 + $0xa00] sm:$0xff] }
 0x123   : > { %v1073_v15 = vpop.f32.mrf.mxu0  ;;  %1615 = vmatpush.msrb.mxu1 %v833_v13  ;;  %1939 = vmatpush.msra.mxu0 %v574_v43  ;;  %v570_v13 = vld [vmem:[#allocation5 + $0x1c8] sm:$0xff] }
 0x124   : > { %v1074_v18 = vadd.f32 %v1073_v15, %v6178_v41  ;;  %1233 = vmatmul.f32.gmra.mxu1 %v442_v22  ;;  %v1299_v26 = vpop.f32.mrf.mxu2  ;;  %v473_v15 = vld [vmem:[%s6104_s28 + $0x6c0] sm:$0xff]  ;;  %v474_v22 = vld [vmem:[%s6104_s28 + $0x6c8] sm:$0xff] }
 0x125   : > { %1459 = vmatmul.f32.gmra.mxu3 %v444_v24  ;;  %v476_v24 = vld [vmem:[%s6104_s28 + $0x6d8] sm:$0xff]  ;;  %1940 = vmatpush.msra.mxu0 %v570_v13  ;;  %v262_v43 = vld [vmem:[%s6104_s28 + $0x28] sm:$0xff] }
 0x126   : > { %v1187_v23 = vadd.f32 %v1186_v21, %v1074_v18  ;;  %1120 = vmatmul.f32.gmra.mxu0 %v441_v16  ;;  %v475_v16 = vld [vmem:[%s6104_s28 + $0x6d0] sm:$0xff] }
 0x128   : > { %v1300_v27 = vadd.f32 %v1299_v26, %v1187_v23  ;;  %v1412_v32 = vpop.f32.mrf.mxu3 }
 0x129   : > { %v1189_v34 = vpop.f32.mrf.mxu1  ;;  %1349 = vmatmul.f32.gmra.mxu2 %v451_v30  ;;  %v483_v30 = vld [vmem:[%s6104_s28 + $0x710] sm:$0xff] }
 0x12a   : > { %v6237_v33 = vadd.f32 %v1412_v32, %v1300_v27 }
 0x12b   : > { %v1076_v28 = vpop.f32.mrf.mxu0 }
 0x12c   : > { %v1077_v31 = vadd.f32 %v1076_v28, %v6178_v41  ;;  %1236 = vmatmul.f32.gmra.mxu1 %v450_v35  ;;  %v1302_v40 = vpop.f32.mrf.mxu2 }
 0x12d   : > { %1462 = vmatmul.f32.gmra.mxu3 %v452_v38 }
 0x12e   : > { %v1190_v36 = vadd.f32 %v1189_v34, %v1077_v31  ;;  %1123 = vmatmul.f32.gmra.mxu0 %v449_v29  ;;  %v481_v29 = vld [vmem:[%s6104_s28 + $0x700] sm:$0xff] }
 0x130   : > { %v1303_v44 = vadd.f32 %v1302_v40, %v1190_v36  ;;  %v1415_v50 = vpop.f32.mrf.mxu3  ;;  %v482_v36 = vld [vmem:[%s6104_s28 + $0x708] sm:$0xff] }
 0x131   : > { %v1192_v52 = vpop.f32.mrf.mxu1  ;;  %1352 = vmatmul.f32.gmra.mxu2 %v459_v48  ;;  %v702_v40 = vld [vmem:[#allocation5 + $0x5e8] sm:$0xff]  ;;  %v489_v48 = vld [vmem:[%s6104_s28 + $0x740] sm:$0xff] }
 0x132   : > { %v6244_v51 = vadd.f32 %v1415_v50, %v1303_v44  ;;  %2165 = vmatpush.msra.mxu2 %v702_v40  ;;  %v766_v44 = vld [vmem:[#allocation5 + $0x7e8] sm:$0xff] }
 0x133   : > { %v1079_v46 = vpop.f32.mrf.mxu0  ;;  %2278 = vmatpush.msra.mxu3 %v766_v44 }
 0x134   : > { %v1080_v49 = vadd.f32 %v1079_v46, %v6178_v41  ;;  %1239 = vmatmul.f32.gmra.mxu1 %v458_v53  ;;  %v1305_v57 = vpop.f32.mrf.mxu2  ;;  %v638_v46 = vld [vmem:[#allocation5 + $0x3e8] sm:$0xff]  ;;  %2166 = vmatpush.msra.mxu2 %v698_v11 }
 0x135   : > { %1465 = vmatmul.f32.gmra.mxu3 %v460_v56  ;;  %2052 = vmatpush.msra.mxu1 %v638_v46  ;;  %v490_v56 = vld [vmem:[%s6104_s28 + $0x748] sm:$0xff] }
 0x136   : > { %v1193_v55 = vadd.f32 %v1192_v52, %v1080_v49  ;;  %1126 = vmatmul.f32.gmra.mxu0 %v457_v47  ;;  %v491_v49 = vld [vmem:[%s6104_s28 + $0x750] sm:$0xff]  ;;  %v694_v46 = vld [vmem:[#allocation5 + $0x5a8] sm:$0xff] }
 0x137   : > { %2167 = vmatpush.msra.mxu2 %v694_v46  ;;  %v293_v46 = vld [vmem:[%s6104_s28 + $0x120] sm:$0xff] }
 0x138   : > { %v1306_v58 = vadd.f32 %v1305_v57, %v1193_v55  ;;  %v1418_v0 = vpop.f32.mrf.mxu3 }
 0x139   : > { %v1195_v2 = vpop.f32.mrf.mxu1  ;;  %1355 = vmatmul.f32.gmra.mxu2 %v467_v62 }
 0x13a   : > { %v6251_v1 = vadd.f32 %v1418_v0, %v1306_v58  ;;  %v492_v58 = vld [vmem:[%s6104_s28 + $0x758] sm:$0xff]  ;;  %v499_v0 = vld [vmem:[%s6104_s28 + $0x790] sm:$0xff] }
 0x13b   : > { %v1082_v59 = vpop.f32.mrf.mxu0 }
 0x13c   : > { %v1083_v63 = vadd.f32 %v1082_v59, %v6178_v41  ;;  %1242 = vmatmul.f32.gmra.mxu1 %v466_v4  ;;  %v1308_v8 = vpop.f32.mrf.mxu2 }
 0x13d   : > { %1468 = vmatmul.f32.gmra.mxu3 %v468_v6 }
 0x13e   : > { %v1196_v5 = vadd.f32 %v1195_v2, %v1083_v63  ;;  %1129 = vmatmul.f32.gmra.mxu0 %v465_v60  ;;  %v497_v63 = vld [vmem:[%s6104_s28 + $0x780] sm:$0xff] }
 0x140   : > { %v1309_v12 = vadd.f32 %v1308_v8, %v1196_v5  ;;  %v1421_v18 = vpop.f32.mrf.mxu3 }
 0x141   : > { %v1198_v21 = vpop.f32.mrf.mxu1  ;;  %1358 = vmatmul.f32.gmra.mxu2 %v475_v16  ;;  %v634_v16 = vld [vmem:[#allocation5 + $0x3c8] sm:$0xff] }
 0x142   : > { %v6258_v19 = vadd.f32 %v1421_v18, %v1309_v12  ;;  %v505_v18 = vld [vmem:[%s6104_s28 + $0x7c0] sm:$0xff]  ;;  %2053 = vmatpush.msra.mxu1 %v634_v16 }
 0x143   : > { %v1085_v14 = vpop.f32.mrf.mxu0 }
 0x144   : > { %v1086_v17 = vadd.f32 %v1085_v14, %v6178_v41  ;;  %1245 = vmatmul.f32.gmra.mxu1 %v474_v22  ;;  %v1311_v26 = vpop.f32.mrf.mxu2  ;;  %v762_v14 = vld [vmem:[#allocation5 + $0x7c8] sm:$0xff] }
 0x145   : > { %1471 = vmatmul.f32.gmra.mxu3 %v476_v24 }
 0x146   : > { %v1199_v23 = vadd.f32 %v1198_v21, %v1086_v17  ;;  %1132 = vmatmul.f32.gmra.mxu0 %v473_v15  ;;  %2279 = vmatpush.msra.mxu3 %v762_v14  ;;  %v507_v21 = vld [vmem:[%s6104_s28 + $0x7d0] sm:$0xff] }
 0x148   : > { %v1312_v27 = vadd.f32 %v1311_v26, %v1199_v23  ;;  %v1424_v32 = vpop.f32.mrf.mxu3 }
 0x149   : > { %v1201_v35 = vpop.f32.mrf.mxu1  ;;  %1361 = vmatmul.f32.gmra.mxu2 %v483_v30 }
 0x14a   : > { %v6265_v34 = vadd.f32 %v1424_v32, %v1312_v27  ;;  %v506_v27 = vld [vmem:[%s6104_s28 + $0x7c8] sm:$0xff] }
 0x14b   : > { %v1088_v28 = vpop.f32.mrf.mxu0 }
 0x14c   : > { %v1089_v31 = vadd.f32 %v1088_v28, %v6178_v41  ;;  %1248 = vmatmul.f32.gmra.mxu1 %v482_v36  ;;  %v1314_v42 = vpop.f32.mrf.mxu2  ;;  %v263_v36 = vld [vmem:[%s6104_s28 + $0x30] sm:$0xff] }
 0x14d   : > { %1474 = vmatmul.f32.gmra.mxu3 %v484_v39 }
 0x14e   : > { %v1202_v38 = vadd.f32 %v1201_v35, %v1089_v31  ;;  %1135 = vmatmul.f32.gmra.mxu0 %v481_v29  ;;  %v508_v29 = vld [vmem:[%s6104_s28 + $0x7d8] sm:$0xff]  ;;  %v261_v35 = vld [vmem:[%s6104_s28 + $0x20] sm:$0xff] }
 0x150   : > { %v1315_v45 = vadd.f32 %v1314_v42, %v1202_v38  ;;  %v1427_v52 = vpop.f32.mrf.mxu3 }
 0x151   : > { %v1204_v55 = vpop.f32.mrf.mxu1  ;;  %1364 = vmatmul.f32.gmra.mxu2 %v491_v49  ;;  %v758_v49 = vld [vmem:[#allocation5 + $0x7a8] sm:$0xff] }
 0x152   : > { %v6272_v53 = vadd.f32 %v1427_v52, %v1315_v45  ;;  %v264_v45 = vld [vmem:[%s6104_s28 + $0x38] sm:$0xff]  ;;  %2280 = vmatpush.msra.mxu3 %v758_v49  ;;  %v630_v52 = vld [vmem:[#allocation5 + $0x3a8] sm:$0xff] }
 0x153   : > { %v1091_v47 = vpop.f32.mrf.mxu0  ;;  %2054 = vmatpush.msra.mxu1 %v630_v52 }
 0x154   : > { %v1092_v50 = vadd.f32 %v1091_v47, %v6178_v41  ;;  %1251 = vmatmul.f32.gmra.mxu1 %v490_v56  ;;  %v1317_v59 = vpop.f32.mrf.mxu2  ;;  %v269_v56 = vld [vmem:[%s6104_s28 + $0x60] sm:$0xff] }
 0x155   : > { %1477 = vmatmul.f32.gmra.mxu3 %v492_v58 }
 0x156   : > { %v1205_v57 = vadd.f32 %v1204_v55, %v1092_v50  ;;  %1138 = vmatmul.f32.gmra.mxu0 %v489_v48  ;;  %v566_v48 = vld [vmem:[#allocation5 + $0x1a8] sm:$0xff] }
 0x157   : > { %1941 = vmatpush.msra.mxu0 %v566_v48 }
 0x158   : > { %v1318_v60 = vadd.f32 %v1317_v59, %v1205_v57  ;;  %v1430_v4 = vpop.f32.mrf.mxu3  ;;  %v271_v57 = vld [vmem:[%s6104_s28 + $0x70] sm:$0xff] }
 0x159   : > { %v1207_v6 = vpop.f32.mrf.mxu1  ;;  %1367 = vmatmul.f32.gmra.mxu2 %v499_v0 }
 0x15a   : > { %v6279_v5 = vadd.f32 %v1430_v4, %v1318_v60 }
 0x15b   : > { %v1094_v62 = vpop.f32.mrf.mxu0 }
 0x15c   : > { %v1095_v2 = vadd.f32 %v1094_v62, %v6178_v41  ;;  %1254 = vmatmul.f32.gmra.mxu1 %v498_v7  ;;  %v1320_v12 = vpop.f32.mrf.mxu2 }
 0x15d   : > { %1480 = vmatmul.f32.gmra.mxu3 %v500_v10  ;;  %v279_v10 = vld [vmem:[%s6104_s28 + $0xb0] sm:$0xff] }
 0x15e   : > { %v1208_v8 = vadd.f32 %v1207_v6, %v1095_v2  ;;  %1141 = vmatmul.f32.gmra.mxu0 %v497_v63  ;;  %v270_v63 = vld [vmem:[%s6104_s28 + $0x68] sm:$0xff]  ;;  %v272_v2 = vld [vmem:[%s6104_s28 + $0x78] sm:$0xff] }
 0x160   : > { %v1321_v15 = vadd.f32 %v1320_v12, %v1208_v8  ;;  %v1433_v23 = vpop.f32.mrf.mxu3  ;;  %v277_v8 = vld [vmem:[%s6104_s28 + $0xa0] sm:$0xff] }
 0x161   : > { %v1210_v26 = vpop.f32.mrf.mxu1  ;;  %1370 = vmatmul.f32.gmra.mxu2 %v507_v21 }
 0x162   : > { %v6286_v24 = vadd.f32 %v1433_v23, %v1321_v15  ;;  %v278_v15 = vld [vmem:[%s6104_s28 + $0xa8] sm:$0xff] }
 0x163   : > { %v1097_v17 = vpop.f32.mrf.mxu0  ;;  %v754_v23 = vld [vmem:[#allocation5 + $0x788] sm:$0xff] }
 0x164   : > { %v1098_v22 = vadd.f32 %v1097_v17, %v6178_v41  ;;  %1257 = vmatmul.f32.gmra.mxu1 %v506_v27  ;;  %v1323_v30 = vpop.f32.mrf.mxu2  ;;  %v280_v17 = vld [vmem:[%s6104_s28 + $0xb8] sm:$0xff]  ;;  %2281 = vmatpush.msra.mxu3 %v754_v23  ;;  %v626_v27 = vld [vmem:[#allocation5 + $0x388] sm:$0xff]  ;;  %v311_v23 = vld [vmem:[%s6104_s28 + $0x1b0] sm:$0xff] }
 0x165   : > { %1483 = vmatmul.f32.gmra.mxu3 %v508_v29  ;;  %v285_v29 = vld [vmem:[%s6104_s28 + $0xe0] sm:$0xff]  ;;  %2055 = vmatpush.msra.mxu1 %v626_v27 }
 0x166   : > { %v1211_v28 = vadd.f32 %v1210_v26, %v1098_v22  ;;  %1144 = vmatmul.f32.gmra.mxu0 %v505_v18  ;;  %v690_v18 = vld [vmem:[#allocation5 + $0x588] sm:$0xff] }
 0x167   : > { %2168 = vmatpush.msra.mxu2 %v690_v18  ;;  %v562_v22 = vld [vmem:[#allocation5 + $0x188] sm:$0xff] }
 0x168   : > { %v1324_v31 = vadd.f32 %v1323_v30, %v1211_v28  ;;  %v1436_v39 = vpop.f32.mrf.mxu3  ;;  %1942 = vmatpush.msra.mxu0 %v562_v22  ;;  %v287_v30 = vld [vmem:[%s6104_s28 + $0xf0] sm:$0xff]  ;;  %v309_v22 = vld [vmem:[%s6104_s28 + $0x1a0] sm:$0xff] }
 0x169   : > { %v1213_v42 = vpop.f32.mrf.mxu1  ;;  %1729 = vmatmul.f32.vlgmr.msrb.gmra.mxu2 %v263_v36 }
 0x16a   : > { %v6293_v40 = vadd.f32 %v1436_v39, %v1324_v31 }
 0x16b   : > { %v1100_v32 = vpop.f32.mrf.mxu0 }
 0x16c   : > { %v1101_v38 = vadd.f32 %v1100_v32, %v6178_v41  ;;  %1616 = vmatmul.f32.vlgmr.msrb.gmra.mxu1 %v262_v43  ;;  %v1326_v47 = vpop.f32.mrf.mxu2 }
 0x16d   : > { %1842 = vmatmul.f32.vlgmr.msrb.gmra.mxu3 %v264_v45 }
 0x16e   : > { %v1214_v44 = vadd.f32 %v1213_v42, %v1101_v38  ;;  %1503 = vmatmul.f32.vlgmr.msrb.gmra.mxu0 %v261_v35  ;;  %v286_v38 = vld [vmem:[%s6104_s28 + $0xe8] sm:$0xff]  ;;  %v288_v42 = vld [vmem:[%s6104_s28 + $0xf8] sm:$0xff] }
 0x170   : > { %v1327_v50 = vadd.f32 %v1326_v47, %v1214_v44  ;;  %v1439_v59 = vpop.f32.mrf.mxu3  ;;  %v295_v47 = vld [vmem:[%s6104_s28 + $0x130] sm:$0xff] }
 0x171   : > { %v1216_v62 = vpop.f32.mrf.mxu1  ;;  %1732 = vmatmul.f32.gmra.mxu2 %v271_v57  ;;  %v296_v57 = vld [vmem:[%s6104_s28 + $0x138] sm:$0xff] }
 0x172   : > { %v6300_v60 = vadd.f32 %v1439_v59, %v1327_v50 }
 0x173   : > { %v1103_v55 = vpop.f32.mrf.mxu0 }
 0x174   : > { %v1104_v58 = vadd.f32 %v1103_v55, %v6178_v41  ;;  %1619 = vmatmul.f32.gmra.mxu1 %v270_v63  ;;  %v1329_v4 = vpop.f32.mrf.mxu2  ;;  %v294_v55 = vld [vmem:[%s6104_s28 + $0x128] sm:$0xff] }
 0x175   : > { %1845 = vmatmul.f32.gmra.mxu3 %v272_v2  ;;  %v750_v63 = vld [vmem:[#allocation5 + $0x768] sm:$0xff] }
 0x176   : > { %v1217_v0 = vadd.f32 %v1216_v62, %v1104_v58  ;;  %1506 = vmatmul.f32.gmra.mxu0 %v269_v56  ;;  %v686_v58 = vld [vmem:[#allocation5 + $0x568] sm:$0xff]  ;;  %2282 = vmatpush.msra.mxu3 %v750_v63 }
 0x177   : > { %2169 = vmatpush.msra.mxu2 %v686_v58  ;;  %v558_v62 = vld [vmem:[#allocation5 + $0x168] sm:$0xff]  ;;  %v320_v58 = vld [vmem:[%s6104_s28 + $0x1f8] sm:$0xff] }
 0x178   : > { %v1330_v6 = vadd.f32 %v1329_v4, %v1217_v0  ;;  %v1442_v12 = vpop.f32.mrf.mxu3  ;;  %1943 = vmatpush.msra.mxu0 %v558_v62  ;;  %v622_v2 = vld [vmem:[#allocation5 + $0x368] sm:$0xff] }
 0x179   : > { %v1219_v14 = vpop.f32.mrf.mxu1  ;;  %1735 = vmatmul.f32.gmra.mxu2 %v279_v10  ;;  %2056 = vmatpush.msra.mxu1 %v622_v2  ;;  %v327_v2 = vld [vmem:[%s6104_s28 + $0x230] sm:$0xff] }
 0x17a   : > { %v6307_v13 = vadd.f32 %v1442_v12, %v1330_v6  ;;  %v301_v6 = vld [vmem:[%s6104_s28 + $0x160] sm:$0xff] }
 0x17b   : > { %v1106_v7 = vpop.f32.mrf.mxu0 }
 0x17c   : > { %v1107_v11 = vadd.f32 %v1106_v7, %v6178_v41  ;;  %1622 = vmatmul.f32.gmra.mxu1 %v278_v15  ;;  %v1332_v21 = vpop.f32.mrf.mxu2  ;;  %v303_v7 = vld [vmem:[%s6104_s28 + $0x170] sm:$0xff] }
 0x17d   : > { %1848 = vmatmul.f32.gmra.mxu3 %v280_v17 }
 0x17e   : > { %v1220_v16 = vadd.f32 %v1219_v14, %v1107_v11  ;;  %1509 = vmatmul.f32.gmra.mxu0 %v277_v8  ;;  %v302_v14 = vld [vmem:[%s6104_s28 + $0x168] sm:$0xff] }
 0x180   : > { %v1333_v26 = vadd.f32 %v1332_v21, %v1220_v16  ;;  %v1445_v32 = vpop.f32.mrf.mxu3  ;;  %v304_v16 = vld [vmem:[%s6104_s28 + $0x178] sm:$0xff] }
 0x181   : > { %v1222_v36 = vpop.f32.mrf.mxu1  ;;  %1738 = vmatmul.f32.gmra.mxu2 %v287_v30  ;;  %v310_v30 = vld [vmem:[%s6104_s28 + $0x1a8] sm:$0xff] }
 0x182   : > { %v6314_v35 = vadd.f32 %v1445_v32, %v1333_v26  ;;  %v312_v32 = vld [vmem:[%s6104_s28 + $0x1b8] sm:$0xff] }
 0x183   : > { %v1109_v28 = vpop.f32.mrf.mxu0 }
 0x184   : > { %v1110_v31 = vadd.f32 %v1109_v28, %v6178_v41  ;;  %1625 = vmatmul.f32.gmra.mxu1 %v286_v38  ;;  %v1335_v43 = vpop.f32.mrf.mxu2 }
 0x185   : > { %1851 = vmatmul.f32.gmra.mxu3 %v288_v42  ;;  %v746_v42 = vld [vmem:[#allocation5 + $0x748] sm:$0xff] }
 0x186   : > { %v1223_v39 = vadd.f32 %v1222_v36, %v1110_v31  ;;  %1512 = vmatmul.f32.gmra.mxu0 %v285_v29  ;;  %v682_v36 = vld [vmem:[#allocation5 + $0x548] sm:$0xff]  ;;  %2283 = vmatpush.msra.mxu3 %v746_v42 }
 0x187   : > { %2170 = vmatpush.msra.mxu2 %v682_v36  ;;  %v334_v36 = vld [vmem:[%s6104_s28 + $0x268] sm:$0xff] }
 0x188   : > { %v1336_v44 = vadd.f32 %v1335_v43, %v1223_v39  ;;  %v1448_v49 = vpop.f32.mrf.mxu3  ;;  %v554_v39 = vld [vmem:[#allocation5 + $0x148] sm:$0xff] }
 0x189   : > { %v1225_v52 = vpop.f32.mrf.mxu1  ;;  %1741 = vmatmul.f32.gmra.mxu2 %v295_v47  ;;  %1944 = vmatpush.msra.mxu0 %v554_v39  ;;  %v319_v47 = vld [vmem:[%s6104_s28 + $0x1f0] sm:$0xff]  ;;  %v336_v39 = vld [vmem:[%s6104_s28 + $0x278] sm:$0xff] }
 0x18a   : > { %v6321_v50 = vadd.f32 %v1448_v49, %v1336_v44  ;;  %v618_v44 = vld [vmem:[#allocation5 + $0x348] sm:$0xff] }
 0x18b   : > { %v1112_v45 = vpop.f32.mrf.mxu0  ;;  %2057 = vmatpush.msra.mxu1 %v618_v44 }
 0x18c   : > { %v1113_v48 = vadd.f32 %v1112_v45, %v6178_v41  ;;  %1628 = vmatmul.f32.gmra.mxu1 %v294_v55  ;;  %v1338_v59 = vpop.f32.mrf.mxu2 }
 0x18d   : > { %1854 = vmatmul.f32.gmra.mxu3 %v296_v57 }
 0x18e   : > { %v1226_v56 = vadd.f32 %v1225_v52, %v1113_v48  ;;  %1515 = vmatmul.f32.gmra.mxu0 %v293_v46  ;;  %v317_v46 = vld [vmem:[%s6104_s28 + $0x1e0] sm:$0xff] }
 0x190   : > { %v1339_v0 = vadd.f32 %v1338_v59, %v1226_v56  ;;  %v1451_v10 = vpop.f32.mrf.mxu3  ;;  %v318_v56 = vld [vmem:[%s6104_s28 + $0x1e8] sm:$0xff] }
 0x191   : > { %v1228_v12 = vpop.f32.mrf.mxu1  ;;  %1744 = vmatmul.f32.gmra.mxu2 %v303_v7 }
 0x192   : > { %v6328_v11 = vadd.f32 %v1451_v10, %v1339_v0  ;;  %v325_v0 = vld [vmem:[%s6104_s28 + $0x220] sm:$0xff]  ;;  %v326_v10 = vld [vmem:[%s6104_s28 + $0x228] sm:$0xff] }
 0x193   : > { %v1115_v4 = vpop.f32.mrf.mxu0 }
 0x194   : > { %v1116_v8 = vadd.f32 %v1115_v4, %v6178_v41  ;;  %1631 = vmatmul.f32.gmra.mxu1 %v302_v14  ;;  %v1341_v17 = vpop.f32.mrf.mxu2  ;;  %v328_v14 = vld [vmem:[%s6104_s28 + $0x238] sm:$0xff] }
 0x195   : > { %1857 = vmatmul.f32.gmra.mxu3 %v304_v16 }
 0x196   : > { %v1229_v15 = vadd.f32 %v1228_v12, %v1116_v8  ;;  %1518 = vmatmul.f32.gmra.mxu0 %v301_v6 }
 0x198   : > { %v1342_v18 = vadd.f32 %v1341_v17, %v1229_v15  ;;  %v1454_v27 = vpop.f32.mrf.mxu3  ;;  %v678_v15 = vld [vmem:[#allocation5 + $0x528] sm:$0xff] }
 0x199   : > { %v1231_v29 = vpop.f32.mrf.mxu1  ;;  %1747 = vmatmul.f32.gmra.mxu2 %v311_v23  ;;  %v550_v17 = vld [vmem:[#allocation5 + $0x128] sm:$0xff] }
 0x19a   : > { %v6335_v28 = vadd.f32 %v1454_v27, %v1342_v18  ;;  %2171 = vmatpush.msra.mxu2 %v678_v15  ;;  %v742_v18 = vld [vmem:[#allocation5 + $0x728] sm:$0xff]  ;;  %1945 = vmatpush.msra.mxu0 %v550_v17  ;;  %v335_v27 = vld [vmem:[%s6104_s28 + $0x270] sm:$0xff] }
 0x19b   : > { %v1118_v21 = vpop.f32.mrf.mxu0  ;;  %2284 = vmatpush.msra.mxu3 %v742_v18  ;;  %v350_v17 = vld [vmem:[%s6104_s28 + $0x2e8] sm:$0xff] }
 0x19c   : > { %v1119_v26 = vadd.f32 %v1118_v21, %v6178_v41  ;;  %1634 = vmatmul.f32.gmra.mxu1 %v310_v30  ;;  %v1344_v38 = vpop.f32.mrf.mxu2 }
 0x19d   : > { %1860 = vmatmul.f32.gmra.mxu3 %v312_v32 }
 0x19e   : > { %v1232_v31 = vadd.f32 %v1231_v29, %v1119_v26  ;;  %1521 = vmatmul.f32.gmra.mxu0 %v309_v22  ;;  %v614_v22 = vld [vmem:[#allocation5 + $0x328] sm:$0xff]  ;;  %v333_v26 = vld [vmem:[%s6104_s28 + $0x260] sm:$0xff] }
 0x19f   : > { %2058 = vmatpush.msra.mxu1 %v614_v22 }
 0x1a0   : > { %v1345_v43 = vadd.f32 %v1344_v38, %v1232_v31  ;;  %v1457_v49 = vpop.f32.mrf.mxu3 }
 0x1a1   : > { %v1234_v55 = vpop.f32.mrf.mxu1  ;;  %1750 = vmatmul.f32.gmra.mxu2 %v319_v47 }
 0x1a2   : > { %v6342_v52 = vadd.f32 %v1457_v49, %v1345_v43 }
 0x1a3   : > { %v1121_v45 = vpop.f32.mrf.mxu0 }
 0x1a4   : > { %v1122_v48 = vadd.f32 %v1121_v45, %v6178_v41  ;;  %1637 = vmatmul.f32.gmra.mxu1 %v318_v56  ;;  %v1347_v59 = vpop.f32.mrf.mxu2  ;;  %v341_v45 = vld [vmem:[%s6104_s28 + $0x2a0] sm:$0xff]  ;;  %v342_v56 = vld [vmem:[%s6104_s28 + $0x2a8] sm:$0xff] }
 0x1a5   : > { %1863 = vmatmul.f32.gmra.mxu3 %v320_v58  ;;  %v344_v58 = vld [vmem:[%s6104_s28 + $0x2b8] sm:$0xff] }
 0x1a6   : > { %v1235_v57 = vadd.f32 %v1234_v55, %v1122_v48  ;;  %1524 = vmatmul.f32.gmra.mxu0 %v317_v46  ;;  %v343_v46 = vld [vmem:[%s6104_s28 + $0x2b0] sm:$0xff] }
 0x1a8   : > { %v1348_v62 = vadd.f32 %v1347_v59, %v1235_v57  ;;  %v1460_v6 = vpop.f32.mrf.mxu3  ;;  %v674_v59 = vld [vmem:[#allocation5 + $0x508] sm:$0xff] }
 0x1a9   : > { %v1237_v8 = vpop.f32.mrf.mxu1  ;;  %1753 = vmatmul.f32.gmra.mxu2 %v327_v2 }
 0x1aa   : > { %v6349_v7 = vadd.f32 %v1460_v6, %v1348_v62  ;;  %2172 = vmatpush.msra.mxu2 %v674_v59 }
 0x1ab   : > { %v1124_v63 = vpop.f32.mrf.mxu0 }
 0x1ac   : > { %v1125_v4 = vadd.f32 %v1124_v63, %v6178_v41  ;;  %1640 = vmatmul.f32.gmra.mxu1 %v326_v10  ;;  %v1350_v16 = vpop.f32.mrf.mxu2  ;;  %v546_v63 = vld [vmem:[#allocation5 + $0x108] sm:$0xff]  ;;  %v351_v10 = vld [vmem:[%s6104_s28 + $0x2f0] sm:$0xff] }
 0x1ad   : > { %1866 = vmatmul.f32.gmra.mxu3 %v328_v14  ;;  %1946 = vmatpush.msra.mxu0 %v546_v63 }
 0x1ae   : > { %v1238_v12 = vadd.f32 %v1237_v8, %v1125_v4  ;;  %1527 = vmatmul.f32.gmra.mxu0 %v325_v0  ;;  %v738_v0 = vld [vmem:[#allocation5 + $0x708] sm:$0xff]  ;;  %v349_v8 = vld [vmem:[%s6104_s28 + $0x2e0] sm:$0xff] }
 0x1af   : > { %2285 = vmatpush.msra.mxu3 %v738_v0  ;;  %v610_v4 = vld [vmem:[#allocation5 + $0x308] sm:$0xff] }
 0x1b0   : > { %v1351_v21 = vadd.f32 %v1350_v16, %v1238_v12  ;;  %v1463_v30 = vpop.f32.mrf.mxu3  ;;  %2059 = vmatpush.msra.mxu1 %v610_v4 }
 0x1b1   : > { %v1240_v32 = vpop.f32.mrf.mxu1  ;;  %1756 = vmatmul.f32.gmra.mxu2 %v335_v27  ;;  %v357_v27 = vld [vmem:[%s6104_s28 + $0x320] sm:$0xff] }
 0x1b2   : > { %v6356_v31 = vadd.f32 %v1463_v30, %v1351_v21  ;;  %v352_v21 = vld [vmem:[%s6104_s28 + $0x2f8] sm:$0xff] }
 0x1b3   : > { %v1127_v23 = vpop.f32.mrf.mxu0 }
 0x1b4   : > { %v1128_v29 = vadd.f32 %v1127_v23, %v6178_v41  ;;  %1643 = vmatmul.f32.gmra.mxu1 %v334_v36  ;;  %v1353_v42 = vpop.f32.mrf.mxu2 }
 0x1b5   : > { %1869 = vmatmul.f32.gmra.mxu3 %v336_v39  ;;  %v358_v39 = vld [vmem:[%s6104_s28 + $0x328] sm:$0xff] }
 0x1b6   : > { %v1241_v38 = vadd.f32 %v1240_v32, %v1128_v29  ;;  %1530 = vmatmul.f32.gmra.mxu0 %v333_v26  ;;  %v359_v29 = vld [vmem:[%s6104_s28 + $0x330] sm:$0xff] }
 0x1b8   : > { %v1354_v43 = vadd.f32 %v1353_v42, %v1241_v38  ;;  %v1466_v48 = vpop.f32.mrf.mxu3 }
 0x1b9   : > { %v1243_v55 = vpop.f32.mrf.mxu1  ;;  %1759 = vmatmul.f32.gmra.mxu2 %v343_v46  ;;  %v542_v46 = vld [vmem:[#allocation5 + $0xe8] sm:$0xff] }
 0x1ba   : > { %v6363_v49 = vadd.f32 %v1466_v48, %v1354_v43  ;;  %v360_v43 = vld [vmem:[%s6104_s28 + $0x338] sm:$0xff]  ;;  %1947 = vmatpush.msra.mxu0 %v542_v46 }
 0x1bb   : > { %v1130_v44 = vpop.f32.mrf.mxu0 }
 0x1bc   : > { %v1131_v47 = vadd.f32 %v1130_v44, %v6178_v41  ;;  %1646 = vmatmul.f32.gmra.mxu1 %v342_v56  ;;  %v1356_v62 = vpop.f32.mrf.mxu2  ;;  %v670_v44 = vld [vmem:[#allocation5 + $0x4e8] sm:$0xff] }
 0x1bd   : > { %1872 = vmatmul.f32.gmra.mxu3 %v344_v58  ;;  %2173 = vmatpush.msra.mxu2 %v670_v44  ;;  %v367_v58 = vld [vmem:[%s6104_s28 + $0x370] sm:$0xff]  ;;  %v381_v44 = vld [vmem:[%s6104_s28 + $0x3e0] sm:$0xff] }
 0x1be   : > { %v1244_v57 = vadd.f32 %v1243_v55, %v1131_v47  ;;  %1533 = vmatmul.f32.gmra.mxu0 %v341_v45  ;;  %v734_v47 = vld [vmem:[#allocation5 + $0x6e8] sm:$0xff] }
 0x1bf   : > { %2286 = vmatpush.msra.mxu3 %v734_v47  ;;  %v606_v55 = vld [vmem:[#allocation5 + $0x2e8] sm:$0xff] }
 0x1c0   : > { %v1357_v2 = vadd.f32 %v1356_v62, %v1244_v57  ;;  %v1469_v14 = vpop.f32.mrf.mxu3  ;;  %v365_v57 = vld [vmem:[%s6104_s28 + $0x360] sm:$0xff]  ;;  %2060 = vmatpush.msra.mxu1 %v606_v55 }
 0x1c1   : > { %v1246_v16 = vpop.f32.mrf.mxu1  ;;  %1762 = vmatmul.f32.gmra.mxu2 %v351_v10 }
 0x1c2   : > { %v6370_v15 = vadd.f32 %v1469_v14, %v1357_v2  ;;  %v366_v2 = vld [vmem:[%s6104_s28 + $0x368] sm:$0xff]  ;;  %v373_v14 = vld [vmem:[%s6104_s28 + $0x3a0] sm:$0xff] }
 0x1c3   : > { %v1133_v6 = vpop.f32.mrf.mxu0 }
 0x1c4   : > { %v1134_v12 = vadd.f32 %v1133_v6, %v6178_v41  ;;  %1649 = vmatmul.f32.gmra.mxu1 %v350_v17  ;;  %v1359_v22 = vpop.f32.mrf.mxu2  ;;  %v368_v6 = vld [vmem:[%s6104_s28 + $0x378] sm:$0xff] }
 0x1c5   : > { %1875 = vmatmul.f32.gmra.mxu3 %v352_v21 }
 0x1c6   : > { %v1247_v18 = vadd.f32 %v1246_v16, %v1134_v12  ;;  %1536 = vmatmul.f32.gmra.mxu0 %v349_v8  ;;  %v375_v16 = vld [vmem:[%s6104_s28 + $0x3b0] sm:$0xff] }
 0x1c8   : > { %v1360_v23 = vadd.f32 %v1359_v22, %v1247_v18  ;;  %v1472_v32 = vpop.f32.mrf.mxu3 }
 0x1c9   : > { %v1249_v38 = vpop.f32.mrf.mxu1  ;;  %1765 = vmatmul.f32.gmra.mxu2 %v359_v29  ;;  %v666_v29 = vld [vmem:[#allocation5 + $0x4c8] sm:$0xff] }
 0x1ca   : > { %v6377_v36 = vadd.f32 %v1472_v32, %v1360_v23  ;;  %v374_v23 = vld [vmem:[%s6104_s28 + $0x3a8] sm:$0xff]  ;;  %2174 = vmatpush.msra.mxu2 %v666_v29  ;;  %v397_v29 = vld [vmem:[%s6104_s28 + $0x460] sm:$0xff] }
 0x1cb   : > { %v1136_v26 = vpop.f32.mrf.mxu0  ;;  %v538_v32 = vld [vmem:[#allocation5 + $0xc8] sm:$0xff] }
 0x1cc   : > { %v1137_v30 = vadd.f32 %v1136_v26, %v6178_v41  ;;  %1652 = vmatmul.f32.gmra.mxu1 %v358_v39  ;;  %v1362_v45 = vpop.f32.mrf.mxu2  ;;  %1948 = vmatpush.msra.mxu0 %v538_v32 }
 0x1cd   : > { %1878 = vmatmul.f32.gmra.mxu3 %v360_v43 }
 0x1ce   : > { %v1250_v42 = vadd.f32 %v1249_v38, %v1137_v30  ;;  %1539 = vmatmul.f32.gmra.mxu0 %v357_v27  ;;  %v376_v27 = vld [vmem:[%s6104_s28 + $0x3b8] sm:$0xff]  ;;  %v730_v38 = vld [vmem:[#allocation5 + $0x6c8] sm:$0xff] }
 0x1cf   : > { %2287 = vmatpush.msra.mxu3 %v730_v38 }
 0x1d0   : > { %v1363_v48 = vadd.f32 %v1362_v45, %v1250_v42  ;;  %v1475_v62 = vpop.f32.mrf.mxu3  ;;  %v602_v42 = vld [vmem:[#allocation5 + $0x2c8] sm:$0xff]  ;;  %v383_v45 = vld [vmem:[%s6104_s28 + $0x3f0] sm:$0xff] }
 0x1d1   : > { %v1252_v0 = vpop.f32.mrf.mxu1  ;;  %1768 = vmatmul.f32.gmra.mxu2 %v367_v58  ;;  %2061 = vmatpush.msra.mxu1 %v602_v42  ;;  %v384_v58 = vld [vmem:[%s6104_s28 + $0x3f8] sm:$0xff] }
 0x1d2   : > { %v6384_v63 = vadd.f32 %v1475_v62, %v1363_v48 }
 0x1d3   : > { %v1139_v56 = vpop.f32.mrf.mxu0 }
 0x1d4   : > { %v1140_v59 = vadd.f32 %v1139_v56, %v6178_v41  ;;  %1655 = vmatmul.f32.gmra.mxu1 %v366_v2  ;;  %v1365_v8 = vpop.f32.mrf.mxu2  ;;  %v382_v56 = vld [vmem:[%s6104_s28 + $0x3e8] sm:$0xff]  ;;  %v389_v2 = vld [vmem:[%s6104_s28 + $0x420] sm:$0xff] }
 0x1d5   : > { %1881 = vmatmul.f32.gmra.mxu3 %v368_v6 }
 0x1d6   : > { %v1253_v4 = vadd.f32 %v1252_v0, %v1140_v59  ;;  %1542 = vmatmul.f32.gmra.mxu0 %v365_v57 }
 0x1d8   : > { %v1366_v10 = vadd.f32 %v1365_v8, %v1253_v4  ;;  %v1478_v18 = vpop.f32.mrf.mxu3  ;;  %v391_v4 = vld [vmem:[%s6104_s28 + $0x430] sm:$0xff] }
 0x1d9   : > { %v1255_v22 = vpop.f32.mrf.mxu1  ;;  %1771 = vmatmul.f32.gmra.mxu2 %v375_v16  ;;  %v662_v16 = vld [vmem:[#allocation5 + $0x4a8] sm:$0xff] }
 0x1da   : > { %v6391_v21 = vadd.f32 %v1478_v18, %v1366_v10  ;;  %2175 = vmatpush.msra.mxu2 %v662_v16 }
 0x1db   : > { %v1142_v12 = vpop.f32.mrf.mxu0 }
 0x1dc   : > { %v1143_v17 = vadd.f32 %v1142_v12, %v6178_v41  ;;  %1658 = vmatmul.f32.gmra.mxu1 %v374_v23  ;;  %v1368_v30 = vpop.f32.mrf.mxu2  ;;  %v390_v12 = vld [vmem:[%s6104_s28 + $0x428] sm:$0xff] }
 0x1dd   : > { %1884 = vmatmul.f32.gmra.mxu3 %v376_v27  ;;  %v726_v23 = vld [vmem:[#allocation5 + $0x6a8] sm:$0xff] }
 0x1de   : > { %v1256_v26 = vadd.f32 %v1255_v22, %v1143_v17  ;;  %1545 = vmatmul.f32.gmra.mxu0 %v373_v14  ;;  %v392_v14 = vld [vmem:[%s6104_s28 + $0x438] sm:$0xff]  ;;  %v534_v22 = vld [vmem:[#allocation5 + $0xa8] sm:$0xff]  ;;  %2288 = vmatpush.msra.mxu3 %v726_v23 }
 0x1df   : > { %1949 = vmatpush.msra.mxu0 %v534_v22 }
 0x1e0   : > { %v1369_v39 = vadd.f32 %v1368_v30, %v1256_v26  ;;  %v1481_v47 = vpop.f32.mrf.mxu3  ;;  %v598_v26 = vld [vmem:[#allocation5 + $0x2a8] sm:$0xff]  ;;  %v399_v30 = vld [vmem:[%s6104_s28 + $0x470] sm:$0xff] }
 0x1e1   : > { %v1258_v55 = vpop.f32.mrf.mxu1  ;;  %1774 = vmatmul.f32.gmra.mxu2 %v383_v45  ;;  %2062 = vmatpush.msra.mxu1 %v598_v26 }
 0x1e2   : > { %v6398_v48 = vadd.f32 %v1481_v47, %v1369_v39 }
 0x1e3   : > { %v1145_v43 = vpop.f32.mrf.mxu0 }
 0x1e4   : > { %v1146_v46 = vadd.f32 %v1145_v43, %v6178_v41  ;;  %1661 = vmatmul.f32.gmra.mxu1 %v382_v56  ;;  %v1371_v59 = vpop.f32.mrf.mxu2  ;;  %v398_v43 = vld [vmem:[%s6104_s28 + $0x468] sm:$0xff]  ;;  %v407_v56 = vld [vmem:[%s6104_s28 + $0x4b0] sm:$0xff] }
 0x1e5   : > { %1887 = vmatmul.f32.gmra.mxu3 %v384_v58 }
 0x1e6   : > { %v1259_v57 = vadd.f32 %v1258_v55, %v1146_v46  ;;  %1548 = vmatmul.f32.gmra.mxu0 %v381_v44  ;;  %v400_v44 = vld [vmem:[%s6104_s28 + $0x478] sm:$0xff]  ;;  %v405_v55 = vld [vmem:[%s6104_s28 + $0x4a0] sm:$0xff] }
 0x1e8   : > { %v1372_v62 = vadd.f32 %v1371_v59, %v1259_v57  ;;  %v1484_v41 = vpop.f32.mrf.mxu3 }
 0x1e9   : > { %v1617_v10 = vpop.f32.mrf.mxu1  ;;  %1777 = vmatmul.f32.gmra.mxu2 %v391_v4  ;;  %v658_v4 = vld [vmem:[#allocation5 + $0x488] sm:$0xff] }
 0x1ea   : > { %v6405_v8 = vadd.f32 %v1484_v41, %v1372_v62  ;;  %2176 = vmatpush.msra.mxu2 %v658_v4  ;;  %v431_v4 = vld [vmem:[%s6104_s28 + $0x570] sm:$0xff] }
 0x1eb   : > { %v1504_v0 = vpop.f32.mrf.mxu0 }
 0x1ec   : > { %v1505_v6 = vadd.f32 %v1504_v0, %v6188_v61  ;;  %1664 = vmatmul.f32.gmra.mxu1 %v390_v12  ;;  %v1730_v18 = vpop.f32.mrf.mxu2  ;;  %v406_v0 = vld [vmem:[%s6104_s28 + $0x4a8] sm:$0xff] }
 0x1ed   : > { %1890 = vmatmul.f32.gmra.mxu3 %v392_v14  ;;  %v722_v12 = vld [vmem:[#allocation5 + $0x688] sm:$0xff] }
 0x1ee   : > { %1551 = vmatmul.f32.gmra.mxu0 %v389_v2  ;;  %v1618_v17 = vadd.f32 %v1617_v10, %v1505_v6  ;;  %v408_v2 = vld [vmem:[%s6104_s28 + $0x4b8] sm:$0xff]  ;;  %v530_v10 = vld [vmem:[#allocation5 + $0x88] sm:$0xff]  ;;  %2289 = vmatpush.msra.mxu3 %v722_v12 }
 0x1ef   : > { %1950 = vmatpush.msra.mxu0 %v530_v10  ;;  %v594_v14 = vld [vmem:[#allocation5 + $0x288] sm:$0xff] }
 0x1f0   : > { %v1731_v61 = vadd.f32 %v1730_v18, %v1618_v17  ;;  %v1843_v38 = vpop.f32.mrf.mxu3  ;;  %v413_v17 = vld [vmem:[%s6104_s28 + $0x4e0] sm:$0xff]  ;;  %v415_v18 = vld [vmem:[%s6104_s28 + $0x4f0] sm:$0xff]  ;;  %2063 = vmatpush.msra.mxu1 %v594_v14  ;;  %v432_v14 = vld [vmem:[%s6104_s28 + $0x578] sm:$0xff] }
 0x1f1   : > { %v1620_v42 = vpop.f32.mrf.mxu1  ;;  %1780 = vmatmul.f32.gmra.mxu2 %v399_v30 }
 0x1f2   : > { %v1844_v39 = vadd.f32 %v1843_v38, %v1731_v61 }
 0x1f3   : > { %v1507_v27 = vpop.f32.mrf.mxu0 }
 0x1f4   : > { %v1508_v32 = vadd.f32 %v1507_v27, %v6195_v9  ;;  %4651 = vst [vmem:[%s6415_s20] sm:$0xff] %v1844_v39  ;;  %1667 = vmatmul.f32.gmra.mxu1 %v398_v43  ;;  %v1733_v9 = vpop.f32.mrf.mxu2  ;;  %v414_v27 = vld [vmem:[%s6104_s28 + $0x4e8] sm:$0xff] }
 0x1f5   : > { %1893 = vmatmul.f32.gmra.mxu3 %v400_v44 }
 0x1f6   : > { %1554 = vmatmul.f32.gmra.mxu0 %v397_v29  ;;  %v1621_v45 = vadd.f32 %v1620_v42, %v1508_v32  ;;  %v416_v29 = vld [vmem:[%s6104_s28 + $0x4f8] sm:$0xff]  ;;  %v421_v42 = vld [vmem:[%s6104_s28 + $0x520] sm:$0xff] }
 0x1f8   : > { %v1734_v46 = vadd.f32 %v1733_v9, %v1621_v45  ;;  %v1846_v58 = vpop.f32.mrf.mxu3 }
 0x1f9   : > { %v1623_v62 = vpop.f32.mrf.mxu1  ;;  %1783 = vmatmul.f32.gmra.mxu2 %v407_v56 }
 0x1fa   : > { %v1847_v59 = vadd.f32 %v1846_v58, %v1734_v46  ;;  %v422_v46 = vld [vmem:[%s6104_s28 + $0x528] sm:$0xff] }
 0x1fb   : > { %v1510_v47 = vpop.f32.mrf.mxu0  ;;  %v526_v58 = vld [vmem:[#allocation5 + $0x68] sm:$0xff] }
 0x1fc   : > { %v1511_v57 = vadd.f32 %v1510_v47, %v6202_v25  ;;  %4655 = vst [vmem:[%s6415_s20 + $0x20] sm:$0xff] %v1847_v59  ;;  %1670 = vmatmul.f32.gmra.mxu1 %v406_v0  ;;  %v1736_v6 = vpop.f32.mrf.mxu2  ;;  %v424_v47 = vld [vmem:[%s6104_s28 + $0x538] sm:$0xff]  ;;  %v718_v59 = vld [vmem:[#allocation5 + $0x668] sm:$0xff]  ;;  %1951 = vmatpush.msra.mxu0 %v526_v58 }
 0x1fd   : > { %1896 = vmatmul.f32.gmra.mxu3 %v408_v2  ;;  %v429_v2 = vld [vmem:[%s6104_s28 + $0x560] sm:$0xff]  ;;  %v446_v58 = vld [vmem:[%s6104_s28 + $0x5e8] sm:$0xff] }
 0x1fe   : > { %1557 = vmatmul.f32.gmra.mxu0 %v405_v55  ;;  %v1624_v41 = vadd.f32 %v1623_v62, %v1511_v57  ;;  %v654_v55 = vld [vmem:[#allocation5 + $0x468] sm:$0xff]  ;;  %2290 = vmatpush.msra.mxu3 %v718_v59  ;;  %v448_v59 = vld [vmem:[%s6104_s28 + $0x5f8] sm:$0xff] }
 0x1ff   : > { %2177 = vmatpush.msra.mxu2 %v654_v55  ;;  %v590_v62 = vld [vmem:[#allocation5 + $0x268] sm:$0xff] }
 0x200   : > { %v1737_v25 = vadd.f32 %v1736_v6, %v1624_v41  ;;  %v1849_v23 = vpop.f32.mrf.mxu3  ;;  %2064 = vmatpush.msra.mxu1 %v590_v62 }
 0x201   : > { %v1626_v26 = vpop.f32.mrf.mxu1  ;;  %1786 = vmatmul.f32.gmra.mxu2 %v415_v18 }
 0x202   : > { %v1850_v61 = vadd.f32 %v1849_v23, %v1737_v25  ;;  %v430_v25 = vld [vmem:[%s6104_s28 + $0x568] sm:$0xff]  ;;  %v437_v23 = vld [vmem:[%s6104_s28 + $0x5a0] sm:$0xff] }
 0x203   : > { %v1513_v16 = vpop.f32.mrf.mxu0 }
 0x204   : > { %v1514_v22 = vadd.f32 %v1513_v16, %v6209_v37  ;;  %4659 = vst [vmem:[%s6415_s20 + $0x40] sm:$0xff] %v1850_v61  ;;  %1673 = vmatmul.f32.gmra.mxu1 %v414_v27  ;;  %v1739_v32 = vpop.f32.mrf.mxu2  ;;  %v423_v37 = vld [vmem:[%s6104_s28 + $0x530] sm:$0xff] }
 0x205   : > { %1899 = vmatmul.f32.gmra.mxu3 %v416_v29 }
 0x206   : > { %1560 = vmatmul.f32.gmra.mxu0 %v413_v17  ;;  %v1627_v30 = vadd.f32 %v1626_v26, %v1514_v22 }
 0x208   : > { %v1740_v38 = vadd.f32 %v1739_v32, %v1627_v30  ;;  %v1852_v44 = vpop.f32.mrf.mxu3  ;;  %v438_v30 = vld [vmem:[%s6104_s28 + $0x5a8] sm:$0xff]  ;;  %v440_v32 = vld [vmem:[%s6104_s28 + $0x5b8] sm:$0xff] }
 0x209   : > { %v1629_v9 = vpop.f32.mrf.mxu1  ;;  %1789 = vmatmul.f32.gmra.mxu2 %v423_v37  ;;  %v522_v37 = vld [vmem:[#allocation5 + $0x48] sm:$0xff] }
 0x20a   : > { %v1853_v45 = vadd.f32 %v1852_v44, %v1740_v38  ;;  %v650_v38 = vld [vmem:[#allocation5 + $0x448] sm:$0xff]  ;;  %1952 = vmatpush.msra.mxu0 %v522_v37 }
 0x20b   : > { %v1516_v39 = vpop.f32.mrf.mxu0  ;;  %2178 = vmatpush.msra.mxu2 %v650_v38  ;;  %v586_v44 = vld [vmem:[#allocation5 + $0x248] sm:$0xff] }
 0x20c   : > { %v1517_v43 = vadd.f32 %v1516_v39, %v6216_v54  ;;  %4663 = vst [vmem:[%s6415_s20 + $0x60] sm:$0xff] %v1853_v45  ;;  %1676 = vmatmul.f32.gmra.mxu1 %v422_v46  ;;  %v1742_v57 = vpop.f32.mrf.mxu2  ;;  %v447_v46 = vld [vmem:[%s6104_s28 + $0x5f0] sm:$0xff] }
 0x20d   : > { %1902 = vmatmul.f32.gmra.mxu3 %v424_v47  ;;  %2065 = vmatpush.msra.mxu1 %v586_v44 }
 0x20e   : > { %1563 = vmatmul.f32.gmra.mxu0 %v421_v42  ;;  %v1630_v56 = vadd.f32 %v1629_v9, %v1517_v43  ;;  %v714_v43 = vld [vmem:[#allocation5 + $0x648] sm:$0xff]  ;;  %v445_v9 = vld [vmem:[%s6104_s28 + $0x5e0] sm:$0xff] }
 0x20f   : > { %2291 = vmatpush.msra.mxu3 %v714_v43 }
 0x210   : > { %v1743_v54 = vadd.f32 %v1742_v57, %v1630_v56  ;;  %v1855_v6 = vpop.f32.mrf.mxu3 }
 0x211   : > { %v1632_v12 = vpop.f32.mrf.mxu1  ;;  %1792 = vmatmul.f32.gmra.mxu2 %v431_v4  ;;  %v453_v4 = vld [vmem:[%s6104_s28 + $0x620] sm:$0xff] }
 0x212   : > { %v1856_v10 = vadd.f32 %v1855_v6, %v1743_v54 }
 0x213   : > { %v1519_v0 = vpop.f32.mrf.mxu0 }
 0x214   : > { %v1520_v41 = vadd.f32 %v1519_v0, %v6223_v3  ;;  %4667 = vst [vmem:[%s6415_s20 + $0x80] sm:$0xff] %v1856_v10  ;;  %1679 = vmatmul.f32.gmra.mxu1 %v430_v25  ;;  %v1745_v17 = vpop.f32.mrf.mxu2  ;;  %v439_v3 = vld [vmem:[%s6104_s28 + $0x5b0] sm:$0xff]  ;;  %v454_v25 = vld [vmem:[%s6104_s28 + $0x628] sm:$0xff] }
 0x215   : > { %1905 = vmatmul.f32.gmra.mxu3 %v432_v14  ;;  %v456_v14 = vld [vmem:[%s6104_s28 + $0x638] sm:$0xff] }
 0x216   : > { %1566 = vmatmul.f32.gmra.mxu0 %v429_v2  ;;  %v1633_v16 = vadd.f32 %v1632_v12, %v1520_v41 }
 0x218   : > { %v1746_v18 = vadd.f32 %v1745_v17, %v1633_v16  ;;  %v1858_v26 = vpop.f32.mrf.mxu3  ;;  %v646_v16 = vld [vmem:[#allocation5 + $0x428] sm:$0xff] }
 0x219   : > { %v1635_v29 = vpop.f32.mrf.mxu1  ;;  %1795 = vmatmul.f32.gmra.mxu2 %v439_v3  ;;  %v582_v3 = vld [vmem:[#allocation5 + $0x228] sm:$0xff] }
 0x21a   : > { %v1859_v27 = vadd.f32 %v1858_v26, %v1746_v18  ;;  %2179 = vmatpush.msra.mxu2 %v646_v16  ;;  %v461_v26 = vld [vmem:[%s6104_s28 + $0x660] sm:$0xff]  ;;  %2066 = vmatpush.msra.mxu1 %v582_v3  ;;  %v480_v16 = vld [vmem:[%s6104_s28 + $0x6f8] sm:$0xff] }
 0x21b   : > { %v1522_v22 = vpop.f32.mrf.mxu0 }
 0x21c   : > { %v1523_v61 = vadd.f32 %v1522_v22, %v6230_v20  ;;  %4671 = vst [vmem:[%s6415_s20 + $0xa0] sm:$0xff] %v1859_v27  ;;  %1682 = vmatmul.f32.gmra.mxu1 %v438_v30  ;;  %v1748_v42 = vpop.f32.mrf.mxu2  ;;  %v518_v22 = vld [vmem:[#allocation5 + $0x28] sm:$0xff]  ;;  %v463_v27 = vld [vmem:[%s6104_s28 + $0x670] sm:$0xff] }
 0x21d   : > { %1908 = vmatmul.f32.gmra.mxu3 %v440_v32  ;;  %1953 = vmatpush.msra.mxu0 %v518_v22 }
 0x21e   : > { %1569 = vmatmul.f32.gmra.mxu0 %v437_v23  ;;  %v1636_v39 = vadd.f32 %v1635_v29, %v1523_v61  ;;  %v710_v23 = vld [vmem:[#allocation5 + $0x628] sm:$0xff] }
 0x21f   : > { %2292 = vmatpush.msra.mxu3 %v710_v23 }
 0x220   : > { %v1749_v20 = vadd.f32 %v1748_v42, %v1636_v39  ;;  %v1861_v55 = vpop.f32.mrf.mxu3  ;;  %v462_v39 = vld [vmem:[%s6104_s28 + $0x668] sm:$0xff]  ;;  %v464_v42 = vld [vmem:[%s6104_s28 + $0x678] sm:$0xff] }
 0x221   : > { %v1638_v57 = vpop.f32.mrf.mxu1  ;;  %1798 = vmatmul.f32.gmra.mxu2 %v447_v46 }
 0x222   : > { %v1862_v56 = vadd.f32 %v1861_v55, %v1749_v20 }
 0x223   : > { %v1525_v45 = vpop.f32.mrf.mxu0 }
 0x224   : > { %v1526_v47 = vadd.f32 %v1525_v45, %v6237_v33  ;;  %4675 = vst [vmem:[%s6415_s20 + $0xc0] sm:$0xff] %v1862_v56  ;;  %1685 = vmatmul.f32.gmra.mxu1 %v446_v58  ;;  %v1751_v62 = vpop.f32.mrf.mxu2  ;;  %v455_v33 = vld [vmem:[%s6104_s28 + $0x630] sm:$0xff]  ;;  %v469_v45 = vld [vmem:[%s6104_s28 + $0x6a0] sm:$0xff]  ;;  %v470_v56 = vld [vmem:[%s6104_s28 + $0x6a8] sm:$0xff] }
 0x225   : > { %1911 = vmatmul.f32.gmra.mxu3 %v448_v59  ;;  %v642_v58 = vld [vmem:[#allocation5 + $0x408] sm:$0xff] }
 0x226   : > { %1572 = vmatmul.f32.gmra.mxu0 %v445_v9  ;;  %v1639_v54 = vadd.f32 %v1638_v57, %v1526_v47  ;;  %v472_v57 = vld [vmem:[%s6104_s28 + $0x6b8] sm:$0xff]  ;;  %2180 = vmatpush.msra.mxu2 %v642_v58 }
 0x228   : > { %v1752_v0 = vadd.f32 %v1751_v62, %v1639_v54  ;;  %v1864_v6 = vpop.f32.mrf.mxu3  ;;  %v514_v62 = vld [vmem:[#allocation5 + $0x8] sm:$0xff] }
 0x229   : > { %v1641_v12 = vpop.f32.mrf.mxu1  ;;  %1801 = vmatmul.f32.gmra.mxu2 %v455_v33  ;;  %1954 = vmatpush.msra.mxu0 %v514_v62  ;;  %v477_v33 = vld [vmem:[%s6104_s28 + $0x6e0] sm:$0xff] }
 0x22a   : > { %v1865_v10 = vadd.f32 %v1864_v6, %v1752_v0  ;;  %v706_v0 = vld [vmem:[#allocation5 + $0x608] sm:$0xff]  ;;  %v501_v62 = vld [vmem:[%s6104_s28 + $0x7a0] sm:$0xff] }
 0x22b   : > { %v1528_v2 = vpop.f32.mrf.mxu0  ;;  %2293 = vmatpush.msra.mxu3 %v706_v0 }
 0x22c   : > { %v1529_v41 = vadd.f32 %v1528_v2, %v6244_v51  ;;  %4679 = vst [vmem:[%s6415_s20 + $0xe0] sm:$0xff] %v1865_v10  ;;  %1688 = vmatmul.f32.gmra.mxu1 %v454_v25  ;;  %v1754_v18 = vpop.f32.mrf.mxu2  ;;  %v578_v2 = vld [vmem:[#allocation5 + $0x208] sm:$0xff] }
 0x22d   : > { %1914 = vmatmul.f32.gmra.mxu3 %v456_v14  ;;  %2067 = vmatpush.msra.mxu1 %v578_v2  ;;  %v478_v14 = vld [vmem:[%s6104_s28 + $0x6e8] sm:$0xff] }
 0x22e   : > { %1575 = vmatmul.f32.gmra.mxu0 %v453_v4  ;;  %v1642_v17 = vadd.f32 %v1641_v12, %v1529_v41  ;;  %v479_v41 = vld [vmem:[%s6104_s28 + $0x6f0] sm:$0xff] }
 0x230   : > { %v1755_v51 = vadd.f32 %v1754_v18, %v1642_v17  ;;  %v1867_v30 = vpop.f32.mrf.mxu3 }
 0x231   : > { %v1644_v38 = vpop.f32.mrf.mxu1  ;;  %1804 = vmatmul.f32.gmra.mxu2 %v463_v27 }
 0x232   : > { %v1868_v32 = vadd.f32 %v1867_v30, %v1755_v51  ;;  %v485_v51 = vld [vmem:[%s6104_s28 + $0x720] sm:$0xff]  ;;  %v488_v30 = vld [vmem:[%s6104_s28 + $0x738] sm:$0xff] }
 0x233   : > { %v1531_v61 = vpop.f32.mrf.mxu0 }
 0x234   : > { %v1532_v29 = vadd.f32 %v1531_v61, %v6251_v1  ;;  %4683 = vst [vmem:[%s6415_s20 + $0x100] sm:$0xff] %v1868_v32  ;;  %1691 = vmatmul.f32.gmra.mxu1 %v462_v39  ;;  %v1757_v43 = vpop.f32.mrf.mxu2  ;;  %v471_v1 = vld [vmem:[%s6104_s28 + $0x6b0] sm:$0xff]  ;;  %v958_v32 = vld [vmem:[#allocation5 + $0xde8] sm:$0xff] }
 0x235   : > { %1917 = vmatmul.f32.gmra.mxu3 %v464_v42  ;;  %2617 = vmatpush.msrb.mxu2 %v958_v32  ;;  %v830_v42 = vld [vmem:[#allocation5 + $0x9e8] sm:$0xff] }
 0x236   : > { %1578 = vmatmul.f32.gmra.mxu0 %v461_v26  ;;  %v1645_v37 = vadd.f32 %v1644_v38, %v1532_v29  ;;  %v486_v29 = vld [vmem:[%s6104_s28 + $0x728] sm:$0xff] }
 0x237   : > { %2391 = vmatpush.msrb.mxu0 %v830_v42 }
 0x238   : > { %v1758_v20 = vadd.f32 %v1757_v43, %v1645_v37  ;;  %v1870_v46 = vpop.f32.mrf.mxu3  ;;  %v1022_v37 = vld [vmem:[#allocation5 + $0xfe8] sm:$0xff] }
 0x239   : > { %v1647_v55 = vpop.f32.mrf.mxu1  ;;  %1807 = vmatmul.f32.gmra.mxu2 %v471_v1  ;;  %2730 = vmatpush.msrb.mxu3 %v1022_v37  ;;  %v894_v43 = vld [vmem:[#allocation5 + $0xbe8] sm:$0xff]  ;;  %v5019_v37 = vld [vmem:[%s6104_s28] sm:$0xff] }
 0x23a   : > { %v1871_v47 = vadd.f32 %v1870_v46, %v1758_v20  ;;  %2504 = vmatpush.msrb.mxu1 %v894_v43  ;;  %v950_v43 = vld [vmem:[#allocation5 + $0xda8] sm:$0xff] }
 0x23b   : > { %v1534_v44 = vpop.f32.mrf.mxu0 }
 0x23c   : > { %v1535_v9 = vadd.f32 %v1534_v44, %v6258_v19  ;;  %4687 = vst [vmem:[%s6415_s20 + $0x120] sm:$0xff] %v1871_v47  ;;  %1694 = vmatmul.f32.gmra.mxu1 %v470_v56  ;;  %v1760_v54 = vpop.f32.mrf.mxu2  ;;  %v493_v44 = vld [vmem:[%s6104_s28 + $0x760] sm:$0xff]  ;;  %v496_v56 = vld [vmem:[%s6104_s28 + $0x778] sm:$0xff] }
 0x23d   : > { %1920 = vmatmul.f32.gmra.mxu3 %v472_v57 }
 0x23e   : > { %1581 = vmatmul.f32.gmra.mxu0 %v469_v45  ;;  %v1648_v59 = vadd.f32 %v1647_v55, %v1535_v9  ;;  %v495_v45 = vld [vmem:[%s6104_s28 + $0x770] sm:$0xff]  ;;  %v494_v55 = vld [vmem:[%s6104_s28 + $0x768] sm:$0xff] }
 0x240   : > { %v1761_v19 = vadd.f32 %v1760_v54, %v1648_v59  ;;  %v1873_v10 = vpop.f32.mrf.mxu3 }
 0x241   : > { %v1650_v25 = vpop.f32.mrf.mxu1  ;;  %1810 = vmatmul.f32.gmra.mxu2 %v479_v41  ;;  %v504_v41 = vld [vmem:[%s6104_s28 + $0x7b8] sm:$0xff] }
 0x242   : > { %v1874_v12 = vadd.f32 %v1873_v10, %v1761_v19 }
 0x243   : > { %v1537_v4 = vpop.f32.mrf.mxu0 }
 0x244   : > { %v1538_v6 = vadd.f32 %v1537_v4, %v6265_v34  ;;  %4691 = vst [vmem:[%s6415_s20 + $0x140] sm:$0xff] %v1874_v12  ;;  %1697 = vmatmul.f32.gmra.mxu1 %v478_v14  ;;  %v1763_v18 = vpop.f32.mrf.mxu2  ;;  %v487_v34 = vld [vmem:[%s6104_s28 + $0x730] sm:$0xff]  ;;  %v1018_v14 = vld [vmem:[#allocation5 + $0xfc8] sm:$0xff] }
 0x245   : > { %1923 = vmatmul.f32.gmra.mxu3 %v480_v16  ;;  %v890_v16 = vld [vmem:[#allocation5 + $0xbc8] sm:$0xff] }
 0x246   : > { %1584 = vmatmul.f32.gmra.mxu0 %v477_v33  ;;  %v1651_v17 = vadd.f32 %v1650_v25, %v1538_v6  ;;  %v502_v33 = vld [vmem:[%s6104_s28 + $0x7a8] sm:$0xff]  ;;  %2731 = vmatpush.msrb.mxu3 %v1018_v14 }
 0x247   : > { %v954_v6 = vld [vmem:[#allocation5 + $0xdc8] sm:$0xff]  ;;  %2505 = vmatpush.msrb.mxu1 %v890_v16 }
 0x248   : > { %v1764_v22 = vadd.f32 %v1763_v18, %v1651_v17  ;;  %v1876_v61 = vpop.f32.mrf.mxu3  ;;  %2618 = vmatpush.msrb.mxu2 %v954_v6  ;;  %v826_v25 = vld [vmem:[#allocation5 + $0x9c8] sm:$0xff]  ;;  %v509_v18 = vld [vmem:[%s6104_s28 + $0x7e0] sm:$0xff] }
 0x249   : > { %v1653_v27 = vpop.f32.mrf.mxu1  ;;  %1813 = vmatmul.f32.gmra.mxu2 %v487_v34  ;;  %2392 = vmatpush.msrb.mxu0 %v826_v25  ;;  %v5028_v25 = vld [vmem:[%s6104_s28 + $0x90] sm:$0xff]  ;;  %v946_v14 = vld [vmem:[#allocation5 + $0xd88] sm:$0xff] }
 0x24a   : > { %v1877_v26 = vadd.f32 %v1876_v61, %v1764_v22  ;;  %v511_v22 = vld [vmem:[%s6104_s28 + $0x7f0] sm:$0xff]  ;;  %v510_v61 = vld [vmem:[%s6104_s28 + $0x7e8] sm:$0xff]  ;;  %2619 = vmatpush.msrb.mxu2 %v950_v43 }
 0x24b   : > { %v1540_v23 = vpop.f32.mrf.mxu0  ;;  %v5029_v16 = vld [vmem:[%s6104_s28 + $0x88] sm:$0xff] }
 0x24c   : > { %v1541_v3 = vadd.f32 %v1540_v23, %v6272_v53  ;;  %4695 = vst [vmem:[%s6415_s20 + $0x160] sm:$0xff] %v1877_v26  ;;  %1700 = vmatmul.f32.gmra.mxu1 %v486_v29  ;;  %v1766_v39 = vpop.f32.mrf.mxu2  ;;  %v512_v26 = vld [vmem:[%s6104_s28 + $0x7f8] sm:$0xff]  ;;  %2620 = vmatpush.msrb.mxu2 %v946_v14  ;;  %v5043_v14 = vld [vmem:[%s6104_s28 + $0x180] sm:$0xff] }
 0x24d   : > { %1926 = vmatmul.f32.gmra.mxu3 %v488_v30 }
 0x24e   : > { %1587 = vmatmul.f32.gmra.mxu0 %v485_v51  ;;  %v1654_v38 = vadd.f32 %v1653_v27, %v1541_v3 }
 0x250   : > { %v1767_v53 = vadd.f32 %v1766_v39, %v1654_v38  ;;  %v1879_v9 = vpop.f32.mrf.mxu3 }
 0x251   : > { %v1656_v47 = vpop.f32.mrf.mxu1  ;;  %1816 = vmatmul.f32.gmra.mxu2 %v495_v45  ;;  %v5022_v45 = vld [vmem:[%s6104_s28 + $0x18] sm:$0xff] }
 0x252   : > { %v1880_v46 = vadd.f32 %v1879_v9, %v1767_v53  ;;  %v5020_v53 = vld [vmem:[%s6104_s28 + $0x10] sm:$0xff]  ;;  %v822_v9 = vld [vmem:[#allocation5 + $0x9a8] sm:$0xff] }
 0x253   : > { %v1543_v20 = vpop.f32.mrf.mxu0  ;;  %2393 = vmatpush.msrb.mxu0 %v822_v9 }
 0x254   : > { %v1544_v1 = vadd.f32 %v1543_v20, %v6279_v5  ;;  %4699 = vst [vmem:[%s6415_s20 + $0x180] sm:$0xff] %v1880_v46  ;;  %1703 = vmatmul.f32.gmra.mxu1 %v494_v55  ;;  %v1769_v58 = vpop.f32.mrf.mxu2  ;;  %v503_v5 = vld [vmem:[%s6104_s28 + $0x7b0] sm:$0xff] }
 0x255   : > { %1929 = vmatmul.f32.gmra.mxu3 %v496_v56 }
 0x256   : > { %1590 = vmatmul.f32.gmra.mxu0 %v493_v44  ;;  %v1657_v57 = vadd.f32 %v1656_v47, %v1544_v1  ;;  %v5021_v44 = vld [vmem:[%s6104_s28 + $0x8] sm:$0xff] }
 0x257   : > { %v886_v47 = vld [vmem:[#allocation5 + $0xba8] sm:$0xff] }
 0x258   : > { %v1770_v59 = vadd.f32 %v1769_v58, %v1657_v57  ;;  %v1882_v19 = vpop.f32.mrf.mxu3  ;;  %2506 = vmatpush.msrb.mxu1 %v886_v47 }
 0x259   : > { %v1659_v4 = vpop.f32.mrf.mxu1  ;;  %1819 = vmatmul.f32.gmra.mxu2 %v503_v5 }
 0x25a   : > { %v1883_v2 = vadd.f32 %v1882_v19, %v1770_v59  ;;  %v5026_v19 = vld [vmem:[%s6104_s28 + $0x58] sm:$0xff] }
 0x25b   : > { %v1546_v54 = vpop.f32.mrf.mxu0 }
 0x25c   : > { %v1547_v0 = vadd.f32 %v1546_v54, %v6286_v24  ;;  %4703 = vst [vmem:[%s6415_s20 + $0x1a0] sm:$0xff] %v1883_v2  ;;  %1706 = vmatmul.f32.gmra.mxu1 %v502_v33  ;;  %v1772_v12 = vpop.f32.mrf.mxu2  ;;  %v5023_v54 = vld [vmem:[%s6104_s28 + $0x40] sm:$0xff] }
 0x25d   : > { %1932 = vmatmul.f32.gmra.mxu3 %v504_v41 }
 0x25e   : > { %1593 = vmatmul.f32.gmra.mxu0 %v501_v62  ;;  %v1660_v10 = vadd.f32 %v1659_v4, %v1547_v0  ;;  %v5024_v62 = vld [vmem:[%s6104_s28 + $0x50] sm:$0xff]  ;;  %v5025_v0 = vld [vmem:[%s6104_s28 + $0x48] sm:$0xff] }
 0x260   : > { %v1773_v24 = vadd.f32 %v1772_v12, %v1660_v10  ;;  %v1885_v51 = vpop.f32.mrf.mxu3  ;;  %v5027_v12 = vld [vmem:[%s6104_s28 + $0x80] sm:$0xff] }
 0x261   : > { %v1662_v3 = vpop.f32.mrf.mxu1  ;;  %1822 = vmatmul.f32.gmra.mxu2 %v511_v22  ;;  %v818_v22 = vld [vmem:[#allocation5 + $0x988] sm:$0xff] }
 0x262   : > { %v1886_v34 = vadd.f32 %v1885_v51, %v1773_v24  ;;  %2394 = vmatpush.msrb.mxu0 %v818_v22  ;;  %v882_v51 = vld [vmem:[#allocation5 + $0xb88] sm:$0xff]  ;;  %v5046_v22 = vld [vmem:[%s6104_s28 + $0x198] sm:$0xff] }
 0x263   : > { %v1549_v17 = vpop.f32.mrf.mxu0  ;;  %2507 = vmatpush.msrb.mxu1 %v882_v51 }
 0x264   : > { %v1550_v23 = vadd.f32 %v1549_v17, %v6293_v40  ;;  %4707 = vst [vmem:[%s6415_s20 + $0x1c0] sm:$0xff] %v1886_v34  ;;  %1709 = vmatmul.f32.gmra.mxu1 %v510_v61  ;;  %v1775_v29 = vpop.f32.mrf.mxu2  ;;  %v5030_v17 = vld [vmem:[%s6104_s28 + $0x98] sm:$0xff] }
 0x265   : > { %1935 = vmatmul.f32.gmra.mxu3 %v512_v26 }
 0x266   : > { %1596 = vmatmul.f32.gmra.mxu0 %v509_v18  ;;  %v1663_v27 = vadd.f32 %v1662_v3, %v1550_v23 }
 0x268   : > { %v1776_v30 = vadd.f32 %v1775_v29, %v1663_v27  ;;  %v1888_v38 = vpop.f32.mrf.mxu3  ;;  %v5031_v29 = vld [vmem:[%s6104_s28 + $0xc0] sm:$0xff] }
 0x269   : > { %v1665_v42 = vpop.f32.mrf.mxu1  ;;  %2181 = vmatmul.f32.vlgmr.msra.gmra.mxu2 %v5020_v53 }
 0x26a   : > { %v1889_v39 = vadd.f32 %v1888_v38, %v1776_v30  ;;  %v5032_v30 = vld [vmem:[%s6104_s28 + $0xd0] sm:$0xff]  ;;  %v5034_v38 = vld [vmem:[%s6104_s28 + $0xd8] sm:$0xff] }
 0x26b   : > { %v1552_v32 = vpop.f32.mrf.mxu0 }
 0x26c   : > { %v1553_v40 = vadd.f32 %v1552_v32, %v6300_v60  ;;  %4711 = vst [vmem:[%s6415_s20 + $0x1e0] sm:$0xff] %v1889_v39  ;;  %2068 = vmatmul.f32.vlgmr.msra.gmra.mxu1 %v5021_v44  ;;  %v1778_v1 = vpop.f32.mrf.mxu2  ;;  %v1014_v60 = vld [vmem:[#allocation5 + $0xfa8] sm:$0xff]  ;;  %v5035_v44 = vld [vmem:[%s6104_s28 + $0x100] sm:$0xff] }
 0x26d   : > { %2294 = vmatmul.f32.vlgmr.msra.gmra.mxu3 %v5022_v45  ;;  %v5036_v45 = vld [vmem:[%s6104_s28 + $0x110] sm:$0xff] }
 0x26e   : > { %1955 = vmatmul.f32.vlgmr.msra.gmra.mxu0 %v5019_v37  ;;  %v1666_v20 = vadd.f32 %v1665_v42, %v1553_v40  ;;  %2732 = vmatpush.msrb.mxu3 %v1014_v60  ;;  %v5033_v40 = vld [vmem:[%s6104_s28 + $0xc8] sm:$0xff] }
 0x26f   : > { %v5037_v60 = vld [vmem:[%s6104_s28 + $0x108] sm:$0xff] }
 0x270   : > { %v1779_v46 = vadd.f32 %v1778_v1, %v1666_v20  ;;  %v1891_v57 = vpop.f32.mrf.mxu3  ;;  %v942_v1 = vld [vmem:[#allocation5 + $0xd68] sm:$0xff] }
 0x271   : > { %v1668_v59 = vpop.f32.mrf.mxu1  ;;  %2184 = vmatmul.f32.gmra.mxu2 %v5024_v62 }
 0x272   : > { %v1892_v58 = vadd.f32 %v1891_v57, %v1779_v46  ;;  %2621 = vmatpush.msrb.mxu2 %v942_v1  ;;  %v5038_v46 = vld [vmem:[%s6104_s28 + $0x118] sm:$0xff]  ;;  %v878_v57 = vld [vmem:[#allocation5 + $0xb68] sm:$0xff] }
 0x273   : > { %v1555_v55 = vpop.f32.mrf.mxu0  ;;  %2508 = vmatpush.msrb.mxu1 %v878_v57  ;;  %v934_v1 = vld [vmem:[#allocation5 + $0xd28] sm:$0xff] }
 0x274   : > { %v1556_v56 = vadd.f32 %v1555_v55, %v6307_v13  ;;  %4715 = vst [vmem:[%s6415_s20 + $0x200] sm:$0xff] %v1892_v58  ;;  %2071 = vmatmul.f32.gmra.mxu1 %v5025_v0  ;;  %v1781_v2 = vpop.f32.mrf.mxu2  ;;  %v814_v55 = vld [vmem:[#allocation5 + $0x968] sm:$0xff]  ;;  %v5039_v0 = vld [vmem:[%s6104_s28 + $0x140] sm:$0xff] }
 0x275   : > { %2297 = vmatmul.f32.gmra.mxu3 %v5026_v19  ;;  %2395 = vmatpush.msrb.mxu0 %v814_v55  ;;  %v5040_v19 = vld [vmem:[%s6104_s28 + $0x150] sm:$0xff]  ;;  %v806_v55 = vld [vmem:[#allocation5 + $0x928] sm:$0xff] }
 0x276   : > { %1958 = vmatmul.f32.gmra.mxu0 %v5023_v54  ;;  %v1669_v5 = vadd.f32 %v1668_v59, %v1556_v56 }
 0x278   : > { %v1782_v4 = vadd.f32 %v1781_v2, %v1669_v5  ;;  %v1894_v41 = vpop.f32.mrf.mxu3 }
 0x279   : > { %v1671_v10 = vpop.f32.mrf.mxu1  ;;  %2187 = vmatmul.f32.gmra.mxu2 %v5028_v25 }
 0x27a   : > { %v1895_v6 = vadd.f32 %v1894_v41, %v1782_v4  ;;  %v5041_v4 = vld [vmem:[%s6104_s28 + $0x148] sm:$0xff] }
 0x27b   : > { %v1558_v13 = vpop.f32.mrf.mxu0 }
 0x27c   : > { %v1559_v33 = vadd.f32 %v1558_v13, %v6314_v35  ;;  %4719 = vst [vmem:[%s6415_s20 + $0x220] sm:$0xff] %v1895_v6  ;;  %2074 = vmatmul.f32.gmra.mxu1 %v5029_v16  ;;  %v1784_v18 = vpop.f32.mrf.mxu2  ;;  %v1010_v35 = vld [vmem:[#allocation5 + $0xf88] sm:$0xff]  ;;  %v5042_v13 = vld [vmem:[%s6104_s28 + $0x158] sm:$0xff] }
 0x27d   : > { %2300 = vmatmul.f32.gmra.mxu3 %v5030_v17  ;;  %v938_v16 = vld [vmem:[#allocation5 + $0xd48] sm:$0xff] }
 0x27e   : > { %1961 = vmatmul.f32.gmra.mxu0 %v5027_v12  ;;  %v1672_v24 = vadd.f32 %v1671_v10, %v1559_v33  ;;  %2733 = vmatpush.msrb.mxu3 %v1010_v35 }
 0x27f   : > { %2622 = vmatpush.msrb.mxu2 %v938_v16  ;;  %v5061_v16 = vld [vmem:[%s6104_s28 + $0x288] sm:$0xff] }
 0x280   : > { %v1785_v23 = vadd.f32 %v1784_v18, %v1672_v24  ;;  %v1897_v61 = vpop.f32.mrf.mxu3  ;;  %v5044_v24 = vld [vmem:[%s6104_s28 + $0x190] sm:$0xff]  ;;  %v5045_v18 = vld [vmem:[%s6104_s28 + $0x188] sm:$0xff] }
 0x281   : > { %v1674_v27 = vpop.f32.mrf.mxu1  ;;  %2190 = vmatmul.f32.gmra.mxu2 %v5032_v30  ;;  %v5047_v30 = vld [vmem:[%s6104_s28 + $0x1c0] sm:$0xff] }
 0x282   : > { %v1898_v26 = vadd.f32 %v1897_v61, %v1785_v23  ;;  %v810_v23 = vld [vmem:[#allocation5 + $0x948] sm:$0xff]  ;;  %2623 = vmatpush.msrb.mxu2 %v934_v1 }
 0x283   : > { %v1561_v34 = vpop.f32.mrf.mxu0  ;;  %2396 = vmatpush.msrb.mxu0 %v810_v23  ;;  %v866_v23 = vld [vmem:[#allocation5 + $0xb08] sm:$0xff] }
 0x284   : > { %v1562_v3 = vadd.f32 %v1561_v34, %v6321_v50  ;;  %4723 = vst [vmem:[%s6415_s20 + $0x240] sm:$0xff] %v1898_v26  ;;  %2077 = vmatmul.f32.gmra.mxu1 %v5033_v40  ;;  %v1787_v39 = vpop.f32.mrf.mxu2  ;;  %v874_v34 = vld [vmem:[#allocation5 + $0xb48] sm:$0xff] }
 0x285   : > { %2303 = vmatmul.f32.gmra.mxu3 %v5034_v38  ;;  %2509 = vmatpush.msrb.mxu1 %v874_v34  ;;  %v5049_v38 = vld [vmem:[%s6104_s28 + $0x1c8] sm:$0xff] }
 0x286   : > { %1964 = vmatmul.f32.gmra.mxu0 %v5031_v29  ;;  %v1675_v32 = vadd.f32 %v1674_v27, %v1562_v3 }
 0x287   : > { %2397 = vmatpush.msrb.mxu0 %v806_v55 }
 0x288   : > { %v1788_v42 = vadd.f32 %v1787_v39, %v1675_v32  ;;  %v1900_v53 = vpop.f32.mrf.mxu3  ;;  %v5048_v32 = vld [vmem:[%s6104_s28 + $0x1d0] sm:$0xff]  ;;  %v5050_v39 = vld [vmem:[%s6104_s28 + $0x1d8] sm:$0xff] }
 0x289   : > { %v1677_v20 = vpop.f32.mrf.mxu1  ;;  %2193 = vmatmul.f32.gmra.mxu2 %v5036_v45  ;;  %v5052_v45 = vld [vmem:[%s6104_s28 + $0x210] sm:$0xff] }
 0x28a   : > { %v1901_v43 = vadd.f32 %v1900_v53, %v1788_v42 }
 0x28b   : > { %v1564_v50 = vpop.f32.mrf.mxu0 }
 0x28c   : > { %v1565_v37 = vadd.f32 %v1564_v50, %v6328_v11  ;;  %4727 = vst [vmem:[%s6415_s20 + $0x260] sm:$0xff] %v1901_v43  ;;  %2080 = vmatmul.f32.gmra.mxu1 %v5037_v60  ;;  %v1790_v47 = vpop.f32.mrf.mxu2  ;;  %v1006_v11 = vld [vmem:[#allocation5 + $0xf68] sm:$0xff] }
 0x28d   : > { %2306 = vmatmul.f32.gmra.mxu3 %v5038_v46  ;;  %v5053_v60 = vld [vmem:[%s6104_s28 + $0x208] sm:$0xff]  ;;  %v5054_v46 = vld [vmem:[%s6104_s28 + $0x218] sm:$0xff] }
 0x28e   : > { %1967 = vmatmul.f32.gmra.mxu0 %v5035_v44  ;;  %v1678_v9 = vadd.f32 %v1677_v20, %v1565_v37  ;;  %2734 = vmatpush.msrb.mxu3 %v1006_v11  ;;  %v5051_v44 = vld [vmem:[%s6104_s28 + $0x200] sm:$0xff] }
 0x290   : > { %v1791_v56 = vadd.f32 %v1790_v47, %v1678_v9  ;;  %v1903_v54 = vpop.f32.mrf.mxu3 }
 0x291   : > { %v1680_v5 = vpop.f32.mrf.mxu1  ;;  %2196 = vmatmul.f32.gmra.mxu2 %v5040_v19 }
 0x292   : > { %v1904_v62 = vadd.f32 %v1903_v54, %v1791_v56  ;;  %v870_v56 = vld [vmem:[#allocation5 + $0xb28] sm:$0xff] }
 0x293   : > { %v1567_v58 = vpop.f32.mrf.mxu0  ;;  %2510 = vmatpush.msrb.mxu1 %v870_v56 }
 0x294   : > { %v1568_v59 = vadd.f32 %v1567_v58, %v6335_v28  ;;  %4731 = vst [vmem:[%s6415_s20 + $0x280] sm:$0xff] %v1904_v62  ;;  %2083 = vmatmul.f32.gmra.mxu1 %v5041_v4  ;;  %v1793_v33 = vpop.f32.mrf.mxu2  ;;  %v5058_v4 = vld [vmem:[%s6104_s28 + $0x258] sm:$0xff] }
 0x295   : > { %2309 = vmatmul.f32.gmra.mxu3 %v5042_v13  ;;  %2511 = vmatpush.msrb.mxu1 %v866_v23  ;;  %v5080_v23 = vld [vmem:[%s6104_s28 + $0x3d0] sm:$0xff] }
 0x296   : > { %1970 = vmatmul.f32.gmra.mxu0 %v5039_v0  ;;  %v1681_v2 = vadd.f32 %v1680_v5, %v1568_v59  ;;  %v5055_v5 = vld [vmem:[%s6104_s28 + $0x240] sm:$0xff]  ;;  %v5056_v0 = vld [vmem:[%s6104_s28 + $0x250] sm:$0xff] }
 0x298   : > { %v1794_v41 = vadd.f32 %v1793_v33, %v1681_v2  ;;  %v1906_v10 = vpop.f32.mrf.mxu3  ;;  %v5057_v2 = vld [vmem:[%s6104_s28 + $0x248] sm:$0xff] }
 0x299   : > { %v1683_v25 = vpop.f32.mrf.mxu1  ;;  %2199 = vmatmul.f32.gmra.mxu2 %v5044_v24 }
 0x29a   : > { %v1907_v12 = vadd.f32 %v1906_v10, %v1794_v41 }
 0x29b   : > { %v1570_v28 = vpop.f32.mrf.mxu0 }
 0x29c   : > { %v1571_v6 = vadd.f32 %v1570_v28, %v6342_v52  ;;  %4735 = vst [vmem:[%s6415_s20 + $0x2a0] sm:$0xff] %v1907_v12  ;;  %2086 = vmatmul.f32.gmra.mxu1 %v5045_v18  ;;  %v1796_v35 = vpop.f32.mrf.mxu2  ;;  %v1002_v52 = vld [vmem:[#allocation5 + $0xf48] sm:$0xff]  ;;  %v5059_v12 = vld [vmem:[%s6104_s28 + $0x280] sm:$0xff] }
 0x29d   : > { %2312 = vmatmul.f32.gmra.mxu3 %v5046_v22  ;;  %v802_v22 = vld [vmem:[#allocation5 + $0x908] sm:$0xff] }
 0x29e   : > { %1973 = vmatmul.f32.gmra.mxu0 %v5043_v14  ;;  %v1684_v17 = vadd.f32 %v1683_v25, %v1571_v6  ;;  %2735 = vmatpush.msrb.mxu3 %v1002_v52  ;;  %v5060_v25 = vld [vmem:[%s6104_s28 + $0x290] sm:$0xff]  ;;  %v930_v14 = vld [vmem:[#allocation5 + $0xd08] sm:$0xff] }
 0x29f   : > { %2624 = vmatpush.msrb.mxu2 %v930_v14  ;;  %2398 = vmatpush.msrb.mxu0 %v802_v22 }
 0x2a0   : > { %v1797_v51 = vadd.f32 %v1796_v35, %v1684_v17  ;;  %v1909_v26 = vpop.f32.mrf.mxu3  ;;  %v5062_v17 = vld [vmem:[%s6104_s28 + $0x298] sm:$0xff] }
 0x2a1   : > { %v1686_v29 = vpop.f32.mrf.mxu1  ;;  %2202 = vmatmul.f32.gmra.mxu2 %v5048_v32  ;;  %v5066_v32 = vld [vmem:[%s6104_s28 + $0x2d8] sm:$0xff] }
 0x2a2   : > { %v1910_v27 = vadd.f32 %v1909_v26, %v1797_v51  ;;  %v5063_v26 = vld [vmem:[%s6104_s28 + $0x2c0] sm:$0xff] }
 0x2a3   : > { %v1573_v3 = vpop.f32.mrf.mxu0 }
 0x2a4   : > { %v1574_v61 = vadd.f32 %v1573_v3, %v6349_v7  ;;  %4739 = vst [vmem:[%s6415_s20 + $0x2c0] sm:$0xff] %v1910_v27  ;;  %2089 = vmatmul.f32.gmra.mxu1 %v5049_v38  ;;  %v1799_v42 = vpop.f32.mrf.mxu2  ;;  %v5064_v27 = vld [vmem:[%s6104_s28 + $0x2d0] sm:$0xff] }
 0x2a5   : > { %2315 = vmatmul.f32.gmra.mxu3 %v5050_v39 }
 0x2a6   : > { %1976 = vmatmul.f32.gmra.mxu0 %v5047_v30  ;;  %v1687_v40 = vadd.f32 %v1686_v29, %v1574_v61  ;;  %v5065_v30 = vld [vmem:[%s6104_s28 + $0x2c8] sm:$0xff] }
 0x2a8   : > { %v1800_v50 = vadd.f32 %v1799_v42, %v1687_v40  ;;  %v1912_v53 = vpop.f32.mrf.mxu3 }
 0x2a9   : > { %v1689_v20 = vpop.f32.mrf.mxu1  ;;  %2205 = vmatmul.f32.gmra.mxu2 %v5052_v45  ;;  %v5070_v45 = vld [vmem:[%s6104_s28 + $0x318] sm:$0xff] }
 0x2aa   : > { %v1913_v43 = vadd.f32 %v1912_v53, %v1800_v50  ;;  %v5068_v53 = vld [vmem:[%s6104_s28 + $0x310] sm:$0xff] }
 0x2ab   : > { %v1576_v7 = vpop.f32.mrf.mxu0 }
 0x2ac   : > { %v1577_v37 = vadd.f32 %v1576_v7, %v6356_v31  ;;  %4743 = vst [vmem:[%s6415_s20 + $0x2e0] sm:$0xff] %v1913_v43  ;;  %2092 = vmatmul.f32.gmra.mxu1 %v5053_v60  ;;  %v1802_v47 = vpop.f32.mrf.mxu2  ;;  %v998_v31 = vld [vmem:[#allocation5 + $0xf28] sm:$0xff] }
 0x2ad   : > { %2318 = vmatmul.f32.gmra.mxu3 %v5054_v46  ;;  %v926_v43 = vld [vmem:[#allocation5 + $0xce8] sm:$0xff] }
 0x2ae   : > { %1979 = vmatmul.f32.gmra.mxu0 %v5051_v44  ;;  %v1690_v9 = vadd.f32 %v1689_v20, %v1577_v37  ;;  %2736 = vmatpush.msrb.mxu3 %v998_v31  ;;  %v5067_v37 = vld [vmem:[%s6104_s28 + $0x300] sm:$0xff]  ;;  %v5069_v44 = vld [vmem:[%s6104_s28 + $0x308] sm:$0xff] }
 0x2af   : > { %2625 = vmatpush.msrb.mxu2 %v926_v43  ;;  %v862_v46 = vld [vmem:[#allocation5 + $0xae8] sm:$0xff] }
 0x2b0   : > { %v1803_v11 = vadd.f32 %v1802_v47, %v1690_v9  ;;  %v1915_v59 = vpop.f32.mrf.mxu3  ;;  %v798_v9 = vld [vmem:[#allocation5 + $0x8e8] sm:$0xff]  ;;  %2512 = vmatpush.msrb.mxu1 %v862_v46 }
 0x2b1   : > { %v1692_v62 = vpop.f32.mrf.mxu1  ;;  %2208 = vmatmul.f32.gmra.mxu2 %v5056_v0  ;;  %2399 = vmatpush.msrb.mxu0 %v798_v9  ;;  %v982_v43 = vld [vmem:[#allocation5 + $0xea8] sm:$0xff] }
 0x2b2   : > { %v1916_v54 = vadd.f32 %v1915_v59, %v1803_v11 }
 0x2b3   : > { %v1579_v57 = vpop.f32.mrf.mxu0 }
 0x2b4   : > { %v1580_v58 = vadd.f32 %v1579_v57, %v6363_v49  ;;  %4747 = vst [vmem:[%s6415_s20 + $0x300] sm:$0xff] %v1916_v54  ;;  %2095 = vmatmul.f32.gmra.mxu1 %v5057_v2  ;;  %v1805_v13 = vpop.f32.mrf.mxu2  ;;  %v5071_v57 = vld [vmem:[%s6104_s28 + $0x340] sm:$0xff]  ;;  %v5073_v54 = vld [vmem:[%s6104_s28 + $0x348] sm:$0xff] }
 0x2b5   : > { %2321 = vmatmul.f32.gmra.mxu3 %v5058_v4 }
 0x2b6   : > { %1982 = vmatmul.f32.gmra.mxu0 %v5055_v5  ;;  %v1693_v19 = vadd.f32 %v1692_v62, %v1580_v58  ;;  %v5072_v58 = vld [vmem:[%s6104_s28 + $0x350] sm:$0xff]  ;;  %v5074_v62 = vld [vmem:[%s6104_s28 + $0x358] sm:$0xff] }
 0x2b8   : > { %v1806_v33 = vadd.f32 %v1805_v13, %v1693_v19  ;;  %v1918_v28 = vpop.f32.mrf.mxu3 }
 0x2b9   : > { %v1695_v10 = vpop.f32.mrf.mxu1  ;;  %2211 = vmatmul.f32.gmra.mxu2 %v5060_v25  ;;  %v794_v25 = vld [vmem:[#allocation5 + $0x8c8] sm:$0xff] }
 0x2ba   : > { %v1919_v6 = vadd.f32 %v1918_v28, %v1806_v33  ;;  %v5075_v33 = vld [vmem:[%s6104_s28 + $0x380] sm:$0xff]  ;;  %2400 = vmatpush.msrb.mxu0 %v794_v25 }
 0x2bb   : > { %v1582_v49 = vpop.f32.mrf.mxu0 }
 0x2bc   : > { %v1583_v41 = vadd.f32 %v1582_v49, %v6370_v15  ;;  %4751 = vst [vmem:[%s6415_s20 + $0x320] sm:$0xff] %v1919_v6  ;;  %2098 = vmatmul.f32.gmra.mxu1 %v5061_v16  ;;  %v1808_v18 = vpop.f32.mrf.mxu2  ;;  %v994_v15 = vld [vmem:[#allocation5 + $0xf08] sm:$0xff]  ;;  %v5076_v49 = vld [vmem:[%s6104_s28 + $0x390] sm:$0xff] }
 0x2bd   : > { %2324 = vmatmul.f32.gmra.mxu3 %v5062_v17  ;;  %v5077_v6 = vld [vmem:[%s6104_s28 + $0x388] sm:$0xff] }
 0x2be   : > { %1985 = vmatmul.f32.gmra.mxu0 %v5059_v12  ;;  %v1696_v24 = vadd.f32 %v1695_v10, %v1583_v41  ;;  %2737 = vmatpush.msrb.mxu3 %v994_v15  ;;  %v922_v41 = vld [vmem:[#allocation5 + $0xcc8] sm:$0xff]  ;;  %v5078_v10 = vld [vmem:[%s6104_s28 + $0x398] sm:$0xff] }
 0x2bf   : > { %2626 = vmatpush.msrb.mxu2 %v922_v41  ;;  %v978_v41 = vld [vmem:[#allocation5 + $0xe88] sm:$0xff] }
 0x2c0   : > { %v1809_v35 = vadd.f32 %v1808_v18, %v1696_v24  ;;  %v1921_v34 = vpop.f32.mrf.mxu3  ;;  %v858_v24 = vld [vmem:[#allocation5 + $0xac8] sm:$0xff] }
 0x2c1   : > { %v1698_v61 = vpop.f32.mrf.mxu1  ;;  %2214 = vmatmul.f32.gmra.mxu2 %v5064_v27  ;;  %2513 = vmatpush.msrb.mxu1 %v858_v24 }
 0x2c2   : > { %v1922_v3 = vadd.f32 %v1921_v34, %v1809_v35  ;;  %v5079_v35 = vld [vmem:[%s6104_s28 + $0x3c0] sm:$0xff] }
 0x2c3   : > { %v1585_v52 = vpop.f32.mrf.mxu0  ;;  %v5082_v34 = vld [vmem:[#allocation7] sm:$0xf] }
 0x2c4   : > { %v1586_v51 = vadd.f32 %v1585_v52, %v6377_v36  ;;  %4755 = vst [vmem:[%s6415_s20 + $0x340] sm:$0xff] %v1922_v3  ;;  %2101 = vmatmul.f32.gmra.mxu1 %v5065_v30  ;;  %v1811_v40 = vpop.f32.mrf.mxu2  ;;  %v6597_v3 = vperm.slane %v5082_v34, 1 }
 0x2c5   : > { %2327 = vmatmul.f32.gmra.mxu3 %v5066_v32 }
 0x2c6   : > { %1988 = vmatmul.f32.gmra.mxu0 %v5063_v26  ;;  %v1699_v29 = vadd.f32 %v1698_v61, %v1586_v51  ;;  %v5081_v51 = vld [vmem:[%s6104_s28 + $0x3c8] sm:$0xff]  ;;  %v5083_v61 = vld [vmem:[%s6104_s28 + $0x3d8] sm:$0xff] }
 0x2c8   : > { %v1812_v38 = vadd.f32 %v1811_v40, %v1699_v29  ;;  %v1924_v42 = vpop.f32.mrf.mxu3 }
 0x2c9   : > { %v1701_v7 = vpop.f32.mrf.mxu1  ;;  %2217 = vmatmul.f32.gmra.mxu2 %v5068_v53  ;;  %v790_v53 = vld [vmem:[#allocation5 + $0x8a8] sm:$0xff] }
 0x2ca   : > { %v1925_v50 = vadd.f32 %v1924_v42, %v1812_v38  ;;  %v918_v42 = vld [vmem:[#allocation5 + $0xca8] sm:$0xff]  ;;  %2401 = vmatpush.msrb.mxu0 %v790_v53 }
 0x2cb   : > { %v1588_v36 = vpop.f32.mrf.mxu0  ;;  %2627 = vmatpush.msrb.mxu2 %v918_v42  ;;  %v846_v42 = vld [vmem:[#allocation5 + $0xa68] sm:$0xff] }
 0x2cc   : > { %v1589_v39 = vadd.f32 %v1588_v36, %v6384_v63  ;;  %4759 = vst [vmem:[%s6415_s20 + $0x360] sm:$0xff] %v1925_v50  ;;  %2104 = vmatmul.f32.gmra.mxu1 %v5069_v44  ;;  %v1814_v1 = vpop.f32.mrf.mxu2  ;;  %v990_v63 = vld [vmem:[#allocation5 + $0xee8] sm:$0xff]  ;;  %v5084_v36 = vld [vmem:[%s6104_s28 + $0x400] sm:$0xff] }
 0x2cd   : > { %2330 = vmatmul.f32.gmra.mxu3 %v5070_v45  ;;  %v5086_v50 = vld [vmem:[%s6104_s28 + $0x408] sm:$0xff] }
 0x2ce   : > { %1991 = vmatmul.f32.gmra.mxu0 %v5067_v37  ;;  %v1702_v20 = vadd.f32 %v1701_v7, %v1589_v39  ;;  %2738 = vmatpush.msrb.mxu3 %v990_v63  ;;  %v5085_v39 = vld [vmem:[%s6104_s28 + $0x410] sm:$0xff]  ;;  %v5087_v7 = vld [vmem:[%s6104_s28 + $0x418] sm:$0xff]  ;;  %v854_v44 = vld [vmem:[#allocation5 + $0xaa8] sm:$0xff] }
 0x2cf   : > { %2514 = vmatpush.msrb.mxu1 %v854_v44  ;;  %v5104_v44 = vld [vmem:[%s6104_s28 + $0x540] sm:$0xff] }
 0x2d0   : > { %v1815_v60 = vadd.f32 %v1814_v1, %v1702_v20  ;;  %v1927_v31 = vpop.f32.mrf.mxu3 }
 0x2d1   : > { %v1704_v56 = vpop.f32.mrf.mxu1  ;;  %2220 = vmatmul.f32.gmra.mxu2 %v5072_v58 }
 0x2d2   : > { %v1928_v11 = vadd.f32 %v1927_v31, %v1815_v60  ;;  %v5090_v31 = vld [vmem:[%s6104_s28 + $0x448] sm:$0xff] }
 0x2d3   : > { %v1591_v47 = vpop.f32.mrf.mxu0 }
 0x2d4   : > { %v1592_v55 = vadd.f32 %v1591_v47, %v6391_v21  ;;  %4763 = vst [vmem:[%s6415_s20 + $0x380] sm:$0xff] %v1928_v11  ;;  %2107 = vmatmul.f32.gmra.mxu1 %v5073_v54  ;;  %v1817_v5 = vpop.f32.mrf.mxu2  ;;  %v5088_v47 = vld [vmem:[%s6104_s28 + $0x440] sm:$0xff]  ;;  %v5091_v11 = vld [vmem:[%s6104_s28 + $0x458] sm:$0xff] }
 0x2d5   : > { %2333 = vmatmul.f32.gmra.mxu3 %v5074_v62 }
 0x2d6   : > { %1994 = vmatmul.f32.gmra.mxu0 %v5071_v57  ;;  %v1705_v59 = vadd.f32 %v1704_v56, %v1592_v55  ;;  %v5089_v55 = vld [vmem:[%s6104_s28 + $0x450] sm:$0xff] }
 0x2d8   : > { %v1818_v0 = vadd.f32 %v1817_v5, %v1705_v59  ;;  %v1930_v2 = vpop.f32.mrf.mxu3 }
 0x2d9   : > { %v1707_v13 = vpop.f32.mrf.mxu1  ;;  %2223 = vmatmul.f32.gmra.mxu2 %v5076_v49  ;;  %v786_v49 = vld [vmem:[#allocation5 + $0x888] sm:$0xff] }
 0x2da   : > { %v1931_v4 = vadd.f32 %v1930_v2, %v1818_v0  ;;  %v914_v2 = vld [vmem:[#allocation5 + $0xc88] sm:$0xff]  ;;  %2402 = vmatpush.msrb.mxu0 %v786_v49 }
 0x2db   : > { %v1594_v21 = vpop.f32.mrf.mxu0  ;;  %2628 = vmatpush.msrb.mxu2 %v914_v2  ;;  %v970_v2 = vld [vmem:[#allocation5 + $0xe48] sm:$0xff] }
 0x2dc   : > { %v1595_v19 = vadd.f32 %v1594_v21, %v6398_v48  ;;  %4767 = vst [vmem:[%s6415_s20 + $0x3a0] sm:$0xff] %v1931_v4  ;;  %2110 = vmatmul.f32.gmra.mxu1 %v5077_v6  ;;  %v1820_v12 = vpop.f32.mrf.mxu2  ;;  %v986_v48 = vld [vmem:[#allocation5 + $0xec8] sm:$0xff]  ;;  %v5092_v21 = vld [vmem:[%s6104_s28 + $0x480] sm:$0xff] }
 0x2dd   : > { %2336 = vmatmul.f32.gmra.mxu3 %v5078_v10  ;;  %v5094_v4 = vld [vmem:[%s6104_s28 + $0x488] sm:$0xff] }
 0x2de   : > { %1997 = vmatmul.f32.gmra.mxu0 %v5075_v33  ;;  %v1708_v28 = vadd.f32 %v1707_v13, %v1595_v19  ;;  %2739 = vmatpush.msrb.mxu3 %v986_v48  ;;  %v5093_v19 = vld [vmem:[%s6104_s28 + $0x490] sm:$0xff]  ;;  %v5095_v13 = vld [vmem:[%s6104_s28 + $0x498] sm:$0xff]  ;;  %v850_v6 = vld [vmem:[#allocation5 + $0xa88] sm:$0xff] }
 0x2df   : > { %2515 = vmatpush.msrb.mxu1 %v850_v6 }
 0x2e0   : > { %v1821_v14 = vadd.f32 %v1820_v12, %v1708_v28  ;;  %v1933_v18 = vpop.f32.mrf.mxu3  ;;  %2740 = vmatpush.msrb.mxu3 %v982_v43 }
 0x2e1   : > { %v1710_v15 = vpop.f32.mrf.mxu1  ;;  %2226 = vmatmul.f32.gmra.mxu2 %v5080_v23  ;;  %2516 = vmatpush.msrb.mxu1 %v846_v42 }
 0x2e2   : > { %v1934_v22 = vadd.f32 %v1933_v18, %v1821_v14  ;;  %2741 = vmatpush.msrb.mxu3 %v978_v41  ;;  %v5098_v18 = vld [vmem:[%s6104_s28 + $0x4c8] sm:$0xff] }
 0x2e3   : > { %v1597_v16 = vpop.f32.mrf.mxu0 }
 0x2e4   : > { %v1598_v17 = vadd.f32 %v1597_v16, %v6405_v8  ;;  %4771 = vst [vmem:[%s6415_s20 + $0x3c0] sm:$0xff] %v1934_v22  ;;  %2113 = vmatmul.f32.gmra.mxu1 %v5081_v51  ;;  %v1823_v8 = vpop.f32.mrf.mxu2  ;;  %v5096_v16 = vld [vmem:[%s6104_s28 + $0x4c0] sm:$0xff]  ;;  %v5099_v22 = vld [vmem:[%s6104_s28 + $0x4d8] sm:$0xff] }
 0x2e5   : > { %2339 = vmatmul.f32.gmra.mxu3 %v5083_v61 }
 0x2e6   : > { %2000 = vmatmul.f32.gmra.mxu0 %v5079_v35  ;;  %v1711_v52 = vadd.f32 %v1710_v15, %v1598_v17  ;;  %v5097_v17 = vld [vmem:[%s6104_s28 + $0x4d0] sm:$0xff] }
 0x2e8   : > { %v1824_v26 = vadd.f32 %v1823_v8, %v1711_v52  ;;  %v1936_v29 = vpop.f32.mrf.mxu3 }
 0x2e9   : > { %v2069_v40 = vpop.f32.mrf.mxu1  ;;  %2229 = vmatmul.f32.gmra.mxu2 %v5085_v39 }
 0x2ea   : > { %v1937_v32 = vadd.f32 %v1936_v29, %v1824_v26  ;;  %v5100_v26 = vld [vmem:[%s6104_s28 + $0x500] sm:$0xff]  ;;  %v910_v29 = vld [vmem:[#allocation5 + $0xc68] sm:$0xff] }
 0x2eb   : > { %v1956_v27 = vpop.f32.mrf.mxu0  ;;  %2629 = vmatpush.msrb.mxu2 %v910_v29 }
 0x2ec   : > { %v1957_v30 = vadd.f32 %v1956_v27, %v6597_v3  ;;  %4775 = vst [vmem:[%s6415_s20 + $0x3e0] sm:$0xff] %v1937_v32  ;;  %2116 = vmatmul.f32.gmra.mxu1 %v5086_v50  ;;  %v2182_v37 = vpop.f32.mrf.mxu2  ;;  %v5101_v27 = vld [vmem:[%s6104_s28 + $0x510] sm:$0xff]  ;;  %v5103_v32 = vld [vmem:[%s6104_s28 + $0x518] sm:$0xff] }
 0x2ed   : > { %2342 = vmatmul.f32.gmra.mxu3 %v5087_v7 }
 0x2ee   : > { %v2070_v38 = vadd.f32 %v2069_v40, %v1957_v30  ;;  %2003 = vmatmul.f32.gmra.mxu0 %v5084_v36  ;;  %v5102_v30 = vld [vmem:[%s6104_s28 + $0x508] sm:$0xff] }
 0x2ef   : > { %v974_v36 = vld [vmem:[#allocation5 + $0xe68] sm:$0xff] }
 0x2f0   : > { %v2183_v20 = vadd.f32 %v2182_v37, %v2070_v38  ;;  %v2295_v9 = vpop.f32.mrf.mxu3  ;;  %v782_v38 = vld [vmem:[#allocation5 + $0x868] sm:$0xff]  ;;  %2742 = vmatpush.msrb.mxu3 %v974_v36 }
 0x2f1   : > { %v2072_v60 = vpop.f32.mrf.mxu1  ;;  %2232 = vmatmul.f32.gmra.mxu2 %v5089_v55  ;;  %2403 = vmatpush.msrb.mxu0 %v782_v38  ;;  %v838_v38 = vld [vmem:[#allocation5 + $0xa28] sm:$0xff] }
 0x2f2   : > { %v6607_v63 = vadd.f32 %v2295_v9, %v2183_v20  ;;  %v5107_v9 = vld [vmem:[%s6104_s28 + $0x558] sm:$0xff]  ;;  %2743 = vmatpush.msrb.mxu3 %v970_v2 }
 0x2f3   : > { %v1959_v45 = vpop.f32.mrf.mxu0 }
 0x2f4   : > { %v1960_v1 = vadd.f32 %v1959_v45, %v6597_v3  ;;  %2119 = vmatmul.f32.gmra.mxu1 %v5090_v31  ;;  %v2185_v56 = vpop.f32.mrf.mxu2  ;;  %v5105_v45 = vld [vmem:[%s6104_s28 + $0x550] sm:$0xff] }
 0x2f5   : > { %2345 = vmatmul.f32.gmra.mxu3 %v5091_v11 }
 0x2f6   : > { %v2073_v46 = vadd.f32 %v2072_v60, %v1960_v1  ;;  %2006 = vmatmul.f32.gmra.mxu0 %v5088_v47  ;;  %v5106_v1 = vld [vmem:[%s6104_s28 + $0x548] sm:$0xff] }
 0x2f8   : > { %v2186_v57 = vadd.f32 %v2185_v56, %v2073_v46  ;;  %v2298_v54 = vpop.f32.mrf.mxu3 }
 0x2f9   : > { %v2075_v5 = vpop.f32.mrf.mxu1  ;;  %2235 = vmatmul.f32.gmra.mxu2 %v5093_v19  ;;  %v778_v19 = vld [vmem:[#allocation5 + $0x848] sm:$0xff] }
 0x2fa   : > { %v6614_v62 = vadd.f32 %v2298_v54, %v2186_v57  ;;  %v906_v54 = vld [vmem:[#allocation5 + $0xc48] sm:$0xff]  ;;  %2404 = vmatpush.msrb.mxu0 %v778_v19 }
 0x2fb   : > { %v1962_v58 = vpop.f32.mrf.mxu0  ;;  %2630 = vmatpush.msrb.mxu2 %v906_v54  ;;  %v5126_v54 = vld [vmem:[%s6104_s28 + $0x688] sm:$0xff] }
 0x2fc   : > { %v1963_v59 = vadd.f32 %v1962_v58, %v6597_v3  ;;  %2122 = vmatmul.f32.gmra.mxu1 %v5094_v4  ;;  %v2188_v33 = vpop.f32.mrf.mxu2  ;;  %v5108_v58 = vld [vmem:[%s6104_s28 + $0x580] sm:$0xff]  ;;  %v962_v19 = vld [vmem:[#allocation5 + $0xe08] sm:$0xff] }
 0x2fd   : > { %2348 = vmatmul.f32.gmra.mxu3 %v5095_v13  ;;  %v842_v13 = vld [vmem:[#allocation5 + $0xa48] sm:$0xff] }
 0x2fe   : > { %v2076_v0 = vadd.f32 %v2075_v5, %v1963_v59  ;;  %2009 = vmatmul.f32.gmra.mxu0 %v5092_v21  ;;  %v5109_v59 = vld [vmem:[%s6104_s28 + $0x590] sm:$0xff]  ;;  %v5110_v5 = vld [vmem:[%s6104_s28 + $0x588] sm:$0xff]  ;;  %2517 = vmatpush.msrb.mxu1 %v842_v13 }
 0x300   : > { %v2189_v28 = vadd.f32 %v2188_v33, %v2076_v0  ;;  %v2301_v25 = vpop.f32.mrf.mxu3  ;;  %v5111_v0 = vld [vmem:[%s6104_s28 + $0x598] sm:$0xff]  ;;  %2518 = vmatpush.msrb.mxu1 %v838_v38 }
 0x301   : > { %v2078_v14 = vpop.f32.mrf.mxu1  ;;  %2238 = vmatmul.f32.gmra.mxu2 %v5097_v17 }
 0x302   : > { %v6621_v48 = vadd.f32 %v2301_v25, %v2189_v28  ;;  %v5113_v25 = vld [vmem:[%s6104_s28 + $0x5d0] sm:$0xff] }
 0x303   : > { %v1965_v10 = vpop.f32.mrf.mxu0 }
 0x304   : > { %v1966_v12 = vadd.f32 %v1965_v10, %v6597_v3  ;;  %2125 = vmatmul.f32.gmra.mxu1 %v5098_v18  ;;  %v2191_v15 = vpop.f32.mrf.mxu2 }
 0x305   : > { %2351 = vmatmul.f32.gmra.mxu3 %v5099_v22 }
 0x306   : > { %v2079_v24 = vadd.f32 %v2078_v14, %v1966_v12  ;;  %2012 = vmatmul.f32.gmra.mxu0 %v5096_v16  ;;  %v5112_v12 = vld [vmem:[%s6104_s28 + $0x5c0] sm:$0xff]  ;;  %v5114_v14 = vld [vmem:[%s6104_s28 + $0x5c8] sm:$0xff] }
 0x308   : > { %v2192_v35 = vadd.f32 %v2191_v15, %v2079_v24  ;;  %v2304_v51 = vpop.f32.mrf.mxu3  ;;  %v5115_v24 = vld [vmem:[%s6104_s28 + $0x5d8] sm:$0xff] }
 0x309   : > { %v2081_v61 = vpop.f32.mrf.mxu1  ;;  %2241 = vmatmul.f32.gmra.mxu2 %v5101_v27  ;;  %v5119_v27 = vld [vmem:[%s6104_s28 + $0x618] sm:$0xff] }
 0x30a   : > { %v6628_v34 = vadd.f32 %v2304_v51, %v2192_v35  ;;  %v5116_v51 = vld [vmem:[%s6104_s28 + $0x600] sm:$0xff] }
 0x30b   : > { %v1968_v23 = vpop.f32.mrf.mxu0 }
 0x30c   : > { %v1969_v52 = vadd.f32 %v1968_v23, %v6597_v3  ;;  %2128 = vmatmul.f32.gmra.mxu1 %v5102_v30  ;;  %v2194_v40 = vpop.f32.mrf.mxu2  ;;  %v774_v30 = vld [vmem:[#allocation5 + $0x828] sm:$0xff] }
 0x30d   : > { %2354 = vmatmul.f32.gmra.mxu3 %v5103_v32  ;;  %v966_v32 = vld [vmem:[#allocation5 + $0xe28] sm:$0xff]  ;;  %2405 = vmatpush.msrb.mxu0 %v774_v30 }
 0x30e   : > { %v2082_v8 = vadd.f32 %v2081_v61, %v1969_v52  ;;  %2015 = vmatmul.f32.gmra.mxu0 %v5100_v26  ;;  %v5117_v61 = vld [vmem:[%s6104_s28 + $0x610] sm:$0xff]  ;;  %v5118_v26 = vld [vmem:[%s6104_s28 + $0x608] sm:$0xff]  ;;  %2744 = vmatpush.msrb.mxu3 %v966_v32 }
 0x30f   : > { %v575_v32 = vld [vmem:[#allocation5 + $0x1f0] sm:$0xff] }
 0x310   : > { %v2195_v39 = vadd.f32 %v2194_v40, %v2082_v8  ;;  %v2307_v37 = vpop.f32.mrf.mxu3  ;;  %v902_v8 = vld [vmem:[#allocation5 + $0xc28] sm:$0xff]  ;;  %2745 = vmatpush.msrb.mxu3 %v962_v19  ;;  %v5143_v19 = vld [vmem:[%s6104_s28 + $0x798] sm:$0xff] }
 0x311   : > { %v2084_v43 = vpop.f32.mrf.mxu1  ;;  %2244 = vmatmul.f32.gmra.mxu2 %v5105_v45  ;;  %v5123_v45 = vld [vmem:[%s6104_s28 + $0x658] sm:$0xff] }
 0x312   : > { %v6635_v53 = vadd.f32 %v2307_v37, %v2195_v39  ;;  %2631 = vmatpush.msrb.mxu2 %v902_v8  ;;  %v5133_v8 = vld [vmem:[%s6104_s28 + $0x710] sm:$0xff] }
 0x313   : > { %v1971_v50 = vpop.f32.mrf.mxu0 }
 0x314   : > { %v1972_v7 = vadd.f32 %v1971_v50, %v6597_v3  ;;  %2131 = vmatmul.f32.gmra.mxu1 %v5106_v1  ;;  %v2197_v60 = vpop.f32.mrf.mxu2 }
 0x315   : > { %2357 = vmatmul.f32.gmra.mxu3 %v5107_v9 }
 0x316   : > { %v2085_v20 = vadd.f32 %v2084_v43, %v1972_v7  ;;  %2018 = vmatmul.f32.gmra.mxu0 %v5104_v44  ;;  %v5120_v43 = vld [vmem:[%s6104_s28 + $0x640] sm:$0xff]  ;;  %v5122_v44 = vld [vmem:[%s6104_s28 + $0x648] sm:$0xff] }
 0x318   : > { %v2198_v46 = vadd.f32 %v2197_v60, %v2085_v20  ;;  %v2310_v31 = vpop.f32.mrf.mxu3  ;;  %v5121_v20 = vld [vmem:[%s6104_s28 + $0x650] sm:$0xff] }
 0x319   : > { %v2087_v56 = vpop.f32.mrf.mxu1  ;;  %2247 = vmatmul.f32.gmra.mxu2 %v5109_v59  ;;  %v898_v59 = vld [vmem:[#allocation5 + $0xc08] sm:$0xff] }
 0x31a   : > { %v6642_v11 = vadd.f32 %v2310_v31, %v2198_v46  ;;  %2632 = vmatpush.msrb.mxu2 %v898_v59 }
 0x31b   : > { %v1974_v47 = vpop.f32.mrf.mxu0 }
 0x31c   : > { %v1975_v55 = vadd.f32 %v1974_v47, %v6597_v3  ;;  %2134 = vmatmul.f32.gmra.mxu1 %v5110_v5  ;;  %v2200_v21 = vpop.f32.mrf.mxu2  ;;  %v5127_v5 = vld [vmem:[%s6104_s28 + $0x698] sm:$0xff] }
 0x31d   : > { %2360 = vmatmul.f32.gmra.mxu3 %v5111_v0 }
 0x31e   : > { %v2088_v57 = vadd.f32 %v2087_v56, %v1975_v55  ;;  %2021 = vmatmul.f32.gmra.mxu0 %v5108_v58  ;;  %v5125_v58 = vld [vmem:[%s6104_s28 + $0x690] sm:$0xff] }
 0x320   : > { %v2201_v4 = vadd.f32 %v2200_v21, %v2088_v57  ;;  %v2313_v41 = vpop.f32.mrf.mxu3  ;;  %v5124_v57 = vld [vmem:[%s6104_s28 + $0x680] sm:$0xff]  ;;  %v770_v21 = vld [vmem:[#allocation5 + $0x808] sm:$0xff] }
 0x321   : > { %v2090_v6 = vpop.f32.mrf.mxu1  ;;  %2250 = vmatmul.f32.gmra.mxu2 %v5113_v25  ;;  %2406 = vmatpush.msrb.mxu0 %v770_v21  ;;  %v5129_v25 = vld [vmem:[%s6104_s28 + $0x6d0] sm:$0xff]  ;;  %v5142_v21 = vld [vmem:[%s6104_s28 + $0x788] sm:$0xff] }
 0x322   : > { %v6649_v28 = vadd.f32 %v2313_v41, %v2201_v4  ;;  %v834_v4 = vld [vmem:[#allocation5 + $0xa08] sm:$0xff] }
 0x323   : > { %v1977_v33 = vpop.f32.mrf.mxu0  ;;  %2519 = vmatpush.msrb.mxu1 %v834_v4  ;;  %2843 = vmatpush.msra.mxu0 %v575_v32  ;;  %v571_v4 = vld [vmem:[#allocation5 + $0x1d0] sm:$0xff] }
 0x324   : > { %v1978_v49 = vadd.f32 %v1977_v33, %v6597_v3  ;;  %2137 = vmatmul.f32.gmra.mxu1 %v5114_v14  ;;  %v2203_v16 = vpop.f32.mrf.mxu2  ;;  %v5130_v14 = vld [vmem:[%s6104_s28 + $0x6c8] sm:$0xff]  ;;  %v5149_v32 = vld [vmem:[%s6104_s28 + $0x30] sm:$0xff] }
 0x325   : > { %2363 = vmatmul.f32.gmra.mxu3 %v5115_v24  ;;  %v5131_v24 = vld [vmem:[%s6104_s28 + $0x6d8] sm:$0xff]  ;;  %2844 = vmatpush.msra.mxu0 %v571_v4 }
 0x326   : > { %v2091_v10 = vadd.f32 %v2090_v6, %v1978_v49  ;;  %2024 = vmatmul.f32.gmra.mxu0 %v5112_v12  ;;  %v5128_v12 = vld [vmem:[%s6104_s28 + $0x6c0] sm:$0xff] }
 0x328   : > { %v2204_v17 = vadd.f32 %v2203_v16, %v2091_v10  ;;  %v2316_v15 = vpop.f32.mrf.mxu3 }
 0x329   : > { %v2093_v23 = vpop.f32.mrf.mxu1  ;;  %2253 = vmatmul.f32.gmra.mxu2 %v5117_v61  ;;  %v5132_v61 = vld [vmem:[%s6104_s28 + $0x700] sm:$0xff] }
 0x32a   : > { %v6656_v35 = vadd.f32 %v2316_v15, %v2204_v17 }
 0x32b   : > { %v1980_v18 = vpop.f32.mrf.mxu0 }
 0x32c   : > { %v1981_v22 = vadd.f32 %v1980_v18, %v6597_v3  ;;  %2140 = vmatmul.f32.gmra.mxu1 %v5118_v26  ;;  %v2206_v29 = vpop.f32.mrf.mxu2  ;;  %v703_v26 = vld [vmem:[#allocation5 + $0x5f0] sm:$0xff] }
 0x32d   : > { %2366 = vmatmul.f32.gmra.mxu3 %v5119_v27  ;;  %3069 = vmatpush.msra.mxu2 %v703_v26  ;;  %v5134_v27 = vld [vmem:[%s6104_s28 + $0x708] sm:$0xff] }
 0x32e   : > { %v2094_v52 = vadd.f32 %v2093_v23, %v1981_v22  ;;  %2027 = vmatmul.f32.gmra.mxu0 %v5116_v51 }
 0x330   : > { %v2207_v40 = vadd.f32 %v2206_v29, %v2094_v52  ;;  %v2319_v42 = vpop.f32.mrf.mxu3  ;;  %v5135_v29 = vld [vmem:[%s6104_s28 + $0x718] sm:$0xff] }
 0x331   : > { %v2096_v7 = vpop.f32.mrf.mxu1  ;;  %2256 = vmatmul.f32.gmra.mxu2 %v5121_v20 }
 0x332   : > { %v6663_v50 = vadd.f32 %v2319_v42, %v2207_v40  ;;  %v767_v40 = vld [vmem:[#allocation5 + $0x7f0] sm:$0xff] }
 0x333   : > { %v1983_v36 = vpop.f32.mrf.mxu0  ;;  %3182 = vmatpush.msra.mxu3 %v767_v40  ;;  %v695_v40 = vld [vmem:[#allocation5 + $0x5b0] sm:$0xff] }
 0x334   : > { %v1984_v39 = vadd.f32 %v1983_v36, %v6597_v3  ;;  %2143 = vmatmul.f32.gmra.mxu1 %v5122_v44  ;;  %v2209_v1 = vpop.f32.mrf.mxu2  ;;  %v639_v36 = vld [vmem:[#allocation5 + $0x3f0] sm:$0xff]  ;;  %v5136_v44 = vld [vmem:[%s6104_s28 + $0x740] sm:$0xff] }
 0x335   : > { %2369 = vmatmul.f32.gmra.mxu3 %v5123_v45  ;;  %2956 = vmatpush.msra.mxu1 %v639_v36  ;;  %v5137_v45 = vld [vmem:[%s6104_s28 + $0x750] sm:$0xff]  ;;  %v5151_v36 = vld [vmem:[%s6104_s28 + $0x38] sm:$0xff] }
 0x336   : > { %v2097_v37 = vadd.f32 %v2096_v7, %v1984_v39  ;;  %2030 = vmatmul.f32.gmra.mxu0 %v5120_v43 }
 0x338   : > { %v2210_v9 = vadd.f32 %v2209_v1, %v2097_v37  ;;  %v2322_v47 = vpop.f32.mrf.mxu3  ;;  %v5138_v1 = vld [vmem:[%s6104_s28 + $0x748] sm:$0xff] }
 0x339   : > { %v2099_v31 = vpop.f32.mrf.mxu1  ;;  %2259 = vmatmul.f32.gmra.mxu2 %v5125_v58 }
 0x33a   : > { %v6670_v55 = vadd.f32 %v2322_v47, %v2210_v9  ;;  %v5139_v9 = vld [vmem:[%s6104_s28 + $0x758] sm:$0xff] }
 0x33b   : > { %v1986_v60 = vpop.f32.mrf.mxu0 }
 0x33c   : > { %v1987_v46 = vadd.f32 %v1986_v60, %v6597_v3  ;;  %2146 = vmatmul.f32.gmra.mxu1 %v5126_v54  ;;  %v2212_v0 = vpop.f32.mrf.mxu2  ;;  %v5140_v54 = vld [vmem:[%s6104_s28 + $0x780] sm:$0xff] }
 0x33d   : > { %2372 = vmatmul.f32.gmra.mxu3 %v5127_v5  ;;  %v5141_v5 = vld [vmem:[%s6104_s28 + $0x790] sm:$0xff] }
 0x33e   : > { %v2100_v56 = vadd.f32 %v2099_v31, %v1987_v46  ;;  %2033 = vmatmul.f32.gmra.mxu0 %v5124_v57 }
 0x340   : > { %v2213_v2 = vadd.f32 %v2212_v0, %v2100_v56  ;;  %v2325_v49 = vpop.f32.mrf.mxu3  ;;  %v699_v0 = vld [vmem:[#allocation5 + $0x5d0] sm:$0xff] }
 0x341   : > { %v2102_v6 = vpop.f32.mrf.mxu1  ;;  %2262 = vmatmul.f32.gmra.mxu2 %v5129_v25 }
 0x342   : > { %v6677_v41 = vadd.f32 %v2325_v49, %v2213_v2  ;;  %3070 = vmatpush.msra.mxu2 %v699_v0  ;;  %v635_v49 = vld [vmem:[#allocation5 + $0x3d0] sm:$0xff] }
 0x343   : > { %v1989_v13 = vpop.f32.mrf.mxu0  ;;  %2957 = vmatpush.msra.mxu1 %v635_v49  ;;  %v691_v49 = vld [vmem:[#allocation5 + $0x590] sm:$0xff] }
 0x344   : > { %v1990_v33 = vadd.f32 %v1989_v13, %v6597_v3  ;;  %2149 = vmatmul.f32.gmra.mxu1 %v5130_v14  ;;  %v2215_v16 = vpop.f32.mrf.mxu2  ;;  %v763_v13 = vld [vmem:[#allocation5 + $0x7d0] sm:$0xff]  ;;  %3071 = vmatpush.msra.mxu2 %v695_v40 }
 0x345   : > { %2375 = vmatmul.f32.gmra.mxu3 %v5131_v24 }
 0x346   : > { %v2103_v10 = vadd.f32 %v2102_v6, %v1990_v33  ;;  %2036 = vmatmul.f32.gmra.mxu0 %v5128_v12  ;;  %3183 = vmatpush.msra.mxu3 %v763_v13  ;;  %v5156_v13 = vld [vmem:[%s6104_s28 + $0xa0] sm:$0xff] }
 0x347   : > { %3072 = vmatpush.msra.mxu2 %v691_v49  ;;  %v5171_v49 = vld [vmem:[%s6104_s28 + $0x178] sm:$0xff] }
 0x348   : > { %v2216_v17 = vadd.f32 %v2215_v16, %v2103_v10  ;;  %v2328_v15 = vpop.f32.mrf.mxu3  ;;  %v5144_v16 = vld [vmem:[%s6104_s28 + $0x7c0] sm:$0xff] }
 0x349   : > { %v2105_v52 = vpop.f32.mrf.mxu1  ;;  %2265 = vmatmul.f32.gmra.mxu2 %v5133_v8 }
 0x34a   : > { %v6684_v23 = vadd.f32 %v2328_v15, %v2216_v17  ;;  %v5145_v17 = vld [vmem:[%s6104_s28 + $0x7d0] sm:$0xff] }
 0x34b   : > { %v1992_v18 = vpop.f32.mrf.mxu0 }
 0x34c   : > { %v1993_v22 = vadd.f32 %v1992_v18, %v6597_v3  ;;  %2152 = vmatmul.f32.gmra.mxu1 %v5134_v27  ;;  %v2218_v30 = vpop.f32.mrf.mxu2  ;;  %v5146_v18 = vld [vmem:[%s6104_s28 + $0x7c8] sm:$0xff] }
 0x34d   : > { %2378 = vmatmul.f32.gmra.mxu3 %v5135_v29 }
 0x34e   : > { %v2106_v51 = vadd.f32 %v2105_v52, %v1993_v22  ;;  %2039 = vmatmul.f32.gmra.mxu0 %v5132_v61  ;;  %v5147_v22 = vld [vmem:[%s6104_s28 + $0x7d8] sm:$0xff] }
 0x350   : > { %v2219_v38 = vadd.f32 %v2218_v30, %v2106_v51  ;;  %v2331_v7 = vpop.f32.mrf.mxu3  ;;  %v5148_v30 = vld [vmem:[%s6104_s28 + $0x20] sm:$0xff] }
 0x351   : > { %v2108_v43 = vpop.f32.mrf.mxu1  ;;  %2268 = vmatmul.f32.gmra.mxu2 %v5137_v45 }
 0x352   : > { %v6691_v37 = vadd.f32 %v2331_v7, %v2219_v38  ;;  %v5150_v38 = vld [vmem:[%s6104_s28 + $0x28] sm:$0xff]  ;;  %v759_v7 = vld [vmem:[#allocation5 + $0x7b0] sm:$0xff] }
 0x353   : > { %v1995_v39 = vpop.f32.mrf.mxu0  ;;  %3184 = vmatpush.msra.mxu3 %v759_v7 }
 0x354   : > { %v1996_v42 = vadd.f32 %v1995_v39, %v6597_v3  ;;  %2155 = vmatmul.f32.gmra.mxu1 %v5138_v1  ;;  %v2221_v60 = vpop.f32.mrf.mxu2 }
 0x355   : > { %2381 = vmatmul.f32.gmra.mxu3 %v5139_v9 }
 0x356   : > { %v2109_v20 = vadd.f32 %v2108_v43, %v1996_v42  ;;  %2042 = vmatmul.f32.gmra.mxu0 %v5136_v44  ;;  %v567_v42 = vld [vmem:[#allocation5 + $0x1b0] sm:$0xff] }
 0x357   : > { %2845 = vmatpush.msra.mxu0 %v567_v42 }
 0x358   : > { %v2222_v46 = vadd.f32 %v2221_v60, %v2109_v20  ;;  %v2334_v56 = vpop.f32.mrf.mxu3  ;;  %v631_v20 = vld [vmem:[#allocation5 + $0x3b0] sm:$0xff] }
 0x359   : > { %v2111_v58 = vpop.f32.mrf.mxu1  ;;  %2271 = vmatmul.f32.gmra.mxu2 %v5141_v5  ;;  %2958 = vmatpush.msra.mxu1 %v631_v20  ;;  %v5164_v20 = vld [vmem:[%s6104_s28 + $0x120] sm:$0xff] }
 0x35a   : > { %v6698_v57 = vadd.f32 %v2334_v56, %v2222_v46  ;;  %v5154_v56 = vld [vmem:[%s6104_s28 + $0x68] sm:$0xff] }
 0x35b   : > { %v1998_v47 = vpop.f32.mrf.mxu0 }
 0x35c   : > { %v1999_v31 = vadd.f32 %v1998_v47, %v6597_v3  ;;  %2158 = vmatmul.f32.gmra.mxu1 %v5142_v21  ;;  %v2224_v2 = vpop.f32.mrf.mxu2  ;;  %v5152_v47 = vld [vmem:[%s6104_s28 + $0x60] sm:$0xff] }
 0x35d   : > { %2384 = vmatmul.f32.gmra.mxu3 %v5143_v19 }
 0x35e   : > { %v2112_v59 = vadd.f32 %v2111_v58, %v1999_v31  ;;  %2045 = vmatmul.f32.gmra.mxu0 %v5140_v54  ;;  %v5153_v31 = vld [vmem:[%s6104_s28 + $0x70] sm:$0xff]  ;;  %v5155_v58 = vld [vmem:[%s6104_s28 + $0x78] sm:$0xff] }
 0x360   : > { %v2225_v33 = vadd.f32 %v2224_v2, %v2112_v59  ;;  %v2337_v12 = vpop.f32.mrf.mxu3 }
 0x361   : > { %v2114_v14 = vpop.f32.mrf.mxu1  ;;  %2274 = vmatmul.f32.gmra.mxu2 %v5145_v17  ;;  %v627_v17 = vld [vmem:[#allocation5 + $0x390] sm:$0xff] }
 0x362   : > { %v6705_v25 = vadd.f32 %v2337_v12, %v2225_v33  ;;  %v5157_v33 = vld [vmem:[%s6104_s28 + $0xb0] sm:$0xff]  ;;  %2959 = vmatpush.msra.mxu1 %v627_v17 }
 0x363   : > { %v2001_v6 = vpop.f32.mrf.mxu0 }
 0x364   : > { %v2002_v10 = vadd.f32 %v2001_v6, %v6597_v3  ;;  %2161 = vmatmul.f32.gmra.mxu1 %v5146_v18  ;;  %v2227_v15 = vpop.f32.mrf.mxu2  ;;  %v5158_v6 = vld [vmem:[%s6104_s28 + $0xa8] sm:$0xff] }
 0x365   : > { %2387 = vmatmul.f32.gmra.mxu3 %v5147_v22 }
 0x366   : > { %v2115_v24 = vadd.f32 %v2114_v14, %v2002_v10  ;;  %2048 = vmatmul.f32.gmra.mxu0 %v5144_v16  ;;  %v5159_v10 = vld [vmem:[%s6104_s28 + $0xb8] sm:$0xff]  ;;  %v563_v14 = vld [vmem:[#allocation5 + $0x190] sm:$0xff] }
 0x367   : > { %2846 = vmatpush.msra.mxu0 %v563_v14 }
 0x368   : > { %v2228_v52 = vadd.f32 %v2227_v15, %v2115_v24  ;;  %v2340_v8 = vpop.f32.mrf.mxu3  ;;  %v755_v24 = vld [vmem:[#allocation5 + $0x790] sm:$0xff] }
 0x369   : > { %v2117_v27 = vpop.f32.mrf.mxu1  ;;  %2633 = vmatmul.f32.vlgmr.msrb.gmra.mxu2 %v5149_v32  ;;  %3185 = vmatpush.msra.mxu3 %v755_v24 }
 0x36a   : > { %v6712_v26 = vadd.f32 %v2340_v8, %v2228_v52  ;;  %v5160_v8 = vld [vmem:[%s6104_s28 + $0xe0] sm:$0xff] }
 0x36b   : > { %v2004_v51 = vpop.f32.mrf.mxu0 }
 0x36c   : > { %v2005_v61 = vadd.f32 %v2004_v51, %v6597_v3  ;;  %2520 = vmatmul.f32.vlgmr.msrb.gmra.mxu1 %v5150_v38  ;;  %v2230_v39 = vpop.f32.mrf.mxu2 }
 0x36d   : > { %2746 = vmatmul.f32.vlgmr.msrb.gmra.mxu3 %v5151_v36 }
 0x36e   : > { %v2118_v29 = vadd.f32 %v2117_v27, %v2005_v61  ;;  %2407 = vmatmul.f32.vlgmr.msrb.gmra.mxu0 %v5148_v30  ;;  %v5161_v27 = vld [vmem:[%s6104_s28 + $0xf0] sm:$0xff]  ;;  %v5163_v30 = vld [vmem:[%s6104_s28 + $0xf8] sm:$0xff] }
 0x370   : > { %v2231_v43 = vadd.f32 %v2230_v39, %v2118_v29  ;;  %v2343_v1 = vpop.f32.mrf.mxu3  ;;  %v5162_v29 = vld [vmem:[%s6104_s28 + $0xe8] sm:$0xff] }
 0x371   : > { %v2120_v60 = vpop.f32.mrf.mxu1  ;;  %2636 = vmatmul.f32.gmra.mxu2 %v5153_v31  ;;  %v751_v31 = vld [vmem:[#allocation5 + $0x770] sm:$0xff] }
 0x372   : > { %v6719_v9 = vadd.f32 %v2343_v1, %v2231_v43  ;;  %v5166_v1 = vld [vmem:[%s6104_s28 + $0x128] sm:$0xff]  ;;  %3186 = vmatpush.msra.mxu3 %v751_v31 }
 0x373   : > { %v2007_v44 = vpop.f32.mrf.mxu0 }
 0x374   : > { %v2008_v45 = vadd.f32 %v2007_v44, %v6597_v3  ;;  %2523 = vmatmul.f32.gmra.mxu1 %v5154_v56  ;;  %v2233_v59 = vpop.f32.mrf.mxu2  ;;  %v5165_v44 = vld [vmem:[%s6104_s28 + $0x130] sm:$0xff] }
 0x375   : > { %2749 = vmatmul.f32.gmra.mxu3 %v5155_v58  ;;  %v623_v58 = vld [vmem:[#allocation5 + $0x370] sm:$0xff] }
 0x376   : > { %v2121_v46 = vadd.f32 %v2120_v60, %v2008_v45  ;;  %2410 = vmatmul.f32.gmra.mxu0 %v5152_v47  ;;  %v687_v45 = vld [vmem:[#allocation5 + $0x570] sm:$0xff]  ;;  %v5167_v60 = vld [vmem:[%s6104_s28 + $0x138] sm:$0xff]  ;;  %2960 = vmatpush.msra.mxu1 %v623_v58 }
 0x377   : > { %3073 = vmatpush.msra.mxu2 %v687_v45  ;;  %v559_v47 = vld [vmem:[#allocation5 + $0x170] sm:$0xff] }
 0x378   : > { %v2234_v54 = vadd.f32 %v2233_v59, %v2121_v46  ;;  %v2346_v21 = vpop.f32.mrf.mxu3  ;;  %2847 = vmatpush.msra.mxu0 %v559_v47  ;;  %v5177_v45 = vld [vmem:[%s6104_s28 + $0x1f0] sm:$0xff] }
 0x379   : > { %v2123_v2 = vpop.f32.mrf.mxu1  ;;  %2639 = vmatmul.f32.gmra.mxu2 %v5157_v33  ;;  %v5170_v33 = vld [vmem:[%s6104_s28 + $0x168] sm:$0xff] }
 0x37a   : > { %v6726_v19 = vadd.f32 %v2346_v21, %v2234_v54 }
 0x37b   : > { %v2010_v5 = vpop.f32.mrf.mxu0 }
 0x37c   : > { %v2011_v0 = vadd.f32 %v2010_v5, %v6597_v3  ;;  %2526 = vmatmul.f32.gmra.mxu1 %v5158_v6  ;;  %v2236_v12 = vpop.f32.mrf.mxu2 }
 0x37d   : > { %2752 = vmatmul.f32.gmra.mxu3 %v5159_v10 }
 0x37e   : > { %v2124_v4 = vadd.f32 %v2123_v2, %v2011_v0  ;;  %2413 = vmatmul.f32.gmra.mxu0 %v5156_v13  ;;  %v5169_v13 = vld [vmem:[%s6104_s28 + $0x170] sm:$0xff] }
 0x380   : > { %v2237_v16 = vadd.f32 %v2236_v12, %v2124_v4  ;;  %v2349_v15 = vpop.f32.mrf.mxu3  ;;  %v5168_v4 = vld [vmem:[%s6104_s28 + $0x160] sm:$0xff] }
 0x381   : > { %v2126_v51 = vpop.f32.mrf.mxu1  ;;  %2642 = vmatmul.f32.gmra.mxu2 %v5161_v27 }
 0x382   : > { %v6733_v52 = vadd.f32 %v2349_v15, %v2237_v16  ;;  %v5173_v15 = vld [vmem:[%s6104_s28 + $0x1b0] sm:$0xff] }
 0x383   : > { %v2013_v18 = vpop.f32.mrf.mxu0 }
 0x384   : > { %v2014_v22 = vadd.f32 %v2013_v18, %v6597_v3  ;;  %2529 = vmatmul.f32.gmra.mxu1 %v5162_v29  ;;  %v2239_v32 = vpop.f32.mrf.mxu2  ;;  %v555_v29 = vld [vmem:[#allocation5 + $0x150] sm:$0xff] }
 0x385   : > { %2755 = vmatmul.f32.gmra.mxu3 %v5163_v30  ;;  %v747_v30 = vld [vmem:[#allocation5 + $0x750] sm:$0xff]  ;;  %2848 = vmatpush.msra.mxu0 %v555_v29  ;;  %v5187_v29 = vld [vmem:[%s6104_s28 + $0x278] sm:$0xff] }
 0x386   : > { %v2127_v61 = vadd.f32 %v2126_v51, %v2014_v22  ;;  %2416 = vmatmul.f32.gmra.mxu0 %v5160_v8  ;;  %v5172_v22 = vld [vmem:[%s6104_s28 + $0x1a0] sm:$0xff]  ;;  %v683_v51 = vld [vmem:[#allocation5 + $0x550] sm:$0xff]  ;;  %v5175_v8 = vld [vmem:[%s6104_s28 + $0x1b8] sm:$0xff]  ;;  %3187 = vmatpush.msra.mxu3 %v747_v30 }
 0x387   : > { %3074 = vmatpush.msra.mxu2 %v683_v51 }
 0x388   : > { %v2240_v40 = vadd.f32 %v2239_v32, %v2127_v61  ;;  %v2352_v39 = vpop.f32.mrf.mxu3  ;;  %v5174_v61 = vld [vmem:[%s6104_s28 + $0x1a8] sm:$0xff] }
 0x389   : > { %v2129_v7 = vpop.f32.mrf.mxu1  ;;  %2645 = vmatmul.f32.gmra.mxu2 %v5165_v44  ;;  %v5176_v44 = vld [vmem:[%s6104_s28 + $0x1e0] sm:$0xff] }
 0x38a   : > { %v6740_v42 = vadd.f32 %v2352_v39, %v2240_v40  ;;  %v619_v40 = vld [vmem:[#allocation5 + $0x350] sm:$0xff] }
 0x38b   : > { %v2016_v38 = vpop.f32.mrf.mxu0  ;;  %2961 = vmatpush.msra.mxu1 %v619_v40 }
 0x38c   : > { %v2017_v36 = vadd.f32 %v2016_v38, %v6597_v3  ;;  %2532 = vmatmul.f32.gmra.mxu1 %v5166_v1  ;;  %v2242_v46 = vpop.f32.mrf.mxu2  ;;  %v5178_v1 = vld [vmem:[%s6104_s28 + $0x1e8] sm:$0xff] }
 0x38d   : > { %2758 = vmatmul.f32.gmra.mxu3 %v5167_v60  ;;  %v5179_v60 = vld [vmem:[%s6104_s28 + $0x1f8] sm:$0xff] }
 0x38e   : > { %v2130_v43 = vadd.f32 %v2129_v7, %v2017_v36  ;;  %2419 = vmatmul.f32.gmra.mxu0 %v5164_v20 }
 0x390   : > { %v2243_v56 = vadd.f32 %v2242_v46, %v2130_v43  ;;  %v2355_v5 = vpop.f32.mrf.mxu3 }
 0x391   : > { %v2132_v21 = vpop.f32.mrf.mxu1  ;;  %2648 = vmatmul.f32.gmra.mxu2 %v5169_v13  ;;  %v5182_v13 = vld [vmem:[%s6104_s28 + $0x228] sm:$0xff] }
 0x392   : > { %v6747_v0 = vadd.f32 %v2355_v5, %v2243_v56 }
 0x393   : > { %v2019_v59 = vpop.f32.mrf.mxu0 }
 0x394   : > { %v2020_v54 = vadd.f32 %v2019_v59, %v6597_v3  ;;  %2535 = vmatmul.f32.gmra.mxu1 %v5170_v33  ;;  %v2245_v6 = vpop.f32.mrf.mxu2  ;;  %v5183_v33 = vld [vmem:[%s6104_s28 + $0x238] sm:$0xff] }
 0x395   : > { %2761 = vmatmul.f32.gmra.mxu3 %v5171_v49 }
 0x396   : > { %v2133_v2 = vadd.f32 %v2132_v21, %v2020_v54  ;;  %2422 = vmatmul.f32.gmra.mxu0 %v5168_v4  ;;  %v5180_v21 = vld [vmem:[%s6104_s28 + $0x220] sm:$0xff]  ;;  %v679_v4 = vld [vmem:[#allocation5 + $0x530] sm:$0xff] }
 0x397   : > { %3075 = vmatpush.msra.mxu2 %v679_v4 }
 0x398   : > { %v2246_v10 = vadd.f32 %v2245_v6, %v2133_v2  ;;  %v2358_v24 = vpop.f32.mrf.mxu3  ;;  %v5181_v2 = vld [vmem:[%s6104_s28 + $0x230] sm:$0xff] }
 0x399   : > { %v2135_v17 = vpop.f32.mrf.mxu1  ;;  %2651 = vmatmul.f32.gmra.mxu2 %v5173_v15  ;;  %v551_v6 = vld [vmem:[#allocation5 + $0x130] sm:$0xff] }
 0x39a   : > { %v6754_v16 = vadd.f32 %v2358_v24, %v2246_v10  ;;  %v743_v10 = vld [vmem:[#allocation5 + $0x730] sm:$0xff]  ;;  %2849 = vmatpush.msra.mxu0 %v551_v6 }
 0x39b   : > { %v2022_v12 = vpop.f32.mrf.mxu0  ;;  %3188 = vmatpush.msra.mxu3 %v743_v10  ;;  %v5193_v6 = vld [vmem:[%s6104_s28 + $0x2f0] sm:$0xff]  ;;  %v5194_v10 = vld [vmem:[%s6104_s28 + $0x2e8] sm:$0xff] }
 0x39c   : > { %v2023_v14 = vadd.f32 %v2022_v12, %v6597_v3  ;;  %2538 = vmatmul.f32.gmra.mxu1 %v5174_v61  ;;  %v2248_v27 = vpop.f32.mrf.mxu2  ;;  %v5184_v61 = vld [vmem:[%s6104_s28 + $0x260] sm:$0xff] }
 0x39d   : > { %2764 = vmatmul.f32.gmra.mxu3 %v5175_v8  ;;  %v5185_v8 = vld [vmem:[%s6104_s28 + $0x270] sm:$0xff] }
 0x39e   : > { %v2136_v18 = vadd.f32 %v2135_v17, %v2023_v14  ;;  %2425 = vmatmul.f32.gmra.mxu0 %v5172_v22  ;;  %v615_v14 = vld [vmem:[#allocation5 + $0x330] sm:$0xff] }
 0x39f   : > { %2962 = vmatpush.msra.mxu1 %v615_v14 }
 0x3a0   : > { %v2249_v32 = vadd.f32 %v2248_v27, %v2136_v18  ;;  %v2361_v39 = vpop.f32.mrf.mxu3  ;;  %v5186_v27 = vld [vmem:[%s6104_s28 + $0x268] sm:$0xff] }
 0x3a1   : > { %v2138_v43 = vpop.f32.mrf.mxu1  ;;  %2654 = vmatmul.f32.gmra.mxu2 %v5177_v45  ;;  %v5189_v45 = vld [vmem:[%s6104_s28 + $0x2b0] sm:$0xff] }
 0x3a2   : > { %v6761_v7 = vadd.f32 %v2361_v39, %v2249_v32 }
 0x3a3   : > { %v2025_v38 = vpop.f32.mrf.mxu0 }
 0x3a4   : > { %v2026_v36 = vadd.f32 %v2025_v38, %v6597_v3  ;;  %2541 = vmatmul.f32.gmra.mxu1 %v5178_v1  ;;  %v2251_v46 = vpop.f32.mrf.mxu2  ;;  %v675_v1 = vld [vmem:[#allocation5 + $0x510] sm:$0xff] }
 0x3a5   : > { %2767 = vmatmul.f32.gmra.mxu3 %v5179_v60  ;;  %3076 = vmatpush.msra.mxu2 %v675_v1  ;;  %v5190_v60 = vld [vmem:[%s6104_s28 + $0x2a8] sm:$0xff] }
 0x3a6   : > { %v2139_v20 = vadd.f32 %v2138_v43, %v2026_v36  ;;  %2428 = vmatmul.f32.gmra.mxu0 %v5176_v44  ;;  %v5188_v44 = vld [vmem:[%s6104_s28 + $0x2a0] sm:$0xff] }
 0x3a8   : > { %v2252_v47 = vadd.f32 %v2251_v46, %v2139_v20  ;;  %v2364_v58 = vpop.f32.mrf.mxu3  ;;  %v5191_v46 = vld [vmem:[%s6104_s28 + $0x2b8] sm:$0xff] }
 0x3a9   : > { %v2141_v54 = vpop.f32.mrf.mxu1  ;;  %2657 = vmatmul.f32.gmra.mxu2 %v5181_v2 }
 0x3aa   : > { %v6768_v59 = vadd.f32 %v2364_v58, %v2252_v47 }
 0x3ab   : > { %v2028_v31 = vpop.f32.mrf.mxu0 }
 0x3ac   : > { %v2029_v56 = vadd.f32 %v2028_v31, %v6597_v3  ;;  %2544 = vmatmul.f32.gmra.mxu1 %v5182_v13  ;;  %v2254_v49 = vpop.f32.mrf.mxu2  ;;  %v547_v31 = vld [vmem:[#allocation5 + $0x110] sm:$0xff] }
 0x3ad   : > { %2770 = vmatmul.f32.gmra.mxu3 %v5183_v33  ;;  %2850 = vmatpush.msra.mxu0 %v547_v31 }
 0x3ae   : > { %v2142_v5 = vadd.f32 %v2141_v54, %v2029_v56  ;;  %2431 = vmatmul.f32.gmra.mxu0 %v5180_v21  ;;  %v739_v56 = vld [vmem:[#allocation5 + $0x710] sm:$0xff] }
 0x3af   : > { %3189 = vmatpush.msra.mxu3 %v739_v56  ;;  %v611_v54 = vld [vmem:[#allocation5 + $0x310] sm:$0xff]  ;;  %v5200_v56 = vld [vmem:[%s6104_s28 + $0x360] sm:$0xff] }
 0x3b0   : > { %v2255_v12 = vadd.f32 %v2254_v49, %v2142_v5  ;;  %v2367_v18 = vpop.f32.mrf.mxu3  ;;  %2963 = vmatpush.msra.mxu1 %v611_v54  ;;  %v5192_v49 = vld [vmem:[%s6104_s28 + $0x2e0] sm:$0xff]  ;;  %v5202_v54 = vld [vmem:[%s6104_s28 + $0x368] sm:$0xff] }
 0x3b1   : > { %v2144_v15 = vpop.f32.mrf.mxu1  ;;  %2660 = vmatmul.f32.gmra.mxu2 %v5185_v8 }
 0x3b2   : > { %v6775_v22 = vadd.f32 %v2367_v18, %v2255_v12  ;;  %v5195_v12 = vld [vmem:[%s6104_s28 + $0x2f8] sm:$0xff] }
 0x3b3   : > { %v2031_v24 = vpop.f32.mrf.mxu0 }
 0x3b4   : > { %v2032_v17 = vadd.f32 %v2031_v24, %v6597_v3  ;;  %2547 = vmatmul.f32.gmra.mxu1 %v5186_v27  ;;  %v2257_v30 = vpop.f32.mrf.mxu2  ;;  %v5196_v27 = vld [vmem:[%s6104_s28 + $0x320] sm:$0xff] }
 0x3b5   : > { %2773 = vmatmul.f32.gmra.mxu3 %v5187_v29  ;;  %v5197_v29 = vld [vmem:[%s6104_s28 + $0x330] sm:$0xff] }
 0x3b6   : > { %v2145_v51 = vadd.f32 %v2144_v15, %v2032_v17  ;;  %2434 = vmatmul.f32.gmra.mxu0 %v5184_v61 }
 0x3b8   : > { %v2258_v32 = vadd.f32 %v2257_v30, %v2145_v51  ;;  %v2370_v36 = vpop.f32.mrf.mxu3  ;;  %v671_v30 = vld [vmem:[#allocation5 + $0x4f0] sm:$0xff] }
 0x3b9   : > { %v2147_v43 = vpop.f32.mrf.mxu1  ;;  %2663 = vmatmul.f32.gmra.mxu2 %v5189_v45 }
 0x3ba   : > { %v6782_v39 = vadd.f32 %v2370_v36, %v2258_v32  ;;  %3077 = vmatpush.msra.mxu2 %v671_v30  ;;  %v5198_v32 = vld [vmem:[%s6104_s28 + $0x328] sm:$0xff]  ;;  %v543_v36 = vld [vmem:[#allocation5 + $0xf0] sm:$0xff] }
 0x3bb   : > { %v2034_v40 = vpop.f32.mrf.mxu0  ;;  %2851 = vmatpush.msra.mxu0 %v543_v36  ;;  %v603_v30 = vld [vmem:[#allocation5 + $0x2d0] sm:$0xff] }
 0x3bc   : > { %v2035_v38 = vadd.f32 %v2034_v40, %v6597_v3  ;;  %2550 = vmatmul.f32.gmra.mxu1 %v5190_v60  ;;  %v2260_v47 = vpop.f32.mrf.mxu2  ;;  %v5199_v40 = vld [vmem:[%s6104_s28 + $0x338] sm:$0xff] }
 0x3bd   : > { %2776 = vmatmul.f32.gmra.mxu3 %v5191_v46 }
 0x3be   : > { %v2148_v20 = vadd.f32 %v2147_v43, %v2035_v38  ;;  %2437 = vmatmul.f32.gmra.mxu0 %v5188_v44  ;;  %v735_v43 = vld [vmem:[#allocation5 + $0x6f0] sm:$0xff] }
 0x3bf   : > { %3190 = vmatpush.msra.mxu3 %v735_v43  ;;  %v607_v44 = vld [vmem:[#allocation5 + $0x2f0] sm:$0xff] }
 0x3c0   : > { %v2261_v58 = vadd.f32 %v2260_v47, %v2148_v20  ;;  %v2373_v2 = vpop.f32.mrf.mxu3  ;;  %2964 = vmatpush.msra.mxu1 %v607_v44  ;;  %v5208_v44 = vld [vmem:[%s6104_s28 + $0x3e0] sm:$0xff] }
 0x3c1   : > { %v2150_v13 = vpop.f32.mrf.mxu1  ;;  %2666 = vmatmul.f32.gmra.mxu2 %v5193_v6 }
 0x3c2   : > { %v6789_v4 = vadd.f32 %v2373_v2, %v2261_v58  ;;  %v5201_v58 = vld [vmem:[%s6104_s28 + $0x370] sm:$0xff]  ;;  %2965 = vmatpush.msra.mxu1 %v603_v30 }
 0x3c3   : > { %v2037_v5 = vpop.f32.mrf.mxu0  ;;  %v5217_v30 = vld [vmem:[%s6104_s28 + $0x470] sm:$0xff] }
 0x3c4   : > { %v2038_v21 = vadd.f32 %v2037_v5, %v6597_v3  ;;  %2553 = vmatmul.f32.gmra.mxu1 %v5194_v10  ;;  %v2263_v14 = vpop.f32.mrf.mxu2  ;;  %v5203_v5 = vld [vmem:[%s6104_s28 + $0x378] sm:$0xff] }
 0x3c5   : > { %2779 = vmatmul.f32.gmra.mxu3 %v5195_v12 }
 0x3c6   : > { %v2151_v33 = vadd.f32 %v2150_v13, %v2038_v21  ;;  %2440 = vmatmul.f32.gmra.mxu0 %v5192_v49 }
 0x3c8   : > { %v2264_v24 = vadd.f32 %v2263_v14, %v2151_v33  ;;  %v2376_v15 = vpop.f32.mrf.mxu3  ;;  %v5204_v14 = vld [vmem:[%s6104_s28 + $0x3a0] sm:$0xff] }
 0x3c9   : > { %v2153_v61 = vpop.f32.mrf.mxu1  ;;  %2669 = vmatmul.f32.gmra.mxu2 %v5197_v29 }
 0x3ca   : > { %v6796_v51 = vadd.f32 %v2376_v15, %v2264_v24  ;;  %v5205_v24 = vld [vmem:[%s6104_s28 + $0x3b0] sm:$0xff]  ;;  %v5207_v15 = vld [vmem:[%s6104_s28 + $0x3b8] sm:$0xff] }
 0x3cb   : > { %v2040_v17 = vpop.f32.mrf.mxu0 }
 0x3cc   : > { %v2041_v18 = vadd.f32 %v2040_v17, %v6597_v3  ;;  %2556 = vmatmul.f32.gmra.mxu1 %v5198_v32  ;;  %v2266_v38 = vpop.f32.mrf.mxu2  ;;  %v667_v17 = vld [vmem:[#allocation5 + $0x4d0] sm:$0xff] }
 0x3cd   : > { %2782 = vmatmul.f32.gmra.mxu3 %v5199_v40  ;;  %3078 = vmatpush.msra.mxu2 %v667_v17  ;;  %v599_v17 = vld [vmem:[#allocation5 + $0x2b0] sm:$0xff] }
 0x3ce   : > { %v2154_v8 = vadd.f32 %v2153_v61, %v2041_v18  ;;  %2443 = vmatmul.f32.gmra.mxu0 %v5196_v27  ;;  %v5206_v18 = vld [vmem:[%s6104_s28 + $0x3a8] sm:$0xff]  ;;  %v731_v27 = vld [vmem:[#allocation5 + $0x6d0] sm:$0xff]  ;;  %2966 = vmatpush.msra.mxu1 %v599_v17 }
 0x3cf   : > { %3191 = vmatpush.msra.mxu3 %v731_v27  ;;  %v5225_v17 = vld [vmem:[%s6104_s28 + $0x4f0] sm:$0xff] }
 0x3d0   : > { %v2267_v20 = vadd.f32 %v2266_v38, %v2154_v8  ;;  %v2379_v60 = vpop.f32.mrf.mxu3  ;;  %v539_v8 = vld [vmem:[#allocation5 + $0xd0] sm:$0xff] }
 0x3d1   : > { %v2156_v47 = vpop.f32.mrf.mxu1  ;;  %2672 = vmatmul.f32.gmra.mxu2 %v5201_v58  ;;  %2852 = vmatpush.msra.mxu0 %v539_v8 }
 0x3d2   : > { %v6803_v46 = vadd.f32 %v2379_v60, %v2267_v20  ;;  %v5211_v60 = vld [vmem:[%s6104_s28 + $0x3f8] sm:$0xff] }
 0x3d3   : > { %v2043_v45 = vpop.f32.mrf.mxu0 }
 0x3d4   : > { %v2044_v1 = vadd.f32 %v2043_v45, %v6597_v3  ;;  %2559 = vmatmul.f32.gmra.mxu1 %v5202_v54  ;;  %v2269_v21 = vpop.f32.mrf.mxu2  ;;  %v5209_v45 = vld [vmem:[%s6104_s28 + $0x3f0] sm:$0xff] }
 0x3d5   : > { %2785 = vmatmul.f32.gmra.mxu3 %v5203_v5 }
 0x3d6   : > { %v2157_v31 = vadd.f32 %v2156_v47, %v2044_v1  ;;  %2446 = vmatmul.f32.gmra.mxu0 %v5200_v56  ;;  %v5210_v1 = vld [vmem:[%s6104_s28 + $0x3e8] sm:$0xff] }
 0x3d8   : > { %v2270_v2 = vadd.f32 %v2269_v21, %v2157_v31  ;;  %v2382_v49 = vpop.f32.mrf.mxu3  ;;  %v5212_v21 = vld [vmem:[%s6104_s28 + $0x420] sm:$0xff] }
 0x3d9   : > { %v2159_v10 = vpop.f32.mrf.mxu1  ;;  %2675 = vmatmul.f32.gmra.mxu2 %v5205_v24 }
 0x3da   : > { %v6810_v6 = vadd.f32 %v2382_v49, %v2270_v2  ;;  %v5213_v2 = vld [vmem:[%s6104_s28 + $0x430] sm:$0xff]  ;;  %v5214_v49 = vld [vmem:[%s6104_s28 + $0x428] sm:$0xff] }
 0x3db   : > { %v2046_v13 = vpop.f32.mrf.mxu0 }
 0x3dc   : > { %v2047_v33 = vadd.f32 %v2046_v13, %v6597_v3  ;;  %2562 = vmatmul.f32.gmra.mxu1 %v5206_v18  ;;  %v2272_v61 = vpop.f32.mrf.mxu2  ;;  %v663_v13 = vld [vmem:[#allocation5 + $0x4b0] sm:$0xff] }
 0x3dd   : > { %2788 = vmatmul.f32.gmra.mxu3 %v5207_v15  ;;  %3079 = vmatpush.msra.mxu2 %v663_v13 }
 0x3de   : > { %v2160_v12 = vadd.f32 %v2159_v10, %v2047_v33  ;;  %2449 = vmatmul.f32.gmra.mxu0 %v5204_v14  ;;  %v5215_v10 = vld [vmem:[%s6104_s28 + $0x438] sm:$0xff]  ;;  %v535_v14 = vld [vmem:[#allocation5 + $0xb0] sm:$0xff] }
 0x3df   : > { %2853 = vmatpush.msra.mxu0 %v535_v14 }
 0x3e0   : > { %v2273_v29 = vadd.f32 %v2272_v61, %v2160_v12  ;;  %v2385_v38 = vpop.f32.mrf.mxu3 }
 0x3e1   : > { %v2162_v43 = vpop.f32.mrf.mxu1  ;;  %2678 = vmatmul.f32.gmra.mxu2 %v5209_v45 }
 0x3e2   : > { %v6817_v36 = vadd.f32 %v2385_v38, %v2273_v29  ;;  %v5216_v29 = vld [vmem:[%s6104_s28 + $0x460] sm:$0xff]  ;;  %v5219_v38 = vld [vmem:[%s6104_s28 + $0x478] sm:$0xff] }
 0x3e3   : > { %v2049_v32 = vpop.f32.mrf.mxu0 }
 0x3e4   : > { %v2050_v40 = vadd.f32 %v2049_v32, %v6597_v3  ;;  %2565 = vmatmul.f32.gmra.mxu1 %v5210_v1  ;;  %v2275_v47 = vpop.f32.mrf.mxu2 }
 0x3e5   : > { %2791 = vmatmul.f32.gmra.mxu3 %v5211_v60 }
 0x3e6   : > { %v2163_v20 = vadd.f32 %v2162_v43, %v2050_v40  ;;  %2452 = vmatmul.f32.gmra.mxu0 %v5208_v44  ;;  %v5218_v40 = vld [vmem:[%s6104_s28 + $0x468] sm:$0xff] }
 0x3e8   : > { %v2276_v31 = vadd.f32 %v2275_v47, %v2163_v20  ;;  %v2388_v56 = vpop.f32.mrf.mxu3  ;;  %v5220_v47 = vld [vmem:[%s6104_s28 + $0x4a0] sm:$0xff] }
 0x3e9   : > { %v2521_v5 = vpop.f32.mrf.mxu1  ;;  %2681 = vmatmul.f32.gmra.mxu2 %v5213_v2  ;;  %v531_v2 = vld [vmem:[#allocation5 + $0x90] sm:$0xff] }
 0x3ea   : > { %v6824_v54 = vadd.f32 %v2388_v56, %v2276_v31  ;;  %v5221_v31 = vld [vmem:[%s6104_s28 + $0x4b0] sm:$0xff]  ;;  %2854 = vmatpush.msra.mxu0 %v531_v2  ;;  %v5232_v2 = vld [vmem:[%s6104_s28 + $0x560] sm:$0xff] }
 0x3eb   : > { %v2408_v3 = vpop.f32.mrf.mxu0 }
 0x3ec   : > { %v2409_v58 = vadd.f32 %v2408_v3, %v6607_v63  ;;  %2568 = vmatmul.f32.gmra.mxu1 %v5214_v49  ;;  %v2634_v12 = vpop.f32.mrf.mxu2  ;;  %v727_v63 = vld [vmem:[#allocation5 + $0x6b0] sm:$0xff] }
 0x3ed   : > { %2794 = vmatmul.f32.gmra.mxu3 %v5215_v10  ;;  %v659_v3 = vld [vmem:[#allocation5 + $0x490] sm:$0xff] }
 0x3ee   : > { %2455 = vmatmul.f32.gmra.mxu0 %v5212_v21  ;;  %v2522_v33 = vadd.f32 %v2521_v5, %v2409_v58  ;;  %3192 = vmatpush.msra.mxu3 %v727_v63  ;;  %v5222_v58 = vld [vmem:[%s6104_s28 + $0x4a8] sm:$0xff]  ;;  %v5223_v5 = vld [vmem:[%s6104_s28 + $0x4b8] sm:$0xff] }
 0x3ef   : > { %3080 = vmatpush.msra.mxu2 %v659_v3 }
 0x3f0   : > { %v2635_v24 = vadd.f32 %v2634_v12, %v2522_v33  ;;  %v2747_v61 = vpop.f32.mrf.mxu3  ;;  %v595_v33 = vld [vmem:[#allocation5 + $0x290] sm:$0xff] }
 0x3f1   : > { %v2524_v27 = vpop.f32.mrf.mxu1  ;;  %2684 = vmatmul.f32.gmra.mxu2 %v5217_v30  ;;  %2967 = vmatpush.msra.mxu1 %v595_v33  ;;  %v5234_v33 = vld [vmem:[%s6104_s28 + $0x568] sm:$0xff] }
 0x3f2   : > { %v2748_v8 = vadd.f32 %v2747_v61, %v2635_v24  ;;  %v5224_v24 = vld [vmem:[%s6104_s28 + $0x4e0] sm:$0xff]  ;;  %v5227_v61 = vld [vmem:[%s6104_s28 + $0x4f8] sm:$0xff] }
 0x3f3   : > { %v2411_v18 = vpop.f32.mrf.mxu0 }
 0x3f4   : > { %v2412_v15 = vadd.f32 %v2411_v18, %v6614_v62  ;;  %4652 = vst [vmem:[%s6415_s20 + $0x8] sm:$0xff] %v2748_v8  ;;  %2571 = vmatmul.f32.gmra.mxu1 %v5218_v40  ;;  %v2637_v43 = vpop.f32.mrf.mxu2 }
 0x3f5   : > { %2797 = vmatmul.f32.gmra.mxu3 %v5219_v38  ;;  %v5228_v38 = vld [vmem:[%s6104_s28 + $0x520] sm:$0xff] }
 0x3f6   : > { %2458 = vmatmul.f32.gmra.mxu0 %v5216_v29  ;;  %v2525_v32 = vadd.f32 %v2524_v27, %v2412_v15  ;;  %v5226_v15 = vld [vmem:[%s6104_s28 + $0x4e8] sm:$0xff] }
 0x3f8   : > { %v2638_v20 = vadd.f32 %v2637_v43, %v2525_v32  ;;  %v2750_v45 = vpop.f32.mrf.mxu3  ;;  %v5229_v43 = vld [vmem:[%s6104_s28 + $0x530] sm:$0xff] }
 0x3f9   : > { %v2527_v60 = vpop.f32.mrf.mxu1  ;;  %2687 = vmatmul.f32.gmra.mxu2 %v5221_v31  ;;  %v591_v31 = vld [vmem:[#allocation5 + $0x270] sm:$0xff] }
 0x3fa   : > { %v2751_v1 = vadd.f32 %v2750_v45, %v2638_v20  ;;  %v655_v20 = vld [vmem:[#allocation5 + $0x470] sm:$0xff]  ;;  %v5231_v45 = vld [vmem:[%s6104_s28 + $0x538] sm:$0xff]  ;;  %2968 = vmatpush.msra.mxu1 %v591_v31 }
 0x3fb   : > { %v2414_v62 = vpop.f32.mrf.mxu0  ;;  %3081 = vmatpush.msra.mxu2 %v655_v20 }
 0x3fc   : > { %v2415_v44 = vadd.f32 %v2414_v62, %v6621_v48  ;;  %4656 = vst [vmem:[%s6415_s20 + $0x28] sm:$0xff] %v2751_v1  ;;  %2574 = vmatmul.f32.gmra.mxu1 %v5222_v58  ;;  %v2640_v21 = vpop.f32.mrf.mxu2  ;;  %v723_v48 = vld [vmem:[#allocation5 + $0x690] sm:$0xff] }
 0x3fd   : > { %2800 = vmatmul.f32.gmra.mxu3 %v5223_v5 }
 0x3fe   : > { %2461 = vmatmul.f32.gmra.mxu0 %v5220_v47  ;;  %v2528_v56 = vadd.f32 %v2527_v60, %v2415_v44  ;;  %3193 = vmatpush.msra.mxu3 %v723_v48  ;;  %v5230_v44 = vld [vmem:[%s6104_s28 + $0x528] sm:$0xff]  ;;  %v527_v60 = vld [vmem:[#allocation5 + $0x70] sm:$0xff] }
 0x3ff   : > { %2855 = vmatpush.msra.mxu0 %v527_v60  ;;  %v5233_v48 = vld [vmem:[%s6104_s28 + $0x570] sm:$0xff] }
 0x400   : > { %v2641_v13 = vadd.f32 %v2640_v21, %v2528_v56  ;;  %v2753_v12 = vpop.f32.mrf.mxu3 }
 0x401   : > { %v2530_v63 = vpop.f32.mrf.mxu1  ;;  %2690 = vmatmul.f32.gmra.mxu2 %v5225_v17 }
 0x402   : > { %v2754_v14 = vadd.f32 %v2753_v12, %v2641_v13 }
 0x403   : > { %v2417_v49 = vpop.f32.mrf.mxu0 }
 0x404   : > { %v2418_v10 = vadd.f32 %v2417_v49, %v6628_v34  ;;  %4660 = vst [vmem:[%s6415_s20 + $0x48] sm:$0xff] %v2754_v14  ;;  %2577 = vmatmul.f32.gmra.mxu1 %v5226_v15  ;;  %v2643_v8 = vpop.f32.mrf.mxu2  ;;  %v5235_v49 = vld [vmem:[%s6104_s28 + $0x578] sm:$0xff]  ;;  %v5237_v15 = vld [vmem:[%s6104_s28 + $0x5b0] sm:$0xff] }
 0x405   : > { %2803 = vmatmul.f32.gmra.mxu3 %v5227_v61  ;;  %v651_v61 = vld [vmem:[#allocation5 + $0x450] sm:$0xff] }
 0x406   : > { %2464 = vmatmul.f32.gmra.mxu0 %v5224_v24  ;;  %v2531_v18 = vadd.f32 %v2530_v63, %v2418_v10  ;;  %3082 = vmatpush.msra.mxu2 %v651_v61 }
 0x408   : > { %v2644_v27 = vadd.f32 %v2643_v8, %v2531_v18  ;;  %v2756_v30 = vpop.f32.mrf.mxu3  ;;  %v5236_v18 = vld [vmem:[%s6104_s28 + $0x5a0] sm:$0xff] }
 0x409   : > { %v2533_v40 = vpop.f32.mrf.mxu1  ;;  %2693 = vmatmul.f32.gmra.mxu2 %v5229_v43 }
 0x40a   : > { %v2757_v32 = vadd.f32 %v2756_v30, %v2644_v27  ;;  %v5238_v27 = vld [vmem:[%s6104_s28 + $0x5a8] sm:$0xff]  ;;  %v523_v30 = vld [vmem:[#allocation5 + $0x50] sm:$0xff] }
 0x40b   : > { %v2420_v34 = vpop.f32.mrf.mxu0  ;;  %2856 = vmatpush.msra.mxu0 %v523_v30  ;;  %v5251_v30 = vld [vmem:[%s6104_s28 + $0x678] sm:$0xff] }
 0x40c   : > { %v2421_v29 = vadd.f32 %v2420_v34, %v6635_v53  ;;  %4664 = vst [vmem:[%s6415_s20 + $0x68] sm:$0xff] %v2757_v32  ;;  %2580 = vmatmul.f32.gmra.mxu1 %v5230_v44  ;;  %v2646_v1 = vpop.f32.mrf.mxu2  ;;  %v719_v53 = vld [vmem:[#allocation5 + $0x670] sm:$0xff]  ;;  %v5239_v34 = vld [vmem:[%s6104_s28 + $0x5b8] sm:$0xff] }
 0x40d   : > { %2806 = vmatmul.f32.gmra.mxu3 %v5231_v45  ;;  %v5240_v45 = vld [vmem:[%s6104_s28 + $0x5e0] sm:$0xff] }
 0x40e   : > { %2467 = vmatmul.f32.gmra.mxu0 %v5228_v38  ;;  %v2534_v62 = vadd.f32 %v2533_v40, %v2421_v29  ;;  %3194 = vmatpush.msra.mxu3 %v719_v53  ;;  %v587_v40 = vld [vmem:[#allocation5 + $0x250] sm:$0xff]  ;;  %v5242_v53 = vld [vmem:[%s6104_s28 + $0x5e8] sm:$0xff] }
 0x40f   : > { %2969 = vmatpush.msra.mxu1 %v587_v40 }
 0x410   : > { %v2647_v47 = vadd.f32 %v2646_v1, %v2534_v62  ;;  %v2759_v58 = vpop.f32.mrf.mxu3  ;;  %v5241_v1 = vld [vmem:[%s6104_s28 + $0x5f0] sm:$0xff] }
 0x411   : > { %v2536_v21 = vpop.f32.mrf.mxu1  ;;  %2696 = vmatmul.f32.gmra.mxu2 %v5233_v48  ;;  %v5245_v48 = vld [vmem:[%s6104_s28 + $0x630] sm:$0xff] }
 0x412   : > { %v2760_v5 = vadd.f32 %v2759_v58, %v2647_v47  ;;  %v5243_v47 = vld [vmem:[%s6104_s28 + $0x5f8] sm:$0xff] }
 0x413   : > { %v2423_v3 = vpop.f32.mrf.mxu0 }
 0x414   : > { %v2424_v56 = vadd.f32 %v2423_v3, %v6642_v11  ;;  %4668 = vst [vmem:[%s6415_s20 + $0x88] sm:$0xff] %v2760_v5  ;;  %2583 = vmatmul.f32.gmra.mxu1 %v5234_v33  ;;  %v2649_v10 = vpop.f32.mrf.mxu2 }
 0x415   : > { %2809 = vmatmul.f32.gmra.mxu3 %v5235_v49  ;;  %v5246_v49 = vld [vmem:[%s6104_s28 + $0x628] sm:$0xff] }
 0x416   : > { %2470 = vmatmul.f32.gmra.mxu0 %v5232_v2  ;;  %v2537_v13 = vadd.f32 %v2536_v21, %v2424_v56  ;;  %v5244_v2 = vld [vmem:[%s6104_s28 + $0x620] sm:$0xff] }
 0x418   : > { %v2650_v12 = vadd.f32 %v2649_v10, %v2537_v13  ;;  %v2762_v63 = vpop.f32.mrf.mxu3  ;;  %v647_v13 = vld [vmem:[#allocation5 + $0x430] sm:$0xff]  ;;  %v5247_v10 = vld [vmem:[%s6104_s28 + $0x638] sm:$0xff] }
 0x419   : > { %v2539_v17 = vpop.f32.mrf.mxu1  ;;  %2699 = vmatmul.f32.gmra.mxu2 %v5237_v15 }
 0x41a   : > { %v2763_v24 = vadd.f32 %v2762_v63, %v2650_v12  ;;  %3083 = vmatpush.msra.mxu2 %v647_v13  ;;  %v583_v63 = vld [vmem:[#allocation5 + $0x230] sm:$0xff] }
 0x41b   : > { %v2426_v11 = vpop.f32.mrf.mxu0  ;;  %2970 = vmatpush.msra.mxu1 %v583_v63  ;;  %v5257_v13 = vld [vmem:[%s6104_s28 + $0x6f0] sm:$0xff] }
 0x41c   : > { %v2427_v14 = vadd.f32 %v2426_v11, %v6649_v28  ;;  %4672 = vst [vmem:[%s6415_s20 + $0xa8] sm:$0xff] %v2763_v24  ;;  %2586 = vmatmul.f32.gmra.mxu1 %v5238_v27  ;;  %v2652_v29 = vpop.f32.mrf.mxu2  ;;  %v715_v28 = vld [vmem:[#allocation5 + $0x650] sm:$0xff] }
 0x41d   : > { %2812 = vmatmul.f32.gmra.mxu3 %v5239_v34  ;;  %v519_v11 = vld [vmem:[#allocation5 + $0x30] sm:$0xff] }
 0x41e   : > { %2473 = vmatmul.f32.gmra.mxu0 %v5236_v18  ;;  %v2540_v8 = vadd.f32 %v2539_v17, %v2427_v14  ;;  %3195 = vmatpush.msra.mxu3 %v715_v28  ;;  %v5249_v27 = vld [vmem:[%s6104_s28 + $0x670] sm:$0xff] }
 0x41f   : > { %2857 = vmatpush.msra.mxu0 %v519_v11 }
 0x420   : > { %v2653_v32 = vadd.f32 %v2652_v29, %v2540_v8  ;;  %v2765_v20 = vpop.f32.mrf.mxu3  ;;  %v5248_v8 = vld [vmem:[%s6104_s28 + $0x660] sm:$0xff]  ;;  %v5250_v29 = vld [vmem:[%s6104_s28 + $0x668] sm:$0xff] }
 0x421   : > { %v2542_v44 = vpop.f32.mrf.mxu1  ;;  %2702 = vmatmul.f32.gmra.mxu2 %v5241_v1 }
 0x422   : > { %v2766_v62 = vadd.f32 %v2765_v20, %v2653_v32 }
 0x423   : > { %v2429_v38 = vpop.f32.mrf.mxu0 }
 0x424   : > { %v2430_v43 = vadd.f32 %v2429_v38, %v6656_v35  ;;  %4676 = vst [vmem:[%s6415_s20 + $0xc8] sm:$0xff] %v2766_v62  ;;  %2589 = vmatmul.f32.gmra.mxu1 %v5242_v53  ;;  %v2655_v31 = vpop.f32.mrf.mxu2  ;;  %v5252_v62 = vld [vmem:[%s6104_s28 + $0x6a0] sm:$0xff]  ;;  %v5255_v53 = vld [vmem:[%s6104_s28 + $0x6b8] sm:$0xff] }
 0x425   : > { %2815 = vmatmul.f32.gmra.mxu3 %v5243_v47 }
 0x426   : > { %2476 = vmatmul.f32.gmra.mxu0 %v5240_v45  ;;  %v2543_v60 = vadd.f32 %v2542_v44, %v2430_v43  ;;  %v5253_v44 = vld [vmem:[%s6104_s28 + $0x6b0] sm:$0xff] }
 0x427   : > { %v643_v45 = vld [vmem:[#allocation5 + $0x410] sm:$0xff] }
 0x428   : > { %v2656_v3 = vadd.f32 %v2655_v31, %v2543_v60  ;;  %v2768_v58 = vpop.f32.mrf.mxu3  ;;  %v5254_v60 = vld [vmem:[%s6104_s28 + $0x6a8] sm:$0xff]  ;;  %3084 = vmatpush.msra.mxu2 %v643_v45  ;;  %v515_v31 = vld [vmem:[#allocation5 + $0x10] sm:$0xff] }
 0x429   : > { %v2545_v21 = vpop.f32.mrf.mxu1  ;;  %2705 = vmatmul.f32.gmra.mxu2 %v5245_v48  ;;  %2858 = vmatpush.msra.mxu0 %v515_v31  ;;  %v5256_v48 = vld [vmem:[%s6104_s28 + $0x6e0] sm:$0xff]  ;;  %v5266_v45 = vld [vmem:[%s6104_s28 + $0x768] sm:$0xff] }
 0x42a   : > { %v2769_v5 = vadd.f32 %v2768_v58, %v2656_v3 }
 0x42b   : > { %v2432_v35 = vpop.f32.mrf.mxu0 }
 0x42c   : > { %v2433_v56 = vadd.f32 %v2432_v35, %v6663_v50  ;;  %4680 = vst [vmem:[%s6415_s20 + $0xe8] sm:$0xff] %v2769_v5  ;;  %2592 = vmatmul.f32.gmra.mxu1 %v5246_v49  ;;  %v2658_v12 = vpop.f32.mrf.mxu2  ;;  %v711_v50 = vld [vmem:[#allocation5 + $0x630] sm:$0xff]  ;;  %v5258_v49 = vld [vmem:[%s6104_s28 + $0x6e8] sm:$0xff] }
 0x42d   : > { %2818 = vmatmul.f32.gmra.mxu3 %v5247_v10  ;;  %v579_v35 = vld [vmem:[#allocation5 + $0x210] sm:$0xff]  ;;  %v5259_v10 = vld [vmem:[%s6104_s28 + $0x6f8] sm:$0xff] }
 0x42e   : > { %2479 = vmatmul.f32.gmra.mxu0 %v5244_v2  ;;  %v2546_v33 = vadd.f32 %v2545_v21, %v2433_v56  ;;  %3196 = vmatpush.msra.mxu3 %v711_v50 }
 0x42f   : > { %2971 = vmatpush.msra.mxu1 %v579_v35  ;;  %v5268_v35 = vld [vmem:[%s6104_s28 + $0x7a0] sm:$0xff] }
 0x430   : > { %v2659_v14 = vadd.f32 %v2658_v12, %v2546_v33  ;;  %v2771_v18 = vpop.f32.mrf.mxu3 }
 0x431   : > { %v2548_v61 = vpop.f32.mrf.mxu1  ;;  %2708 = vmatmul.f32.gmra.mxu2 %v5249_v27  ;;  %v5263_v27 = vld [vmem:[%s6104_s28 + $0x738] sm:$0xff] }
 0x432   : > { %v2772_v15 = vadd.f32 %v2771_v18, %v2659_v14  ;;  %v5261_v18 = vld [vmem:[%s6104_s28 + $0x730] sm:$0xff] }
 0x433   : > { %v2435_v24 = vpop.f32.mrf.mxu0 }
 0x434   : > { %v2436_v17 = vadd.f32 %v2435_v24, %v6670_v55  ;;  %4684 = vst [vmem:[%s6415_s20 + $0x108] sm:$0xff] %v2772_v15  ;;  %2595 = vmatmul.f32.gmra.mxu1 %v5250_v29  ;;  %v2661_v28 = vpop.f32.mrf.mxu2  ;;  %v959_v15 = vld [vmem:[#allocation5 + $0xdf0] sm:$0xff] }
 0x435   : > { %2821 = vmatmul.f32.gmra.mxu3 %v5251_v30  ;;  %3521 = vmatpush.msrb.mxu2 %v959_v15  ;;  %v831_v29 = vld [vmem:[#allocation5 + $0x9f0] sm:$0xff] }
 0x436   : > { %2482 = vmatmul.f32.gmra.mxu0 %v5248_v8  ;;  %v2549_v34 = vadd.f32 %v2548_v61, %v2436_v17  ;;  %v5260_v17 = vld [vmem:[%s6104_s28 + $0x720] sm:$0xff]  ;;  %v5262_v8 = vld [vmem:[%s6104_s28 + $0x728] sm:$0xff] }
 0x437   : > { %3295 = vmatpush.msrb.mxu0 %v831_v29 }
 0x438   : > { %v2662_v32 = vadd.f32 %v2661_v28, %v2549_v34  ;;  %v2774_v38 = vpop.f32.mrf.mxu3  ;;  %v895_v28 = vld [vmem:[#allocation5 + $0xbf0] sm:$0xff] }
 0x439   : > { %v2551_v20 = vpop.f32.mrf.mxu1  ;;  %2711 = vmatmul.f32.gmra.mxu2 %v5253_v44  ;;  %3408 = vmatpush.msrb.mxu1 %v895_v28  ;;  %v951_v28 = vld [vmem:[#allocation5 + $0xdb0] sm:$0xff] }
 0x43a   : > { %v2775_v43 = vadd.f32 %v2774_v38, %v2662_v32 }
 0x43b   : > { %v2438_v55 = vpop.f32.mrf.mxu0 }
 0x43c   : > { %v2439_v40 = vadd.f32 %v2438_v55, %v6677_v41  ;;  %4688 = vst [vmem:[%s6415_s20 + $0x128] sm:$0xff] %v2775_v43  ;;  %2598 = vmatmul.f32.gmra.mxu1 %v5254_v60  ;;  %v2664_v47 = vpop.f32.mrf.mxu2  ;;  %v707_v41 = vld [vmem:[#allocation5 + $0x610] sm:$0xff] }
 0x43d   : > { %2824 = vmatmul.f32.gmra.mxu3 %v5255_v53 }
 0x43e   : > { %2485 = vmatmul.f32.gmra.mxu0 %v5252_v62  ;;  %v2552_v1 = vadd.f32 %v2551_v20, %v2439_v40  ;;  %3197 = vmatpush.msra.mxu3 %v707_v41  ;;  %v5264_v20 = vld [vmem:[%s6104_s28 + $0x760] sm:$0xff]  ;;  %v5265_v62 = vld [vmem:[%s6104_s28 + $0x770] sm:$0xff] }
 0x440   : > { %v2665_v3 = vadd.f32 %v2664_v47, %v2552_v1  ;;  %v2777_v5 = vpop.f32.mrf.mxu3  ;;  %v5267_v1 = vld [vmem:[%s6104_s28 + $0x778] sm:$0xff] }
 0x441   : > { %v2554_v2 = vpop.f32.mrf.mxu1  ;;  %2714 = vmatmul.f32.gmra.mxu2 %v5257_v13  ;;  %v827_v13 = vld [vmem:[#allocation5 + $0x9d0] sm:$0xff] }
 0x442   : > { %v2778_v21 = vadd.f32 %v2777_v5, %v2665_v3  ;;  %3296 = vmatpush.msrb.mxu0 %v827_v13  ;;  %v5285_v13 = vld [vmem:[%s6104_s28 + $0x90] sm:$0xff] }
 0x443   : > { %v2441_v56 = vpop.f32.mrf.mxu0 }
 0x444   : > { %v2442_v58 = vadd.f32 %v2441_v56, %v6684_v23  ;;  %4692 = vst [vmem:[%s6415_s20 + $0x148] sm:$0xff] %v2778_v21  ;;  %2601 = vmatmul.f32.gmra.mxu1 %v5258_v49  ;;  %v2667_v12 = vpop.f32.mrf.mxu2  ;;  %v5269_v56 = vld [vmem:[%s6104_s28 + $0x7b0] sm:$0xff]  ;;  %v5270_v21 = vld [vmem:[%s6104_s28 + $0x7a8] sm:$0xff] }
 0x445   : > { %2827 = vmatmul.f32.gmra.mxu3 %v5259_v10  ;;  %v891_v49 = vld [vmem:[#allocation5 + $0xbd0] sm:$0xff] }
 0x446   : > { %2488 = vmatmul.f32.gmra.mxu0 %v5256_v48  ;;  %v2555_v33 = vadd.f32 %v2554_v2, %v2442_v58  ;;  %v955_v58 = vld [vmem:[#allocation5 + $0xdd0] sm:$0xff]  ;;  %v5271_v2 = vld [vmem:[%s6104_s28 + $0x7b8] sm:$0xff]  ;;  %3409 = vmatpush.msrb.mxu1 %v891_v49  ;;  %v5286_v49 = vld [vmem:[%s6104_s28 + $0x88] sm:$0xff] }
 0x447   : > { %3522 = vmatpush.msrb.mxu2 %v955_v58 }
 0x448   : > { %v2668_v11 = vadd.f32 %v2667_v12, %v2555_v33  ;;  %v2780_v14 = vpop.f32.mrf.mxu3 }
 0x449   : > { %v2557_v24 = vpop.f32.mrf.mxu1  ;;  %2717 = vmatmul.f32.gmra.mxu2 %v5261_v18  ;;  %v5275_v18 = vld [vmem:[%s6104_s28 + $0x7f8] sm:$0xff] }
 0x44a   : > { %v2781_v63 = vadd.f32 %v2780_v14, %v2668_v11  ;;  %v5272_v14 = vld [vmem:[%s6104_s28 + $0x7e0] sm:$0xff]  ;;  %3523 = vmatpush.msrb.mxu2 %v951_v28 }
 0x44b   : > { %v2444_v23 = vpop.f32.mrf.mxu0 }
 0x44c   : > { %v2445_v50 = vadd.f32 %v2444_v23, %v6691_v37  ;;  %4696 = vst [vmem:[%s6415_s20 + $0x168] sm:$0xff] %v2781_v63  ;;  %2604 = vmatmul.f32.gmra.mxu1 %v5262_v8  ;;  %v2670_v34 = vpop.f32.mrf.mxu2  ;;  %v1023_v37 = vld [vmem:[#allocation5 + $0xff0] sm:$0xff] }
 0x44d   : > { %2830 = vmatmul.f32.gmra.mxu3 %v5263_v27  ;;  %v5273_v63 = vld [vmem:[%s6104_s28 + $0x7f0] sm:$0xff] }
 0x44e   : > { %2491 = vmatmul.f32.gmra.mxu0 %v5260_v17  ;;  %v2558_v61 = vadd.f32 %v2557_v24, %v2445_v50  ;;  %3634 = vmatpush.msrb.mxu3 %v1023_v37  ;;  %v5274_v17 = vld [vmem:[%s6104_s28 + $0x7e8] sm:$0xff]  ;;  %v5276_v37 = vld [vmem:[%s6104_s28] sm:$0xff] }
 0x450   : > { %v2671_v30 = vadd.f32 %v2670_v34, %v2558_v61  ;;  %v2783_v40 = vpop.f32.mrf.mxu3 }
 0x451   : > { %v2560_v43 = vpop.f32.mrf.mxu1  ;;  %2720 = vmatmul.f32.gmra.mxu2 %v5265_v62  ;;  %v887_v62 = vld [vmem:[#allocation5 + $0xbb0] sm:$0xff] }
 0x452   : > { %v2784_v38 = vadd.f32 %v2783_v40, %v2671_v30  ;;  %v5277_v30 = vld [vmem:[%s6104_s28 + $0x10] sm:$0xff]  ;;  %v5279_v40 = vld [vmem:[%s6104_s28 + $0x18] sm:$0xff]  ;;  %3410 = vmatpush.msrb.mxu1 %v887_v62 }
 0x453   : > { %v2447_v32 = vpop.f32.mrf.mxu0 }
 0x454   : > { %v2448_v55 = vadd.f32 %v2447_v32, %v6698_v57  ;;  %4700 = vst [vmem:[%s6415_s20 + $0x188] sm:$0xff] %v2784_v38  ;;  %2607 = vmatmul.f32.gmra.mxu1 %v5266_v45  ;;  %v2673_v60 = vpop.f32.mrf.mxu2 }
 0x455   : > { %2833 = vmatmul.f32.gmra.mxu3 %v5267_v1 }
 0x456   : > { %2494 = vmatmul.f32.gmra.mxu0 %v5264_v20  ;;  %v2561_v44 = vadd.f32 %v2560_v43, %v2448_v55  ;;  %v5278_v55 = vld [vmem:[%s6104_s28 + $0x8] sm:$0xff]  ;;  %v823_v43 = vld [vmem:[#allocation5 + $0x9b0] sm:$0xff] }
 0x457   : > { %3297 = vmatpush.msrb.mxu0 %v823_v43 }
 0x458   : > { %v2674_v53 = vadd.f32 %v2673_v60, %v2561_v44  ;;  %v2786_v31 = vpop.f32.mrf.mxu3 }
 0x459   : > { %v2563_v3 = vpop.f32.mrf.mxu1  ;;  %2723 = vmatmul.f32.gmra.mxu2 %v5269_v56 }
 0x45a   : > { %v2787_v41 = vadd.f32 %v2786_v31, %v2674_v53 }
 0x45b   : > { %v2450_v57 = vpop.f32.mrf.mxu0 }
 0x45c   : > { %v2451_v47 = vadd.f32 %v2450_v57, %v6705_v25  ;;  %4704 = vst [vmem:[%s6415_s20 + $0x1a8] sm:$0xff] %v2787_v41  ;;  %2610 = vmatmul.f32.gmra.mxu1 %v5270_v21  ;;  %v2676_v48 = vpop.f32.mrf.mxu2  ;;  %v1019_v25 = vld [vmem:[#allocation5 + $0xfd0] sm:$0xff]  ;;  %v5280_v57 = vld [vmem:[%s6104_s28 + $0x40] sm:$0xff]  ;;  %v5282_v41 = vld [vmem:[%s6104_s28 + $0x48] sm:$0xff] }
 0x45d   : > { %2836 = vmatmul.f32.gmra.mxu3 %v5271_v2 }
 0x45e   : > { %2497 = vmatmul.f32.gmra.mxu0 %v5268_v35  ;;  %v2564_v5 = vadd.f32 %v2563_v3, %v2451_v47  ;;  %3635 = vmatpush.msrb.mxu3 %v1019_v25  ;;  %v5281_v47 = vld [vmem:[%s6104_s28 + $0x50] sm:$0xff]  ;;  %v5283_v3 = vld [vmem:[%s6104_s28 + $0x58] sm:$0xff] }
 0x45f   : > { %v947_v25 = vld [vmem:[#allocation5 + $0xd90] sm:$0xff] }
 0x460   : > { %v2677_v33 = vadd.f32 %v2676_v48, %v2564_v5  ;;  %v2789_v11 = vpop.f32.mrf.mxu3  ;;  %v5284_v48 = vld [vmem:[%s6104_s28 + $0x80] sm:$0xff]  ;;  %3524 = vmatpush.msrb.mxu2 %v947_v25 }
 0x461   : > { %v2566_v50 = vpop.f32.mrf.mxu1  ;;  %2726 = vmatmul.f32.gmra.mxu2 %v5273_v63  ;;  %v5300_v25 = vld [vmem:[%s6104_s28 + $0x180] sm:$0xff] }
 0x462   : > { %v2790_v23 = vadd.f32 %v2789_v11, %v2677_v33  ;;  %v819_v11 = vld [vmem:[#allocation5 + $0x990] sm:$0xff] }
 0x463   : > { %v2453_v10 = vpop.f32.mrf.mxu0  ;;  %3298 = vmatpush.msrb.mxu0 %v819_v11  ;;  %v5303_v11 = vld [vmem:[%s6104_s28 + $0x198] sm:$0xff] }
 0x464   : > { %v2454_v12 = vadd.f32 %v2453_v10, %v6712_v26  ;;  %4708 = vst [vmem:[%s6415_s20 + $0x1c8] sm:$0xff] %v2790_v23  ;;  %2613 = vmatmul.f32.gmra.mxu1 %v5274_v17  ;;  %v2679_v15 = vpop.f32.mrf.mxu2  ;;  %v5287_v10 = vld [vmem:[%s6104_s28 + $0x98] sm:$0xff] }
 0x465   : > { %2839 = vmatmul.f32.gmra.mxu3 %v5275_v18 }
 0x466   : > { %2500 = vmatmul.f32.gmra.mxu0 %v5272_v14  ;;  %v2567_v24 = vadd.f32 %v2566_v50, %v2454_v12  ;;  %v883_v50 = vld [vmem:[#allocation5 + $0xb90] sm:$0xff] }
 0x467   : > { %3411 = vmatpush.msrb.mxu1 %v883_v50 }
 0x468   : > { %v2680_v61 = vadd.f32 %v2679_v15, %v2567_v24  ;;  %v2792_v27 = vpop.f32.mrf.mxu3  ;;  %v5288_v15 = vld [vmem:[%s6104_s28 + $0xc0] sm:$0xff] }
 0x469   : > { %v2569_v29 = vpop.f32.mrf.mxu1  ;;  %3085 = vmatmul.f32.vlgmr.msra.gmra.mxu2 %v5277_v30 }
 0x46a   : > { %v2793_v34 = vadd.f32 %v2792_v27, %v2680_v61  ;;  %v5289_v61 = vld [vmem:[%s6104_s28 + $0xd0] sm:$0xff]  ;;  %v5291_v27 = vld [vmem:[%s6104_s28 + $0xd8] sm:$0xff] }
 0x46b   : > { %v2456_v26 = vpop.f32.mrf.mxu0 }
 0x46c   : > { %v2457_v8 = vadd.f32 %v2456_v26, %v6719_v9  ;;  %4712 = vst [vmem:[%s6415_s20 + $0x1e8] sm:$0xff] %v2793_v34  ;;  %2972 = vmatmul.f32.vlgmr.msra.gmra.mxu1 %v5278_v55  ;;  %v2682_v38 = vpop.f32.mrf.mxu2  ;;  %v1015_v9 = vld [vmem:[#allocation5 + $0xfb0] sm:$0xff]  ;;  %v5292_v55 = vld [vmem:[%s6104_s28 + $0x100] sm:$0xff] }
 0x46d   : > { %3198 = vmatmul.f32.vlgmr.msra.gmra.mxu3 %v5279_v40  ;;  %v5293_v40 = vld [vmem:[%s6104_s28 + $0x110] sm:$0xff] }
 0x46e   : > { %2859 = vmatmul.f32.vlgmr.msra.gmra.mxu0 %v5276_v37  ;;  %v2570_v32 = vadd.f32 %v2569_v29, %v2457_v8  ;;  %3636 = vmatpush.msrb.mxu3 %v1015_v9  ;;  %v5290_v8 = vld [vmem:[%s6104_s28 + $0xc8] sm:$0xff] }
 0x46f   : > { %v5294_v9 = vld [vmem:[%s6104_s28 + $0x108] sm:$0xff] }
 0x470   : > { %v2683_v20 = vadd.f32 %v2682_v38, %v2570_v32  ;;  %v2795_v1 = vpop.f32.mrf.mxu3  ;;  %v943_v38 = vld [vmem:[#allocation5 + $0xd70] sm:$0xff] }
 0x471   : > { %v2572_v53 = vpop.f32.mrf.mxu1  ;;  %3088 = vmatmul.f32.gmra.mxu2 %v5281_v47 }
 0x472   : > { %v2796_v60 = vadd.f32 %v2795_v1, %v2683_v20  ;;  %3525 = vmatpush.msrb.mxu2 %v943_v38  ;;  %v5295_v20 = vld [vmem:[%s6104_s28 + $0x118] sm:$0xff]  ;;  %v879_v1 = vld [vmem:[#allocation5 + $0xb70] sm:$0xff] }
 0x473   : > { %v2459_v44 = vpop.f32.mrf.mxu0  ;;  %3412 = vmatpush.msrb.mxu1 %v879_v1  ;;  %v935_v38 = vld [vmem:[#allocation5 + $0xd30] sm:$0xff] }
 0x474   : > { %v2460_v45 = vadd.f32 %v2459_v44, %v6726_v19  ;;  %4716 = vst [vmem:[%s6415_s20 + $0x208] sm:$0xff] %v2796_v60  ;;  %2975 = vmatmul.f32.gmra.mxu1 %v5282_v41  ;;  %v2685_v35 = vpop.f32.mrf.mxu2  ;;  %v815_v44 = vld [vmem:[#allocation5 + $0x970] sm:$0xff]  ;;  %v5296_v41 = vld [vmem:[%s6104_s28 + $0x140] sm:$0xff] }
 0x475   : > { %3201 = vmatmul.f32.gmra.mxu3 %v5283_v3  ;;  %3299 = vmatpush.msrb.mxu0 %v815_v44  ;;  %v5297_v3 = vld [vmem:[%s6104_s28 + $0x150] sm:$0xff] }
 0x476   : > { %2862 = vmatmul.f32.gmra.mxu0 %v5280_v57  ;;  %v2573_v31 = vadd.f32 %v2572_v53, %v2460_v45  ;;  %v807_v44 = vld [vmem:[#allocation5 + $0x930] sm:$0xff] }
 0x478   : > { %v2686_v56 = vadd.f32 %v2685_v35, %v2573_v31  ;;  %v2798_v5 = vpop.f32.mrf.mxu3 }
 0x479   : > { %v2575_v2 = vpop.f32.mrf.mxu1  ;;  %3091 = vmatmul.f32.gmra.mxu2 %v5285_v13 }
 0x47a   : > { %v2799_v21 = vadd.f32 %v2798_v5, %v2686_v56  ;;  %v5298_v56 = vld [vmem:[%s6104_s28 + $0x148] sm:$0xff] }
 0x47b   : > { %v2462_v19 = vpop.f32.mrf.mxu0 }
 0x47c   : > { %v2463_v58 = vadd.f32 %v2462_v19, %v6733_v52  ;;  %4720 = vst [vmem:[%s6415_s20 + $0x228] sm:$0xff] %v2799_v21  ;;  %2978 = vmatmul.f32.gmra.mxu1 %v5286_v49  ;;  %v2688_v12 = vpop.f32.mrf.mxu2  ;;  %v1011_v52 = vld [vmem:[#allocation5 + $0xf90] sm:$0xff]  ;;  %v5299_v19 = vld [vmem:[%s6104_s28 + $0x158] sm:$0xff] }
 0x47d   : > { %3204 = vmatmul.f32.gmra.mxu3 %v5287_v10  ;;  %v939_v49 = vld [vmem:[#allocation5 + $0xd50] sm:$0xff] }
 0x47e   : > { %2865 = vmatmul.f32.gmra.mxu0 %v5284_v48  ;;  %v2576_v33 = vadd.f32 %v2575_v2, %v2463_v58  ;;  %3637 = vmatpush.msrb.mxu3 %v1011_v52 }
 0x47f   : > { %3526 = vmatpush.msrb.mxu2 %v939_v49  ;;  %v5318_v49 = vld [vmem:[%s6104_s28 + $0x288] sm:$0xff] }
 0x480   : > { %v2689_v23 = vadd.f32 %v2688_v12, %v2576_v33  ;;  %v2801_v24 = vpop.f32.mrf.mxu3  ;;  %v5301_v33 = vld [vmem:[%s6104_s28 + $0x190] sm:$0xff]  ;;  %v5302_v12 = vld [vmem:[%s6104_s28 + $0x188] sm:$0xff] }
 0x481   : > { %v2578_v18 = vpop.f32.mrf.mxu1  ;;  %3094 = vmatmul.f32.gmra.mxu2 %v5289_v61  ;;  %v5304_v61 = vld [vmem:[%s6104_s28 + $0x1c0] sm:$0xff] }
 0x482   : > { %v2802_v17 = vadd.f32 %v2801_v24, %v2689_v23  ;;  %v811_v23 = vld [vmem:[#allocation5 + $0x950] sm:$0xff]  ;;  %3527 = vmatpush.msrb.mxu2 %v935_v38 }
 0x483   : > { %v2465_v14 = vpop.f32.mrf.mxu0  ;;  %3300 = vmatpush.msrb.mxu0 %v811_v23  ;;  %v867_v23 = vld [vmem:[#allocation5 + $0xb10] sm:$0xff] }
 0x484   : > { %v2466_v63 = vadd.f32 %v2465_v14, %v6740_v42  ;;  %4724 = vst [vmem:[%s6415_s20 + $0x248] sm:$0xff] %v2802_v17  ;;  %2981 = vmatmul.f32.gmra.mxu1 %v5290_v8  ;;  %v2691_v34 = vpop.f32.mrf.mxu2  ;;  %v875_v14 = vld [vmem:[#allocation5 + $0xb50] sm:$0xff] }
 0x485   : > { %3207 = vmatmul.f32.gmra.mxu3 %v5291_v27  ;;  %3413 = vmatpush.msrb.mxu1 %v875_v14  ;;  %v5306_v27 = vld [vmem:[%s6104_s28 + $0x1c8] sm:$0xff] }
 0x486   : > { %2868 = vmatmul.f32.gmra.mxu0 %v5288_v15  ;;  %v2579_v26 = vadd.f32 %v2578_v18, %v2466_v63 }
 0x487   : > { %3301 = vmatpush.msrb.mxu0 %v807_v44 }
 0x488   : > { %v2692_v29 = vadd.f32 %v2691_v34, %v2579_v26  ;;  %v2804_v30 = vpop.f32.mrf.mxu3  ;;  %v5305_v26 = vld [vmem:[%s6104_s28 + $0x1d0] sm:$0xff]  ;;  %v5307_v34 = vld [vmem:[%s6104_s28 + $0x1d8] sm:$0xff] }
 0x489   : > { %v2581_v32 = vpop.f32.mrf.mxu1  ;;  %3097 = vmatmul.f32.gmra.mxu2 %v5293_v40  ;;  %v5309_v40 = vld [vmem:[%s6104_s28 + $0x210] sm:$0xff] }
 0x48a   : > { %v2805_v28 = vadd.f32 %v2804_v30, %v2692_v29 }
 0x48b   : > { %v2468_v42 = vpop.f32.mrf.mxu0 }
 0x48c   : > { %v2469_v37 = vadd.f32 %v2468_v42, %v6747_v0  ;;  %4728 = vst [vmem:[%s6415_s20 + $0x268] sm:$0xff] %v2805_v28  ;;  %2984 = vmatmul.f32.gmra.mxu1 %v5294_v9  ;;  %v2694_v62 = vpop.f32.mrf.mxu2  ;;  %v1007_v0 = vld [vmem:[#allocation5 + $0xf70] sm:$0xff]  ;;  %v5310_v9 = vld [vmem:[%s6104_s28 + $0x208] sm:$0xff] }
 0x48d   : > { %3210 = vmatmul.f32.gmra.mxu3 %v5295_v20  ;;  %v5311_v20 = vld [vmem:[%s6104_s28 + $0x218] sm:$0xff] }
 0x48e   : > { %2871 = vmatmul.f32.gmra.mxu0 %v5292_v55  ;;  %v2582_v43 = vadd.f32 %v2581_v32, %v2469_v37  ;;  %3638 = vmatpush.msrb.mxu3 %v1007_v0  ;;  %v5308_v55 = vld [vmem:[%s6104_s28 + $0x200] sm:$0xff] }
 0x490   : > { %v2695_v45 = vadd.f32 %v2694_v62, %v2582_v43  ;;  %v2807_v57 = vpop.f32.mrf.mxu3 }
 0x491   : > { %v2584_v31 = vpop.f32.mrf.mxu1  ;;  %3100 = vmatmul.f32.gmra.mxu2 %v5297_v3 }
 0x492   : > { %v2808_v47 = vadd.f32 %v2807_v57, %v2695_v45  ;;  %v871_v45 = vld [vmem:[#allocation5 + $0xb30] sm:$0xff] }
 0x493   : > { %v2471_v60 = vpop.f32.mrf.mxu0  ;;  %3414 = vmatpush.msrb.mxu1 %v871_v45 }
 0x494   : > { %v2472_v53 = vadd.f32 %v2471_v60, %v6754_v16  ;;  %4732 = vst [vmem:[%s6415_s20 + $0x288] sm:$0xff] %v2808_v47  ;;  %2987 = vmatmul.f32.gmra.mxu1 %v5298_v56  ;;  %v2697_v58 = vpop.f32.mrf.mxu2  ;;  %v5315_v56 = vld [vmem:[%s6104_s28 + $0x258] sm:$0xff] }
 0x495   : > { %3213 = vmatmul.f32.gmra.mxu3 %v5299_v19  ;;  %3415 = vmatpush.msrb.mxu1 %v867_v23  ;;  %v5337_v23 = vld [vmem:[%s6104_s28 + $0x3d0] sm:$0xff] }
 0x496   : > { %2874 = vmatmul.f32.gmra.mxu0 %v5296_v41  ;;  %v2585_v35 = vadd.f32 %v2584_v31, %v2472_v53  ;;  %v5312_v31 = vld [vmem:[%s6104_s28 + $0x240] sm:$0xff]  ;;  %v5313_v41 = vld [vmem:[%s6104_s28 + $0x250] sm:$0xff] }
 0x498   : > { %v2698_v5 = vadd.f32 %v2697_v58, %v2585_v35  ;;  %v2810_v2 = vpop.f32.mrf.mxu3  ;;  %v5314_v35 = vld [vmem:[%s6104_s28 + $0x248] sm:$0xff] }
 0x499   : > { %v2587_v13 = vpop.f32.mrf.mxu1  ;;  %3103 = vmatmul.f32.gmra.mxu2 %v5301_v33 }
 0x49a   : > { %v2811_v48 = vadd.f32 %v2810_v2, %v2698_v5 }
 0x49b   : > { %v2474_v16 = vpop.f32.mrf.mxu0 }
 0x49c   : > { %v2475_v21 = vadd.f32 %v2474_v16, %v6761_v7  ;;  %4736 = vst [vmem:[%s6415_s20 + $0x2a8] sm:$0xff] %v2811_v48  ;;  %2990 = vmatmul.f32.gmra.mxu1 %v5302_v12  ;;  %v2700_v52 = vpop.f32.mrf.mxu2  ;;  %v1003_v7 = vld [vmem:[#allocation5 + $0xf50] sm:$0xff]  ;;  %v5316_v48 = vld [vmem:[%s6104_s28 + $0x280] sm:$0xff] }
 0x49d   : > { %3216 = vmatmul.f32.gmra.mxu3 %v5303_v11  ;;  %v803_v11 = vld [vmem:[#allocation5 + $0x910] sm:$0xff] }
 0x49e   : > { %2877 = vmatmul.f32.gmra.mxu0 %v5300_v25  ;;  %v2588_v10 = vadd.f32 %v2587_v13, %v2475_v21  ;;  %3639 = vmatpush.msrb.mxu3 %v1003_v7  ;;  %v5317_v13 = vld [vmem:[%s6104_s28 + $0x290] sm:$0xff] }
 0x49f   : > { %v931_v25 = vld [vmem:[#allocation5 + $0xd10] sm:$0xff]  ;;  %3302 = vmatpush.msrb.mxu0 %v803_v11 }
 0x4a0   : > { %v2701_v50 = vadd.f32 %v2700_v52, %v2588_v10  ;;  %v2813_v17 = vpop.f32.mrf.mxu3  ;;  %3528 = vmatpush.msrb.mxu2 %v931_v25  ;;  %v5319_v10 = vld [vmem:[%s6104_s28 + $0x298] sm:$0xff] }
 0x4a1   : > { %v2590_v15 = vpop.f32.mrf.mxu1  ;;  %3106 = vmatmul.f32.gmra.mxu2 %v5305_v26  ;;  %v5323_v26 = vld [vmem:[%s6104_s28 + $0x2d8] sm:$0xff] }
 0x4a2   : > { %v2814_v18 = vadd.f32 %v2813_v17, %v2701_v50  ;;  %v5320_v17 = vld [vmem:[%s6104_s28 + $0x2c0] sm:$0xff] }
 0x4a3   : > { %v2477_v63 = vpop.f32.mrf.mxu0 }
 0x4a4   : > { %v2478_v24 = vadd.f32 %v2477_v63, %v6768_v59  ;;  %4740 = vst [vmem:[%s6415_s20 + $0x2c8] sm:$0xff] %v2814_v18  ;;  %2993 = vmatmul.f32.gmra.mxu1 %v5306_v27  ;;  %v2703_v29 = vpop.f32.mrf.mxu2  ;;  %v5321_v18 = vld [vmem:[%s6104_s28 + $0x2d0] sm:$0xff] }
 0x4a5   : > { %3219 = vmatmul.f32.gmra.mxu3 %v5307_v34 }
 0x4a6   : > { %2880 = vmatmul.f32.gmra.mxu0 %v5304_v61  ;;  %v2591_v8 = vadd.f32 %v2590_v15, %v2478_v24  ;;  %v5322_v61 = vld [vmem:[%s6104_s28 + $0x2c8] sm:$0xff] }
 0x4a8   : > { %v2704_v42 = vadd.f32 %v2703_v29, %v2591_v8  ;;  %v2816_v30 = vpop.f32.mrf.mxu3 }
 0x4a9   : > { %v2593_v32 = vpop.f32.mrf.mxu1  ;;  %3109 = vmatmul.f32.gmra.mxu2 %v5309_v40  ;;  %v5327_v40 = vld [vmem:[%s6104_s28 + $0x318] sm:$0xff] }
 0x4aa   : > { %v2817_v28 = vadd.f32 %v2816_v30, %v2704_v42  ;;  %v5325_v30 = vld [vmem:[%s6104_s28 + $0x310] sm:$0xff] }
 0x4ab   : > { %v2480_v59 = vpop.f32.mrf.mxu0 }
 0x4ac   : > { %v2481_v37 = vadd.f32 %v2480_v59, %v6775_v22  ;;  %4744 = vst [vmem:[%s6415_s20 + $0x2e8] sm:$0xff] %v2817_v28  ;;  %2996 = vmatmul.f32.gmra.mxu1 %v5310_v9  ;;  %v2706_v62 = vpop.f32.mrf.mxu2  ;;  %v999_v22 = vld [vmem:[#allocation5 + $0xf30] sm:$0xff] }
 0x4ad   : > { %3222 = vmatmul.f32.gmra.mxu3 %v5311_v20  ;;  %v927_v28 = vld [vmem:[#allocation5 + $0xcf0] sm:$0xff] }
 0x4ae   : > { %2883 = vmatmul.f32.gmra.mxu0 %v5308_v55  ;;  %v2594_v43 = vadd.f32 %v2593_v32, %v2481_v37  ;;  %3640 = vmatpush.msrb.mxu3 %v999_v22  ;;  %v5324_v37 = vld [vmem:[%s6104_s28 + $0x300] sm:$0xff]  ;;  %v5326_v55 = vld [vmem:[%s6104_s28 + $0x308] sm:$0xff]  ;;  %v863_v20 = vld [vmem:[#allocation5 + $0xaf0] sm:$0xff] }
 0x4af   : > { %3529 = vmatpush.msrb.mxu2 %v927_v28  ;;  %3416 = vmatpush.msrb.mxu1 %v863_v20  ;;  %v983_v28 = vld [vmem:[#allocation5 + $0xeb0] sm:$0xff] }
 0x4b0   : > { %v2707_v0 = vadd.f32 %v2706_v62, %v2594_v43  ;;  %v2819_v53 = vpop.f32.mrf.mxu3  ;;  %v799_v43 = vld [vmem:[#allocation5 + $0x8f0] sm:$0xff] }
 0x4b1   : > { %v2596_v47 = vpop.f32.mrf.mxu1  ;;  %3112 = vmatmul.f32.gmra.mxu2 %v5313_v41  ;;  %3303 = vmatpush.msrb.mxu0 %v799_v43 }
 0x4b2   : > { %v2820_v57 = vadd.f32 %v2819_v53, %v2707_v0 }
 0x4b3   : > { %v2483_v1 = vpop.f32.mrf.mxu0 }
 0x4b4   : > { %v2484_v60 = vadd.f32 %v2483_v1, %v6782_v39  ;;  %4748 = vst [vmem:[%s6415_s20 + $0x308] sm:$0xff] %v2820_v57  ;;  %2999 = vmatmul.f32.gmra.mxu1 %v5314_v35  ;;  %v2709_v19 = vpop.f32.mrf.mxu2  ;;  %v5328_v1 = vld [vmem:[%s6104_s28 + $0x340] sm:$0xff]  ;;  %v5330_v57 = vld [vmem:[%s6104_s28 + $0x348] sm:$0xff] }
 0x4b5   : > { %3225 = vmatmul.f32.gmra.mxu3 %v5315_v56 }
 0x4b6   : > { %2886 = vmatmul.f32.gmra.mxu0 %v5312_v31  ;;  %v2597_v3 = vadd.f32 %v2596_v47, %v2484_v60  ;;  %v5329_v60 = vld [vmem:[%s6104_s28 + $0x350] sm:$0xff]  ;;  %v5331_v47 = vld [vmem:[%s6104_s28 + $0x358] sm:$0xff] }
 0x4b8   : > { %v2710_v58 = vadd.f32 %v2709_v19, %v2597_v3  ;;  %v2822_v16 = vpop.f32.mrf.mxu3 }
 0x4b9   : > { %v2599_v2 = vpop.f32.mrf.mxu1  ;;  %3115 = vmatmul.f32.gmra.mxu2 %v5317_v13  ;;  %v795_v13 = vld [vmem:[#allocation5 + $0x8d0] sm:$0xff] }
 0x4ba   : > { %v2823_v21 = vadd.f32 %v2822_v16, %v2710_v58  ;;  %v5332_v58 = vld [vmem:[%s6104_s28 + $0x380] sm:$0xff]  ;;  %3304 = vmatpush.msrb.mxu0 %v795_v13 }
 0x4bb   : > { %v2486_v39 = vpop.f32.mrf.mxu0 }
 0x4bc   : > { %v2487_v5 = vadd.f32 %v2486_v39, %v6789_v4  ;;  %4752 = vst [vmem:[%s6415_s20 + $0x328] sm:$0xff] %v2823_v21  ;;  %3002 = vmatmul.f32.gmra.mxu1 %v5318_v49  ;;  %v2712_v12 = vpop.f32.mrf.mxu2  ;;  %v995_v4 = vld [vmem:[#allocation5 + $0xf10] sm:$0xff]  ;;  %v5334_v21 = vld [vmem:[%s6104_s28 + $0x388] sm:$0xff] }
 0x4bd   : > { %3228 = vmatmul.f32.gmra.mxu3 %v5319_v10  ;;  %v5333_v39 = vld [vmem:[%s6104_s28 + $0x390] sm:$0xff] }
 0x4be   : > { %2889 = vmatmul.f32.gmra.mxu0 %v5316_v48  ;;  %v2600_v33 = vadd.f32 %v2599_v2, %v2487_v5  ;;  %3641 = vmatpush.msrb.mxu3 %v995_v4  ;;  %v923_v5 = vld [vmem:[#allocation5 + $0xcd0] sm:$0xff]  ;;  %v5335_v2 = vld [vmem:[%s6104_s28 + $0x398] sm:$0xff] }
 0x4bf   : > { %3530 = vmatpush.msrb.mxu2 %v923_v5  ;;  %v979_v5 = vld [vmem:[#allocation5 + $0xe90] sm:$0xff] }
 0x4c0   : > { %v2713_v52 = vadd.f32 %v2712_v12, %v2600_v33  ;;  %v2825_v14 = vpop.f32.mrf.mxu3  ;;  %v859_v33 = vld [vmem:[#allocation5 + $0xad0] sm:$0xff] }
 0x4c1   : > { %v2602_v24 = vpop.f32.mrf.mxu1  ;;  %3118 = vmatmul.f32.gmra.mxu2 %v5321_v18  ;;  %3417 = vmatpush.msrb.mxu1 %v859_v33 }
 0x4c2   : > { %v2826_v63 = vadd.f32 %v2825_v14, %v2713_v52  ;;  %v5336_v52 = vld [vmem:[%s6104_s28 + $0x3c0] sm:$0xff] }
 0x4c3   : > { %v2489_v7 = vpop.f32.mrf.mxu0  ;;  %v5339_v14 = vld [vmem:[#allocation7] sm:$0xf] }
 0x4c4   : > { %v2490_v50 = vadd.f32 %v2489_v7, %v6796_v51  ;;  %4756 = vst [vmem:[%s6415_s20 + $0x348] sm:$0xff] %v2826_v63  ;;  %3005 = vmatmul.f32.gmra.mxu1 %v5322_v61  ;;  %v2715_v8 = vpop.f32.mrf.mxu2  ;;  %v7015_v63 = vperm.slane %v5339_v14, 2 }
 0x4c5   : > { %3231 = vmatmul.f32.gmra.mxu3 %v5323_v26 }
 0x4c6   : > { %2892 = vmatmul.f32.gmra.mxu0 %v5320_v17  ;;  %v2603_v15 = vadd.f32 %v2602_v24, %v2490_v50  ;;  %v5338_v50 = vld [vmem:[%s6104_s28 + $0x3c8] sm:$0xff]  ;;  %v5340_v24 = vld [vmem:[%s6104_s28 + $0x3d8] sm:$0xff] }
 0x4c8   : > { %v2716_v27 = vadd.f32 %v2715_v8, %v2603_v15  ;;  %v2828_v29 = vpop.f32.mrf.mxu3 }
 0x4c9   : > { %v2605_v59 = vpop.f32.mrf.mxu1  ;;  %3121 = vmatmul.f32.gmra.mxu2 %v5325_v30  ;;  %v791_v30 = vld [vmem:[#allocation5 + $0x8b0] sm:$0xff] }
 0x4ca   : > { %v2829_v42 = vadd.f32 %v2828_v29, %v2716_v27  ;;  %v919_v29 = vld [vmem:[#allocation5 + $0xcb0] sm:$0xff]  ;;  %3305 = vmatpush.msrb.mxu0 %v791_v30 }
 0x4cb   : > { %v2492_v51 = vpop.f32.mrf.mxu0  ;;  %3531 = vmatpush.msrb.mxu2 %v919_v29  ;;  %v847_v29 = vld [vmem:[#allocation5 + $0xa70] sm:$0xff] }
 0x4cc   : > { %v2493_v34 = vadd.f32 %v2492_v51, %v6803_v46  ;;  %4760 = vst [vmem:[%s6415_s20 + $0x368] sm:$0xff] %v2829_v42  ;;  %3008 = vmatmul.f32.gmra.mxu1 %v5326_v55  ;;  %v2718_v38 = vpop.f32.mrf.mxu2  ;;  %v991_v46 = vld [vmem:[#allocation5 + $0xef0] sm:$0xff]  ;;  %v5341_v51 = vld [vmem:[%s6104_s28 + $0x400] sm:$0xff]  ;;  %v5343_v42 = vld [vmem:[%s6104_s28 + $0x408] sm:$0xff] }
 0x4cd   : > { %3234 = vmatmul.f32.gmra.mxu3 %v5327_v40  ;;  %v855_v55 = vld [vmem:[#allocation5 + $0xab0] sm:$0xff] }
 0x4ce   : > { %2895 = vmatmul.f32.gmra.mxu0 %v5324_v37  ;;  %v2606_v32 = vadd.f32 %v2605_v59, %v2493_v34  ;;  %3642 = vmatpush.msrb.mxu3 %v991_v46  ;;  %v5342_v34 = vld [vmem:[%s6104_s28 + $0x410] sm:$0xff]  ;;  %v5344_v59 = vld [vmem:[%s6104_s28 + $0x418] sm:$0xff] }
 0x4cf   : > { %3418 = vmatpush.msrb.mxu1 %v855_v55  ;;  %v5361_v55 = vld [vmem:[%s6104_s28 + $0x540] sm:$0xff] }
 0x4d0   : > { %v2719_v9 = vadd.f32 %v2718_v38, %v2606_v32  ;;  %v2831_v22 = vpop.f32.mrf.mxu3 }
 0x4d1   : > { %v2608_v45 = vpop.f32.mrf.mxu1  ;;  %3124 = vmatmul.f32.gmra.mxu2 %v5329_v60 }
 0x4d2   : > { %v2832_v0 = vadd.f32 %v2831_v22, %v2719_v9  ;;  %v5347_v22 = vld [vmem:[%s6104_s28 + $0x448] sm:$0xff] }
 0x4d3   : > { %v2495_v62 = vpop.f32.mrf.mxu0 }
 0x4d4   : > { %v2496_v44 = vadd.f32 %v2495_v62, %v6810_v6  ;;  %4764 = vst [vmem:[%s6415_s20 + $0x388] sm:$0xff] %v2832_v0  ;;  %3011 = vmatmul.f32.gmra.mxu1 %v5330_v57  ;;  %v2721_v31 = vpop.f32.mrf.mxu2  ;;  %v5345_v62 = vld [vmem:[%s6104_s28 + $0x440] sm:$0xff]  ;;  %v5348_v0 = vld [vmem:[%s6104_s28 + $0x458] sm:$0xff] }
 0x4d5   : > { %3237 = vmatmul.f32.gmra.mxu3 %v5331_v47 }
 0x4d6   : > { %2898 = vmatmul.f32.gmra.mxu0 %v5328_v1  ;;  %v2609_v53 = vadd.f32 %v2608_v45, %v2496_v44  ;;  %v5346_v44 = vld [vmem:[%s6104_s28 + $0x450] sm:$0xff] }
 0x4d8   : > { %v2722_v41 = vadd.f32 %v2721_v31, %v2609_v53  ;;  %v2834_v35 = vpop.f32.mrf.mxu3 }
 0x4d9   : > { %v2611_v19 = vpop.f32.mrf.mxu1  ;;  %3127 = vmatmul.f32.gmra.mxu2 %v5333_v39  ;;  %v787_v39 = vld [vmem:[#allocation5 + $0x890] sm:$0xff] }
 0x4da   : > { %v2835_v56 = vadd.f32 %v2834_v35, %v2722_v41  ;;  %v915_v35 = vld [vmem:[#allocation5 + $0xc90] sm:$0xff]  ;;  %3306 = vmatpush.msrb.mxu0 %v787_v39 }
 0x4db   : > { %v2498_v6 = vpop.f32.mrf.mxu0  ;;  %3532 = vmatpush.msrb.mxu2 %v915_v35  ;;  %v971_v35 = vld [vmem:[#allocation5 + $0xe50] sm:$0xff] }
 0x4dc   : > { %v2499_v3 = vadd.f32 %v2498_v6, %v6817_v36  ;;  %4768 = vst [vmem:[%s6415_s20 + $0x3a8] sm:$0xff] %v2835_v56  ;;  %3014 = vmatmul.f32.gmra.mxu1 %v5334_v21  ;;  %v2724_v48 = vpop.f32.mrf.mxu2  ;;  %v987_v36 = vld [vmem:[#allocation5 + $0xed0] sm:$0xff]  ;;  %v5349_v6 = vld [vmem:[%s6104_s28 + $0x480] sm:$0xff]  ;;  %v5351_v56 = vld [vmem:[%s6104_s28 + $0x488] sm:$0xff] }
 0x4dd   : > { %3240 = vmatmul.f32.gmra.mxu3 %v5335_v2  ;;  %v851_v21 = vld [vmem:[#allocation5 + $0xa90] sm:$0xff] }
 0x4de   : > { %2901 = vmatmul.f32.gmra.mxu0 %v5332_v58  ;;  %v2612_v16 = vadd.f32 %v2611_v19, %v2499_v3  ;;  %3643 = vmatpush.msrb.mxu3 %v987_v36  ;;  %v5350_v3 = vld [vmem:[%s6104_s28 + $0x490] sm:$0xff]  ;;  %v5352_v19 = vld [vmem:[%s6104_s28 + $0x498] sm:$0xff] }
 0x4df   : > { %3419 = vmatpush.msrb.mxu1 %v851_v21 }
 0x4e0   : > { %v2725_v25 = vadd.f32 %v2724_v48, %v2612_v16  ;;  %v2837_v12 = vpop.f32.mrf.mxu3  ;;  %3644 = vmatpush.msrb.mxu3 %v983_v28 }
 0x4e1   : > { %v2614_v4 = vpop.f32.mrf.mxu1  ;;  %3130 = vmatmul.f32.gmra.mxu2 %v5337_v23  ;;  %3420 = vmatpush.msrb.mxu1 %v847_v29 }
 0x4e2   : > { %v2838_v11 = vadd.f32 %v2837_v12, %v2725_v25  ;;  %3645 = vmatpush.msrb.mxu3 %v979_v5  ;;  %v5355_v12 = vld [vmem:[%s6104_s28 + $0x4c8] sm:$0xff] }
 0x4e3   : > { %v2501_v49 = vpop.f32.mrf.mxu0 }
 0x4e4   : > { %v2502_v10 = vadd.f32 %v2501_v49, %v6824_v54  ;;  %4772 = vst [vmem:[%s6415_s20 + $0x3c8] sm:$0xff] %v2838_v11  ;;  %3017 = vmatmul.f32.gmra.mxu1 %v5338_v50  ;;  %v2727_v54 = vpop.f32.mrf.mxu2  ;;  %v5353_v49 = vld [vmem:[%s6104_s28 + $0x4c0] sm:$0xff]  ;;  %v5356_v11 = vld [vmem:[%s6104_s28 + $0x4d8] sm:$0xff] }
 0x4e5   : > { %3243 = vmatmul.f32.gmra.mxu3 %v5340_v24 }
 0x4e6   : > { %2904 = vmatmul.f32.gmra.mxu0 %v5336_v52  ;;  %v2615_v7 = vadd.f32 %v2614_v4, %v2502_v10  ;;  %v5354_v10 = vld [vmem:[%s6104_s28 + $0x4d0] sm:$0xff] }
 0x4e8   : > { %v2728_v17 = vadd.f32 %v2727_v54, %v2615_v7  ;;  %v2840_v15 = vpop.f32.mrf.mxu3 }
 0x4e9   : > { %v2973_v8 = vpop.f32.mrf.mxu1  ;;  %3133 = vmatmul.f32.gmra.mxu2 %v5342_v34 }
 0x4ea   : > { %v2841_v26 = vadd.f32 %v2840_v15, %v2728_v17  ;;  %v5357_v17 = vld [vmem:[%s6104_s28 + $0x500] sm:$0xff]  ;;  %v911_v15 = vld [vmem:[#allocation5 + $0xc70] sm:$0xff] }
 0x4eb   : > { %v2860_v18 = vpop.f32.mrf.mxu0  ;;  %3533 = vmatpush.msrb.mxu2 %v911_v15 }
 0x4ec   : > { %v2861_v61 = vadd.f32 %v2860_v18, %v7015_v63  ;;  %4776 = vst [vmem:[%s6415_s20 + $0x3e8] sm:$0xff] %v2841_v26  ;;  %3020 = vmatmul.f32.gmra.mxu1 %v5343_v42  ;;  %v3086_v37 = vpop.f32.mrf.mxu2  ;;  %v5358_v18 = vld [vmem:[%s6104_s28 + $0x510] sm:$0xff]  ;;  %v5360_v26 = vld [vmem:[%s6104_s28 + $0x518] sm:$0xff] }
 0x4ed   : > { %3246 = vmatmul.f32.gmra.mxu3 %v5344_v59 }
 0x4ee   : > { %v2974_v27 = vadd.f32 %v2973_v8, %v2861_v61  ;;  %2907 = vmatmul.f32.gmra.mxu0 %v5341_v51  ;;  %v5359_v61 = vld [vmem:[%s6104_s28 + $0x508] sm:$0xff]  ;;  %v975_v51 = vld [vmem:[#allocation5 + $0xe70] sm:$0xff] }
 0x4ef   : > { %3646 = vmatpush.msrb.mxu3 %v975_v51 }
 0x4f0   : > { %v3087_v32 = vadd.f32 %v3086_v37, %v2974_v27  ;;  %v3199_v43 = vpop.f32.mrf.mxu3  ;;  %v783_v27 = vld [vmem:[#allocation5 + $0x870] sm:$0xff] }
 0x4f1   : > { %v2976_v9 = vpop.f32.mrf.mxu1  ;;  %3136 = vmatmul.f32.gmra.mxu2 %v5346_v44  ;;  %3307 = vmatpush.msrb.mxu0 %v783_v27  ;;  %v839_v27 = vld [vmem:[#allocation5 + $0xa30] sm:$0xff] }
 0x4f2   : > { %v7025_v46 = vadd.f32 %v3199_v43, %v3087_v32  ;;  %v5364_v43 = vld [vmem:[%s6104_s28 + $0x558] sm:$0xff]  ;;  %3647 = vmatpush.msrb.mxu3 %v971_v35 }
 0x4f3   : > { %v2863_v40 = vpop.f32.mrf.mxu0 }
 0x4f4   : > { %v2864_v38 = vadd.f32 %v2863_v40, %v7015_v63  ;;  %3023 = vmatmul.f32.gmra.mxu1 %v5347_v22  ;;  %v3089_v45 = vpop.f32.mrf.mxu2  ;;  %v5362_v40 = vld [vmem:[%s6104_s28 + $0x550] sm:$0xff] }
 0x4f5   : > { %3249 = vmatmul.f32.gmra.mxu3 %v5348_v0 }
 0x4f6   : > { %v2977_v20 = vadd.f32 %v2976_v9, %v2864_v38  ;;  %2910 = vmatmul.f32.gmra.mxu0 %v5345_v62  ;;  %v5363_v38 = vld [vmem:[%s6104_s28 + $0x548] sm:$0xff] }
 0x4f8   : > { %v3090_v1 = vadd.f32 %v3089_v45, %v2977_v20  ;;  %v3202_v57 = vpop.f32.mrf.mxu3 }
 0x4f9   : > { %v2979_v31 = vpop.f32.mrf.mxu1  ;;  %3139 = vmatmul.f32.gmra.mxu2 %v5350_v3  ;;  %v779_v3 = vld [vmem:[#allocation5 + $0x850] sm:$0xff] }
 0x4fa   : > { %v7032_v47 = vadd.f32 %v3202_v57, %v3090_v1  ;;  %v907_v57 = vld [vmem:[#allocation5 + $0xc50] sm:$0xff]  ;;  %3308 = vmatpush.msrb.mxu0 %v779_v3 }
 0x4fb   : > { %v2866_v60 = vpop.f32.mrf.mxu0  ;;  %3534 = vmatpush.msrb.mxu2 %v907_v57  ;;  %v5383_v57 = vld [vmem:[%s6104_s28 + $0x688] sm:$0xff]  ;;  %v963_v3 = vld [vmem:[#allocation5 + $0xe10] sm:$0xff] }
 0x4fc   : > { %v2867_v53 = vadd.f32 %v2866_v60, %v7015_v63  ;;  %3026 = vmatmul.f32.gmra.mxu1 %v5351_v56  ;;  %v3092_v58 = vpop.f32.mrf.mxu2  ;;  %v5365_v60 = vld [vmem:[%s6104_s28 + $0x580] sm:$0xff] }
 0x4fd   : > { %3252 = vmatmul.f32.gmra.mxu3 %v5352_v19  ;;  %v843_v19 = vld [vmem:[#allocation5 + $0xa50] sm:$0xff] }
 0x4fe   : > { %v2980_v41 = vadd.f32 %v2979_v31, %v2867_v53  ;;  %2913 = vmatmul.f32.gmra.mxu0 %v5349_v6  ;;  %v5366_v53 = vld [vmem:[%s6104_s28 + $0x590] sm:$0xff]  ;;  %v5367_v31 = vld [vmem:[%s6104_s28 + $0x588] sm:$0xff]  ;;  %3421 = vmatpush.msrb.mxu1 %v843_v19 }
 0x500   : > { %v3093_v16 = vadd.f32 %v3092_v58, %v2980_v41  ;;  %v3205_v13 = vpop.f32.mrf.mxu3  ;;  %v5368_v41 = vld [vmem:[%s6104_s28 + $0x598] sm:$0xff]  ;;  %3422 = vmatpush.msrb.mxu1 %v839_v27 }
 0x501   : > { %v2982_v25 = vpop.f32.mrf.mxu1  ;;  %3142 = vmatmul.f32.gmra.mxu2 %v5354_v10 }
 0x502   : > { %v7039_v36 = vadd.f32 %v3205_v13, %v3093_v16  ;;  %v5370_v13 = vld [vmem:[%s6104_s28 + $0x5d0] sm:$0xff] }
 0x503   : > { %v2869_v2 = vpop.f32.mrf.mxu0 }
 0x504   : > { %v2870_v48 = vadd.f32 %v2869_v2, %v7015_v63  ;;  %3029 = vmatmul.f32.gmra.mxu1 %v5355_v12  ;;  %v3095_v4 = vpop.f32.mrf.mxu2 }
 0x505   : > { %3255 = vmatmul.f32.gmra.mxu3 %v5356_v11 }
 0x506   : > { %v2983_v33 = vadd.f32 %v2982_v25, %v2870_v48  ;;  %2916 = vmatmul.f32.gmra.mxu0 %v5353_v49  ;;  %v5369_v48 = vld [vmem:[%s6104_s28 + $0x5c0] sm:$0xff]  ;;  %v5371_v25 = vld [vmem:[%s6104_s28 + $0x5c8] sm:$0xff] }
 0x508   : > { %v3096_v52 = vadd.f32 %v3095_v4, %v2983_v33  ;;  %v3208_v50 = vpop.f32.mrf.mxu3  ;;  %v5372_v33 = vld [vmem:[%s6104_s28 + $0x5d8] sm:$0xff] }
 0x509   : > { %v2985_v24 = vpop.f32.mrf.mxu1  ;;  %3145 = vmatmul.f32.gmra.mxu2 %v5358_v18  ;;  %v5376_v18 = vld [vmem:[%s6104_s28 + $0x618] sm:$0xff] }
 0x50a   : > { %v7046_v14 = vadd.f32 %v3208_v50, %v3096_v52  ;;  %v5373_v50 = vld [vmem:[%s6104_s28 + $0x600] sm:$0xff] }
 0x50b   : > { %v2872_v23 = vpop.f32.mrf.mxu0 }
 0x50c   : > { %v2873_v7 = vadd.f32 %v2872_v23, %v7015_v63  ;;  %3032 = vmatmul.f32.gmra.mxu1 %v5359_v61  ;;  %v3098_v8 = vpop.f32.mrf.mxu2  ;;  %v775_v61 = vld [vmem:[#allocation5 + $0x830] sm:$0xff] }
 0x50d   : > { %3258 = vmatmul.f32.gmra.mxu3 %v5360_v26  ;;  %v967_v26 = vld [vmem:[#allocation5 + $0xe30] sm:$0xff]  ;;  %3309 = vmatpush.msrb.mxu0 %v775_v61 }
 0x50e   : > { %v2986_v54 = vadd.f32 %v2985_v24, %v2873_v7  ;;  %2919 = vmatmul.f32.gmra.mxu0 %v5357_v17  ;;  %v5374_v24 = vld [vmem:[%s6104_s28 + $0x610] sm:$0xff]  ;;  %v5375_v17 = vld [vmem:[%s6104_s28 + $0x608] sm:$0xff]  ;;  %3648 = vmatpush.msrb.mxu3 %v967_v26  ;;  %v576_v26 = vld [vmem:[#allocation5 + $0x1f8] sm:$0xff] }
 0x510   : > { %v3099_v34 = vadd.f32 %v3098_v8, %v2986_v54  ;;  %v3211_v37 = vpop.f32.mrf.mxu3  ;;  %v903_v54 = vld [vmem:[#allocation5 + $0xc30] sm:$0xff]  ;;  %3649 = vmatpush.msrb.mxu3 %v963_v3  ;;  %v5400_v3 = vld [vmem:[%s6104_s28 + $0x798] sm:$0xff] }
 0x511   : > { %v2988_v28 = vpop.f32.mrf.mxu1  ;;  %3148 = vmatmul.f32.gmra.mxu2 %v5362_v40  ;;  %v5380_v40 = vld [vmem:[%s6104_s28 + $0x658] sm:$0xff] }
 0x512   : > { %v7053_v30 = vadd.f32 %v3211_v37, %v3099_v34  ;;  %3535 = vmatpush.msrb.mxu2 %v903_v54  ;;  %v5390_v54 = vld [vmem:[%s6104_s28 + $0x710] sm:$0xff] }
 0x513   : > { %v2875_v42 = vpop.f32.mrf.mxu0 }
 0x514   : > { %v2876_v59 = vadd.f32 %v2875_v42, %v7015_v63  ;;  %3035 = vmatmul.f32.gmra.mxu1 %v5363_v38  ;;  %v3101_v9 = vpop.f32.mrf.mxu2 }
 0x515   : > { %3261 = vmatmul.f32.gmra.mxu3 %v5364_v43 }
 0x516   : > { %v2989_v32 = vadd.f32 %v2988_v28, %v2876_v59  ;;  %2922 = vmatmul.f32.gmra.mxu0 %v5361_v55  ;;  %v5377_v28 = vld [vmem:[%s6104_s28 + $0x640] sm:$0xff]  ;;  %v5379_v55 = vld [vmem:[%s6104_s28 + $0x648] sm:$0xff] }
 0x518   : > { %v3102_v20 = vadd.f32 %v3101_v9, %v2989_v32  ;;  %v3214_v22 = vpop.f32.mrf.mxu3  ;;  %v5378_v32 = vld [vmem:[%s6104_s28 + $0x650] sm:$0xff] }
 0x519   : > { %v2991_v45 = vpop.f32.mrf.mxu1  ;;  %3151 = vmatmul.f32.gmra.mxu2 %v5366_v53  ;;  %v899_v53 = vld [vmem:[#allocation5 + $0xc10] sm:$0xff] }
 0x51a   : > { %v7060_v0 = vadd.f32 %v3214_v22, %v3102_v20  ;;  %3536 = vmatpush.msrb.mxu2 %v899_v53 }
 0x51b   : > { %v2878_v62 = vpop.f32.mrf.mxu0 }
 0x51c   : > { %v2879_v44 = vadd.f32 %v2878_v62, %v7015_v63  ;;  %3038 = vmatmul.f32.gmra.mxu1 %v5367_v31  ;;  %v3104_v6 = vpop.f32.mrf.mxu2  ;;  %v5384_v31 = vld [vmem:[%s6104_s28 + $0x698] sm:$0xff] }
 0x51d   : > { %3264 = vmatmul.f32.gmra.mxu3 %v5368_v41 }
 0x51e   : > { %v2992_v1 = vadd.f32 %v2991_v45, %v2879_v44  ;;  %2925 = vmatmul.f32.gmra.mxu0 %v5365_v60  ;;  %v5382_v60 = vld [vmem:[%s6104_s28 + $0x690] sm:$0xff] }
 0x520   : > { %v3105_v56 = vadd.f32 %v3104_v6, %v2992_v1  ;;  %v3217_v5 = vpop.f32.mrf.mxu3  ;;  %v5381_v1 = vld [vmem:[%s6104_s28 + $0x680] sm:$0xff]  ;;  %v771_v6 = vld [vmem:[#allocation5 + $0x810] sm:$0xff] }
 0x521   : > { %v2994_v21 = vpop.f32.mrf.mxu1  ;;  %3154 = vmatmul.f32.gmra.mxu2 %v5370_v13  ;;  %3310 = vmatpush.msrb.mxu0 %v771_v6  ;;  %v5386_v13 = vld [vmem:[%s6104_s28 + $0x6d0] sm:$0xff]  ;;  %v5399_v6 = vld [vmem:[%s6104_s28 + $0x788] sm:$0xff] }
 0x522   : > { %v7067_v16 = vadd.f32 %v3217_v5, %v3105_v56  ;;  %v835_v56 = vld [vmem:[#allocation5 + $0xa10] sm:$0xff] }
 0x523   : > { %v2881_v58 = vpop.f32.mrf.mxu0  ;;  %3423 = vmatpush.msrb.mxu1 %v835_v56  ;;  %3747 = vmatpush.msra.mxu0 %v576_v26  ;;  %v572_v56 = vld [vmem:[#allocation5 + $0x1d8] sm:$0xff]  ;;  %v5406_v26 = vld [vmem:[%s6104_s28 + $0x30] sm:$0xff] }
 0x524   : > { %v2882_v39 = vadd.f32 %v2881_v58, %v7015_v63  ;;  %3041 = vmatmul.f32.gmra.mxu1 %v5371_v25  ;;  %v3107_v49 = vpop.f32.mrf.mxu2  ;;  %v5387_v25 = vld [vmem:[%s6104_s28 + $0x6c8] sm:$0xff] }
 0x525   : > { %3267 = vmatmul.f32.gmra.mxu3 %v5372_v33  ;;  %v5388_v33 = vld [vmem:[%s6104_s28 + $0x6d8] sm:$0xff]  ;;  %3748 = vmatpush.msra.mxu0 %v572_v56 }
 0x526   : > { %v2995_v2 = vadd.f32 %v2994_v21, %v2882_v39  ;;  %2928 = vmatmul.f32.gmra.mxu0 %v5369_v48  ;;  %v5385_v48 = vld [vmem:[%s6104_s28 + $0x6c0] sm:$0xff] }
 0x528   : > { %v3108_v10 = vadd.f32 %v3107_v49, %v2995_v2  ;;  %v3220_v4 = vpop.f32.mrf.mxu3 }
 0x529   : > { %v2997_v23 = vpop.f32.mrf.mxu1  ;;  %3157 = vmatmul.f32.gmra.mxu2 %v5374_v24  ;;  %v5389_v24 = vld [vmem:[%s6104_s28 + $0x700] sm:$0xff] }
 0x52a   : > { %v7074_v52 = vadd.f32 %v3220_v4, %v3108_v10 }
 0x52b   : > { %v2884_v12 = vpop.f32.mrf.mxu0 }
 0x52c   : > { %v2885_v11 = vadd.f32 %v2884_v12, %v7015_v63  ;;  %3044 = vmatmul.f32.gmra.mxu1 %v5375_v17  ;;  %v3110_v15 = vpop.f32.mrf.mxu2  ;;  %v704_v17 = vld [vmem:[#allocation5 + $0x5f8] sm:$0xff] }
 0x52d   : > { %3270 = vmatmul.f32.gmra.mxu3 %v5376_v18  ;;  %3973 = vmatpush.msra.mxu2 %v704_v17  ;;  %v5391_v18 = vld [vmem:[%s6104_s28 + $0x708] sm:$0xff] }
 0x52e   : > { %v2998_v7 = vadd.f32 %v2997_v23, %v2885_v11  ;;  %2931 = vmatmul.f32.gmra.mxu0 %v5373_v50 }
 0x530   : > { %v3111_v8 = vadd.f32 %v3110_v15, %v2998_v7  ;;  %v3223_v29 = vpop.f32.mrf.mxu3  ;;  %v5392_v15 = vld [vmem:[%s6104_s28 + $0x718] sm:$0xff] }
 0x531   : > { %v3000_v59 = vpop.f32.mrf.mxu1  ;;  %3160 = vmatmul.f32.gmra.mxu2 %v5378_v32 }
 0x532   : > { %v7081_v42 = vadd.f32 %v3223_v29, %v3111_v8  ;;  %v768_v8 = vld [vmem:[#allocation5 + $0x7f8] sm:$0xff] }
 0x533   : > { %v2887_v51 = vpop.f32.mrf.mxu0  ;;  %4086 = vmatpush.msra.mxu3 %v768_v8  ;;  %v696_v8 = vld [vmem:[#allocation5 + $0x5b8] sm:$0xff] }
 0x534   : > { %v2888_v34 = vadd.f32 %v2887_v51, %v7015_v63  ;;  %3047 = vmatmul.f32.gmra.mxu1 %v5379_v55  ;;  %v3113_v38 = vpop.f32.mrf.mxu2  ;;  %v640_v51 = vld [vmem:[#allocation5 + $0x3f8] sm:$0xff]  ;;  %v5393_v55 = vld [vmem:[%s6104_s28 + $0x740] sm:$0xff] }
 0x535   : > { %3273 = vmatmul.f32.gmra.mxu3 %v5380_v40  ;;  %3860 = vmatpush.msra.mxu1 %v640_v51  ;;  %v5394_v40 = vld [vmem:[%s6104_s28 + $0x750] sm:$0xff]  ;;  %v5408_v51 = vld [vmem:[%s6104_s28 + $0x38] sm:$0xff] }
 0x536   : > { %v3001_v37 = vadd.f32 %v3000_v59, %v2888_v34  ;;  %2934 = vmatmul.f32.gmra.mxu0 %v5377_v28 }
 0x538   : > { %v3114_v43 = vadd.f32 %v3113_v38, %v3001_v37  ;;  %v3226_v62 = vpop.f32.mrf.mxu3  ;;  %v5395_v38 = vld [vmem:[%s6104_s28 + $0x748] sm:$0xff] }
 0x539   : > { %v3003_v22 = vpop.f32.mrf.mxu1  ;;  %3163 = vmatmul.f32.gmra.mxu2 %v5382_v60 }
 0x53a   : > { %v7088_v44 = vadd.f32 %v3226_v62, %v3114_v43  ;;  %v5396_v43 = vld [vmem:[%s6104_s28 + $0x758] sm:$0xff] }
 0x53b   : > { %v2890_v9 = vpop.f32.mrf.mxu0 }
 0x53c   : > { %v2891_v20 = vadd.f32 %v2890_v9, %v7015_v63  ;;  %3050 = vmatmul.f32.gmra.mxu1 %v5383_v57  ;;  %v3116_v41 = vpop.f32.mrf.mxu2  ;;  %v5397_v57 = vld [vmem:[%s6104_s28 + $0x780] sm:$0xff] }
 0x53d   : > { %3276 = vmatmul.f32.gmra.mxu3 %v5384_v31  ;;  %v5398_v31 = vld [vmem:[%s6104_s28 + $0x790] sm:$0xff] }
 0x53e   : > { %v3004_v45 = vadd.f32 %v3003_v22, %v2891_v20  ;;  %2937 = vmatmul.f32.gmra.mxu0 %v5381_v1 }
 0x540   : > { %v3117_v35 = vadd.f32 %v3116_v41, %v3004_v45  ;;  %v3229_v39 = vpop.f32.mrf.mxu3  ;;  %v700_v41 = vld [vmem:[#allocation5 + $0x5d8] sm:$0xff] }
 0x541   : > { %v3006_v21 = vpop.f32.mrf.mxu1  ;;  %3166 = vmatmul.f32.gmra.mxu2 %v5386_v13 }
 0x542   : > { %v7095_v5 = vadd.f32 %v3229_v39, %v3117_v35  ;;  %3974 = vmatpush.msra.mxu2 %v700_v41  ;;  %v636_v39 = vld [vmem:[#allocation5 + $0x3d8] sm:$0xff] }
 0x543   : > { %v2893_v19 = vpop.f32.mrf.mxu0  ;;  %3861 = vmatpush.msra.mxu1 %v636_v39  ;;  %v692_v39 = vld [vmem:[#allocation5 + $0x598] sm:$0xff] }
 0x544   : > { %v2894_v58 = vadd.f32 %v2893_v19, %v7015_v63  ;;  %3053 = vmatmul.f32.gmra.mxu1 %v5387_v25  ;;  %v3119_v49 = vpop.f32.mrf.mxu2  ;;  %v764_v19 = vld [vmem:[#allocation5 + $0x7d8] sm:$0xff]  ;;  %3975 = vmatpush.msra.mxu2 %v696_v8 }
 0x545   : > { %3279 = vmatmul.f32.gmra.mxu3 %v5388_v33 }
 0x546   : > { %v3007_v2 = vadd.f32 %v3006_v21, %v2894_v58  ;;  %2940 = vmatmul.f32.gmra.mxu0 %v5385_v48  ;;  %4087 = vmatpush.msra.mxu3 %v764_v19  ;;  %v5413_v19 = vld [vmem:[%s6104_s28 + $0xa0] sm:$0xff] }
 0x547   : > { %3976 = vmatpush.msra.mxu2 %v692_v39  ;;  %v5428_v39 = vld [vmem:[%s6104_s28 + $0x178] sm:$0xff] }
 0x548   : > { %v3120_v10 = vadd.f32 %v3119_v49, %v3007_v2  ;;  %v3232_v4 = vpop.f32.mrf.mxu3  ;;  %v5401_v49 = vld [vmem:[%s6104_s28 + $0x7c0] sm:$0xff] }
 0x549   : > { %v3009_v7 = vpop.f32.mrf.mxu1  ;;  %3169 = vmatmul.f32.gmra.mxu2 %v5390_v54 }
 0x54a   : > { %v7102_v23 = vadd.f32 %v3232_v4, %v3120_v10  ;;  %v5402_v10 = vld [vmem:[%s6104_s28 + $0x7d0] sm:$0xff] }
 0x54b   : > { %v2896_v12 = vpop.f32.mrf.mxu0 }
 0x54c   : > { %v2897_v11 = vadd.f32 %v2896_v12, %v7015_v63  ;;  %3056 = vmatmul.f32.gmra.mxu1 %v5391_v18  ;;  %v3122_v61 = vpop.f32.mrf.mxu2  ;;  %v5403_v12 = vld [vmem:[%s6104_s28 + $0x7c8] sm:$0xff] }
 0x54d   : > { %3282 = vmatmul.f32.gmra.mxu3 %v5392_v15 }
 0x54e   : > { %v3010_v50 = vadd.f32 %v3009_v7, %v2897_v11  ;;  %2943 = vmatmul.f32.gmra.mxu0 %v5389_v24  ;;  %v5404_v11 = vld [vmem:[%s6104_s28 + $0x7d8] sm:$0xff] }
 0x550   : > { %v3123_v27 = vadd.f32 %v3122_v61, %v3010_v50  ;;  %v3235_v59 = vpop.f32.mrf.mxu3  ;;  %v5405_v61 = vld [vmem:[%s6104_s28 + $0x20] sm:$0xff] }
 0x551   : > { %v3012_v28 = vpop.f32.mrf.mxu1  ;;  %3172 = vmatmul.f32.gmra.mxu2 %v5394_v40 }
 0x552   : > { %v7109_v37 = vadd.f32 %v3235_v59, %v3123_v27  ;;  %v5407_v27 = vld [vmem:[%s6104_s28 + $0x28] sm:$0xff]  ;;  %v760_v59 = vld [vmem:[#allocation5 + $0x7b8] sm:$0xff] }
 0x553   : > { %v2899_v34 = vpop.f32.mrf.mxu0  ;;  %4088 = vmatpush.msra.mxu3 %v760_v59 }
 0x554   : > { %v2900_v29 = vadd.f32 %v2899_v34, %v7015_v63  ;;  %3059 = vmatmul.f32.gmra.mxu1 %v5395_v38  ;;  %v3125_v9 = vpop.f32.mrf.mxu2 }
 0x555   : > { %3285 = vmatmul.f32.gmra.mxu3 %v5396_v43 }
 0x556   : > { %v3013_v32 = vadd.f32 %v3012_v28, %v2900_v29  ;;  %2946 = vmatmul.f32.gmra.mxu0 %v5393_v55  ;;  %v568_v29 = vld [vmem:[#allocation5 + $0x1b8] sm:$0xff] }
 0x557   : > { %3749 = vmatpush.msra.mxu0 %v568_v29 }
 0x558   : > { %v3126_v20 = vadd.f32 %v3125_v9, %v3013_v32  ;;  %v3238_v45 = vpop.f32.mrf.mxu3  ;;  %v632_v32 = vld [vmem:[#allocation5 + $0x3b8] sm:$0xff] }
 0x559   : > { %v3015_v60 = vpop.f32.mrf.mxu1  ;;  %3175 = vmatmul.f32.gmra.mxu2 %v5398_v31  ;;  %3862 = vmatpush.msra.mxu1 %v632_v32  ;;  %v5421_v32 = vld [vmem:[%s6104_s28 + $0x120] sm:$0xff] }
 0x55a   : > { %v7116_v1 = vadd.f32 %v3238_v45, %v3126_v20  ;;  %v5411_v45 = vld [vmem:[%s6104_s28 + $0x68] sm:$0xff] }
 0x55b   : > { %v2902_v62 = vpop.f32.mrf.mxu0 }
 0x55c   : > { %v2903_v22 = vadd.f32 %v2902_v62, %v7015_v63  ;;  %3062 = vmatmul.f32.gmra.mxu1 %v5399_v6  ;;  %v3128_v35 = vpop.f32.mrf.mxu2  ;;  %v5409_v62 = vld [vmem:[%s6104_s28 + $0x60] sm:$0xff] }
 0x55d   : > { %3288 = vmatmul.f32.gmra.mxu3 %v5400_v3 }
 0x55e   : > { %v3016_v53 = vadd.f32 %v3015_v60, %v2903_v22  ;;  %2949 = vmatmul.f32.gmra.mxu0 %v5397_v57  ;;  %v5410_v22 = vld [vmem:[%s6104_s28 + $0x70] sm:$0xff]  ;;  %v5412_v60 = vld [vmem:[%s6104_s28 + $0x78] sm:$0xff] }
 0x560   : > { %v3129_v58 = vadd.f32 %v3128_v35, %v3016_v53  ;;  %v3241_v48 = vpop.f32.mrf.mxu3 }
 0x561   : > { %v3018_v25 = vpop.f32.mrf.mxu1  ;;  %3178 = vmatmul.f32.gmra.mxu2 %v5402_v10  ;;  %v628_v10 = vld [vmem:[#allocation5 + $0x398] sm:$0xff] }
 0x562   : > { %v7123_v13 = vadd.f32 %v3241_v48, %v3129_v58  ;;  %v5414_v58 = vld [vmem:[%s6104_s28 + $0xb0] sm:$0xff]  ;;  %3863 = vmatpush.msra.mxu1 %v628_v10 }
 0x563   : > { %v2905_v21 = vpop.f32.mrf.mxu0 }
 0x564   : > { %v2906_v2 = vadd.f32 %v2905_v21, %v7015_v63  ;;  %3065 = vmatmul.f32.gmra.mxu1 %v5403_v12  ;;  %v3131_v4 = vpop.f32.mrf.mxu2  ;;  %v5415_v21 = vld [vmem:[%s6104_s28 + $0xa8] sm:$0xff] }
 0x565   : > { %3291 = vmatmul.f32.gmra.mxu3 %v5404_v11 }
 0x566   : > { %v3019_v33 = vadd.f32 %v3018_v25, %v2906_v2  ;;  %2952 = vmatmul.f32.gmra.mxu0 %v5401_v49  ;;  %v5416_v2 = vld [vmem:[%s6104_s28 + $0xb8] sm:$0xff] }
 0x567   : > { %v564_v25 = vld [vmem:[#allocation5 + $0x198] sm:$0xff] }
 0x568   : > { %v3132_v7 = vadd.f32 %v3131_v4, %v3019_v33  ;;  %v3244_v54 = vpop.f32.mrf.mxu3  ;;  %v756_v33 = vld [vmem:[#allocation5 + $0x798] sm:$0xff]  ;;  %3750 = vmatpush.msra.mxu0 %v564_v25 }
 0x569   : > { %v3021_v18 = vpop.f32.mrf.mxu1  ;;  %3537 = vmatmul.f32.vlgmr.msrb.gmra.mxu2 %v5406_v26  ;;  %4089 = vmatpush.msra.mxu3 %v756_v33 }
 0x56a   : > { %v7130_v17 = vadd.f32 %v3244_v54, %v3132_v7  ;;  %v5417_v54 = vld [vmem:[%s6104_s28 + $0xe0] sm:$0xff] }
 0x56b   : > { %v2908_v50 = vpop.f32.mrf.mxu0 }
 0x56c   : > { %v2909_v24 = vadd.f32 %v2908_v50, %v7015_v63  ;;  %3424 = vmatmul.f32.vlgmr.msrb.gmra.mxu1 %v5407_v27  ;;  %v3134_v34 = vpop.f32.mrf.mxu2 }
 0x56d   : > { %3650 = vmatmul.f32.vlgmr.msrb.gmra.mxu3 %v5408_v51 }
 0x56e   : > { %v3022_v15 = vadd.f32 %v3021_v18, %v2909_v24  ;;  %3311 = vmatmul.f32.vlgmr.msrb.gmra.mxu0 %v5405_v61  ;;  %v5418_v18 = vld [vmem:[%s6104_s28 + $0xf0] sm:$0xff]  ;;  %v5420_v61 = vld [vmem:[%s6104_s28 + $0xf8] sm:$0xff] }
 0x570   : > { %v3135_v28 = vadd.f32 %v3134_v34, %v3022_v15  ;;  %v3247_v38 = vpop.f32.mrf.mxu3  ;;  %v5419_v15 = vld [vmem:[%s6104_s28 + $0xe8] sm:$0xff] }
 0x571   : > { %v3024_v9 = vpop.f32.mrf.mxu1  ;;  %3540 = vmatmul.f32.gmra.mxu2 %v5410_v22  ;;  %v752_v22 = vld [vmem:[#allocation5 + $0x778] sm:$0xff] }
 0x572   : > { %v7137_v43 = vadd.f32 %v3247_v38, %v3135_v28  ;;  %v5423_v38 = vld [vmem:[%s6104_s28 + $0x128] sm:$0xff]  ;;  %4090 = vmatpush.msra.mxu3 %v752_v22 }
 0x573   : > { %v2911_v55 = vpop.f32.mrf.mxu0 }
 0x574   : > { %v2912_v40 = vadd.f32 %v2911_v55, %v7015_v63  ;;  %3427 = vmatmul.f32.gmra.mxu1 %v5411_v45  ;;  %v3137_v53 = vpop.f32.mrf.mxu2  ;;  %v5422_v55 = vld [vmem:[%s6104_s28 + $0x130] sm:$0xff] }
 0x575   : > { %3653 = vmatmul.f32.gmra.mxu3 %v5412_v60  ;;  %v624_v60 = vld [vmem:[#allocation5 + $0x378] sm:$0xff] }
 0x576   : > { %v3025_v20 = vadd.f32 %v3024_v9, %v2912_v40  ;;  %3314 = vmatmul.f32.gmra.mxu0 %v5409_v62  ;;  %v688_v40 = vld [vmem:[#allocation5 + $0x578] sm:$0xff]  ;;  %3864 = vmatpush.msra.mxu1 %v624_v60 }
 0x577   : > { %3977 = vmatpush.msra.mxu2 %v688_v40  ;;  %v5424_v9 = vld [vmem:[%s6104_s28 + $0x138] sm:$0xff]  ;;  %v5434_v40 = vld [vmem:[%s6104_s28 + $0x1f0] sm:$0xff] }
 0x578   : > { %v3138_v57 = vadd.f32 %v3137_v53, %v3025_v20  ;;  %v3250_v6 = vpop.f32.mrf.mxu3  ;;  %v560_v62 = vld [vmem:[#allocation5 + $0x178] sm:$0xff] }
 0x579   : > { %v3027_v35 = vpop.f32.mrf.mxu1  ;;  %3543 = vmatmul.f32.gmra.mxu2 %v5414_v58  ;;  %3751 = vmatpush.msra.mxu0 %v560_v62  ;;  %v5427_v58 = vld [vmem:[%s6104_s28 + $0x168] sm:$0xff] }
 0x57a   : > { %v7144_v3 = vadd.f32 %v3250_v6, %v3138_v57 }
 0x57b   : > { %v2914_v31 = vpop.f32.mrf.mxu0 }
 0x57c   : > { %v2915_v41 = vadd.f32 %v2914_v31, %v7015_v63  ;;  %3430 = vmatmul.f32.gmra.mxu1 %v5415_v21  ;;  %v3140_v48 = vpop.f32.mrf.mxu2 }
 0x57d   : > { %3656 = vmatmul.f32.gmra.mxu3 %v5416_v2 }
 0x57e   : > { %v3028_v56 = vadd.f32 %v3027_v35, %v2915_v41  ;;  %3317 = vmatmul.f32.gmra.mxu0 %v5413_v19  ;;  %v5426_v19 = vld [vmem:[%s6104_s28 + $0x170] sm:$0xff] }
 0x580   : > { %v3141_v49 = vadd.f32 %v3140_v48, %v3028_v56  ;;  %v3253_v4 = vpop.f32.mrf.mxu3  ;;  %v5425_v56 = vld [vmem:[%s6104_s28 + $0x160] sm:$0xff] }
 0x581   : > { %v3030_v50 = vpop.f32.mrf.mxu1  ;;  %3546 = vmatmul.f32.gmra.mxu2 %v5418_v18 }
 0x582   : > { %v7151_v7 = vadd.f32 %v3253_v4, %v3141_v49  ;;  %v5430_v4 = vld [vmem:[%s6104_s28 + $0x1b0] sm:$0xff] }
 0x583   : > { %v2917_v12 = vpop.f32.mrf.mxu0 }
 0x584   : > { %v2918_v11 = vadd.f32 %v2917_v12, %v7015_v63  ;;  %3433 = vmatmul.f32.gmra.mxu1 %v5419_v15  ;;  %v3143_v26 = vpop.f32.mrf.mxu2  ;;  %v556_v15 = vld [vmem:[#allocation5 + $0x158] sm:$0xff] }
 0x585   : > { %3659 = vmatmul.f32.gmra.mxu3 %v5420_v61  ;;  %v748_v61 = vld [vmem:[#allocation5 + $0x758] sm:$0xff]  ;;  %3752 = vmatpush.msra.mxu0 %v556_v15 }
 0x586   : > { %v3031_v24 = vadd.f32 %v3030_v50, %v2918_v11  ;;  %3320 = vmatmul.f32.gmra.mxu0 %v5417_v54  ;;  %v5429_v11 = vld [vmem:[%s6104_s28 + $0x1a0] sm:$0xff]  ;;  %v684_v50 = vld [vmem:[#allocation5 + $0x558] sm:$0xff]  ;;  %4091 = vmatpush.msra.mxu3 %v748_v61 }
 0x587   : > { %3978 = vmatpush.msra.mxu2 %v684_v50  ;;  %v5432_v54 = vld [vmem:[%s6104_s28 + $0x1b8] sm:$0xff] }
 0x588   : > { %v3144_v8 = vadd.f32 %v3143_v26, %v3031_v24  ;;  %v3256_v34 = vpop.f32.mrf.mxu3  ;;  %v5431_v24 = vld [vmem:[%s6104_s28 + $0x1a8] sm:$0xff]  ;;  %v5444_v15 = vld [vmem:[%s6104_s28 + $0x278] sm:$0xff] }
 0x589   : > { %v3033_v59 = vpop.f32.mrf.mxu1  ;;  %3549 = vmatmul.f32.gmra.mxu2 %v5422_v55  ;;  %v5433_v55 = vld [vmem:[%s6104_s28 + $0x1e0] sm:$0xff] }
 0x58a   : > { %v7158_v29 = vadd.f32 %v3256_v34, %v3144_v8  ;;  %v620_v8 = vld [vmem:[#allocation5 + $0x358] sm:$0xff] }
 0x58b   : > { %v2920_v27 = vpop.f32.mrf.mxu0  ;;  %3865 = vmatpush.msra.mxu1 %v620_v8 }
 0x58c   : > { %v2921_v51 = vadd.f32 %v2920_v27, %v7015_v63  ;;  %3436 = vmatmul.f32.gmra.mxu1 %v5423_v38  ;;  %v3146_v20 = vpop.f32.mrf.mxu2  ;;  %v5435_v38 = vld [vmem:[%s6104_s28 + $0x1e8] sm:$0xff] }
 0x58d   : > { %3662 = vmatmul.f32.gmra.mxu3 %v5424_v9  ;;  %v5436_v9 = vld [vmem:[%s6104_s28 + $0x1f8] sm:$0xff] }
 0x58e   : > { %v3034_v28 = vadd.f32 %v3033_v59, %v2921_v51  ;;  %3323 = vmatmul.f32.gmra.mxu0 %v5421_v32 }
 0x590   : > { %v3147_v45 = vadd.f32 %v3146_v20, %v3034_v28  ;;  %v3259_v31 = vpop.f32.mrf.mxu3 }
 0x591   : > { %v3036_v6 = vpop.f32.mrf.mxu1  ;;  %3552 = vmatmul.f32.gmra.mxu2 %v5426_v19  ;;  %v5439_v19 = vld [vmem:[%s6104_s28 + $0x228] sm:$0xff] }
 0x592   : > { %v7165_v41 = vadd.f32 %v3259_v31, %v3147_v45 }
 0x593   : > { %v2923_v53 = vpop.f32.mrf.mxu0 }
 0x594   : > { %v2924_v57 = vadd.f32 %v2923_v53, %v7015_v63  ;;  %3439 = vmatmul.f32.gmra.mxu1 %v5427_v58  ;;  %v3149_v21 = vpop.f32.mrf.mxu2  ;;  %v5440_v58 = vld [vmem:[%s6104_s28 + $0x238] sm:$0xff] }
 0x595   : > { %3665 = vmatmul.f32.gmra.mxu3 %v5428_v39 }
 0x596   : > { %v3037_v35 = vadd.f32 %v3036_v6, %v2924_v57  ;;  %3326 = vmatmul.f32.gmra.mxu0 %v5425_v56  ;;  %v5437_v6 = vld [vmem:[%s6104_s28 + $0x220] sm:$0xff]  ;;  %v680_v56 = vld [vmem:[#allocation5 + $0x538] sm:$0xff] }
 0x597   : > { %3979 = vmatpush.msra.mxu2 %v680_v56 }
 0x598   : > { %v3150_v2 = vadd.f32 %v3149_v21, %v3037_v35  ;;  %v3262_v33 = vpop.f32.mrf.mxu3  ;;  %v5438_v35 = vld [vmem:[%s6104_s28 + $0x230] sm:$0xff]  ;;  %v552_v21 = vld [vmem:[#allocation5 + $0x138] sm:$0xff] }
 0x599   : > { %v3039_v10 = vpop.f32.mrf.mxu1  ;;  %3555 = vmatmul.f32.gmra.mxu2 %v5430_v4  ;;  %3753 = vmatpush.msra.mxu0 %v552_v21  ;;  %v5450_v21 = vld [vmem:[%s6104_s28 + $0x2f0] sm:$0xff] }
 0x59a   : > { %v7172_v49 = vadd.f32 %v3262_v33, %v3150_v2  ;;  %v744_v2 = vld [vmem:[#allocation5 + $0x738] sm:$0xff] }
 0x59b   : > { %v2926_v48 = vpop.f32.mrf.mxu0  ;;  %4092 = vmatpush.msra.mxu3 %v744_v2  ;;  %v5451_v2 = vld [vmem:[%s6104_s28 + $0x2e8] sm:$0xff] }
 0x59c   : > { %v2927_v25 = vadd.f32 %v2926_v48, %v7015_v63  ;;  %3442 = vmatmul.f32.gmra.mxu1 %v5431_v24  ;;  %v3152_v18 = vpop.f32.mrf.mxu2  ;;  %v5441_v24 = vld [vmem:[%s6104_s28 + $0x260] sm:$0xff] }
 0x59d   : > { %3668 = vmatmul.f32.gmra.mxu3 %v5432_v54  ;;  %v5442_v54 = vld [vmem:[%s6104_s28 + $0x270] sm:$0xff] }
 0x59e   : > { %v3040_v12 = vadd.f32 %v3039_v10, %v2927_v25  ;;  %3329 = vmatmul.f32.gmra.mxu0 %v5429_v11  ;;  %v616_v25 = vld [vmem:[#allocation5 + $0x338] sm:$0xff] }
 0x59f   : > { %3866 = vmatpush.msra.mxu1 %v616_v25 }
 0x5a0   : > { %v3153_v26 = vadd.f32 %v3152_v18, %v3040_v12  ;;  %v3265_v34 = vpop.f32.mrf.mxu3  ;;  %v5443_v18 = vld [vmem:[%s6104_s28 + $0x268] sm:$0xff] }
 0x5a1   : > { %v3042_v28 = vpop.f32.mrf.mxu1  ;;  %3558 = vmatmul.f32.gmra.mxu2 %v5434_v40  ;;  %v5446_v40 = vld [vmem:[%s6104_s28 + $0x2b0] sm:$0xff] }
 0x5a2   : > { %v7179_v59 = vadd.f32 %v3265_v34, %v3153_v26 }
 0x5a3   : > { %v2929_v27 = vpop.f32.mrf.mxu0 }
 0x5a4   : > { %v2930_v51 = vadd.f32 %v2929_v27, %v7015_v63  ;;  %3445 = vmatmul.f32.gmra.mxu1 %v5435_v38  ;;  %v3155_v20 = vpop.f32.mrf.mxu2  ;;  %v676_v38 = vld [vmem:[#allocation5 + $0x518] sm:$0xff] }
 0x5a5   : > { %3671 = vmatmul.f32.gmra.mxu3 %v5436_v9  ;;  %3980 = vmatpush.msra.mxu2 %v676_v38  ;;  %v5447_v9 = vld [vmem:[%s6104_s28 + $0x2a8] sm:$0xff] }
 0x5a6   : > { %v3043_v32 = vadd.f32 %v3042_v28, %v2930_v51  ;;  %3332 = vmatmul.f32.gmra.mxu0 %v5433_v55  ;;  %v5445_v55 = vld [vmem:[%s6104_s28 + $0x2a0] sm:$0xff] }
 0x5a8   : > { %v3156_v62 = vadd.f32 %v3155_v20, %v3043_v32  ;;  %v3268_v60 = vpop.f32.mrf.mxu3  ;;  %v5448_v20 = vld [vmem:[%s6104_s28 + $0x2b8] sm:$0xff] }
 0x5a9   : > { %v3045_v57 = vpop.f32.mrf.mxu1  ;;  %3561 = vmatmul.f32.gmra.mxu2 %v5438_v35 }
 0x5aa   : > { %v7186_v53 = vadd.f32 %v3268_v60, %v3156_v62 }
 0x5ab   : > { %v2932_v22 = vpop.f32.mrf.mxu0 }
 0x5ac   : > { %v2933_v45 = vadd.f32 %v2932_v22, %v7015_v63  ;;  %3448 = vmatmul.f32.gmra.mxu1 %v5439_v19  ;;  %v3158_v39 = vpop.f32.mrf.mxu2  ;;  %v548_v22 = vld [vmem:[#allocation5 + $0x118] sm:$0xff] }
 0x5ad   : > { %3674 = vmatmul.f32.gmra.mxu3 %v5440_v58  ;;  %3754 = vmatpush.msra.mxu0 %v548_v22 }
 0x5ae   : > { %v3046_v31 = vadd.f32 %v3045_v57, %v2933_v45  ;;  %3335 = vmatmul.f32.gmra.mxu0 %v5437_v6  ;;  %v740_v45 = vld [vmem:[#allocation5 + $0x718] sm:$0xff] }
 0x5af   : > { %4093 = vmatpush.msra.mxu3 %v740_v45  ;;  %v612_v57 = vld [vmem:[#allocation5 + $0x318] sm:$0xff]  ;;  %v5457_v45 = vld [vmem:[%s6104_s28 + $0x360] sm:$0xff] }
 0x5b0   : > { %v3159_v48 = vadd.f32 %v3158_v39, %v3046_v31  ;;  %v3271_v12 = vpop.f32.mrf.mxu3  ;;  %3867 = vmatpush.msra.mxu1 %v612_v57  ;;  %v5449_v39 = vld [vmem:[%s6104_s28 + $0x2e0] sm:$0xff]  ;;  %v5459_v57 = vld [vmem:[%s6104_s28 + $0x368] sm:$0xff] }
 0x5b1   : > { %v3048_v4 = vpop.f32.mrf.mxu1  ;;  %3564 = vmatmul.f32.gmra.mxu2 %v5442_v54 }
 0x5b2   : > { %v7193_v11 = vadd.f32 %v3271_v12, %v3159_v48  ;;  %v5452_v48 = vld [vmem:[%s6104_s28 + $0x2f8] sm:$0xff] }
 0x5b3   : > { %v2935_v33 = vpop.f32.mrf.mxu0 }
 0x5b4   : > { %v2936_v10 = vadd.f32 %v2935_v33, %v7015_v63  ;;  %3451 = vmatmul.f32.gmra.mxu1 %v5443_v18  ;;  %v3161_v61 = vpop.f32.mrf.mxu2  ;;  %v5453_v18 = vld [vmem:[%s6104_s28 + $0x320] sm:$0xff] }
 0x5b5   : > { %3677 = vmatmul.f32.gmra.mxu3 %v5444_v15  ;;  %v5454_v15 = vld [vmem:[%s6104_s28 + $0x330] sm:$0xff] }
 0x5b6   : > { %v3049_v50 = vadd.f32 %v3048_v4, %v2936_v10  ;;  %3338 = vmatmul.f32.gmra.mxu0 %v5441_v24 }
 0x5b8   : > { %v3162_v26 = vadd.f32 %v3161_v61, %v3049_v50  ;;  %v3274_v51 = vpop.f32.mrf.mxu3  ;;  %v672_v61 = vld [vmem:[#allocation5 + $0x4f8] sm:$0xff] }
 0x5b9   : > { %v3051_v28 = vpop.f32.mrf.mxu1  ;;  %3567 = vmatmul.f32.gmra.mxu2 %v5446_v40 }
 0x5ba   : > { %v7200_v34 = vadd.f32 %v3274_v51, %v3162_v26  ;;  %3981 = vmatpush.msra.mxu2 %v672_v61  ;;  %v5455_v26 = vld [vmem:[%s6104_s28 + $0x328] sm:$0xff]  ;;  %v544_v51 = vld [vmem:[#allocation5 + $0xf8] sm:$0xff] }
 0x5bb   : > { %v2938_v8 = vpop.f32.mrf.mxu0  ;;  %3755 = vmatpush.msra.mxu0 %v544_v51  ;;  %v604_v61 = vld [vmem:[#allocation5 + $0x2d8] sm:$0xff] }
 0x5bc   : > { %v2939_v27 = vadd.f32 %v2938_v8, %v7015_v63  ;;  %3454 = vmatmul.f32.gmra.mxu1 %v5447_v9  ;;  %v3164_v62 = vpop.f32.mrf.mxu2  ;;  %v5456_v8 = vld [vmem:[%s6104_s28 + $0x338] sm:$0xff] }
 0x5bd   : > { %3680 = vmatmul.f32.gmra.mxu3 %v5448_v20 }
 0x5be   : > { %v3052_v32 = vadd.f32 %v3051_v28, %v2939_v27  ;;  %3341 = vmatmul.f32.gmra.mxu0 %v5445_v55  ;;  %v736_v28 = vld [vmem:[#allocation5 + $0x6f8] sm:$0xff] }
 0x5bf   : > { %4094 = vmatpush.msra.mxu3 %v736_v28  ;;  %v608_v55 = vld [vmem:[#allocation5 + $0x2f8] sm:$0xff] }
 0x5c0   : > { %v3165_v60 = vadd.f32 %v3164_v62, %v3052_v32  ;;  %v3277_v35 = vpop.f32.mrf.mxu3  ;;  %3868 = vmatpush.msra.mxu1 %v608_v55  ;;  %v5465_v55 = vld [vmem:[%s6104_s28 + $0x3e0] sm:$0xff] }
 0x5c1   : > { %v3054_v19 = vpop.f32.mrf.mxu1  ;;  %3570 = vmatmul.f32.gmra.mxu2 %v5450_v21 }
 0x5c2   : > { %v7207_v56 = vadd.f32 %v3277_v35, %v3165_v60  ;;  %v5458_v60 = vld [vmem:[%s6104_s28 + $0x370] sm:$0xff]  ;;  %3869 = vmatpush.msra.mxu1 %v604_v61 }
 0x5c3   : > { %v2941_v31 = vpop.f32.mrf.mxu0  ;;  %v5474_v61 = vld [vmem:[%s6104_s28 + $0x470] sm:$0xff] }
 0x5c4   : > { %v2942_v6 = vadd.f32 %v2941_v31, %v7015_v63  ;;  %3457 = vmatmul.f32.gmra.mxu1 %v5451_v2  ;;  %v3167_v25 = vpop.f32.mrf.mxu2  ;;  %v5460_v31 = vld [vmem:[%s6104_s28 + $0x378] sm:$0xff] }
 0x5c5   : > { %3683 = vmatmul.f32.gmra.mxu3 %v5452_v48 }
 0x5c6   : > { %v3055_v58 = vadd.f32 %v3054_v19, %v2942_v6  ;;  %3344 = vmatmul.f32.gmra.mxu0 %v5449_v39 }
 0x5c8   : > { %v3168_v33 = vadd.f32 %v3167_v25, %v3055_v58  ;;  %v3280_v4 = vpop.f32.mrf.mxu3  ;;  %v5461_v25 = vld [vmem:[%s6104_s28 + $0x3a0] sm:$0xff] }
 0x5c9   : > { %v3057_v24 = vpop.f32.mrf.mxu1  ;;  %3573 = vmatmul.f32.gmra.mxu2 %v5454_v15 }
 0x5ca   : > { %v7214_v50 = vadd.f32 %v3280_v4, %v3168_v33  ;;  %v5462_v33 = vld [vmem:[%s6104_s28 + $0x3b0] sm:$0xff]  ;;  %v5464_v4 = vld [vmem:[%s6104_s28 + $0x3b8] sm:$0xff] }
 0x5cb   : > { %v2944_v10 = vpop.f32.mrf.mxu0 }
 0x5cc   : > { %v2945_v12 = vadd.f32 %v2944_v10, %v7015_v63  ;;  %3460 = vmatmul.f32.gmra.mxu1 %v5455_v26  ;;  %v3170_v27 = vpop.f32.mrf.mxu2  ;;  %v668_v10 = vld [vmem:[#allocation5 + $0x4d8] sm:$0xff] }
 0x5cd   : > { %3686 = vmatmul.f32.gmra.mxu3 %v5456_v8  ;;  %3982 = vmatpush.msra.mxu2 %v668_v10  ;;  %v600_v10 = vld [vmem:[#allocation5 + $0x2b8] sm:$0xff] }
 0x5ce   : > { %v3058_v54 = vadd.f32 %v3057_v24, %v2945_v12  ;;  %3347 = vmatmul.f32.gmra.mxu0 %v5453_v18  ;;  %v5463_v12 = vld [vmem:[%s6104_s28 + $0x3a8] sm:$0xff]  ;;  %v732_v18 = vld [vmem:[#allocation5 + $0x6d8] sm:$0xff]  ;;  %3870 = vmatpush.msra.mxu1 %v600_v10  ;;  %v5482_v10 = vld [vmem:[%s6104_s28 + $0x4f0] sm:$0xff] }
 0x5cf   : > { %4095 = vmatpush.msra.mxu3 %v732_v18 }
 0x5d0   : > { %v3171_v32 = vadd.f32 %v3170_v27, %v3058_v54  ;;  %v3283_v9 = vpop.f32.mrf.mxu3  ;;  %v540_v54 = vld [vmem:[#allocation5 + $0xd8] sm:$0xff] }
 0x5d1   : > { %v3060_v62 = vpop.f32.mrf.mxu1  ;;  %3576 = vmatmul.f32.gmra.mxu2 %v5458_v60  ;;  %3756 = vmatpush.msra.mxu0 %v540_v54 }
 0x5d2   : > { %v7221_v20 = vadd.f32 %v3283_v9, %v3171_v32  ;;  %v5468_v9 = vld [vmem:[%s6104_s28 + $0x3f8] sm:$0xff] }
 0x5d3   : > { %v2947_v40 = vpop.f32.mrf.mxu0 }
 0x5d4   : > { %v2948_v38 = vadd.f32 %v2947_v40, %v7015_v63  ;;  %3463 = vmatmul.f32.gmra.mxu1 %v5459_v57  ;;  %v3173_v6 = vpop.f32.mrf.mxu2  ;;  %v5466_v40 = vld [vmem:[%s6104_s28 + $0x3f0] sm:$0xff] }
 0x5d5   : > { %3689 = vmatmul.f32.gmra.mxu3 %v5460_v31 }
 0x5d6   : > { %v3061_v22 = vadd.f32 %v3060_v62, %v2948_v38  ;;  %3350 = vmatmul.f32.gmra.mxu0 %v5457_v45  ;;  %v5467_v38 = vld [vmem:[%s6104_s28 + $0x3e8] sm:$0xff] }
 0x5d8   : > { %v3174_v35 = vadd.f32 %v3173_v6, %v3061_v22  ;;  %v3286_v39 = vpop.f32.mrf.mxu3  ;;  %v5469_v6 = vld [vmem:[%s6104_s28 + $0x420] sm:$0xff] }
 0x5d9   : > { %v3063_v2 = vpop.f32.mrf.mxu1  ;;  %3579 = vmatmul.f32.gmra.mxu2 %v5462_v33 }
 0x5da   : > { %v7228_v21 = vadd.f32 %v3286_v39, %v3174_v35  ;;  %v5470_v35 = vld [vmem:[%s6104_s28 + $0x430] sm:$0xff]  ;;  %v5471_v39 = vld [vmem:[%s6104_s28 + $0x428] sm:$0xff] }
 0x5db   : > { %v2950_v19 = vpop.f32.mrf.mxu0 }
 0x5dc   : > { %v2951_v58 = vadd.f32 %v2950_v19, %v7015_v63  ;;  %3466 = vmatmul.f32.gmra.mxu1 %v5463_v12  ;;  %v3176_v24 = vpop.f32.mrf.mxu2  ;;  %v664_v19 = vld [vmem:[#allocation5 + $0x4b8] sm:$0xff] }
 0x5dd   : > { %3692 = vmatmul.f32.gmra.mxu3 %v5464_v4  ;;  %3983 = vmatpush.msra.mxu2 %v664_v19 }
 0x5de   : > { %v3064_v48 = vadd.f32 %v3063_v2, %v2951_v58  ;;  %3353 = vmatmul.f32.gmra.mxu0 %v5461_v25  ;;  %v5472_v2 = vld [vmem:[%s6104_s28 + $0x438] sm:$0xff] }
 0x5df   : > { %v536_v25 = vld [vmem:[#allocation5 + $0xb8] sm:$0xff] }
 0x5e0   : > { %v3177_v15 = vadd.f32 %v3176_v24, %v3064_v48  ;;  %v3289_v27 = vpop.f32.mrf.mxu3  ;;  %3757 = vmatpush.msra.mxu0 %v536_v25 }
 0x5e1   : > { %v3066_v28 = vpop.f32.mrf.mxu1  ;;  %3582 = vmatmul.f32.gmra.mxu2 %v5466_v40 }
 0x5e2   : > { %v7235_v51 = vadd.f32 %v3289_v27, %v3177_v15  ;;  %v5473_v15 = vld [vmem:[%s6104_s28 + $0x460] sm:$0xff]  ;;  %v5476_v27 = vld [vmem:[%s6104_s28 + $0x478] sm:$0xff] }
 0x5e3   : > { %v2953_v26 = vpop.f32.mrf.mxu0 }
 0x5e4   : > { %v2954_v8 = vadd.f32 %v2953_v26, %v7015_v63  ;;  %3469 = vmatmul.f32.gmra.mxu1 %v5467_v38  ;;  %v3179_v62 = vpop.f32.mrf.mxu2 }
 0x5e5   : > { %3695 = vmatmul.f32.gmra.mxu3 %v5468_v9 }
 0x5e6   : > { %v3067_v32 = vadd.f32 %v3066_v28, %v2954_v8  ;;  %3356 = vmatmul.f32.gmra.mxu0 %v5465_v55  ;;  %v5475_v8 = vld [vmem:[%s6104_s28 + $0x468] sm:$0xff] }
 0x5e8   : > { %v3180_v22 = vadd.f32 %v3179_v62, %v3067_v32  ;;  %v3292_v45 = vpop.f32.mrf.mxu3  ;;  %v5477_v62 = vld [vmem:[%s6104_s28 + $0x4a0] sm:$0xff] }
 0x5e9   : > { %v3425_v31 = vpop.f32.mrf.mxu1  ;;  %3585 = vmatmul.f32.gmra.mxu2 %v5470_v35  ;;  %v532_v35 = vld [vmem:[#allocation5 + $0x98] sm:$0xff] }
 0x5ea   : > { %v7242_v57 = vadd.f32 %v3292_v45, %v3180_v22  ;;  %v5478_v22 = vld [vmem:[%s6104_s28 + $0x4b0] sm:$0xff]  ;;  %3758 = vmatpush.msra.mxu0 %v532_v35  ;;  %v5489_v35 = vld [vmem:[%s6104_s28 + $0x560] sm:$0xff] }
 0x5eb   : > { %v3312_v63 = vpop.f32.mrf.mxu0 }
 0x5ec   : > { %v3313_v60 = vadd.f32 %v3312_v63, %v7025_v46  ;;  %3472 = vmatmul.f32.gmra.mxu1 %v5471_v39  ;;  %v3538_v48 = vpop.f32.mrf.mxu2  ;;  %v728_v46 = vld [vmem:[#allocation5 + $0x6b8] sm:$0xff] }
 0x5ed   : > { %3698 = vmatmul.f32.gmra.mxu3 %v5472_v2  ;;  %v660_v63 = vld [vmem:[#allocation5 + $0x498] sm:$0xff] }
 0x5ee   : > { %3359 = vmatmul.f32.gmra.mxu0 %v5469_v6  ;;  %v3426_v58 = vadd.f32 %v3425_v31, %v3313_v60  ;;  %4096 = vmatpush.msra.mxu3 %v728_v46  ;;  %v5479_v60 = vld [vmem:[%s6104_s28 + $0x4a8] sm:$0xff]  ;;  %v5480_v31 = vld [vmem:[%s6104_s28 + $0x4b8] sm:$0xff] }
 0x5ef   : > { %3984 = vmatpush.msra.mxu2 %v660_v63 }
 0x5f0   : > { %v3539_v33 = vadd.f32 %v3538_v48, %v3426_v58  ;;  %v3651_v24 = vpop.f32.mrf.mxu3  ;;  %v596_v58 = vld [vmem:[#allocation5 + $0x298] sm:$0xff] }
 0x5f1   : > { %v3428_v18 = vpop.f32.mrf.mxu1  ;;  %3588 = vmatmul.f32.gmra.mxu2 %v5474_v61  ;;  %3871 = vmatpush.msra.mxu1 %v596_v58  ;;  %v5491_v58 = vld [vmem:[%s6104_s28 + $0x568] sm:$0xff] }
 0x5f2   : > { %v3652_v54 = vadd.f32 %v3651_v24, %v3539_v33  ;;  %v5481_v33 = vld [vmem:[%s6104_s28 + $0x4e0] sm:$0xff]  ;;  %v5484_v24 = vld [vmem:[%s6104_s28 + $0x4f8] sm:$0xff] }
 0x5f3   : > { %v3315_v12 = vpop.f32.mrf.mxu0 }
 0x5f4   : > { %v3316_v4 = vadd.f32 %v3315_v12, %v7032_v47  ;;  %4653 = vst [vmem:[%s6415_s20 + $0x10] sm:$0xff] %v3652_v54  ;;  %3475 = vmatmul.f32.gmra.mxu1 %v5475_v8  ;;  %v3541_v28 = vpop.f32.mrf.mxu2 }
 0x5f5   : > { %3701 = vmatmul.f32.gmra.mxu3 %v5476_v27  ;;  %v5485_v27 = vld [vmem:[%s6104_s28 + $0x520] sm:$0xff] }
 0x5f6   : > { %3362 = vmatmul.f32.gmra.mxu0 %v5473_v15  ;;  %v3429_v26 = vadd.f32 %v3428_v18, %v3316_v4  ;;  %v5483_v4 = vld [vmem:[%s6104_s28 + $0x4e8] sm:$0xff] }
 0x5f8   : > { %v3542_v32 = vadd.f32 %v3541_v28, %v3429_v26  ;;  %v3654_v40 = vpop.f32.mrf.mxu3  ;;  %v5486_v28 = vld [vmem:[%s6104_s28 + $0x530] sm:$0xff] }
 0x5f9   : > { %v3431_v9 = vpop.f32.mrf.mxu1  ;;  %3591 = vmatmul.f32.gmra.mxu2 %v5478_v22  ;;  %v592_v22 = vld [vmem:[#allocation5 + $0x278] sm:$0xff] }
 0x5fa   : > { %v3655_v38 = vadd.f32 %v3654_v40, %v3542_v32  ;;  %v656_v32 = vld [vmem:[#allocation5 + $0x478] sm:$0xff]  ;;  %3872 = vmatpush.msra.mxu1 %v592_v22 }
 0x5fb   : > { %v3318_v47 = vpop.f32.mrf.mxu0  ;;  %3985 = vmatpush.msra.mxu2 %v656_v32  ;;  %v5488_v40 = vld [vmem:[%s6104_s28 + $0x538] sm:$0xff] }
 0x5fc   : > { %v3319_v55 = vadd.f32 %v3318_v47, %v7039_v36  ;;  %4657 = vst [vmem:[%s6415_s20 + $0x30] sm:$0xff] %v3655_v38  ;;  %3478 = vmatmul.f32.gmra.mxu1 %v5479_v60  ;;  %v3544_v6 = vpop.f32.mrf.mxu2  ;;  %v724_v36 = vld [vmem:[#allocation5 + $0x698] sm:$0xff] }
 0x5fd   : > { %3704 = vmatmul.f32.gmra.mxu3 %v5480_v31 }
 0x5fe   : > { %3365 = vmatmul.f32.gmra.mxu0 %v5477_v62  ;;  %v3432_v45 = vadd.f32 %v3431_v9, %v3319_v55  ;;  %4097 = vmatpush.msra.mxu3 %v724_v36  ;;  %v5487_v55 = vld [vmem:[%s6104_s28 + $0x528] sm:$0xff]  ;;  %v528_v9 = vld [vmem:[#allocation5 + $0x78] sm:$0xff]  ;;  %v5490_v36 = vld [vmem:[%s6104_s28 + $0x570] sm:$0xff] }
 0x5ff   : > { %3759 = vmatpush.msra.mxu0 %v528_v9 }
 0x600   : > { %v3545_v19 = vadd.f32 %v3544_v6, %v3432_v45  ;;  %v3657_v48 = vpop.f32.mrf.mxu3 }
 0x601   : > { %v3434_v46 = vpop.f32.mrf.mxu1  ;;  %3594 = vmatmul.f32.gmra.mxu2 %v5482_v10 }
 0x602   : > { %v3658_v25 = vadd.f32 %v3657_v48, %v3545_v19 }
 0x603   : > { %v3321_v39 = vpop.f32.mrf.mxu0 }
 0x604   : > { %v3322_v2 = vadd.f32 %v3321_v39, %v7046_v14  ;;  %4661 = vst [vmem:[%s6415_s20 + $0x50] sm:$0xff] %v3658_v25  ;;  %3481 = vmatmul.f32.gmra.mxu1 %v5483_v4  ;;  %v3547_v54 = vpop.f32.mrf.mxu2  ;;  %v5492_v39 = vld [vmem:[%s6104_s28 + $0x578] sm:$0xff]  ;;  %v5494_v4 = vld [vmem:[%s6104_s28 + $0x5b0] sm:$0xff] }
 0x605   : > { %3707 = vmatmul.f32.gmra.mxu3 %v5484_v24  ;;  %v652_v24 = vld [vmem:[#allocation5 + $0x458] sm:$0xff] }
 0x606   : > { %3368 = vmatmul.f32.gmra.mxu0 %v5481_v33  ;;  %v3435_v12 = vadd.f32 %v3434_v46, %v3322_v2  ;;  %3986 = vmatpush.msra.mxu2 %v652_v24 }
 0x608   : > { %v3548_v18 = vadd.f32 %v3547_v54, %v3435_v12  ;;  %v3660_v61 = vpop.f32.mrf.mxu3  ;;  %v5493_v12 = vld [vmem:[%s6104_s28 + $0x5a0] sm:$0xff] }
 0x609   : > { %v3437_v8 = vpop.f32.mrf.mxu1  ;;  %3597 = vmatmul.f32.gmra.mxu2 %v5486_v28 }
 0x60a   : > { %v3661_v26 = vadd.f32 %v3660_v61, %v3548_v18  ;;  %v5495_v18 = vld [vmem:[%s6104_s28 + $0x5a8] sm:$0xff]  ;;  %v524_v61 = vld [vmem:[#allocation5 + $0x58] sm:$0xff] }
 0x60b   : > { %v3324_v14 = vpop.f32.mrf.mxu0  ;;  %3760 = vmatpush.msra.mxu0 %v524_v61  ;;  %v5508_v61 = vld [vmem:[%s6104_s28 + $0x678] sm:$0xff] }
 0x60c   : > { %v3325_v15 = vadd.f32 %v3324_v14, %v7053_v30  ;;  %4665 = vst [vmem:[%s6415_s20 + $0x70] sm:$0xff] %v3661_v26  ;;  %3484 = vmatmul.f32.gmra.mxu1 %v5487_v55  ;;  %v3550_v38 = vpop.f32.mrf.mxu2  ;;  %v720_v30 = vld [vmem:[#allocation5 + $0x678] sm:$0xff] }
 0x60d   : > { %3710 = vmatmul.f32.gmra.mxu3 %v5488_v40  ;;  %v5496_v14 = vld [vmem:[%s6104_s28 + $0x5b8] sm:$0xff]  ;;  %v5497_v40 = vld [vmem:[%s6104_s28 + $0x5e0] sm:$0xff] }
 0x60e   : > { %3371 = vmatmul.f32.gmra.mxu0 %v5485_v27  ;;  %v3438_v47 = vadd.f32 %v3437_v8, %v3325_v15  ;;  %4098 = vmatpush.msra.mxu3 %v720_v30  ;;  %v588_v8 = vld [vmem:[#allocation5 + $0x258] sm:$0xff]  ;;  %v5499_v30 = vld [vmem:[%s6104_s28 + $0x5e8] sm:$0xff] }
 0x60f   : > { %3873 = vmatpush.msra.mxu1 %v588_v8 }
 0x610   : > { %v3551_v62 = vadd.f32 %v3550_v38, %v3438_v47  ;;  %v3663_v60 = vpop.f32.mrf.mxu3  ;;  %v5498_v38 = vld [vmem:[%s6104_s28 + $0x5f0] sm:$0xff] }
 0x611   : > { %v3440_v6 = vpop.f32.mrf.mxu1  ;;  %3600 = vmatmul.f32.gmra.mxu2 %v5490_v36  ;;  %v5502_v36 = vld [vmem:[%s6104_s28 + $0x630] sm:$0xff] }
 0x612   : > { %v3664_v31 = vadd.f32 %v3663_v60, %v3551_v62  ;;  %v5500_v62 = vld [vmem:[%s6104_s28 + $0x5f8] sm:$0xff] }
 0x613   : > { %v3327_v63 = vpop.f32.mrf.mxu0 }
 0x614   : > { %v3328_v45 = vadd.f32 %v3327_v63, %v7060_v0  ;;  %4669 = vst [vmem:[%s6415_s20 + $0x90] sm:$0xff] %v3664_v31  ;;  %3487 = vmatmul.f32.gmra.mxu1 %v5491_v58  ;;  %v3553_v2 = vpop.f32.mrf.mxu2 }
 0x615   : > { %3713 = vmatmul.f32.gmra.mxu3 %v5492_v39  ;;  %v5503_v39 = vld [vmem:[%s6104_s28 + $0x628] sm:$0xff] }
 0x616   : > { %3374 = vmatmul.f32.gmra.mxu0 %v5489_v35  ;;  %v3441_v19 = vadd.f32 %v3440_v6, %v3328_v45  ;;  %v5501_v35 = vld [vmem:[%s6104_s28 + $0x620] sm:$0xff] }
 0x618   : > { %v3554_v48 = vadd.f32 %v3553_v2, %v3441_v19  ;;  %v3666_v46 = vpop.f32.mrf.mxu3  ;;  %v648_v19 = vld [vmem:[#allocation5 + $0x438] sm:$0xff] }
 0x619   : > { %v3443_v10 = vpop.f32.mrf.mxu1  ;;  %3603 = vmatmul.f32.gmra.mxu2 %v5494_v4  ;;  %v5504_v2 = vld [vmem:[%s6104_s28 + $0x638] sm:$0xff] }
 0x61a   : > { %v3667_v33 = vadd.f32 %v3666_v46, %v3554_v48  ;;  %3987 = vmatpush.msra.mxu2 %v648_v19  ;;  %v584_v46 = vld [vmem:[#allocation5 + $0x238] sm:$0xff]  ;;  %v5514_v19 = vld [vmem:[%s6104_s28 + $0x6f0] sm:$0xff] }
 0x61b   : > { %v3330_v0 = vpop.f32.mrf.mxu0  ;;  %3874 = vmatpush.msra.mxu1 %v584_v46 }
 0x61c   : > { %v3331_v25 = vadd.f32 %v3330_v0, %v7067_v16  ;;  %4673 = vst [vmem:[%s6415_s20 + $0xb0] sm:$0xff] %v3667_v33  ;;  %3490 = vmatmul.f32.gmra.mxu1 %v5495_v18  ;;  %v3556_v15 = vpop.f32.mrf.mxu2  ;;  %v716_v16 = vld [vmem:[#allocation5 + $0x658] sm:$0xff]  ;;  %v5506_v18 = vld [vmem:[%s6104_s28 + $0x670] sm:$0xff] }
 0x61d   : > { %3716 = vmatmul.f32.gmra.mxu3 %v5496_v14  ;;  %v520_v0 = vld [vmem:[#allocation5 + $0x38] sm:$0xff] }
 0x61e   : > { %3377 = vmatmul.f32.gmra.mxu0 %v5493_v12  ;;  %v3444_v54 = vadd.f32 %v3443_v10, %v3331_v25  ;;  %4099 = vmatpush.msra.mxu3 %v716_v16 }
 0x61f   : > { %3761 = vmatpush.msra.mxu0 %v520_v0 }
 0x620   : > { %v3557_v26 = vadd.f32 %v3556_v15, %v3444_v54  ;;  %v3669_v32 = vpop.f32.mrf.mxu3  ;;  %v5505_v54 = vld [vmem:[%s6104_s28 + $0x660] sm:$0xff]  ;;  %v5507_v15 = vld [vmem:[%s6104_s28 + $0x668] sm:$0xff] }
 0x621   : > { %v3446_v55 = vpop.f32.mrf.mxu1  ;;  %3606 = vmatmul.f32.gmra.mxu2 %v5498_v38 }
 0x622   : > { %v3670_v47 = vadd.f32 %v3669_v32, %v3557_v26 }
 0x623   : > { %v3333_v27 = vpop.f32.mrf.mxu0 }
 0x624   : > { %v3334_v28 = vadd.f32 %v3333_v27, %v7074_v52  ;;  %4677 = vst [vmem:[%s6415_s20 + $0xd0] sm:$0xff] %v3670_v47  ;;  %3493 = vmatmul.f32.gmra.mxu1 %v5499_v30  ;;  %v3559_v22 = vpop.f32.mrf.mxu2  ;;  %v5509_v47 = vld [vmem:[%s6104_s28 + $0x6a0] sm:$0xff]  ;;  %v5512_v30 = vld [vmem:[%s6104_s28 + $0x6b8] sm:$0xff] }
 0x625   : > { %3719 = vmatmul.f32.gmra.mxu3 %v5500_v62 }
 0x626   : > { %3380 = vmatmul.f32.gmra.mxu0 %v5497_v40  ;;  %v3447_v9 = vadd.f32 %v3446_v55, %v3334_v28  ;;  %v5510_v55 = vld [vmem:[%s6104_s28 + $0x6b0] sm:$0xff]  ;;  %v644_v40 = vld [vmem:[#allocation5 + $0x418] sm:$0xff] }
 0x627   : > { %3988 = vmatpush.msra.mxu2 %v644_v40  ;;  %v5523_v40 = vld [vmem:[%s6104_s28 + $0x768] sm:$0xff] }
 0x628   : > { %v3560_v63 = vadd.f32 %v3559_v22, %v3447_v9  ;;  %v3672_v60 = vpop.f32.mrf.mxu3  ;;  %v5511_v9 = vld [vmem:[%s6104_s28 + $0x6a8] sm:$0xff]  ;;  %v516_v22 = vld [vmem:[#allocation5 + $0x18] sm:$0xff] }
 0x629   : > { %v3449_v6 = vpop.f32.mrf.mxu1  ;;  %3609 = vmatmul.f32.gmra.mxu2 %v5502_v36  ;;  %3762 = vmatpush.msra.mxu0 %v516_v22  ;;  %v5513_v36 = vld [vmem:[%s6104_s28 + $0x6e0] sm:$0xff] }
 0x62a   : > { %v3673_v31 = vadd.f32 %v3672_v60, %v3560_v63 }
 0x62b   : > { %v3336_v52 = vpop.f32.mrf.mxu0 }
 0x62c   : > { %v3337_v45 = vadd.f32 %v3336_v52, %v7081_v42  ;;  %4681 = vst [vmem:[%s6415_s20 + $0xf0] sm:$0xff] %v3673_v31  ;;  %3496 = vmatmul.f32.gmra.mxu1 %v5503_v39  ;;  %v3562_v48 = vpop.f32.mrf.mxu2  ;;  %v712_v42 = vld [vmem:[#allocation5 + $0x638] sm:$0xff]  ;;  %v5515_v39 = vld [vmem:[%s6104_s28 + $0x6e8] sm:$0xff] }
 0x62d   : > { %3722 = vmatmul.f32.gmra.mxu3 %v5504_v2  ;;  %v580_v52 = vld [vmem:[#allocation5 + $0x218] sm:$0xff] }
 0x62e   : > { %3383 = vmatmul.f32.gmra.mxu0 %v5501_v35  ;;  %v3450_v58 = vadd.f32 %v3449_v6, %v3337_v45  ;;  %4100 = vmatpush.msra.mxu3 %v712_v42  ;;  %v5516_v2 = vld [vmem:[%s6104_s28 + $0x6f8] sm:$0xff] }
 0x62f   : > { %3875 = vmatpush.msra.mxu1 %v580_v52  ;;  %v5525_v52 = vld [vmem:[%s6104_s28 + $0x7a0] sm:$0xff] }
 0x630   : > { %v3563_v25 = vadd.f32 %v3562_v48, %v3450_v58  ;;  %v3675_v12 = vpop.f32.mrf.mxu3 }
 0x631   : > { %v3452_v24 = vpop.f32.mrf.mxu1  ;;  %3612 = vmatmul.f32.gmra.mxu2 %v5506_v18  ;;  %v5520_v18 = vld [vmem:[%s6104_s28 + $0x738] sm:$0xff] }
 0x632   : > { %v3676_v4 = vadd.f32 %v3675_v12, %v3563_v25  ;;  %v5518_v12 = vld [vmem:[%s6104_s28 + $0x730] sm:$0xff] }
 0x633   : > { %v3339_v33 = vpop.f32.mrf.mxu0 }
 0x634   : > { %v3340_v10 = vadd.f32 %v3339_v33, %v7088_v44  ;;  %4685 = vst [vmem:[%s6415_s20 + $0x110] sm:$0xff] %v3676_v4  ;;  %3499 = vmatmul.f32.gmra.mxu1 %v5507_v15  ;;  %v3565_v16 = vpop.f32.mrf.mxu2  ;;  %v960_v4 = vld [vmem:[#allocation5 + $0xdf8] sm:$0xff] }
 0x635   : > { %3725 = vmatmul.f32.gmra.mxu3 %v5508_v61  ;;  %4425 = vmatpush.msrb.mxu2 %v960_v4  ;;  %v832_v15 = vld [vmem:[#allocation5 + $0x9f8] sm:$0xff] }
 0x636   : > { %3386 = vmatmul.f32.gmra.mxu0 %v5505_v54  ;;  %v3453_v14 = vadd.f32 %v3452_v24, %v3340_v10  ;;  %v5517_v10 = vld [vmem:[%s6104_s28 + $0x720] sm:$0xff]  ;;  %v5519_v54 = vld [vmem:[%s6104_s28 + $0x728] sm:$0xff] }
 0x637   : > { %4199 = vmatpush.msrb.mxu0 %v832_v15 }
 0x638   : > { %v3566_v26 = vadd.f32 %v3565_v16, %v3453_v14  ;;  %v3678_v27 = vpop.f32.mrf.mxu3  ;;  %v896_v16 = vld [vmem:[#allocation5 + $0xbf8] sm:$0xff] }
 0x639   : > { %v3455_v32 = vpop.f32.mrf.mxu1  ;;  %3615 = vmatmul.f32.gmra.mxu2 %v5510_v55  ;;  %4312 = vmatpush.msrb.mxu1 %v896_v16  ;;  %v952_v16 = vld [vmem:[#allocation5 + $0xdb8] sm:$0xff] }
 0x63a   : > { %v3679_v28 = vadd.f32 %v3678_v27, %v3566_v26 }
 0x63b   : > { %v3342_v44 = vpop.f32.mrf.mxu0 }
 0x63c   : > { %v3343_v8 = vadd.f32 %v3342_v44, %v7095_v5  ;;  %4689 = vst [vmem:[%s6415_s20 + $0x130] sm:$0xff] %v3679_v28  ;;  %3502 = vmatmul.f32.gmra.mxu1 %v5511_v9  ;;  %v3568_v62 = vpop.f32.mrf.mxu2  ;;  %v708_v5 = vld [vmem:[#allocation5 + $0x618] sm:$0xff] }
 0x63d   : > { %3728 = vmatmul.f32.gmra.mxu3 %v5512_v30 }
 0x63e   : > { %3389 = vmatmul.f32.gmra.mxu0 %v5509_v47  ;;  %v3456_v38 = vadd.f32 %v3455_v32, %v3343_v8  ;;  %4101 = vmatpush.msra.mxu3 %v708_v5  ;;  %v5521_v32 = vld [vmem:[%s6104_s28 + $0x760] sm:$0xff]  ;;  %v5522_v47 = vld [vmem:[%s6104_s28 + $0x770] sm:$0xff] }
 0x640   : > { %v3569_v63 = vadd.f32 %v3568_v62, %v3456_v38  ;;  %v3681_v31 = vpop.f32.mrf.mxu3  ;;  %v5524_v38 = vld [vmem:[%s6104_s28 + $0x778] sm:$0xff] }
 0x641   : > { %v3458_v35 = vpop.f32.mrf.mxu1  ;;  %3618 = vmatmul.f32.gmra.mxu2 %v5514_v19  ;;  %v828_v19 = vld [vmem:[#allocation5 + $0x9d8] sm:$0xff] }
 0x642   : > { %v3682_v6 = vadd.f32 %v3681_v31, %v3569_v63  ;;  %4200 = vmatpush.msrb.mxu0 %v828_v19  ;;  %v5542_v19 = vld [vmem:[%s6104_s28 + $0x90] sm:$0xff] }
 0x643   : > { %v3345_v45 = vpop.f32.mrf.mxu0 }
 0x644   : > { %v3346_v60 = vadd.f32 %v3345_v45, %v7102_v23  ;;  %4693 = vst [vmem:[%s6415_s20 + $0x150] sm:$0xff] %v3682_v6  ;;  %3505 = vmatmul.f32.gmra.mxu1 %v5515_v39  ;;  %v3571_v48 = vpop.f32.mrf.mxu2  ;;  %v5526_v45 = vld [vmem:[%s6104_s28 + $0x7b0] sm:$0xff]  ;;  %v5527_v6 = vld [vmem:[%s6104_s28 + $0x7a8] sm:$0xff]  ;;  %v892_v39 = vld [vmem:[#allocation5 + $0xbd8] sm:$0xff] }
 0x645   : > { %3731 = vmatmul.f32.gmra.mxu3 %v5516_v2  ;;  %4313 = vmatpush.msrb.mxu1 %v892_v39  ;;  %v5543_v39 = vld [vmem:[%s6104_s28 + $0x88] sm:$0xff] }
 0x646   : > { %3392 = vmatmul.f32.gmra.mxu0 %v5513_v36  ;;  %v3459_v58 = vadd.f32 %v3458_v35, %v3346_v60  ;;  %v956_v60 = vld [vmem:[#allocation5 + $0xdd8] sm:$0xff] }
 0x647   : > { %4426 = vmatpush.msrb.mxu2 %v956_v60  ;;  %v5528_v35 = vld [vmem:[%s6104_s28 + $0x7b8] sm:$0xff] }
 0x648   : > { %v3572_v0 = vadd.f32 %v3571_v48, %v3459_v58  ;;  %v3684_v25 = vpop.f32.mrf.mxu3 }
 0x649   : > { %v3461_v33 = vpop.f32.mrf.mxu1  ;;  %3621 = vmatmul.f32.gmra.mxu2 %v5518_v12  ;;  %v5532_v12 = vld [vmem:[%s6104_s28 + $0x7f8] sm:$0xff] }
 0x64a   : > { %v3685_v46 = vadd.f32 %v3684_v25, %v3572_v0  ;;  %v5529_v25 = vld [vmem:[%s6104_s28 + $0x7e0] sm:$0xff]  ;;  %4427 = vmatpush.msrb.mxu2 %v952_v16 }
 0x64b   : > { %v3348_v23 = vpop.f32.mrf.mxu0 }
 0x64c   : > { %v3349_v42 = vadd.f32 %v3348_v23, %v7109_v37  ;;  %4697 = vst [vmem:[%s6415_s20 + $0x170] sm:$0xff] %v3685_v46  ;;  %3508 = vmatmul.f32.gmra.mxu1 %v5519_v54  ;;  %v3574_v14 = vpop.f32.mrf.mxu2  ;;  %v1024_v37 = vld [vmem:[#allocation5 + $0xff8] sm:$0xff]  ;;  %v5530_v46 = vld [vmem:[%s6104_s28 + $0x7f0] sm:$0xff] }
 0x64d   : > { %3734 = vmatmul.f32.gmra.mxu3 %v5520_v18 }
 0x64e   : > { %3395 = vmatmul.f32.gmra.mxu0 %v5517_v10  ;;  %v3462_v24 = vadd.f32 %v3461_v33, %v3349_v42  ;;  %4538 = vmatpush.msrb.mxu3 %v1024_v37  ;;  %v5531_v10 = vld [vmem:[%s6104_s28 + $0x7e8] sm:$0xff]  ;;  %v5533_v37 = vld [vmem:[%s6104_s28] sm:$0xff] }
 0x650   : > { %v3575_v61 = vadd.f32 %v3574_v14, %v3462_v24  ;;  %v3687_v8 = vpop.f32.mrf.mxu3 }
 0x651   : > { %v3464_v28 = vpop.f32.mrf.mxu1  ;;  %3624 = vmatmul.f32.gmra.mxu2 %v5522_v47  ;;  %v888_v47 = vld [vmem:[#allocation5 + $0xbb8] sm:$0xff] }
 0x652   : > { %v3688_v27 = vadd.f32 %v3687_v8, %v3575_v61  ;;  %v5534_v61 = vld [vmem:[%s6104_s28 + $0x10] sm:$0xff]  ;;  %v5536_v8 = vld [vmem:[%s6104_s28 + $0x18] sm:$0xff]  ;;  %4314 = vmatpush.msrb.mxu1 %v888_v47 }
 0x653   : > { %v3351_v26 = vpop.f32.mrf.mxu0 }
 0x654   : > { %v3352_v44 = vadd.f32 %v3351_v26, %v7116_v1  ;;  %4701 = vst [vmem:[%s6415_s20 + $0x190] sm:$0xff] %v3688_v27  ;;  %3511 = vmatmul.f32.gmra.mxu1 %v5523_v40  ;;  %v3577_v9 = vpop.f32.mrf.mxu2 }
 0x655   : > { %3737 = vmatmul.f32.gmra.mxu3 %v5524_v38 }
 0x656   : > { %3398 = vmatmul.f32.gmra.mxu0 %v5521_v32  ;;  %v3465_v55 = vadd.f32 %v3464_v28, %v3352_v44  ;;  %v5535_v44 = vld [vmem:[%s6104_s28 + $0x8] sm:$0xff]  ;;  %v824_v28 = vld [vmem:[#allocation5 + $0x9b8] sm:$0xff] }
 0x657   : > { %4201 = vmatpush.msrb.mxu0 %v824_v28 }
 0x658   : > { %v3578_v30 = vadd.f32 %v3577_v9, %v3465_v55  ;;  %v3690_v22 = vpop.f32.mrf.mxu3 }
 0x659   : > { %v3467_v63 = vpop.f32.mrf.mxu1  ;;  %3627 = vmatmul.f32.gmra.mxu2 %v5526_v45 }
 0x65a   : > { %v3691_v5 = vadd.f32 %v3690_v22, %v3578_v30 }
 0x65b   : > { %v3354_v1 = vpop.f32.mrf.mxu0 }
 0x65c   : > { %v3355_v62 = vadd.f32 %v3354_v1, %v7123_v13  ;;  %4705 = vst [vmem:[%s6415_s20 + $0x1b0] sm:$0xff] %v3691_v5  ;;  %3514 = vmatmul.f32.gmra.mxu1 %v5527_v6  ;;  %v3580_v36 = vpop.f32.mrf.mxu2  ;;  %v1020_v13 = vld [vmem:[#allocation5 + $0xfd8] sm:$0xff]  ;;  %v5537_v1 = vld [vmem:[%s6104_s28 + $0x40] sm:$0xff]  ;;  %v5539_v5 = vld [vmem:[%s6104_s28 + $0x48] sm:$0xff] }
 0x65d   : > { %3740 = vmatmul.f32.gmra.mxu3 %v5528_v35 }
 0x65e   : > { %3401 = vmatmul.f32.gmra.mxu0 %v5525_v52  ;;  %v3468_v31 = vadd.f32 %v3467_v63, %v3355_v62  ;;  %4539 = vmatpush.msrb.mxu3 %v1020_v13  ;;  %v5538_v62 = vld [vmem:[%s6104_s28 + $0x50] sm:$0xff]  ;;  %v5540_v63 = vld [vmem:[%s6104_s28 + $0x58] sm:$0xff] }
 0x65f   : > { %v948_v13 = vld [vmem:[#allocation5 + $0xd98] sm:$0xff] }
 0x660   : > { %v3581_v58 = vadd.f32 %v3580_v36, %v3468_v31  ;;  %v3693_v0 = vpop.f32.mrf.mxu3  ;;  %v5541_v36 = vld [vmem:[%s6104_s28 + $0x80] sm:$0xff]  ;;  %4428 = vmatpush.msrb.mxu2 %v948_v13 }
 0x661   : > { %v3470_v42 = vpop.f32.mrf.mxu1  ;;  %3630 = vmatmul.f32.gmra.mxu2 %v5530_v46  ;;  %v5557_v13 = vld [vmem:[%s6104_s28 + $0x180] sm:$0xff] }
 0x662   : > { %v3694_v23 = vadd.f32 %v3693_v0, %v3581_v58  ;;  %v820_v0 = vld [vmem:[#allocation5 + $0x998] sm:$0xff] }
 0x663   : > { %v3357_v2 = vpop.f32.mrf.mxu0  ;;  %4202 = vmatpush.msrb.mxu0 %v820_v0  ;;  %v5560_v0 = vld [vmem:[%s6104_s28 + $0x198] sm:$0xff] }
 0x664   : > { %v3358_v48 = vadd.f32 %v3357_v2, %v7130_v17  ;;  %4709 = vst [vmem:[%s6415_s20 + $0x1d0] sm:$0xff] %v3694_v23  ;;  %3517 = vmatmul.f32.gmra.mxu1 %v5531_v10  ;;  %v3583_v4 = vpop.f32.mrf.mxu2  ;;  %v5544_v2 = vld [vmem:[%s6104_s28 + $0x98] sm:$0xff] }
 0x665   : > { %3743 = vmatmul.f32.gmra.mxu3 %v5532_v12 }
 0x666   : > { %3404 = vmatmul.f32.gmra.mxu0 %v5529_v25  ;;  %v3471_v33 = vadd.f32 %v3470_v42, %v3358_v48  ;;  %v884_v42 = vld [vmem:[#allocation5 + $0xb98] sm:$0xff] }
 0x667   : > { %4315 = vmatpush.msrb.mxu1 %v884_v42 }
 0x668   : > { %v3584_v24 = vadd.f32 %v3583_v4, %v3471_v33  ;;  %v3696_v18 = vpop.f32.mrf.mxu3  ;;  %v5545_v4 = vld [vmem:[%s6104_s28 + $0xc0] sm:$0xff] }
 0x669   : > { %v3473_v15 = vpop.f32.mrf.mxu1  ;;  %3989 = vmatmul.f32.vlgmr.msra.gmra.mxu2 %v5534_v61 }
 0x66a   : > { %v3697_v14 = vadd.f32 %v3696_v18, %v3584_v24  ;;  %v5546_v24 = vld [vmem:[%s6104_s28 + $0xd0] sm:$0xff]  ;;  %v5548_v18 = vld [vmem:[%s6104_s28 + $0xd8] sm:$0xff] }
 0x66b   : > { %v3360_v17 = vpop.f32.mrf.mxu0 }
 0x66c   : > { %v3361_v54 = vadd.f32 %v3360_v17, %v7137_v43  ;;  %4713 = vst [vmem:[%s6415_s20 + $0x1f0] sm:$0xff] %v3697_v14  ;;  %3876 = vmatmul.f32.vlgmr.msra.gmra.mxu1 %v5535_v44  ;;  %v3586_v27 = vpop.f32.mrf.mxu2  ;;  %v1016_v43 = vld [vmem:[#allocation5 + $0xfb8] sm:$0xff]  ;;  %v5549_v44 = vld [vmem:[%s6104_s28 + $0x100] sm:$0xff] }
 0x66d   : > { %4102 = vmatmul.f32.vlgmr.msra.gmra.mxu3 %v5536_v8  ;;  %v5550_v8 = vld [vmem:[%s6104_s28 + $0x110] sm:$0xff] }
 0x66e   : > { %3763 = vmatmul.f32.vlgmr.msra.gmra.mxu0 %v5533_v37  ;;  %v3474_v26 = vadd.f32 %v3473_v15, %v3361_v54  ;;  %4540 = vmatpush.msrb.mxu3 %v1016_v43  ;;  %v5547_v54 = vld [vmem:[%s6104_s28 + $0xc8] sm:$0xff] }
 0x66f   : > { %v5551_v43 = vld [vmem:[%s6104_s28 + $0x108] sm:$0xff] }
 0x670   : > { %v3587_v32 = vadd.f32 %v3586_v27, %v3474_v26  ;;  %v3699_v38 = vpop.f32.mrf.mxu3  ;;  %v944_v27 = vld [vmem:[#allocation5 + $0xd78] sm:$0xff] }
 0x671   : > { %v3476_v30 = vpop.f32.mrf.mxu1  ;;  %3992 = vmatmul.f32.gmra.mxu2 %v5538_v62 }
 0x672   : > { %v3700_v9 = vadd.f32 %v3699_v38, %v3587_v32  ;;  %4429 = vmatpush.msrb.mxu2 %v944_v27  ;;  %v5552_v32 = vld [vmem:[%s6104_s28 + $0x118] sm:$0xff] }
 0x673   : > { %v3363_v55 = vpop.f32.mrf.mxu0  ;;  %v880_v38 = vld [vmem:[#allocation5 + $0xb78] sm:$0xff] }
 0x674   : > { %v3364_v40 = vadd.f32 %v3363_v55, %v7144_v3  ;;  %4717 = vst [vmem:[%s6415_s20 + $0x210] sm:$0xff] %v3700_v9  ;;  %3879 = vmatmul.f32.gmra.mxu1 %v5539_v5  ;;  %v3589_v52 = vpop.f32.mrf.mxu2  ;;  %v816_v55 = vld [vmem:[#allocation5 + $0x978] sm:$0xff]  ;;  %v5553_v5 = vld [vmem:[%s6104_s28 + $0x140] sm:$0xff] }
 0x675   : > { %4105 = vmatmul.f32.gmra.mxu3 %v5540_v63  ;;  %4203 = vmatpush.msrb.mxu0 %v816_v55  ;;  %v5554_v63 = vld [vmem:[%s6104_s28 + $0x150] sm:$0xff]  ;;  %v936_v27 = vld [vmem:[#allocation5 + $0xd38] sm:$0xff] }
 0x676   : > { %3766 = vmatmul.f32.gmra.mxu0 %v5537_v1  ;;  %v3477_v22 = vadd.f32 %v3476_v30, %v3364_v40  ;;  %4316 = vmatpush.msrb.mxu1 %v880_v38  ;;  %v808_v55 = vld [vmem:[#allocation5 + $0x938] sm:$0xff] }
 0x678   : > { %v3590_v45 = vadd.f32 %v3589_v52, %v3477_v22  ;;  %v3702_v31 = vpop.f32.mrf.mxu3 }
 0x679   : > { %v3479_v35 = vpop.f32.mrf.mxu1  ;;  %3995 = vmatmul.f32.gmra.mxu2 %v5542_v19 }
 0x67a   : > { %v3703_v6 = vadd.f32 %v3702_v31, %v3590_v45  ;;  %v5555_v45 = vld [vmem:[%s6104_s28 + $0x148] sm:$0xff] }
 0x67b   : > { %v3366_v3 = vpop.f32.mrf.mxu0 }
 0x67c   : > { %v3367_v60 = vadd.f32 %v3366_v3, %v7151_v7  ;;  %4721 = vst [vmem:[%s6415_s20 + $0x230] sm:$0xff] %v3703_v6  ;;  %3882 = vmatmul.f32.gmra.mxu1 %v5543_v39  ;;  %v3592_v48 = vpop.f32.mrf.mxu2  ;;  %v1012_v7 = vld [vmem:[#allocation5 + $0xf98] sm:$0xff] }
 0x67d   : > { %4108 = vmatmul.f32.gmra.mxu3 %v5544_v2  ;;  %v5556_v3 = vld [vmem:[%s6104_s28 + $0x158] sm:$0xff] }
 0x67e   : > { %3769 = vmatmul.f32.gmra.mxu0 %v5541_v36  ;;  %v3480_v58 = vadd.f32 %v3479_v35, %v3367_v60  ;;  %4541 = vmatpush.msrb.mxu3 %v1012_v7  ;;  %v940_v39 = vld [vmem:[#allocation5 + $0xd58] sm:$0xff] }
 0x67f   : > { %4430 = vmatpush.msrb.mxu2 %v940_v39  ;;  %v5575_v39 = vld [vmem:[%s6104_s28 + $0x288] sm:$0xff] }
 0x680   : > { %v3593_v23 = vadd.f32 %v3592_v48, %v3480_v58  ;;  %v3705_v33 = vpop.f32.mrf.mxu3  ;;  %v5558_v58 = vld [vmem:[%s6104_s28 + $0x190] sm:$0xff]  ;;  %v5559_v48 = vld [vmem:[%s6104_s28 + $0x188] sm:$0xff] }
 0x681   : > { %v3482_v12 = vpop.f32.mrf.mxu1  ;;  %3998 = vmatmul.f32.gmra.mxu2 %v5546_v24  ;;  %v5561_v24 = vld [vmem:[%s6104_s28 + $0x1c0] sm:$0xff] }
 0x682   : > { %v3706_v10 = vadd.f32 %v3705_v33, %v3593_v23  ;;  %v812_v23 = vld [vmem:[#allocation5 + $0x958] sm:$0xff]  ;;  %4431 = vmatpush.msrb.mxu2 %v936_v27 }
 0x683   : > { %v3369_v25 = vpop.f32.mrf.mxu0  ;;  %4204 = vmatpush.msrb.mxu0 %v812_v23  ;;  %v868_v23 = vld [vmem:[#allocation5 + $0xb18] sm:$0xff] }
 0x684   : > { %v3370_v46 = vadd.f32 %v3369_v25, %v7158_v29  ;;  %4725 = vst [vmem:[%s6415_s20 + $0x250] sm:$0xff] %v3706_v10  ;;  %3885 = vmatmul.f32.gmra.mxu1 %v5547_v54  ;;  %v3595_v14 = vpop.f32.mrf.mxu2  ;;  %v876_v25 = vld [vmem:[#allocation5 + $0xb58] sm:$0xff] }
 0x685   : > { %4111 = vmatmul.f32.gmra.mxu3 %v5548_v18  ;;  %4317 = vmatpush.msrb.mxu1 %v876_v25  ;;  %v5563_v18 = vld [vmem:[%s6104_s28 + $0x1c8] sm:$0xff] }
 0x686   : > { %3772 = vmatmul.f32.gmra.mxu0 %v5545_v4  ;;  %v3483_v17 = vadd.f32 %v3482_v12, %v3370_v46 }
 0x687   : > { %4205 = vmatpush.msrb.mxu0 %v808_v55 }
 0x688   : > { %v3596_v15 = vadd.f32 %v3595_v14, %v3483_v17  ;;  %v3708_v61 = vpop.f32.mrf.mxu3  ;;  %v5562_v17 = vld [vmem:[%s6104_s28 + $0x1d0] sm:$0xff]  ;;  %v5564_v14 = vld [vmem:[%s6104_s28 + $0x1d8] sm:$0xff] }
 0x689   : > { %v3485_v26 = vpop.f32.mrf.mxu1  ;;  %4001 = vmatmul.f32.gmra.mxu2 %v5550_v8  ;;  %v5566_v8 = vld [vmem:[%s6104_s28 + $0x210] sm:$0xff] }
 0x68a   : > { %v3709_v16 = vadd.f32 %v3708_v61, %v3596_v15 }
 0x68b   : > { %v3372_v29 = vpop.f32.mrf.mxu0 }
 0x68c   : > { %v3373_v37 = vadd.f32 %v3372_v29, %v7165_v41  ;;  %4729 = vst [vmem:[%s6415_s20 + $0x270] sm:$0xff] %v3709_v16  ;;  %3888 = vmatmul.f32.gmra.mxu1 %v5551_v43  ;;  %v3598_v47 = vpop.f32.mrf.mxu2  ;;  %v1008_v41 = vld [vmem:[#allocation5 + $0xf78] sm:$0xff]  ;;  %v5567_v43 = vld [vmem:[%s6104_s28 + $0x208] sm:$0xff] }
 0x68d   : > { %4114 = vmatmul.f32.gmra.mxu3 %v5552_v32  ;;  %v5568_v32 = vld [vmem:[%s6104_s28 + $0x218] sm:$0xff] }
 0x68e   : > { %3775 = vmatmul.f32.gmra.mxu0 %v5549_v44  ;;  %v3486_v28 = vadd.f32 %v3485_v26, %v3373_v37  ;;  %4542 = vmatpush.msrb.mxu3 %v1008_v41  ;;  %v5565_v44 = vld [vmem:[%s6104_s28 + $0x200] sm:$0xff] }
 0x690   : > { %v3599_v40 = vadd.f32 %v3598_v47, %v3486_v28  ;;  %v3711_v1 = vpop.f32.mrf.mxu3 }
 0x691   : > { %v3488_v22 = vpop.f32.mrf.mxu1  ;;  %4004 = vmatmul.f32.gmra.mxu2 %v5554_v63 }
 0x692   : > { %v3712_v62 = vadd.f32 %v3711_v1, %v3599_v40  ;;  %v872_v40 = vld [vmem:[#allocation5 + $0xb38] sm:$0xff] }
 0x693   : > { %v3375_v9 = vpop.f32.mrf.mxu0  ;;  %4318 = vmatpush.msrb.mxu1 %v872_v40 }
 0x694   : > { %v3376_v30 = vadd.f32 %v3375_v9, %v7172_v49  ;;  %4733 = vst [vmem:[%s6415_s20 + $0x290] sm:$0xff] %v3712_v62  ;;  %3891 = vmatmul.f32.gmra.mxu1 %v5555_v45  ;;  %v3601_v60 = vpop.f32.mrf.mxu2  ;;  %v5572_v45 = vld [vmem:[%s6104_s28 + $0x258] sm:$0xff] }
 0x695   : > { %4117 = vmatmul.f32.gmra.mxu3 %v5556_v3  ;;  %4319 = vmatpush.msrb.mxu1 %v868_v23  ;;  %v5594_v23 = vld [vmem:[%s6104_s28 + $0x3d0] sm:$0xff] }
 0x696   : > { %3778 = vmatmul.f32.gmra.mxu0 %v5553_v5  ;;  %v3489_v52 = vadd.f32 %v3488_v22, %v3376_v30  ;;  %v5569_v22 = vld [vmem:[%s6104_s28 + $0x240] sm:$0xff]  ;;  %v5570_v5 = vld [vmem:[%s6104_s28 + $0x250] sm:$0xff] }
 0x698   : > { %v3602_v31 = vadd.f32 %v3601_v60, %v3489_v52  ;;  %v3714_v35 = vpop.f32.mrf.mxu3  ;;  %v5571_v52 = vld [vmem:[%s6104_s28 + $0x248] sm:$0xff] }
 0x699   : > { %v3491_v19 = vpop.f32.mrf.mxu1  ;;  %4007 = vmatmul.f32.gmra.mxu2 %v5558_v58 }
 0x69a   : > { %v3715_v36 = vadd.f32 %v3714_v35, %v3602_v31 }
 0x69b   : > { %v3378_v49 = vpop.f32.mrf.mxu0 }
 0x69c   : > { %v3379_v6 = vadd.f32 %v3378_v49, %v7179_v59  ;;  %4737 = vst [vmem:[%s6415_s20 + $0x2b0] sm:$0xff] %v3715_v36  ;;  %3894 = vmatmul.f32.gmra.mxu1 %v5559_v48  ;;  %v3604_v7 = vpop.f32.mrf.mxu2  ;;  %v1004_v59 = vld [vmem:[#allocation5 + $0xf58] sm:$0xff]  ;;  %v5573_v36 = vld [vmem:[%s6104_s28 + $0x280] sm:$0xff] }
 0x69d   : > { %4120 = vmatmul.f32.gmra.mxu3 %v5560_v0  ;;  %v804_v0 = vld [vmem:[#allocation5 + $0x918] sm:$0xff] }
 0x69e   : > { %3781 = vmatmul.f32.gmra.mxu0 %v5557_v13  ;;  %v3492_v2 = vadd.f32 %v3491_v19, %v3379_v6  ;;  %4543 = vmatpush.msrb.mxu3 %v1004_v59  ;;  %v5574_v19 = vld [vmem:[%s6104_s28 + $0x290] sm:$0xff]  ;;  %v932_v13 = vld [vmem:[#allocation5 + $0xd18] sm:$0xff] }
 0x69f   : > { %4432 = vmatpush.msrb.mxu2 %v932_v13  ;;  %4206 = vmatpush.msrb.mxu0 %v804_v0 }
 0x6a0   : > { %v3605_v42 = vadd.f32 %v3604_v7, %v3492_v2  ;;  %v3717_v10 = vpop.f32.mrf.mxu3  ;;  %v5576_v2 = vld [vmem:[%s6104_s28 + $0x298] sm:$0xff] }
 0x6a1   : > { %v3494_v4 = vpop.f32.mrf.mxu1  ;;  %4010 = vmatmul.f32.gmra.mxu2 %v5562_v17  ;;  %v5580_v17 = vld [vmem:[%s6104_s28 + $0x2d8] sm:$0xff] }
 0x6a2   : > { %v3718_v12 = vadd.f32 %v3717_v10, %v3605_v42  ;;  %v5577_v10 = vld [vmem:[%s6104_s28 + $0x2c0] sm:$0xff] }
 0x6a3   : > { %v3381_v46 = vpop.f32.mrf.mxu0 }
 0x6a4   : > { %v3382_v33 = vadd.f32 %v3381_v46, %v7186_v53  ;;  %4741 = vst [vmem:[%s6415_s20 + $0x2d0] sm:$0xff] %v3718_v12  ;;  %3897 = vmatmul.f32.gmra.mxu1 %v5563_v18  ;;  %v3607_v15 = vpop.f32.mrf.mxu2  ;;  %v5578_v12 = vld [vmem:[%s6104_s28 + $0x2d0] sm:$0xff] }
 0x6a5   : > { %4123 = vmatmul.f32.gmra.mxu3 %v5564_v14 }
 0x6a6   : > { %3784 = vmatmul.f32.gmra.mxu0 %v5561_v24  ;;  %v3495_v54 = vadd.f32 %v3494_v4, %v3382_v33  ;;  %v5579_v24 = vld [vmem:[%s6104_s28 + $0x2c8] sm:$0xff] }
 0x6a8   : > { %v3608_v29 = vadd.f32 %v3607_v15, %v3495_v54  ;;  %v3720_v61 = vpop.f32.mrf.mxu3 }
 0x6a9   : > { %v3497_v26 = vpop.f32.mrf.mxu1  ;;  %4013 = vmatmul.f32.gmra.mxu2 %v5566_v8  ;;  %v5584_v8 = vld [vmem:[%s6104_s28 + $0x318] sm:$0xff] }
 0x6aa   : > { %v3721_v16 = vadd.f32 %v3720_v61, %v3608_v29  ;;  %v5582_v61 = vld [vmem:[%s6104_s28 + $0x310] sm:$0xff] }
 0x6ab   : > { %v3384_v53 = vpop.f32.mrf.mxu0 }
 0x6ac   : > { %v3385_v37 = vadd.f32 %v3384_v53, %v7193_v11  ;;  %4745 = vst [vmem:[%s6415_s20 + $0x2f0] sm:$0xff] %v3721_v16  ;;  %3900 = vmatmul.f32.gmra.mxu1 %v5567_v43  ;;  %v3610_v47 = vpop.f32.mrf.mxu2  ;;  %v1000_v11 = vld [vmem:[#allocation5 + $0xf38] sm:$0xff] }
 0x6ad   : > { %4126 = vmatmul.f32.gmra.mxu3 %v5568_v32  ;;  %v928_v16 = vld [vmem:[#allocation5 + $0xcf8] sm:$0xff] }
 0x6ae   : > { %3787 = vmatmul.f32.gmra.mxu0 %v5565_v44  ;;  %v3498_v28 = vadd.f32 %v3497_v26, %v3385_v37  ;;  %4544 = vmatpush.msrb.mxu3 %v1000_v11  ;;  %v5581_v37 = vld [vmem:[%s6104_s28 + $0x300] sm:$0xff]  ;;  %v5583_v44 = vld [vmem:[%s6104_s28 + $0x308] sm:$0xff]  ;;  %v864_v32 = vld [vmem:[#allocation5 + $0xaf8] sm:$0xff] }
 0x6af   : > { %4433 = vmatpush.msrb.mxu2 %v928_v16  ;;  %4320 = vmatpush.msrb.mxu1 %v864_v32  ;;  %v984_v16 = vld [vmem:[#allocation5 + $0xeb8] sm:$0xff] }
 0x6b0   : > { %v3611_v41 = vadd.f32 %v3610_v47, %v3498_v28  ;;  %v3723_v30 = vpop.f32.mrf.mxu3  ;;  %v800_v28 = vld [vmem:[#allocation5 + $0x8f8] sm:$0xff] }
 0x6b1   : > { %v3500_v62 = vpop.f32.mrf.mxu1  ;;  %4016 = vmatmul.f32.gmra.mxu2 %v5570_v5  ;;  %4207 = vmatpush.msrb.mxu0 %v800_v28 }
 0x6b2   : > { %v3724_v1 = vadd.f32 %v3723_v30, %v3611_v41 }
 0x6b3   : > { %v3387_v38 = vpop.f32.mrf.mxu0 }
 0x6b4   : > { %v3388_v9 = vadd.f32 %v3387_v38, %v7200_v34  ;;  %4749 = vst [vmem:[%s6415_s20 + $0x310] sm:$0xff] %v3724_v1  ;;  %3903 = vmatmul.f32.gmra.mxu1 %v5571_v52  ;;  %v3613_v3 = vpop.f32.mrf.mxu2  ;;  %v5585_v38 = vld [vmem:[%s6104_s28 + $0x340] sm:$0xff]  ;;  %v5587_v1 = vld [vmem:[%s6104_s28 + $0x348] sm:$0xff] }
 0x6b5   : > { %4129 = vmatmul.f32.gmra.mxu3 %v5572_v45 }
 0x6b6   : > { %3790 = vmatmul.f32.gmra.mxu0 %v5569_v22  ;;  %v3501_v63 = vadd.f32 %v3500_v62, %v3388_v9  ;;  %v5586_v9 = vld [vmem:[%s6104_s28 + $0x350] sm:$0xff]  ;;  %v5588_v62 = vld [vmem:[%s6104_s28 + $0x358] sm:$0xff] }
 0x6b8   : > { %v3614_v60 = vadd.f32 %v3613_v3, %v3501_v63  ;;  %v3726_v49 = vpop.f32.mrf.mxu3 }
 0x6b9   : > { %v3503_v35 = vpop.f32.mrf.mxu1  ;;  %4019 = vmatmul.f32.gmra.mxu2 %v5574_v19  ;;  %v796_v19 = vld [vmem:[#allocation5 + $0x8d8] sm:$0xff] }
 0x6ba   : > { %v3727_v6 = vadd.f32 %v3726_v49, %v3614_v60  ;;  %v5589_v60 = vld [vmem:[%s6104_s28 + $0x380] sm:$0xff]  ;;  %4208 = vmatpush.msrb.mxu0 %v796_v19 }
 0x6bb   : > { %v3390_v34 = vpop.f32.mrf.mxu0 }
 0x6bc   : > { %v3391_v31 = vadd.f32 %v3390_v34, %v7207_v56  ;;  %4753 = vst [vmem:[%s6415_s20 + $0x330] sm:$0xff] %v3727_v6  ;;  %3906 = vmatmul.f32.gmra.mxu1 %v5575_v39  ;;  %v3616_v48 = vpop.f32.mrf.mxu2  ;;  %v996_v56 = vld [vmem:[#allocation5 + $0xf18] sm:$0xff]  ;;  %v5590_v34 = vld [vmem:[%s6104_s28 + $0x390] sm:$0xff]  ;;  %v5591_v6 = vld [vmem:[%s6104_s28 + $0x388] sm:$0xff] }
 0x6bd   : > { %4132 = vmatmul.f32.gmra.mxu3 %v5576_v2 }
 0x6be   : > { %3793 = vmatmul.f32.gmra.mxu0 %v5573_v36  ;;  %v3504_v58 = vadd.f32 %v3503_v35, %v3391_v31  ;;  %4545 = vmatpush.msrb.mxu3 %v996_v56  ;;  %v924_v31 = vld [vmem:[#allocation5 + $0xcd8] sm:$0xff] }
 0x6bf   : > { %4434 = vmatpush.msrb.mxu2 %v924_v31  ;;  %v5592_v35 = vld [vmem:[%s6104_s28 + $0x398] sm:$0xff] }
 0x6c0   : > { %v3617_v7 = vadd.f32 %v3616_v48, %v3504_v58  ;;  %v3729_v25 = vpop.f32.mrf.mxu3  ;;  %v860_v58 = vld [vmem:[#allocation5 + $0xad8] sm:$0xff] }
 0x6c1   : > { %v3506_v33 = vpop.f32.mrf.mxu1  ;;  %4022 = vmatmul.f32.gmra.mxu2 %v5578_v12  ;;  %4321 = vmatpush.msrb.mxu1 %v860_v58  ;;  %v980_v31 = vld [vmem:[#allocation5 + $0xe98] sm:$0xff] }
 0x6c2   : > { %v3730_v46 = vadd.f32 %v3729_v25, %v3617_v7  ;;  %v5593_v7 = vld [vmem:[%s6104_s28 + $0x3c0] sm:$0xff] }
 0x6c3   : > { %v3393_v59 = vpop.f32.mrf.mxu0  ;;  %v5596_v25 = vld [vmem:[#allocation7] sm:$0xf] }
 0x6c4   : > { %v3394_v42 = vadd.f32 %v3393_v59, %v7214_v50  ;;  %4757 = vst [vmem:[%s6415_s20 + $0x350] sm:$0xff] %v3730_v46  ;;  %3909 = vmatmul.f32.gmra.mxu1 %v5579_v24  ;;  %v3619_v54 = vpop.f32.mrf.mxu2  ;;  %v7433_v46 = vperm.slane %v5596_v25, 3 }
 0x6c5   : > { %4135 = vmatmul.f32.gmra.mxu3 %v5580_v17 }
 0x6c6   : > { %3796 = vmatmul.f32.gmra.mxu0 %v5577_v10  ;;  %v3507_v4 = vadd.f32 %v3506_v33, %v3394_v42  ;;  %v5595_v42 = vld [vmem:[%s6104_s28 + $0x3c8] sm:$0xff]  ;;  %v5597_v33 = vld [vmem:[%s6104_s28 + $0x3d8] sm:$0xff] }
 0x6c8   : > { %v3620_v18 = vadd.f32 %v3619_v54, %v3507_v4  ;;  %v3732_v15 = vpop.f32.mrf.mxu3 }
 0x6c9   : > { %v3509_v53 = vpop.f32.mrf.mxu1  ;;  %4025 = vmatmul.f32.gmra.mxu2 %v5582_v61  ;;  %v792_v61 = vld [vmem:[#allocation5 + $0x8b8] sm:$0xff] }
 0x6ca   : > { %v3733_v29 = vadd.f32 %v3732_v15, %v3620_v18  ;;  %v920_v15 = vld [vmem:[#allocation5 + $0xcb8] sm:$0xff]  ;;  %4209 = vmatpush.msrb.mxu0 %v792_v61 }
 0x6cb   : > { %v3396_v50 = vpop.f32.mrf.mxu0  ;;  %4435 = vmatpush.msrb.mxu2 %v920_v15  ;;  %v848_v15 = vld [vmem:[#allocation5 + $0xa78] sm:$0xff] }
 0x6cc   : > { %v3397_v14 = vadd.f32 %v3396_v50, %v7221_v20  ;;  %4761 = vst [vmem:[%s6415_s20 + $0x370] sm:$0xff] %v3733_v29  ;;  %3912 = vmatmul.f32.gmra.mxu1 %v5583_v44  ;;  %v3622_v27 = vpop.f32.mrf.mxu2  ;;  %v992_v20 = vld [vmem:[#allocation5 + $0xef8] sm:$0xff]  ;;  %v5598_v50 = vld [vmem:[%s6104_s28 + $0x400] sm:$0xff]  ;;  %v5600_v29 = vld [vmem:[%s6104_s28 + $0x408] sm:$0xff] }
 0x6cd   : > { %4138 = vmatmul.f32.gmra.mxu3 %v5584_v8  ;;  %v856_v44 = vld [vmem:[#allocation5 + $0xab8] sm:$0xff] }
 0x6ce   : > { %3799 = vmatmul.f32.gmra.mxu0 %v5581_v37  ;;  %v3510_v26 = vadd.f32 %v3509_v53, %v3397_v14  ;;  %4546 = vmatpush.msrb.mxu3 %v992_v20  ;;  %v5599_v14 = vld [vmem:[%s6104_s28 + $0x410] sm:$0xff]  ;;  %v5601_v53 = vld [vmem:[%s6104_s28 + $0x418] sm:$0xff] }
 0x6cf   : > { %4322 = vmatpush.msrb.mxu1 %v856_v44  ;;  %v5618_v44 = vld [vmem:[%s6104_s28 + $0x540] sm:$0xff] }
 0x6d0   : > { %v3623_v43 = vadd.f32 %v3622_v27, %v3510_v26  ;;  %v3735_v11 = vpop.f32.mrf.mxu3 }
 0x6d1   : > { %v3512_v40 = vpop.f32.mrf.mxu1  ;;  %4028 = vmatmul.f32.gmra.mxu2 %v5586_v9 }
 0x6d2   : > { %v3736_v41 = vadd.f32 %v3735_v11, %v3623_v43  ;;  %v5604_v11 = vld [vmem:[%s6104_s28 + $0x448] sm:$0xff] }
 0x6d3   : > { %v3399_v47 = vpop.f32.mrf.mxu0 }
 0x6d4   : > { %v3400_v55 = vadd.f32 %v3399_v47, %v7228_v21  ;;  %4765 = vst [vmem:[%s6415_s20 + $0x390] sm:$0xff] %v3736_v41  ;;  %3915 = vmatmul.f32.gmra.mxu1 %v5587_v1  ;;  %v3625_v22 = vpop.f32.mrf.mxu2  ;;  %v5602_v47 = vld [vmem:[%s6104_s28 + $0x440] sm:$0xff]  ;;  %v5605_v41 = vld [vmem:[%s6104_s28 + $0x458] sm:$0xff] }
 0x6d5   : > { %4141 = vmatmul.f32.gmra.mxu3 %v5588_v62 }
 0x6d6   : > { %3802 = vmatmul.f32.gmra.mxu0 %v5585_v38  ;;  %v3513_v30 = vadd.f32 %v3512_v40, %v3400_v55  ;;  %v5603_v55 = vld [vmem:[%s6104_s28 + $0x450] sm:$0xff] }
 0x6d8   : > { %v3626_v5 = vadd.f32 %v3625_v22, %v3513_v30  ;;  %v3738_v52 = vpop.f32.mrf.mxu3 }
 0x6d9   : > { %v3515_v3 = vpop.f32.mrf.mxu1  ;;  %4031 = vmatmul.f32.gmra.mxu2 %v5590_v34  ;;  %v788_v34 = vld [vmem:[#allocation5 + $0x898] sm:$0xff] }
 0x6da   : > { %v3739_v45 = vadd.f32 %v3738_v52, %v3626_v5  ;;  %v916_v52 = vld [vmem:[#allocation5 + $0xc98] sm:$0xff]  ;;  %4210 = vmatpush.msrb.mxu0 %v788_v34 }
 0x6db   : > { %v3402_v21 = vpop.f32.mrf.mxu0  ;;  %4436 = vmatpush.msrb.mxu2 %v916_v52  ;;  %v972_v52 = vld [vmem:[#allocation5 + $0xe58] sm:$0xff] }
 0x6dc   : > { %v3403_v63 = vadd.f32 %v3402_v21, %v7235_v51  ;;  %4769 = vst [vmem:[%s6415_s20 + $0x3b0] sm:$0xff] %v3739_v45  ;;  %3918 = vmatmul.f32.gmra.mxu1 %v5591_v6  ;;  %v3628_v36 = vpop.f32.mrf.mxu2  ;;  %v988_v51 = vld [vmem:[#allocation5 + $0xed8] sm:$0xff]  ;;  %v5606_v21 = vld [vmem:[%s6104_s28 + $0x480] sm:$0xff]  ;;  %v5608_v45 = vld [vmem:[%s6104_s28 + $0x488] sm:$0xff] }
 0x6dd   : > { %4144 = vmatmul.f32.gmra.mxu3 %v5592_v35  ;;  %v852_v6 = vld [vmem:[#allocation5 + $0xa98] sm:$0xff] }
 0x6de   : > { %3805 = vmatmul.f32.gmra.mxu0 %v5589_v60  ;;  %v3516_v49 = vadd.f32 %v3515_v3, %v3403_v63  ;;  %4547 = vmatpush.msrb.mxu3 %v988_v51  ;;  %v5607_v63 = vld [vmem:[%s6104_s28 + $0x490] sm:$0xff]  ;;  %v5609_v3 = vld [vmem:[%s6104_s28 + $0x498] sm:$0xff] }
 0x6df   : > { %4323 = vmatpush.msrb.mxu1 %v852_v6 }
 0x6e0   : > { %v3629_v13 = vadd.f32 %v3628_v36, %v3516_v49  ;;  %v3741_v48 = vpop.f32.mrf.mxu3  ;;  %4548 = vmatpush.msrb.mxu3 %v984_v16 }
 0x6e1   : > { %v3518_v56 = vpop.f32.mrf.mxu1  ;;  %4034 = vmatmul.f32.gmra.mxu2 %v5594_v23  ;;  %4324 = vmatpush.msrb.mxu1 %v848_v15 }
 0x6e2   : > { %v3742_v0 = vadd.f32 %v3741_v48, %v3629_v13  ;;  %4549 = vmatpush.msrb.mxu3 %v980_v31  ;;  %v5612_v48 = vld [vmem:[%s6104_s28 + $0x4c8] sm:$0xff] }
 0x6e3   : > { %v3405_v39 = vpop.f32.mrf.mxu0 }
 0x6e4   : > { %v3406_v2 = vadd.f32 %v3405_v39, %v7242_v57  ;;  %4773 = vst [vmem:[%s6415_s20 + $0x3d0] sm:$0xff] %v3742_v0  ;;  %3921 = vmatmul.f32.gmra.mxu1 %v5595_v42  ;;  %v3631_v57 = vpop.f32.mrf.mxu2  ;;  %v5610_v39 = vld [vmem:[%s6104_s28 + $0x4c0] sm:$0xff]  ;;  %v5613_v0 = vld [vmem:[%s6104_s28 + $0x4d8] sm:$0xff] }
 0x6e5   : > { %4147 = vmatmul.f32.gmra.mxu3 %v5597_v33 }
 0x6e6   : > { %3808 = vmatmul.f32.gmra.mxu0 %v5593_v7  ;;  %v3519_v59 = vadd.f32 %v3518_v56, %v3406_v2  ;;  %v5611_v2 = vld [vmem:[%s6104_s28 + $0x4d0] sm:$0xff] }
 0x6e8   : > { %v3632_v10 = vadd.f32 %v3631_v57, %v3519_v59  ;;  %v3744_v4 = vpop.f32.mrf.mxu3 }
 0x6e9   : > { %v3877_v54 = vpop.f32.mrf.mxu1  ;;  %4037 = vmatmul.f32.gmra.mxu2 %v5599_v14 }
 0x6ea   : > { %v3745_v17 = vadd.f32 %v3744_v4, %v3632_v10  ;;  %v5614_v10 = vld [vmem:[%s6104_s28 + $0x500] sm:$0xff]  ;;  %v912_v4 = vld [vmem:[#allocation5 + $0xc78] sm:$0xff] }
 0x6eb   : > { %v3764_v12 = vpop.f32.mrf.mxu0  ;;  %4437 = vmatpush.msrb.mxu2 %v912_v4 }
 0x6ec   : > { %v3765_v24 = vadd.f32 %v3764_v12, %v7433_v46  ;;  %4777 = vst [vmem:[%s6415_s20 + $0x3f0] sm:$0xff] %v3745_v17  ;;  %3924 = vmatmul.f32.gmra.mxu1 %v5600_v29  ;;  %v3990_v37 = vpop.f32.mrf.mxu2  ;;  %v5615_v12 = vld [vmem:[%s6104_s28 + $0x510] sm:$0xff]  ;;  %v5617_v17 = vld [vmem:[%s6104_s28 + $0x518] sm:$0xff] }
 0x6ed   : > { %4150 = vmatmul.f32.gmra.mxu3 %v5601_v53 }
 0x6ee   : > { %v3878_v18 = vadd.f32 %v3877_v54, %v3765_v24  ;;  %3811 = vmatmul.f32.gmra.mxu0 %v5598_v50  ;;  %v5616_v24 = vld [vmem:[%s6104_s28 + $0x508] sm:$0xff]  ;;  %v976_v50 = vld [vmem:[#allocation5 + $0xe78] sm:$0xff] }
 0x6ef   : > { %4550 = vmatpush.msrb.mxu3 %v976_v50 }
 0x6f0   : > { %v3991_v26 = vadd.f32 %v3990_v37, %v3878_v18  ;;  %v4103_v28 = vpop.f32.mrf.mxu3  ;;  %v784_v18 = vld [vmem:[#allocation5 + $0x878] sm:$0xff] }
 0x6f1   : > { %v3880_v43 = vpop.f32.mrf.mxu1  ;;  %4040 = vmatmul.f32.gmra.mxu2 %v5603_v55  ;;  %4211 = vmatpush.msrb.mxu0 %v784_v18  ;;  %v840_v18 = vld [vmem:[#allocation5 + $0xa38] sm:$0xff] }
 0x6f2   : > { %v7443_v20 = vadd.f32 %v4103_v28, %v3991_v26  ;;  %v5621_v28 = vld [vmem:[%s6104_s28 + $0x558] sm:$0xff]  ;;  %4551 = vmatpush.msrb.mxu3 %v972_v52 }
 0x6f3   : > { %v3767_v8 = vpop.f32.mrf.mxu0 }
 0x6f4   : > { %v3768_v27 = vadd.f32 %v3767_v8, %v7433_v46  ;;  %3927 = vmatmul.f32.gmra.mxu1 %v5604_v11  ;;  %v3993_v40 = vpop.f32.mrf.mxu2  ;;  %v5619_v8 = vld [vmem:[%s6104_s28 + $0x550] sm:$0xff] }
 0x6f5   : > { %4153 = vmatmul.f32.gmra.mxu3 %v5605_v41 }
 0x6f6   : > { %v3881_v32 = vadd.f32 %v3880_v43, %v3768_v27  ;;  %3814 = vmatmul.f32.gmra.mxu0 %v5602_v47  ;;  %v5620_v27 = vld [vmem:[%s6104_s28 + $0x548] sm:$0xff] }
 0x6f8   : > { %v3994_v38 = vadd.f32 %v3993_v40, %v3881_v32  ;;  %v4106_v1 = vpop.f32.mrf.mxu3 }
 0x6f9   : > { %v3883_v22 = vpop.f32.mrf.mxu1  ;;  %4043 = vmatmul.f32.gmra.mxu2 %v5607_v63  ;;  %v780_v63 = vld [vmem:[#allocation5 + $0x858] sm:$0xff] }
 0x6fa   : > { %v7450_v62 = vadd.f32 %v4106_v1, %v3994_v38  ;;  %v908_v1 = vld [vmem:[#allocation5 + $0xc58] sm:$0xff]  ;;  %4212 = vmatpush.msrb.mxu0 %v780_v63 }
 0x6fb   : > { %v3770_v9 = vpop.f32.mrf.mxu0  ;;  %4438 = vmatpush.msrb.mxu2 %v908_v1  ;;  %v5640_v1 = vld [vmem:[%s6104_s28 + $0x688] sm:$0xff]  ;;  %v964_v63 = vld [vmem:[#allocation5 + $0xe18] sm:$0xff] }
 0x6fc   : > { %v3771_v30 = vadd.f32 %v3770_v9, %v7433_v46  ;;  %3930 = vmatmul.f32.gmra.mxu1 %v5608_v45  ;;  %v3996_v60 = vpop.f32.mrf.mxu2  ;;  %v5622_v9 = vld [vmem:[%s6104_s28 + $0x580] sm:$0xff] }
 0x6fd   : > { %4156 = vmatmul.f32.gmra.mxu3 %v5609_v3  ;;  %v844_v3 = vld [vmem:[#allocation5 + $0xa58] sm:$0xff] }
 0x6fe   : > { %v3884_v5 = vadd.f32 %v3883_v22, %v3771_v30  ;;  %3817 = vmatmul.f32.gmra.mxu0 %v5606_v21  ;;  %v5623_v30 = vld [vmem:[%s6104_s28 + $0x590] sm:$0xff]  ;;  %v5624_v22 = vld [vmem:[%s6104_s28 + $0x588] sm:$0xff]  ;;  %4325 = vmatpush.msrb.mxu1 %v844_v3 }
 0x700   : > { %v3997_v49 = vadd.f32 %v3996_v60, %v3884_v5  ;;  %v4109_v19 = vpop.f32.mrf.mxu3  ;;  %v5625_v5 = vld [vmem:[%s6104_s28 + $0x598] sm:$0xff]  ;;  %4326 = vmatpush.msrb.mxu1 %v840_v18 }
 0x701   : > { %v3886_v13 = vpop.f32.mrf.mxu1  ;;  %4046 = vmatmul.f32.gmra.mxu2 %v5611_v2 }
 0x702   : > { %v7457_v51 = vadd.f32 %v4109_v19, %v3997_v49  ;;  %v5627_v19 = vld [vmem:[%s6104_s28 + $0x5d0] sm:$0xff] }
 0x703   : > { %v3773_v35 = vpop.f32.mrf.mxu0 }
 0x704   : > { %v3774_v36 = vadd.f32 %v3773_v35, %v7433_v46  ;;  %3933 = vmatmul.f32.gmra.mxu1 %v5612_v48  ;;  %v3999_v56 = vpop.f32.mrf.mxu2 }
 0x705   : > { %4159 = vmatmul.f32.gmra.mxu3 %v5613_v0 }
 0x706   : > { %v3887_v58 = vadd.f32 %v3886_v13, %v3774_v36  ;;  %3820 = vmatmul.f32.gmra.mxu0 %v5610_v39  ;;  %v5626_v36 = vld [vmem:[%s6104_s28 + $0x5c0] sm:$0xff]  ;;  %v5628_v13 = vld [vmem:[%s6104_s28 + $0x5c8] sm:$0xff] }
 0x708   : > { %v4000_v7 = vadd.f32 %v3999_v56, %v3887_v58  ;;  %v4112_v42 = vpop.f32.mrf.mxu3  ;;  %v5629_v58 = vld [vmem:[%s6104_s28 + $0x5d8] sm:$0xff] }
 0x709   : > { %v3889_v33 = vpop.f32.mrf.mxu1  ;;  %4049 = vmatmul.f32.gmra.mxu2 %v5615_v12  ;;  %v5633_v12 = vld [vmem:[%s6104_s28 + $0x618] sm:$0xff] }
 0x70a   : > { %v7464_v25 = vadd.f32 %v4112_v42, %v4000_v7  ;;  %v5630_v42 = vld [vmem:[%s6104_s28 + $0x600] sm:$0xff] }
 0x70b   : > { %v3776_v23 = vpop.f32.mrf.mxu0 }
 0x70c   : > { %v3777_v59 = vadd.f32 %v3776_v23, %v7433_v46  ;;  %3936 = vmatmul.f32.gmra.mxu1 %v5616_v24  ;;  %v4002_v54 = vpop.f32.mrf.mxu2  ;;  %v776_v24 = vld [vmem:[#allocation5 + $0x838] sm:$0xff] }
 0x70d   : > { %4162 = vmatmul.f32.gmra.mxu3 %v5617_v17  ;;  %v968_v17 = vld [vmem:[#allocation5 + $0xe38] sm:$0xff]  ;;  %4213 = vmatpush.msrb.mxu0 %v776_v24 }
 0x70e   : > { %v3890_v57 = vadd.f32 %v3889_v33, %v3777_v59  ;;  %3823 = vmatmul.f32.gmra.mxu0 %v5614_v10  ;;  %v5631_v33 = vld [vmem:[%s6104_s28 + $0x610] sm:$0xff]  ;;  %v5632_v10 = vld [vmem:[%s6104_s28 + $0x608] sm:$0xff]  ;;  %4552 = vmatpush.msrb.mxu3 %v968_v17 }
 0x710   : > { %v4003_v14 = vadd.f32 %v4002_v54, %v3890_v57  ;;  %v4115_v37 = vpop.f32.mrf.mxu3  ;;  %v904_v57 = vld [vmem:[#allocation5 + $0xc38] sm:$0xff]  ;;  %4553 = vmatpush.msrb.mxu3 %v964_v63 }
 0x711   : > { %v3892_v16 = vpop.f32.mrf.mxu1  ;;  %4052 = vmatmul.f32.gmra.mxu2 %v5619_v8  ;;  %v5637_v8 = vld [vmem:[%s6104_s28 + $0x658] sm:$0xff] }
 0x712   : > { %v7471_v61 = vadd.f32 %v4115_v37, %v4003_v14  ;;  %4439 = vmatpush.msrb.mxu2 %v904_v57  ;;  %v5647_v57 = vld [vmem:[%s6104_s28 + $0x710] sm:$0xff] }
 0x713   : > { %v3779_v29 = vpop.f32.mrf.mxu0 }
 0x714   : > { %v3780_v53 = vadd.f32 %v3779_v29, %v7433_v46  ;;  %3939 = vmatmul.f32.gmra.mxu1 %v5620_v27  ;;  %v4005_v43 = vpop.f32.mrf.mxu2 }
 0x715   : > { %4165 = vmatmul.f32.gmra.mxu3 %v5621_v28 }
 0x716   : > { %v3893_v26 = vadd.f32 %v3892_v16, %v3780_v53  ;;  %3826 = vmatmul.f32.gmra.mxu0 %v5618_v44  ;;  %v5634_v16 = vld [vmem:[%s6104_s28 + $0x640] sm:$0xff]  ;;  %v5636_v44 = vld [vmem:[%s6104_s28 + $0x648] sm:$0xff] }
 0x718   : > { %v4006_v32 = vadd.f32 %v4005_v43, %v3893_v26  ;;  %v4118_v11 = vpop.f32.mrf.mxu3  ;;  %v5635_v26 = vld [vmem:[%s6104_s28 + $0x650] sm:$0xff] }
 0x719   : > { %v3895_v40 = vpop.f32.mrf.mxu1  ;;  %4055 = vmatmul.f32.gmra.mxu2 %v5623_v30  ;;  %v900_v30 = vld [vmem:[#allocation5 + $0xc18] sm:$0xff] }
 0x71a   : > { %v7478_v41 = vadd.f32 %v4118_v11, %v4006_v32  ;;  %4440 = vmatpush.msrb.mxu2 %v900_v30  ;;  %v5657_v30 = vld [vmem:[%s6104_s28 + $0x798] sm:$0xff] }
 0x71b   : > { %v3782_v47 = vpop.f32.mrf.mxu0 }
 0x71c   : > { %v3783_v55 = vadd.f32 %v3782_v47, %v7433_v46  ;;  %3942 = vmatmul.f32.gmra.mxu1 %v5624_v22  ;;  %v4008_v21 = vpop.f32.mrf.mxu2  ;;  %v5641_v22 = vld [vmem:[%s6104_s28 + $0x698] sm:$0xff] }
 0x71d   : > { %4168 = vmatmul.f32.gmra.mxu3 %v5625_v5 }
 0x71e   : > { %v3896_v38 = vadd.f32 %v3895_v40, %v3783_v55  ;;  %3829 = vmatmul.f32.gmra.mxu0 %v5622_v9  ;;  %v5639_v9 = vld [vmem:[%s6104_s28 + $0x690] sm:$0xff] }
 0x720   : > { %v4009_v45 = vadd.f32 %v4008_v21, %v3896_v38  ;;  %v4121_v31 = vpop.f32.mrf.mxu3  ;;  %v5638_v38 = vld [vmem:[%s6104_s28 + $0x680] sm:$0xff]  ;;  %v772_v21 = vld [vmem:[#allocation5 + $0x818] sm:$0xff] }
 0x721   : > { %v3898_v6 = vpop.f32.mrf.mxu1  ;;  %4058 = vmatmul.f32.gmra.mxu2 %v5627_v19  ;;  %4214 = vmatpush.msrb.mxu0 %v772_v21  ;;  %v5643_v19 = vld [vmem:[%s6104_s28 + $0x6d0] sm:$0xff] }
 0x722   : > { %v7485_v49 = vadd.f32 %v4121_v31, %v4009_v45  ;;  %v836_v45 = vld [vmem:[#allocation5 + $0xa18] sm:$0xff] }
 0x723   : > { %v3785_v60 = vpop.f32.mrf.mxu0  ;;  %4327 = vmatpush.msrb.mxu1 %v836_v45 }
 0x724   : > { %v3786_v34 = vadd.f32 %v3785_v60, %v7433_v46  ;;  %3945 = vmatmul.f32.gmra.mxu1 %v5628_v13  ;;  %v4011_v39 = vpop.f32.mrf.mxu2  ;;  %v5644_v13 = vld [vmem:[%s6104_s28 + $0x6c8] sm:$0xff] }
 0x725   : > { %4171 = vmatmul.f32.gmra.mxu3 %v5629_v58  ;;  %v5645_v58 = vld [vmem:[%s6104_s28 + $0x6d8] sm:$0xff] }
 0x726   : > { %v3899_v35 = vadd.f32 %v3898_v6, %v3786_v34  ;;  %3832 = vmatmul.f32.gmra.mxu0 %v5626_v36  ;;  %v5642_v36 = vld [vmem:[%s6104_s28 + $0x6c0] sm:$0xff] }
 0x728   : > { %v4012_v2 = vadd.f32 %v4011_v39, %v3899_v35  ;;  %v4124_v56 = vpop.f32.mrf.mxu3 }
 0x729   : > { %v3901_v23 = vpop.f32.mrf.mxu1  ;;  %4061 = vmatmul.f32.gmra.mxu2 %v5631_v33  ;;  %v5646_v33 = vld [vmem:[%s6104_s28 + $0x700] sm:$0xff] }
 0x72a   : > { %v7492_v7 = vadd.f32 %v4124_v56, %v4012_v2 }
 0x72b   : > { %v3788_v48 = vpop.f32.mrf.mxu0 }
 0x72c   : > { %v3789_v0 = vadd.f32 %v3788_v48, %v7433_v46  ;;  %3948 = vmatmul.f32.gmra.mxu1 %v5632_v10  ;;  %v4014_v4 = vpop.f32.mrf.mxu2  ;;  %v5648_v10 = vld [vmem:[%s6104_s28 + $0x708] sm:$0xff] }
 0x72d   : > { %4174 = vmatmul.f32.gmra.mxu3 %v5633_v12  ;;  %v5649_v12 = vld [vmem:[%s6104_s28 + $0x718] sm:$0xff] }
 0x72e   : > { %v3902_v59 = vadd.f32 %v3901_v23, %v3789_v0  ;;  %3835 = vmatmul.f32.gmra.mxu0 %v5630_v42 }
 0x730   : > { %v4015_v54 = vadd.f32 %v4014_v4, %v3902_v59  ;;  %v4127_v15 = vpop.f32.mrf.mxu3 }
 0x731   : > { %v3904_v53 = vpop.f32.mrf.mxu1  ;;  %4064 = vmatmul.f32.gmra.mxu2 %v5635_v26  ;;  %v5653_v26 = vld [vmem:[%s6104_s28 + $0x758] sm:$0xff] }
 0x732   : > { %v7499_v29 = vadd.f32 %v4127_v15, %v4015_v54 }
 0x733   : > { %v3791_v50 = vpop.f32.mrf.mxu0 }
 0x734   : > { %v3792_v14 = vadd.f32 %v3791_v50, %v7433_v46  ;;  %3951 = vmatmul.f32.gmra.mxu1 %v5636_v44  ;;  %v4017_v27 = vpop.f32.mrf.mxu2 }
 0x735   : > { %4177 = vmatmul.f32.gmra.mxu3 %v5637_v8 }
 0x736   : > { %v3905_v37 = vadd.f32 %v3904_v53, %v3792_v14  ;;  %3838 = vmatmul.f32.gmra.mxu0 %v5634_v16  ;;  %v5650_v53 = vld [vmem:[%s6104_s28 + $0x740] sm:$0xff]  ;;  %v5652_v16 = vld [vmem:[%s6104_s28 + $0x748] sm:$0xff] }
 0x738   : > { %v4018_v28 = vadd.f32 %v4017_v27, %v3905_v37  ;;  %v4130_v47 = vpop.f32.mrf.mxu3  ;;  %v5651_v37 = vld [vmem:[%s6104_s28 + $0x750] sm:$0xff] }
 0x739   : > { %v3907_v11 = vpop.f32.mrf.mxu1  ;;  %4067 = vmatmul.f32.gmra.mxu2 %v5639_v9  ;;  %v5656_v9 = vld [vmem:[%s6104_s28 + $0x788] sm:$0xff] }
 0x73a   : > { %v7506_v55 = vadd.f32 %v4130_v47, %v4018_v28 }
 0x73b   : > { %v3794_v43 = vpop.f32.mrf.mxu0 }
 0x73c   : > { %v3795_v32 = vadd.f32 %v3794_v43, %v7433_v46  ;;  %3954 = vmatmul.f32.gmra.mxu1 %v5640_v1  ;;  %v4020_v5 = vpop.f32.mrf.mxu2 }
 0x73d   : > { %4180 = vmatmul.f32.gmra.mxu3 %v5641_v22 }
 0x73e   : > { %v3908_v40 = vadd.f32 %v3907_v11, %v3795_v32  ;;  %3841 = vmatmul.f32.gmra.mxu0 %v5638_v38  ;;  %v5655_v38 = vld [vmem:[%s6104_s28 + $0x790] sm:$0xff] }
 0x740   : > { %v4021_v52 = vadd.f32 %v4020_v5, %v3908_v40  ;;  %v4133_v34 = vpop.f32.mrf.mxu3  ;;  %v5654_v40 = vld [vmem:[%s6104_s28 + $0x780] sm:$0xff] }
 0x741   : > { %v3910_v6 = vpop.f32.mrf.mxu1  ;;  %4070 = vmatmul.f32.gmra.mxu2 %v5643_v19 }
 0x742   : > { %v7513_v31 = vadd.f32 %v4133_v34, %v4021_v52  ;;  %v5659_v34 = vld [vmem:[%s6104_s28 + $0x7d0] sm:$0xff] }
 0x743   : > { %v3797_v3 = vpop.f32.mrf.mxu0 }
 0x744   : > { %v3798_v60 = vadd.f32 %v3797_v3, %v7433_v46  ;;  %3957 = vmatmul.f32.gmra.mxu1 %v5644_v13  ;;  %v4023_v39 = vpop.f32.mrf.mxu2 }
 0x745   : > { %4183 = vmatmul.f32.gmra.mxu3 %v5645_v58 }
 0x746   : > { %v3911_v35 = vadd.f32 %v3910_v6, %v3798_v60  ;;  %3844 = vmatmul.f32.gmra.mxu0 %v5642_v36  ;;  %v5658_v60 = vld [vmem:[%s6104_s28 + $0x7c0] sm:$0xff]  ;;  %v5660_v6 = vld [vmem:[%s6104_s28 + $0x7c8] sm:$0xff] }
 0x748   : > { %v4024_v2 = vadd.f32 %v4023_v39, %v3911_v35  ;;  %v4136_v56 = vpop.f32.mrf.mxu3  ;;  %v5661_v35 = vld [vmem:[%s6104_s28 + $0x7d8] sm:$0xff] }
 0x749   : > { %v3913_v59 = vpop.f32.mrf.mxu1  ;;  %4073 = vmatmul.f32.gmra.mxu2 %v5647_v57 }
 0x74a   : > { %v7520_v23 = vadd.f32 %v4136_v56, %v4024_v2  ;;  %v5662_v56 = vld [vmem:[%s6104_s28 + $0x20] sm:$0xff] }
 0x74b   : > { %v3800_v48 = vpop.f32.mrf.mxu0 }
 0x74c   : > { %v3801_v0 = vadd.f32 %v3800_v48, %v7433_v46  ;;  %3960 = vmatmul.f32.gmra.mxu1 %v5648_v10  ;;  %v4026_v4 = vpop.f32.mrf.mxu2 }
 0x74d   : > { %4186 = vmatmul.f32.gmra.mxu3 %v5649_v12 }
 0x74e   : > { %v3914_v42 = vadd.f32 %v3913_v59, %v3801_v0  ;;  %3847 = vmatmul.f32.gmra.mxu0 %v5646_v33  ;;  %v5663_v59 = vld [vmem:[%s6104_s28 + $0x30] sm:$0xff]  ;;  %v5665_v33 = vld [vmem:[%s6104_s28 + $0x38] sm:$0xff] }
 0x750   : > { %v4027_v24 = vadd.f32 %v4026_v4, %v3914_v42  ;;  %v4139_v18 = vpop.f32.mrf.mxu3  ;;  %v5664_v42 = vld [vmem:[%s6104_s28 + $0x28] sm:$0xff] }
 0x751   : > { %v3916_v14 = vpop.f32.mrf.mxu1  ;;  %4076 = vmatmul.f32.gmra.mxu2 %v5651_v37  ;;  %v5669_v37 = vld [vmem:[%s6104_s28 + $0x78] sm:$0xff] }
 0x752   : > { %v7527_v50 = vadd.f32 %v4139_v18, %v4027_v24 }
 0x753   : > { %v3803_v17 = vpop.f32.mrf.mxu0 }
 0x754   : > { %v3804_v54 = vadd.f32 %v3803_v17, %v7433_v46  ;;  %3963 = vmatmul.f32.gmra.mxu1 %v5652_v16  ;;  %v4029_v44 = vpop.f32.mrf.mxu2 }
 0x755   : > { %4189 = vmatmul.f32.gmra.mxu3 %v5653_v26 }
 0x756   : > { %v3917_v15 = vadd.f32 %v3916_v14, %v3804_v54  ;;  %3850 = vmatmul.f32.gmra.mxu0 %v5650_v53  ;;  %v5666_v14 = vld [vmem:[%s6104_s28 + $0x60] sm:$0xff]  ;;  %v5668_v53 = vld [vmem:[%s6104_s28 + $0x68] sm:$0xff] }
 0x758   : > { %v4030_v8 = vadd.f32 %v4029_v44, %v3917_v15  ;;  %v4142_v43 = vpop.f32.mrf.mxu3  ;;  %v5667_v15 = vld [vmem:[%s6104_s28 + $0x70] sm:$0xff] }
 0x759   : > { %v3919_v47 = vpop.f32.mrf.mxu1  ;;  %4079 = vmatmul.f32.gmra.mxu2 %v5655_v38  ;;  %v5672_v38 = vld [vmem:[%s6104_s28 + $0xa8] sm:$0xff] }
 0x75a   : > { %v7534_v32 = vadd.f32 %v4142_v43, %v4030_v8 }
 0x75b   : > { %v3806_v27 = vpop.f32.mrf.mxu0 }
 0x75c   : > { %v3807_v28 = vadd.f32 %v3806_v27, %v7433_v46  ;;  %3966 = vmatmul.f32.gmra.mxu1 %v5656_v9  ;;  %v4032_v1 = vpop.f32.mrf.mxu2  ;;  %v5673_v9 = vld [vmem:[%s6104_s28 + $0xb8] sm:$0xff] }
 0x75d   : > { %4192 = vmatmul.f32.gmra.mxu3 %v5657_v30 }
 0x75e   : > { %v3920_v11 = vadd.f32 %v3919_v47, %v3807_v28  ;;  %3853 = vmatmul.f32.gmra.mxu0 %v5654_v40  ;;  %v5671_v40 = vld [vmem:[%s6104_s28 + $0xb0] sm:$0xff] }
 0x760   : > { %v4033_v22 = vadd.f32 %v4032_v1, %v3920_v11  ;;  %v4145_v63 = vpop.f32.mrf.mxu3  ;;  %v5670_v11 = vld [vmem:[%s6104_s28 + $0xa0] sm:$0xff] }
 0x761   : > { %v3922_v45 = vpop.f32.mrf.mxu1  ;;  %4082 = vmatmul.f32.gmra.mxu2 %v5659_v34  ;;  %v5675_v34 = vld [vmem:[%s6104_s28 + $0xf0] sm:$0xff] }
 0x762   : > { %v7541_v52 = vadd.f32 %v4145_v63, %v4033_v22 }
 0x763   : > { %v3809_v5 = vpop.f32.mrf.mxu0 }
 0x764   : > { %v3810_v21 = vadd.f32 %v3809_v5, %v7433_v46  ;;  %3969 = vmatmul.f32.gmra.mxu1 %v5660_v6  ;;  %v4035_v36 = vpop.f32.mrf.mxu2  ;;  %v5676_v6 = vld [vmem:[%s6104_s28 + $0xe8] sm:$0xff] }
 0x765   : > { %4195 = vmatmul.f32.gmra.mxu3 %v5661_v35  ;;  %v5677_v35 = vld [vmem:[%s6104_s28 + $0xf8] sm:$0xff] }
 0x766   : > { %v3923_v3 = vadd.f32 %v3922_v45, %v3810_v21  ;;  %3856 = vmatmul.f32.gmra.mxu0 %v5658_v60  ;;  %v5674_v60 = vld [vmem:[%s6104_s28 + $0xe0] sm:$0xff] }
 0x768   : > { %v4036_v19 = vadd.f32 %v4035_v36, %v3923_v3  ;;  %v4148_v39 = vpop.f32.mrf.mxu3 }
 0x769   : > { %v3925_v48 = vpop.f32.mrf.mxu1  ;;  %4441 = vmatmul.f32.vlgmr.msrb.gmra.mxu2 %v5663_v59  ;;  %v5678_v59 = vld [vmem:[%s6104_s28 + $0x120] sm:$0xff] }
 0x76a   : > { %v7548_v2 = vadd.f32 %v4148_v39, %v4036_v19 }
 0x76b   : > { %v3812_v13 = vpop.f32.mrf.mxu0 }
 0x76c   : > { %v3813_v58 = vadd.f32 %v3812_v13, %v7433_v46  ;;  %4328 = vmatmul.f32.vlgmr.msrb.gmra.mxu1 %v5664_v42  ;;  %v4038_v57 = vpop.f32.mrf.mxu2  ;;  %v5679_v42 = vld [vmem:[%s6104_s28 + $0x130] sm:$0xff] }
 0x76d   : > { %4554 = vmatmul.f32.vlgmr.msrb.gmra.mxu3 %v5665_v33  ;;  %v5680_v33 = vld [vmem:[%s6104_s28 + $0x128] sm:$0xff] }
 0x76e   : > { %v3926_v0 = vadd.f32 %v3925_v48, %v3813_v58  ;;  %4215 = vmatmul.f32.vlgmr.msrb.gmra.mxu0 %v5662_v56 }
 0x770   : > { %v4039_v10 = vadd.f32 %v4038_v57, %v3926_v0  ;;  %v4151_v24 = vpop.f32.mrf.mxu3  ;;  %v5681_v57 = vld [vmem:[%s6104_s28 + $0x138] sm:$0xff] }
 0x771   : > { %v3928_v54 = vpop.f32.mrf.mxu1  ;;  %4444 = vmatmul.f32.gmra.mxu2 %v5667_v15 }
 0x772   : > { %v7555_v17 = vadd.f32 %v4151_v24, %v4039_v10 }
 0x773   : > { %v3815_v12 = vpop.f32.mrf.mxu0 }
 0x774   : > { %v3816_v4 = vadd.f32 %v3815_v12, %v7433_v46  ;;  %4331 = vmatmul.f32.gmra.mxu1 %v5668_v53  ;;  %v4041_v16 = vpop.f32.mrf.mxu2  ;;  %v5682_v53 = vld [vmem:[%s6104_s28 + $0x160] sm:$0xff] }
 0x775   : > { %4557 = vmatmul.f32.gmra.mxu3 %v5669_v37  ;;  %v5683_v37 = vld [vmem:[%s6104_s28 + $0x170] sm:$0xff] }
 0x776   : > { %v3929_v18 = vadd.f32 %v3928_v54, %v3816_v4  ;;  %4218 = vmatmul.f32.gmra.mxu0 %v5666_v14 }
 0x778   : > { %v4042_v26 = vadd.f32 %v4041_v16, %v3929_v18  ;;  %v4154_v27 = vpop.f32.mrf.mxu3  ;;  %v5684_v16 = vld [vmem:[%s6104_s28 + $0x168] sm:$0xff] }
 0x779   : > { %v3931_v43 = vpop.f32.mrf.mxu1  ;;  %4447 = vmatmul.f32.gmra.mxu2 %v5671_v40 }
 0x77a   : > { %v7562_v28 = vadd.f32 %v4154_v27, %v4042_v26  ;;  %v5685_v26 = vld [vmem:[%s6104_s28 + $0x178] sm:$0xff] }
 0x77b   : > { %v3818_v44 = vpop.f32.mrf.mxu0 }
 0x77c   : > { %v3819_v8 = vadd.f32 %v3818_v44, %v7433_v46  ;;  %4334 = vmatmul.f32.gmra.mxu1 %v5672_v38  ;;  %v4044_v30 = vpop.f32.mrf.mxu2 }
 0x77d   : > { %4560 = vmatmul.f32.gmra.mxu3 %v5673_v9  ;;  %v5686_v9 = vld [vmem:[%s6104_s28 + $0x1a0] sm:$0xff] }
 0x77e   : > { %v3932_v47 = vadd.f32 %v3931_v43, %v3819_v8  ;;  %4221 = vmatmul.f32.gmra.mxu0 %v5670_v11 }
 0x780   : > { %v4045_v1 = vadd.f32 %v4044_v30, %v3932_v47  ;;  %v4157_v21 = vpop.f32.mrf.mxu3  ;;  %v5687_v30 = vld [vmem:[%s6104_s28 + $0x1b0] sm:$0xff] }
 0x781   : > { %v3934_v45 = vpop.f32.mrf.mxu1  ;;  %4450 = vmatmul.f32.gmra.mxu2 %v5675_v34 }
 0x782   : > { %v7569_v63 = vadd.f32 %v4157_v21, %v4045_v1  ;;  %v5688_v1 = vld [vmem:[%s6104_s28 + $0x1a8] sm:$0xff] }
 0x783   : > { %v3821_v22 = vpop.f32.mrf.mxu0 }
 0x784   : > { %v3822_v5 = vadd.f32 %v3821_v22, %v7433_v46  ;;  %4337 = vmatmul.f32.gmra.mxu1 %v5676_v6  ;;  %v4047_v36 = vpop.f32.mrf.mxu2  ;;  %v5689_v22 = vld [vmem:[%s6104_s28 + $0x1b8] sm:$0xff] }
 0x785   : > { %4563 = vmatmul.f32.gmra.mxu3 %v5677_v35 }
 0x786   : > { %v3935_v3 = vadd.f32 %v3934_v45, %v3822_v5  ;;  %4224 = vmatmul.f32.gmra.mxu0 %v5674_v60 }
 0x788   : > { %v4048_v19 = vadd.f32 %v4047_v36, %v3935_v3  ;;  %v4160_v39 = vpop.f32.mrf.mxu3  ;;  %v5690_v36 = vld [vmem:[%s6104_s28 + $0x1e0] sm:$0xff] }
 0x789   : > { %v3937_v0 = vpop.f32.mrf.mxu1  ;;  %4453 = vmatmul.f32.gmra.mxu2 %v5679_v42 }
 0x78a   : > { %v7576_v48 = vadd.f32 %v4160_v39, %v4048_v19  ;;  %v5691_v19 = vld [vmem:[%s6104_s28 + $0x1f0] sm:$0xff] }
 0x78b   : > { %v3824_v13 = vpop.f32.mrf.mxu0 }
 0x78c   : > { %v3825_v58 = vadd.f32 %v3824_v13, %v7433_v46  ;;  %4340 = vmatmul.f32.gmra.mxu1 %v5680_v33  ;;  %v4050_v10 = vpop.f32.mrf.mxu2  ;;  %v5692_v13 = vld [vmem:[%s6104_s28 + $0x1e8] sm:$0xff] }
 0x78d   : > { %4566 = vmatmul.f32.gmra.mxu3 %v5681_v57 }
 0x78e   : > { %v3938_v56 = vadd.f32 %v3937_v0, %v3825_v58  ;;  %4227 = vmatmul.f32.gmra.mxu0 %v5678_v59  ;;  %v5693_v58 = vld [vmem:[%s6104_s28 + $0x1f8] sm:$0xff] }
 0x790   : > { %v4051_v12 = vadd.f32 %v4050_v10, %v3938_v56  ;;  %v4163_v54 = vpop.f32.mrf.mxu3 }
 0x791   : > { %v3940_v14 = vpop.f32.mrf.mxu1  ;;  %4456 = vmatmul.f32.gmra.mxu2 %v5683_v37 }
 0x792   : > { %v7583_v18 = vadd.f32 %v4163_v54, %v4051_v12  ;;  %v5694_v12 = vld [vmem:[%s6104_s28 + $0x220] sm:$0xff]  ;;  %v5697_v54 = vld [vmem:[%s6104_s28 + $0x238] sm:$0xff] }
 0x793   : > { %v3827_v4 = vpop.f32.mrf.mxu0 }
 0x794   : > { %v3828_v24 = vadd.f32 %v3827_v4, %v7433_v46  ;;  %4343 = vmatmul.f32.gmra.mxu1 %v5684_v16  ;;  %v4053_v44 = vpop.f32.mrf.mxu2  ;;  %v5695_v4 = vld [vmem:[%s6104_s28 + $0x230] sm:$0xff] }
 0x795   : > { %4569 = vmatmul.f32.gmra.mxu3 %v5685_v26 }
 0x796   : > { %v3941_v15 = vadd.f32 %v3940_v14, %v3828_v24  ;;  %4230 = vmatmul.f32.gmra.mxu0 %v5682_v53  ;;  %v5696_v24 = vld [vmem:[%s6104_s28 + $0x228] sm:$0xff] }
 0x798   : > { %v4054_v8 = vadd.f32 %v4053_v44, %v3941_v15  ;;  %v4166_v47 = vpop.f32.mrf.mxu3 }
 0x799   : > { %v3943_v40 = vpop.f32.mrf.mxu1  ;;  %4459 = vmatmul.f32.gmra.mxu2 %v5687_v30 }
 0x79a   : > { %v7590_v11 = vadd.f32 %v4166_v47, %v4054_v8  ;;  %v5700_v47 = vld [vmem:[%s6104_s28 + $0x268] sm:$0xff] }
 0x79b   : > { %v3830_v27 = vpop.f32.mrf.mxu0 }
 0x79c   : > { %v3831_v43 = vadd.f32 %v3830_v27, %v7433_v46  ;;  %4346 = vmatmul.f32.gmra.mxu1 %v5688_v1  ;;  %v4056_v5 = vpop.f32.mrf.mxu2  ;;  %v5698_v27 = vld [vmem:[%s6104_s28 + $0x260] sm:$0xff] }
 0x79d   : > { %4572 = vmatmul.f32.gmra.mxu3 %v5689_v22 }
 0x79e   : > { %v3944_v38 = vadd.f32 %v3943_v40, %v3831_v43  ;;  %4233 = vmatmul.f32.gmra.mxu0 %v5686_v9  ;;  %v5699_v43 = vld [vmem:[%s6104_s28 + $0x270] sm:$0xff]  ;;  %v5701_v40 = vld [vmem:[%s6104_s28 + $0x278] sm:$0xff] }
 0x7a0   : > { %v4057_v21 = vadd.f32 %v4056_v5, %v3944_v38  ;;  %v4169_v60 = vpop.f32.mrf.mxu3 }
 0x7a1   : > { %v3946_v6 = vpop.f32.mrf.mxu1  ;;  %4462 = vmatmul.f32.gmra.mxu2 %v5691_v19 }
 0x7a2   : > { %v7597_v34 = vadd.f32 %v4169_v60, %v4057_v21  ;;  %v5703_v60 = vld [vmem:[%s6104_s28 + $0x2b0] sm:$0xff] }
 0x7a3   : > { %v3833_v45 = vpop.f32.mrf.mxu0 }
 0x7a4   : > { %v3834_v3 = vadd.f32 %v3833_v45, %v7433_v46  ;;  %4349 = vmatmul.f32.gmra.mxu1 %v5692_v13  ;;  %v4059_v39 = vpop.f32.mrf.mxu2 }
 0x7a5   : > { %4575 = vmatmul.f32.gmra.mxu3 %v5693_v58 }
 0x7a6   : > { %v3947_v35 = vadd.f32 %v3946_v6, %v3834_v3  ;;  %4236 = vmatmul.f32.gmra.mxu0 %v5690_v36  ;;  %v5702_v3 = vld [vmem:[%s6104_s28 + $0x2a0] sm:$0xff]  ;;  %v5704_v6 = vld [vmem:[%s6104_s28 + $0x2a8] sm:$0xff] }
 0x7a8   : > { %v4060_v0 = vadd.f32 %v4059_v39, %v3947_v35  ;;  %v4172_v42 = vpop.f32.mrf.mxu3  ;;  %v5705_v35 = vld [vmem:[%s6104_s28 + $0x2b8] sm:$0xff] }
 0x7a9   : > { %v3949_v57 = vpop.f32.mrf.mxu1  ;;  %4465 = vmatmul.f32.gmra.mxu2 %v5695_v4 }
 0x7aa   : > { %v7604_v33 = vadd.f32 %v4172_v42, %v4060_v0  ;;  %v5706_v42 = vld [vmem:[%s6104_s28 + $0x2e0] sm:$0xff] }
 0x7ab   : > { %v3836_v56 = vpop.f32.mrf.mxu0 }
 0x7ac   : > { %v3837_v59 = vadd.f32 %v3836_v56, %v7433_v46  ;;  %4352 = vmatmul.f32.gmra.mxu1 %v5696_v24  ;;  %v4062_v14 = vpop.f32.mrf.mxu2 }
 0x7ad   : > { %4578 = vmatmul.f32.gmra.mxu3 %v5697_v54 }
 0x7ae   : > { %v3950_v10 = vadd.f32 %v3949_v57, %v3837_v59  ;;  %4239 = vmatmul.f32.gmra.mxu0 %v5694_v12  ;;  %v5707_v57 = vld [vmem:[%s6104_s28 + $0x2f0] sm:$0xff]  ;;  %v5709_v12 = vld [vmem:[%s6104_s28 + $0x2f8] sm:$0xff] }
 0x7b0   : > { %v4063_v15 = vadd.f32 %v4062_v14, %v3950_v10  ;;  %v4175_v16 = vpop.f32.mrf.mxu3  ;;  %v5708_v10 = vld [vmem:[%s6104_s28 + $0x2e8] sm:$0xff] }
 0x7b1   : > { %v3952_v44 = vpop.f32.mrf.mxu1  ;;  %4468 = vmatmul.f32.gmra.mxu2 %v5699_v43  ;;  %v5713_v43 = vld [vmem:[%s6104_s28 + $0x338] sm:$0xff] }
 0x7b2   : > { %v7611_v26 = vadd.f32 %v4175_v16, %v4063_v15 }
 0x7b3   : > { %v3839_v53 = vpop.f32.mrf.mxu0 }
 0x7b4   : > { %v3840_v37 = vadd.f32 %v3839_v53, %v7433_v46  ;;  %4355 = vmatmul.f32.gmra.mxu1 %v5700_v47  ;;  %v4065_v38 = vpop.f32.mrf.mxu2 }
 0x7b5   : > { %4581 = vmatmul.f32.gmra.mxu3 %v5701_v40 }
 0x7b6   : > { %v3953_v8 = vadd.f32 %v3952_v44, %v3840_v37  ;;  %4242 = vmatmul.f32.gmra.mxu0 %v5698_v27  ;;  %v5710_v44 = vld [vmem:[%s6104_s28 + $0x320] sm:$0xff]  ;;  %v5712_v27 = vld [vmem:[%s6104_s28 + $0x328] sm:$0xff] }
 0x7b8   : > { %v4066_v9 = vadd.f32 %v4065_v38, %v3953_v8  ;;  %v4178_v22 = vpop.f32.mrf.mxu3  ;;  %v5711_v8 = vld [vmem:[%s6104_s28 + $0x330] sm:$0xff] }
 0x7b9   : > { %v3955_v21 = vpop.f32.mrf.mxu1  ;;  %4471 = vmatmul.f32.gmra.mxu2 %v5703_v60  ;;  %v5716_v60 = vld [vmem:[%s6104_s28 + $0x368] sm:$0xff] }
 0x7ba   : > { %v7618_v5 = vadd.f32 %v4178_v22, %v4066_v9 }
 0x7bb   : > { %v3842_v30 = vpop.f32.mrf.mxu0 }
 0x7bc   : > { %v3843_v1 = vadd.f32 %v3842_v30, %v7433_v46  ;;  %4358 = vmatmul.f32.gmra.mxu1 %v5704_v6  ;;  %v4068_v36 = vpop.f32.mrf.mxu2  ;;  %v5717_v6 = vld [vmem:[%s6104_s28 + $0x378] sm:$0xff] }
 0x7bd   : > { %4584 = vmatmul.f32.gmra.mxu3 %v5705_v35 }
 0x7be   : > { %v3956_v45 = vadd.f32 %v3955_v21, %v3843_v1  ;;  %4245 = vmatmul.f32.gmra.mxu0 %v5702_v3  ;;  %v5715_v3 = vld [vmem:[%s6104_s28 + $0x370] sm:$0xff] }
 0x7c0   : > { %v4069_v19 = vadd.f32 %v4068_v36, %v3956_v45  ;;  %v4181_v39 = vpop.f32.mrf.mxu3  ;;  %v5714_v45 = vld [vmem:[%s6104_s28 + $0x360] sm:$0xff] }
 0x7c1   : > { %v3958_v56 = vpop.f32.mrf.mxu1  ;;  %4474 = vmatmul.f32.gmra.mxu2 %v5707_v57  ;;  %v5719_v57 = vld [vmem:[%s6104_s28 + $0x3b0] sm:$0xff] }
 0x7c2   : > { %v7625_v0 = vadd.f32 %v4181_v39, %v4069_v19 }
 0x7c3   : > { %v3845_v13 = vpop.f32.mrf.mxu0 }
 0x7c4   : > { %v3846_v58 = vadd.f32 %v3845_v13, %v7433_v46  ;;  %4361 = vmatmul.f32.gmra.mxu1 %v5708_v10  ;;  %v4071_v4 = vpop.f32.mrf.mxu2  ;;  %v5720_v10 = vld [vmem:[%s6104_s28 + $0x3a8] sm:$0xff] }
 0x7c5   : > { %4587 = vmatmul.f32.gmra.mxu3 %v5709_v12  ;;  %v5721_v12 = vld [vmem:[%s6104_s28 + $0x3b8] sm:$0xff] }
 0x7c6   : > { %v3959_v59 = vadd.f32 %v3958_v56, %v3846_v58  ;;  %4248 = vmatmul.f32.gmra.mxu0 %v5706_v42  ;;  %v5718_v42 = vld [vmem:[%s6104_s28 + $0x3a0] sm:$0xff] }
 0x7c8   : > { %v4072_v24 = vadd.f32 %v4071_v4, %v3959_v59  ;;  %v4184_v15 = vpop.f32.mrf.mxu3 }
 0x7c9   : > { %v3961_v37 = vpop.f32.mrf.mxu1  ;;  %4477 = vmatmul.f32.gmra.mxu2 %v5711_v8  ;;  %v5722_v8 = vld [vmem:[%s6104_s28 + $0x3e0] sm:$0xff] }
 0x7ca   : > { %v7632_v53 = vadd.f32 %v4184_v15, %v4072_v24 }
 0x7cb   : > { %v3848_v54 = vpop.f32.mrf.mxu0 }
 0x7cc   : > { %v3849_v14 = vadd.f32 %v3848_v54, %v7433_v46  ;;  %4364 = vmatmul.f32.gmra.mxu1 %v5712_v27  ;;  %v4074_v47 = vpop.f32.mrf.mxu2  ;;  %v5723_v27 = vld [vmem:[%s6104_s28 + $0x3f0] sm:$0xff] }
 0x7cd   : > { %4590 = vmatmul.f32.gmra.mxu3 %v5713_v43  ;;  %v5724_v43 = vld [vmem:[%s6104_s28 + $0x3e8] sm:$0xff] }
 0x7ce   : > { %v3962_v16 = vadd.f32 %v3961_v37, %v3849_v14  ;;  %4251 = vmatmul.f32.gmra.mxu0 %v5710_v44 }
 0x7d0   : > { %v4075_v40 = vadd.f32 %v4074_v47, %v3962_v16  ;;  %v4187_v30 = vpop.f32.mrf.mxu3  ;;  %v5725_v47 = vld [vmem:[%s6104_s28 + $0x3f8] sm:$0xff] }
 0x7d1   : > { %v3964_v22 = vpop.f32.mrf.mxu1  ;;  %4480 = vmatmul.f32.gmra.mxu2 %v5715_v3  ;;  %v5727_v3 = vld [vmem:[%s6104_s28 + $0x430] sm:$0xff] }
 0x7d2   : > { %v7639_v1 = vadd.f32 %v4187_v30, %v4075_v40 }
 0x7d3   : > { %v3851_v38 = vpop.f32.mrf.mxu0 }
 0x7d4   : > { %v3852_v9 = vadd.f32 %v3851_v38, %v7433_v46  ;;  %4367 = vmatmul.f32.gmra.mxu1 %v5716_v60  ;;  %v4077_v35 = vpop.f32.mrf.mxu2 }
 0x7d5   : > { %4593 = vmatmul.f32.gmra.mxu3 %v5717_v6  ;;  %v5728_v6 = vld [vmem:[%s6104_s28 + $0x428] sm:$0xff] }
 0x7d6   : > { %v3965_v21 = vadd.f32 %v3964_v22, %v3852_v9  ;;  %4254 = vmatmul.f32.gmra.mxu0 %v5714_v45  ;;  %v5726_v45 = vld [vmem:[%s6104_s28 + $0x420] sm:$0xff] }
 0x7d8   : > { %v4078_v36 = vadd.f32 %v4077_v35, %v3965_v21  ;;  %v4190_v58 = vpop.f32.mrf.mxu3  ;;  %v5729_v35 = vld [vmem:[%s6104_s28 + $0x438] sm:$0xff] }
 0x7d9   : > { %v3967_v56 = vpop.f32.mrf.mxu1  ;;  %4483 = vmatmul.f32.gmra.mxu2 %v5719_v57  ;;  %v5731_v57 = vld [vmem:[%s6104_s28 + $0x470] sm:$0xff] }
 0x7da   : > { %v7646_v39 = vadd.f32 %v4190_v58, %v4078_v36 }
 0x7db   : > { %v3854_v19 = vpop.f32.mrf.mxu0 }
 0x7dc   : > { %v3855_v13 = vadd.f32 %v3854_v19, %v7433_v46  ;;  %4370 = vmatmul.f32.gmra.mxu1 %v5720_v10  ;;  %v4080_v4 = vpop.f32.mrf.mxu2 }
 0x7dd   : > { %4596 = vmatmul.f32.gmra.mxu3 %v5721_v12  ;;  %v5732_v12 = vld [vmem:[%s6104_s28 + $0x468] sm:$0xff] }
 0x7de   : > { %v3968_v59 = vadd.f32 %v3967_v56, %v3855_v13  ;;  %4257 = vmatmul.f32.gmra.mxu0 %v5718_v42  ;;  %v5730_v42 = vld [vmem:[%s6104_s28 + $0x460] sm:$0xff] }
 0x7e0   : > { %v4081_v24 = vadd.f32 %v4080_v4, %v3968_v59  ;;  %v4193_v15 = vpop.f32.mrf.mxu3  ;;  %v5733_v4 = vld [vmem:[%s6104_s28 + $0x478] sm:$0xff] }
 0x7e1   : > { %v3970_v16 = vpop.f32.mrf.mxu1  ;;  %4486 = vmatmul.f32.gmra.mxu2 %v5723_v27  ;;  %v5735_v27 = vld [vmem:[%s6104_s28 + $0x4b0] sm:$0xff] }
 0x7e2   : > { %v7653_v37 = vadd.f32 %v4193_v15, %v4081_v24 }
 0x7e3   : > { %v3857_v54 = vpop.f32.mrf.mxu0 }
 0x7e4   : > { %v3858_v14 = vadd.f32 %v3857_v54, %v7433_v46  ;;  %4373 = vmatmul.f32.gmra.mxu1 %v5724_v43  ;;  %v4083_v40 = vpop.f32.mrf.mxu2 }
 0x7e5   : > { %4599 = vmatmul.f32.gmra.mxu3 %v5725_v47  ;;  %v5736_v47 = vld [vmem:[%s6104_s28 + $0x4a8] sm:$0xff] }
 0x7e6   : > { %v3971_v44 = vadd.f32 %v3970_v16, %v3858_v14  ;;  %4260 = vmatmul.f32.gmra.mxu0 %v5722_v8  ;;  %v5734_v8 = vld [vmem:[%s6104_s28 + $0x4a0] sm:$0xff] }
 0x7e8   : > { %v4084_v38 = vadd.f32 %v4083_v40, %v3971_v44  ;;  %v4196_v9 = vpop.f32.mrf.mxu3  ;;  %v5737_v40 = vld [vmem:[%s6104_s28 + $0x4b8] sm:$0xff] }
 0x7e9   : > { %v4329_v21 = vpop.f32.mrf.mxu1  ;;  %4489 = vmatmul.f32.gmra.mxu2 %v5727_v3  ;;  %v5738_v3 = vld [vmem:[%s6104_s28 + $0x4e0] sm:$0xff] }
 0x7ea   : > { %v7660_v22 = vadd.f32 %v4196_v9, %v4084_v38 }
 0x7eb   : > { %v4216_v46 = vpop.f32.mrf.mxu0 }
 0x7ec   : > { %v4217_v30 = vadd.f32 %v4216_v46, %v7443_v20  ;;  %4376 = vmatmul.f32.gmra.mxu1 %v5728_v6  ;;  %v4442_v36 = vpop.f32.mrf.mxu2 }
 0x7ed   : > { %4602 = vmatmul.f32.gmra.mxu3 %v5729_v35  ;;  %v5740_v35 = vld [vmem:[%s6104_s28 + $0x4e8] sm:$0xff] }
 0x7ee   : > { %4263 = vmatmul.f32.gmra.mxu0 %v5726_v45  ;;  %v4330_v60 = vadd.f32 %v4329_v21, %v4217_v30 }
 0x7f0   : > { %v4443_v19 = vadd.f32 %v4442_v36, %v4330_v60  ;;  %v4555_v58 = vpop.f32.mrf.mxu3  ;;  %v5739_v60 = vld [vmem:[%s6104_s28 + $0x4f0] sm:$0xff]  ;;  %v5741_v36 = vld [vmem:[%s6104_s28 + $0x4f8] sm:$0xff] }
 0x7f1   : > { %v4332_v59 = vpop.f32.mrf.mxu1  ;;  %4492 = vmatmul.f32.gmra.mxu2 %v5731_v57  ;;  %v5743_v57 = vld [vmem:[%s6104_s28 + $0x530] sm:$0xff] }
 0x7f2   : > { %v4556_v56 = vadd.f32 %v4555_v58, %v4443_v19 }
 0x7f3   : > { %v4219_v20 = vpop.f32.mrf.mxu0 }
 0x7f4   : > { %v4220_v13 = vadd.f32 %v4219_v20, %v7450_v62  ;;  %4654 = vst [vmem:[%s6415_s20 + $0x18] sm:$0xff] %v4556_v56  ;;  %4379 = vmatmul.f32.gmra.mxu1 %v5732_v12  ;;  %v4445_v24 = vpop.f32.mrf.mxu2  ;;  %v5744_v12 = vld [vmem:[%s6104_s28 + $0x528] sm:$0xff] }
 0x7f5   : > { %4605 = vmatmul.f32.gmra.mxu3 %v5733_v4  ;;  %v5745_v4 = vld [vmem:[%s6104_s28 + $0x538] sm:$0xff] }
 0x7f6   : > { %4266 = vmatmul.f32.gmra.mxu0 %v5730_v42  ;;  %v4333_v10 = vadd.f32 %v4332_v59, %v4220_v13  ;;  %v5742_v42 = vld [vmem:[%s6104_s28 + $0x520] sm:$0xff] }
 0x7f8   : > { %v4446_v62 = vadd.f32 %v4445_v24, %v4333_v10  ;;  %v4558_v15 = vpop.f32.mrf.mxu3 }
 0x7f9   : > { %v4335_v44 = vpop.f32.mrf.mxu1  ;;  %4495 = vmatmul.f32.gmra.mxu2 %v5735_v27 }
 0x7fa   : > { %v4559_v16 = vadd.f32 %v4558_v15, %v4446_v62 }
 0x7fb   : > { %v4222_v54 = vpop.f32.mrf.mxu0 }
 0x7fc   : > { %v4223_v14 = vadd.f32 %v4222_v54, %v7457_v51  ;;  %4658 = vst [vmem:[%s6415_s20 + $0x38] sm:$0xff] %v4559_v16  ;;  %4382 = vmatmul.f32.gmra.mxu1 %v5736_v47  ;;  %v4448_v38 = vpop.f32.mrf.mxu2  ;;  %v5749_v47 = vld [vmem:[%s6104_s28 + $0x578] sm:$0xff] }
 0x7fd   : > { %4608 = vmatmul.f32.gmra.mxu3 %v5737_v40 }
 0x7fe   : > { %4269 = vmatmul.f32.gmra.mxu0 %v5734_v8  ;;  %v4336_v43 = vadd.f32 %v4335_v44, %v4223_v14  ;;  %v5746_v44 = vld [vmem:[%s6104_s28 + $0x560] sm:$0xff]  ;;  %v5747_v8 = vld [vmem:[%s6104_s28 + $0x570] sm:$0xff] }
 0x800   : > { %v4449_v51 = vadd.f32 %v4448_v38, %v4336_v43  ;;  %v4561_v30 = vpop.f32.mrf.mxu3  ;;  %v5748_v43 = vld [vmem:[%s6104_s28 + $0x568] sm:$0xff] }
 0x801   : > { %v4338_v45 = vpop.f32.mrf.mxu1  ;;  %4498 = vmatmul.f32.gmra.mxu2 %v5739_v60  ;;  %v5752_v60 = vld [vmem:[%s6104_s28 + $0x5a8] sm:$0xff] }
 0x802   : > { %v4562_v21 = vadd.f32 %v4561_v30, %v4449_v51 }
 0x803   : > { %v4225_v46 = vpop.f32.mrf.mxu0 }
 0x804   : > { %v4226_v9 = vadd.f32 %v4225_v46, %v7464_v25  ;;  %4662 = vst [vmem:[%s6415_s20 + $0x58] sm:$0xff] %v4562_v21  ;;  %4385 = vmatmul.f32.gmra.mxu1 %v5740_v35  ;;  %v4451_v19 = vpop.f32.mrf.mxu2  ;;  %v5750_v21 = vld [vmem:[%s6104_s28 + $0x5a0] sm:$0xff] }
 0x805   : > { %4611 = vmatmul.f32.gmra.mxu3 %v5741_v36 }
 0x806   : > { %4272 = vmatmul.f32.gmra.mxu0 %v5738_v3  ;;  %v4339_v6 = vadd.f32 %v4338_v45, %v4226_v9  ;;  %v5751_v45 = vld [vmem:[%s6104_s28 + $0x5b0] sm:$0xff] }
 0x808   : > { %v4452_v25 = vadd.f32 %v4451_v19, %v4339_v6  ;;  %v4564_v58 = vpop.f32.mrf.mxu3  ;;  %v5753_v6 = vld [vmem:[%s6104_s28 + $0x5b8] sm:$0xff] }
 0x809   : > { %v4341_v59 = vpop.f32.mrf.mxu1  ;;  %4501 = vmatmul.f32.gmra.mxu2 %v5743_v57  ;;  %v5757_v57 = vld [vmem:[%s6104_s28 + $0x5f8] sm:$0xff] }
 0x80a   : > { %v4565_v56 = vadd.f32 %v4564_v58, %v4452_v25  ;;  %v5754_v58 = vld [vmem:[%s6104_s28 + $0x5e0] sm:$0xff] }
 0x80b   : > { %v4228_v20 = vpop.f32.mrf.mxu0 }
 0x80c   : > { %v4229_v13 = vadd.f32 %v4228_v20, %v7471_v61  ;;  %4666 = vst [vmem:[%s6415_s20 + $0x78] sm:$0xff] %v4565_v56  ;;  %4388 = vmatmul.f32.gmra.mxu1 %v5744_v12  ;;  %v4454_v24 = vpop.f32.mrf.mxu2  ;;  %v5755_v56 = vld [vmem:[%s6104_s28 + $0x5f0] sm:$0xff] }
 0x80d   : > { %4614 = vmatmul.f32.gmra.mxu3 %v5745_v4 }
 0x80e   : > { %4275 = vmatmul.f32.gmra.mxu0 %v5742_v42  ;;  %v4342_v10 = vadd.f32 %v4341_v59, %v4229_v13  ;;  %v5756_v42 = vld [vmem:[%s6104_s28 + $0x5e8] sm:$0xff] }
 0x810   : > { %v4455_v61 = vadd.f32 %v4454_v24, %v4342_v10  ;;  %v4567_v14 = vpop.f32.mrf.mxu3 }
 0x811   : > { %v4344_v16 = vpop.f32.mrf.mxu1  ;;  %4504 = vmatmul.f32.gmra.mxu2 %v5747_v8 }
 0x812   : > { %v4568_v15 = vadd.f32 %v4567_v14, %v4455_v61  ;;  %v5759_v14 = vld [vmem:[%s6104_s28 + $0x630] sm:$0xff] }
 0x813   : > { %v4231_v62 = vpop.f32.mrf.mxu0 }
 0x814   : > { %v4232_v54 = vadd.f32 %v4231_v62, %v7478_v41  ;;  %4670 = vst [vmem:[%s6415_s20 + $0x98] sm:$0xff] %v4568_v15  ;;  %4391 = vmatmul.f32.gmra.mxu1 %v5748_v43  ;;  %v4457_v40 = vpop.f32.mrf.mxu2 }
 0x815   : > { %4617 = vmatmul.f32.gmra.mxu3 %v5749_v47 }
 0x816   : > { %4278 = vmatmul.f32.gmra.mxu0 %v5746_v44  ;;  %v4345_v27 = vadd.f32 %v4344_v16, %v4232_v54  ;;  %v5758_v54 = vld [vmem:[%s6104_s28 + $0x620] sm:$0xff]  ;;  %v5760_v16 = vld [vmem:[%s6104_s28 + $0x628] sm:$0xff]  ;;  %v5761_v44 = vld [vmem:[%s6104_s28 + $0x638] sm:$0xff] }
 0x818   : > { %v4458_v41 = vadd.f32 %v4457_v40, %v4345_v27  ;;  %v4570_v46 = vpop.f32.mrf.mxu3 }
 0x819   : > { %v4347_v30 = vpop.f32.mrf.mxu1  ;;  %4507 = vmatmul.f32.gmra.mxu2 %v5751_v45 }
 0x81a   : > { %v4571_v9 = vadd.f32 %v4570_v46, %v4458_v41 }
 0x81b   : > { %v4234_v38 = vpop.f32.mrf.mxu0 }
 0x81c   : > { %v4235_v51 = vadd.f32 %v4234_v38, %v7485_v49  ;;  %4674 = vst [vmem:[%s6415_s20 + $0xb8] sm:$0xff] %v4571_v9  ;;  %4394 = vmatmul.f32.gmra.mxu1 %v5752_v60  ;;  %v4460_v35 = vpop.f32.mrf.mxu2  ;;  %v5762_v38 = vld [vmem:[%s6104_s28 + $0x660] sm:$0xff]  ;;  %v5764_v9 = vld [vmem:[%s6104_s28 + $0x668] sm:$0xff] }
 0x81d   : > { %4620 = vmatmul.f32.gmra.mxu3 %v5753_v6 }
 0x81e   : > { %4281 = vmatmul.f32.gmra.mxu0 %v5750_v21  ;;  %v4348_v3 = vadd.f32 %v4347_v30, %v4235_v51  ;;  %v5763_v51 = vld [vmem:[%s6104_s28 + $0x670] sm:$0xff]  ;;  %v5765_v30 = vld [vmem:[%s6104_s28 + $0x678] sm:$0xff] }
 0x820   : > { %v4461_v49 = vadd.f32 %v4460_v35, %v4348_v3  ;;  %v4573_v25 = vpop.f32.mrf.mxu3 }
 0x821   : > { %v4350_v13 = vpop.f32.mrf.mxu1  ;;  %4510 = vmatmul.f32.gmra.mxu2 %v5755_v56 }
 0x822   : > { %v4574_v20 = vadd.f32 %v4573_v25, %v4461_v49  ;;  %v5766_v49 = vld [vmem:[%s6104_s28 + $0x6a0] sm:$0xff]  ;;  %v5768_v25 = vld [vmem:[%s6104_s28 + $0x6a8] sm:$0xff] }
 0x823   : > { %v4237_v36 = vpop.f32.mrf.mxu0 }
 0x824   : > { %v4238_v19 = vadd.f32 %v4237_v36, %v7492_v7  ;;  %4678 = vst [vmem:[%s6415_s20 + $0xd8] sm:$0xff] %v4574_v20  ;;  %4397 = vmatmul.f32.gmra.mxu1 %v5756_v42  ;;  %v4463_v10 = vpop.f32.mrf.mxu2  ;;  %v5767_v36 = vld [vmem:[%s6104_s28 + $0x6b0] sm:$0xff]  ;;  %v5769_v20 = vld [vmem:[%s6104_s28 + $0x6b8] sm:$0xff] }
 0x825   : > { %4623 = vmatmul.f32.gmra.mxu3 %v5757_v57 }
 0x826   : > { %4284 = vmatmul.f32.gmra.mxu0 %v5754_v58  ;;  %v4351_v59 = vadd.f32 %v4350_v13, %v4238_v19 }
 0x828   : > { %v4464_v7 = vadd.f32 %v4463_v10, %v4351_v59  ;;  %v4576_v24 = vpop.f32.mrf.mxu3  ;;  %v5770_v10 = vld [vmem:[%s6104_s28 + $0x6e0] sm:$0xff] }
 0x829   : > { %v4353_v62 = vpop.f32.mrf.mxu1  ;;  %4513 = vmatmul.f32.gmra.mxu2 %v5759_v14 }
 0x82a   : > { %v4577_v61 = vadd.f32 %v4576_v24, %v4464_v7  ;;  %v5771_v7 = vld [vmem:[%s6104_s28 + $0x6f0] sm:$0xff]  ;;  %v5773_v24 = vld [vmem:[%s6104_s28 + $0x6f8] sm:$0xff] }
 0x82b   : > { %v4240_v12 = vpop.f32.mrf.mxu0 }
 0x82c   : > { %v4241_v4 = vadd.f32 %v4240_v12, %v7499_v29  ;;  %4682 = vst [vmem:[%s6415_s20 + $0xf8] sm:$0xff] %v4577_v61  ;;  %4400 = vmatmul.f32.gmra.mxu1 %v5760_v16  ;;  %v4466_v8 = vpop.f32.mrf.mxu2 }
 0x82d   : > { %4626 = vmatmul.f32.gmra.mxu3 %v5761_v44  ;;  %v5774_v44 = vld [vmem:[%s6104_s28 + $0x720] sm:$0xff] }
 0x82e   : > { %4287 = vmatmul.f32.gmra.mxu0 %v5758_v54  ;;  %v4354_v15 = vadd.f32 %v4353_v62, %v4241_v4  ;;  %v5772_v4 = vld [vmem:[%s6104_s28 + $0x6e8] sm:$0xff] }
 0x830   : > { %v4467_v29 = vadd.f32 %v4466_v8, %v4354_v15  ;;  %v4579_v47 = vpop.f32.mrf.mxu3  ;;  %v5775_v8 = vld [vmem:[%s6104_s28 + $0x730] sm:$0xff] }
 0x831   : > { %v4356_v41 = vpop.f32.mrf.mxu1  ;;  %4516 = vmatmul.f32.gmra.mxu2 %v5763_v51 }
 0x832   : > { %v4580_v40 = vadd.f32 %v4579_v47, %v4467_v29 }
 0x833   : > { %v4243_v27 = vpop.f32.mrf.mxu0 }
 0x834   : > { %v4244_v43 = vadd.f32 %v4243_v27, %v7506_v55  ;;  %4686 = vst [vmem:[%s6415_s20 + $0x118] sm:$0xff] %v4580_v40  ;;  %4403 = vmatmul.f32.gmra.mxu1 %v5764_v9  ;;  %v4469_v21 = vpop.f32.mrf.mxu2  ;;  %v5776_v27 = vld [vmem:[%s6104_s28 + $0x728] sm:$0xff]  ;;  %v5778_v9 = vld [vmem:[%s6104_s28 + $0x760] sm:$0xff] }
 0x835   : > { %4629 = vmatmul.f32.gmra.mxu3 %v5765_v30  ;;  %v5779_v30 = vld [vmem:[%s6104_s28 + $0x770] sm:$0xff] }
 0x836   : > { %4290 = vmatmul.f32.gmra.mxu0 %v5762_v38  ;;  %v4357_v46 = vadd.f32 %v4356_v41, %v4244_v43  ;;  %v5777_v43 = vld [vmem:[%s6104_s28 + $0x738] sm:$0xff] }
 0x838   : > { %v4470_v55 = vadd.f32 %v4469_v21, %v4357_v46  ;;  %v4582_v60 = vpop.f32.mrf.mxu3 }
 0x839   : > { %v4359_v35 = vpop.f32.mrf.mxu1  ;;  %4519 = vmatmul.f32.gmra.mxu2 %v5767_v36 }
 0x83a   : > { %v4583_v6 = vadd.f32 %v4582_v60, %v4470_v55  ;;  %v5780_v55 = vld [vmem:[%s6104_s28 + $0x768] sm:$0xff] }
 0x83b   : > { %v4246_v45 = vpop.f32.mrf.mxu0 }
 0x83c   : > { %v4247_v3 = vadd.f32 %v4246_v45, %v7513_v31  ;;  %4690 = vst [vmem:[%s6415_s20 + $0x138] sm:$0xff] %v4583_v6  ;;  %4406 = vmatmul.f32.gmra.mxu1 %v5768_v25  ;;  %v4472_v13 = vpop.f32.mrf.mxu2  ;;  %v5781_v45 = vld [vmem:[%s6104_s28 + $0x778] sm:$0xff]  ;;  %v5783_v25 = vld [vmem:[%s6104_s28 + $0x7b0] sm:$0xff] }
 0x83d   : > { %4632 = vmatmul.f32.gmra.mxu3 %v5769_v20 }
 0x83e   : > { %4293 = vmatmul.f32.gmra.mxu0 %v5766_v49  ;;  %v4360_v19 = vadd.f32 %v4359_v35, %v4247_v3 }
 0x840   : > { %v4473_v31 = vadd.f32 %v4472_v13, %v4360_v19  ;;  %v4585_v59 = vpop.f32.mrf.mxu3  ;;  %v5782_v19 = vld [vmem:[%s6104_s28 + $0x7a0] sm:$0xff]  ;;  %v5784_v13 = vld [vmem:[%s6104_s28 + $0x7a8] sm:$0xff] }
 0x841   : > { %v4362_v57 = vpop.f32.mrf.mxu1  ;;  %4522 = vmatmul.f32.gmra.mxu2 %v5771_v7  ;;  %v5786_v7 = vld [vmem:[%s6104_s28 + $0x7e0] sm:$0xff] }
 0x842   : > { %v4586_v42 = vadd.f32 %v4585_v59, %v4473_v31  ;;  %v5785_v31 = vld [vmem:[%s6104_s28 + $0x7b8] sm:$0xff] }
 0x843   : > { %v4249_v58 = vpop.f32.mrf.mxu0 }
 0x844   : > { %v4250_v56 = vadd.f32 %v4249_v58, %v7520_v23  ;;  %4694 = vst [vmem:[%s6415_s20 + $0x158] sm:$0xff] %v4586_v42  ;;  %4409 = vmatmul.f32.gmra.mxu1 %v5772_v4  ;;  %v4475_v61 = vpop.f32.mrf.mxu2 }
 0x845   : > { %4635 = vmatmul.f32.gmra.mxu3 %v5773_v24  ;;  %v5788_v24 = vld [vmem:[%s6104_s28 + $0x7e8] sm:$0xff] }
 0x846   : > { %4296 = vmatmul.f32.gmra.mxu0 %v5770_v10  ;;  %v4363_v12 = vadd.f32 %v4362_v57, %v4250_v56 }
 0x848   : > { %v4476_v23 = vadd.f32 %v4475_v61, %v4363_v12  ;;  %v4588_v14 = vpop.f32.mrf.mxu3  ;;  %v5787_v12 = vld [vmem:[%s6104_s28 + $0x7f0] sm:$0xff]  ;;  %v5789_v61 = vld [vmem:[%s6104_s28 + $0x7f8] sm:$0xff] }
 0x849   : > { %v4365_v16 = vpop.f32.mrf.mxu1  ;;  %4525 = vmatmul.f32.gmra.mxu2 %v5775_v8 }
 0x84a   : > { %v4589_v15 = vadd.f32 %v4588_v14, %v4476_v23 }
 0x84b   : > { %v4252_v62 = vpop.f32.mrf.mxu0 }
 0x84c   : > { %v4253_v54 = vadd.f32 %v4252_v62, %v7527_v50  ;;  %4698 = vst [vmem:[%s6415_s20 + $0x178] sm:$0xff] %v4589_v15  ;;  %4412 = vmatmul.f32.gmra.mxu1 %v5776_v27  ;;  %v4478_v47 = vpop.f32.mrf.mxu2 }
 0x84d   : > { %4638 = vmatmul.f32.gmra.mxu3 %v5777_v43 }
 0x84e   : > { %4299 = vmatmul.f32.gmra.mxu0 %v5774_v44  ;;  %v4366_v29 = vadd.f32 %v4365_v16, %v4253_v54 }
 0x850   : > { %v4479_v50 = vadd.f32 %v4478_v47, %v4366_v29  ;;  %v4591_v38 = vpop.f32.mrf.mxu3 }
 0x851   : > { %v4368_v46 = vpop.f32.mrf.mxu1  ;;  %4528 = vmatmul.f32.gmra.mxu2 %v5779_v30 }
 0x852   : > { %v4592_v51 = vadd.f32 %v4591_v38, %v4479_v50 }
 0x853   : > { %v4255_v40 = vpop.f32.mrf.mxu0 }
 0x854   : > { %v4256_v41 = vadd.f32 %v4255_v40, %v7534_v32  ;;  %4702 = vst [vmem:[%s6415_s20 + $0x198] sm:$0xff] %v4592_v51  ;;  %4415 = vmatmul.f32.gmra.mxu1 %v5780_v55  ;;  %v4481_v3 = vpop.f32.mrf.mxu2 }
 0x855   : > { %4641 = vmatmul.f32.gmra.mxu3 %v5781_v45 }
 0x856   : > { %4302 = vmatmul.f32.gmra.mxu0 %v5778_v9  ;;  %v4369_v21 = vadd.f32 %v4368_v46, %v4256_v41 }
 0x858   : > { %v4482_v32 = vadd.f32 %v4481_v3, %v4369_v21  ;;  %v4594_v35 = vpop.f32.mrf.mxu3 }
 0x859   : > { %v4371_v36 = vpop.f32.mrf.mxu1  ;;  %4531 = vmatmul.f32.gmra.mxu2 %v5783_v25 }
 0x85a   : > { %v4595_v49 = vadd.f32 %v4594_v35, %v4482_v32 }
 0x85b   : > { %v4258_v60 = vpop.f32.mrf.mxu0 }
 0x85c   : > { %v4259_v6 = vadd.f32 %v4258_v60, %v7541_v52  ;;  %4706 = vst [vmem:[%s6415_s20 + $0x1b8] sm:$0xff] %v4595_v49  ;;  %4418 = vmatmul.f32.gmra.mxu1 %v5784_v13  ;;  %v4484_v58 = vpop.f32.mrf.mxu2 }
 0x85d   : > { %4644 = vmatmul.f32.gmra.mxu3 %v5785_v31 }
 0x85e   : > { %4305 = vmatmul.f32.gmra.mxu0 %v5782_v19  ;;  %v4372_v20 = vadd.f32 %v4371_v36, %v4259_v6 }
 0x860   : > { %v4485_v52 = vadd.f32 %v4484_v58, %v4372_v20  ;;  %v4597_v42 = vpop.f32.mrf.mxu3 }
 0x861   : > { %v4374_v10 = vpop.f32.mrf.mxu1  ;;  %4534 = vmatmul.f32.gmra.mxu2 %v5787_v12 }
 0x862   : > { %v4598_v57 = vadd.f32 %v4597_v42, %v4485_v52 }
 0x863   : > { %v4261_v56 = vpop.f32.mrf.mxu0 }
 0x864   : > { %v4262_v59 = vadd.f32 %v4261_v56, %v7548_v2  ;;  %4710 = vst [vmem:[%s6415_s20 + $0x1d8] sm:$0xff] %v4598_v57  ;;  %4421 = vmatmul.f32.gmra.mxu1 %v5788_v24  ;;  %v4487_v23 = vpop.f32.mrf.mxu2 }
 0x865   : > { %4647 = vmatmul.f32.gmra.mxu3 %v5789_v61 }
 0x866   : > { %4308 = vmatmul.f32.gmra.mxu0 %v5786_v7  ;;  %v4375_v4 = vadd.f32 %v4374_v10, %v4262_v59 }
 0x868   : > { %v4488_v62 = vadd.f32 %v4487_v23, %v4375_v4  ;;  %v4600_v14 = vpop.f32.mrf.mxu3 }
 0x869   : > { %v4377_v16 = vpop.f32.mrf.mxu1 }
 0x86a   : > { %v4601_v15 = vadd.f32 %v4600_v14, %v4488_v62 }
 0x86b   : > { %v4264_v54 = vpop.f32.mrf.mxu0 }
 0x86c   : > { %v4265_v2 = vadd.f32 %v4264_v54, %v7555_v17  ;;  %4714 = vst [vmem:[%s6415_s20 + $0x1f8] sm:$0xff] %v4601_v15  ;;  %v4490_v8 = vpop.f32.mrf.mxu2 }
 0x86e   : > { %v4378_v44 = vadd.f32 %v4377_v16, %v4265_v2 }
 0x870   : > { %v4491_v29 = vadd.f32 %v4490_v8, %v4378_v44  ;;  %v4603_v47 = vpop.f32.mrf.mxu3 }
 0x871   : > { %v4380_v40 = vpop.f32.mrf.mxu1 }
 0x872   : > { %v4604_v50 = vadd.f32 %v4603_v47, %v4491_v29 }
 0x873   : > { %v4267_v27 = vpop.f32.mrf.mxu0 }
 0x874   : > { %v4268_v43 = vadd.f32 %v4267_v27, %v7562_v28  ;;  %4718 = vst [vmem:[%s6415_s20 + $0x218] sm:$0xff] %v4604_v50  ;;  %v4493_v38 = vpop.f32.mrf.mxu2 }
 0x876   : > { %v4381_v41 = vadd.f32 %v4380_v40, %v4268_v43 }
 0x878   : > { %v4494_v51 = vadd.f32 %v4493_v38, %v4381_v41  ;;  %v4606_v9 = vpop.f32.mrf.mxu3 }
 0x879   : > { %v4383_v21 = vpop.f32.mrf.mxu1 }
 0x87a   : > { %v4607_v30 = vadd.f32 %v4606_v9, %v4494_v51 }
 0x87b   : > { %v4270_v17 = vpop.f32.mrf.mxu0 }
 0x87c   : > { %v4271_v46 = vadd.f32 %v4270_v17, %v7569_v63  ;;  %4722 = vst [vmem:[%s6415_s20 + $0x238] sm:$0xff] %v4607_v30  ;;  %v4496_v45 = vpop.f32.mrf.mxu2 }
 0x87e   : > { %v4384_v55 = vadd.f32 %v4383_v21, %v4271_v46 }
 0x880   : > { %v4497_v3 = vadd.f32 %v4496_v45, %v4384_v55  ;;  %v4609_v60 = vpop.f32.mrf.mxu3 }
 0x881   : > { %v4386_v35 = vpop.f32.mrf.mxu1 }
 0x882   : > { %v4610_v6 = vadd.f32 %v4609_v60, %v4497_v3 }
 0x883   : > { %v4273_v28 = vpop.f32.mrf.mxu0 }
 0x884   : > { %v4274_v32 = vadd.f32 %v4273_v28, %v7576_v48  ;;  %4726 = vst [vmem:[%s6415_s20 + $0x258] sm:$0xff] %v4610_v6  ;;  %v4499_v36 = vpop.f32.mrf.mxu2 }
 0x886   : > { %v4387_v49 = vadd.f32 %v4386_v35, %v4274_v32 }
 0x888   : > { %v4500_v19 = vadd.f32 %v4499_v36, %v4387_v49  ;;  %v4612_v20 = vpop.f32.mrf.mxu3 }
 0x889   : > { %v4389_v31 = vpop.f32.mrf.mxu1 }
 0x88a   : > { %v4613_v13 = vadd.f32 %v4612_v20, %v4500_v19 }
 0x88b   : > { %v4276_v63 = vpop.f32.mrf.mxu0 }
 0x88c   : > { %v4277_v25 = vadd.f32 %v4276_v63, %v7583_v18  ;;  %4730 = vst [vmem:[%s6415_s20 + $0x278] sm:$0xff] %v4613_v13  ;;  %v4502_v52 = vpop.f32.mrf.mxu2 }
 0x88e   : > { %v4390_v58 = vadd.f32 %v4389_v31, %v4277_v25 }
 0x890   : > { %v4503_v56 = vadd.f32 %v4502_v52, %v4390_v58  ;;  %v4615_v42 = vpop.f32.mrf.mxu3 }
 0x891   : > { %v4392_v10 = vpop.f32.mrf.mxu1 }
 0x892   : > { %v4616_v57 = vadd.f32 %v4615_v42, %v4503_v56 }
 0x893   : > { %v4279_v48 = vpop.f32.mrf.mxu0 }
 0x894   : > { %v4280_v59 = vadd.f32 %v4279_v48, %v7590_v11  ;;  %4734 = vst [vmem:[%s6415_s20 + $0x298] sm:$0xff] %v4616_v57  ;;  %v4505_v12 = vpop.f32.mrf.mxu2 }
 0x896   : > { %v4393_v7 = vadd.f32 %v4392_v10, %v4280_v59 }
 0x898   : > { %v4506_v4 = vadd.f32 %v4505_v12, %v4393_v7  ;;  %v4618_v61 = vpop.f32.mrf.mxu3 }
 0x899   : > { %v4395_v62 = vpop.f32.mrf.mxu1 }
 0x89a   : > { %v4619_v23 = vadd.f32 %v4618_v61, %v4506_v4 }
 0x89b   : > { %v4282_v18 = vpop.f32.mrf.mxu0 }
 0x89c   : > { %v4283_v24 = vadd.f32 %v4282_v18, %v7597_v34  ;;  %4738 = vst [vmem:[%s6415_s20 + $0x2b8] sm:$0xff] %v4619_v23  ;;  %v4508_v2 = vpop.f32.mrf.mxu2 }
 0x89e   : > { %v4396_v54 = vadd.f32 %v4395_v62, %v4283_v24 }
 0x8a0   : > { %v4509_v14 = vadd.f32 %v4508_v2, %v4396_v54  ;;  %v4621_v16 = vpop.f32.mrf.mxu3 }
 0x8a1   : > { %v4398_v8 = vpop.f32.mrf.mxu1 }
 0x8a2   : > { %v4622_v44 = vadd.f32 %v4621_v16, %v4509_v14 }
 0x8a3   : > { %v4285_v11 = vpop.f32.mrf.mxu0 }
 0x8a4   : > { %v4286_v15 = vadd.f32 %v4285_v11, %v7604_v33  ;;  %4742 = vst [vmem:[%s6415_s20 + $0x2d8] sm:$0xff] %v4622_v44  ;;  %v4511_v27 = vpop.f32.mrf.mxu2 }
 0x8a6   : > { %v4399_v29 = vadd.f32 %v4398_v8, %v4286_v15 }
 0x8a8   : > { %v4512_v43 = vadd.f32 %v4511_v27, %v4399_v29  ;;  %v4624_v50 = vpop.f32.mrf.mxu3 }
 0x8a9   : > { %v4401_v41 = vpop.f32.mrf.mxu1 }
 0x8aa   : > { %v4625_v40 = vadd.f32 %v4624_v50, %v4512_v43 }
 0x8ab   : > { %v4288_v34 = vpop.f32.mrf.mxu0 }
 0x8ac   : > { %v4289_v47 = vadd.f32 %v4288_v34, %v7611_v26  ;;  %4746 = vst [vmem:[%s6415_s20 + $0x2f8] sm:$0xff] %v4625_v40  ;;  %v4514_v51 = vpop.f32.mrf.mxu2 }
 0x8ae   : > { %v4402_v38 = vadd.f32 %v4401_v41, %v4289_v47 }
 0x8b0   : > { %v4515_v17 = vadd.f32 %v4514_v51, %v4402_v38  ;;  %v4627_v9 = vpop.f32.mrf.mxu3 }
 0x8b1   : > { %v4404_v21 = vpop.f32.mrf.mxu1 }
 0x8b2   : > { %v4628_v30 = vadd.f32 %v4627_v9, %v4515_v17 }
 0x8b3   : > { %v4291_v33 = vpop.f32.mrf.mxu0 }
 0x8b4   : > { %v4292_v46 = vadd.f32 %v4291_v33, %v7618_v5  ;;  %4750 = vst [vmem:[%s6415_s20 + $0x318] sm:$0xff] %v4628_v30  ;;  %v4517_v45 = vpop.f32.mrf.mxu2 }
 0x8b6   : > { %v4405_v55 = vadd.f32 %v4404_v21, %v4292_v46 }
 0x8b8   : > { %v4518_v3 = vadd.f32 %v4517_v45, %v4405_v55  ;;  %v4630_v32 = vpop.f32.mrf.mxu3 }
 0x8b9   : > { %v4407_v6 = vpop.f32.mrf.mxu1 }
 0x8ba   : > { %v4631_v60 = vadd.f32 %v4630_v32, %v4518_v3 }
 0x8bb   : > { %v4294_v26 = vpop.f32.mrf.mxu0 }
 0x8bc   : > { %v4295_v28 = vadd.f32 %v4294_v26, %v7625_v0  ;;  %4754 = vst [vmem:[%s6415_s20 + $0x338] sm:$0xff] %v4631_v60  ;;  %v4520_v49 = vpop.f32.mrf.mxu2 }
 0x8be   : > { %v4408_v35 = vadd.f32 %v4407_v6, %v4295_v28 }
 0x8c0   : > { %v4521_v36 = vadd.f32 %v4520_v49, %v4408_v35  ;;  %v4633_v63 = vpop.f32.mrf.mxu3 }
 0x8c1   : > { %v4410_v20 = vpop.f32.mrf.mxu1 }
 0x8c2   : > { %v4634_v25 = vadd.f32 %v4633_v63, %v4521_v36 }
 0x8c3   : > { %v4297_v5 = vpop.f32.mrf.mxu0 }
 0x8c4   : > { %v4298_v19 = vadd.f32 %v4297_v5, %v7632_v53  ;;  %4758 = vst [vmem:[%s6415_s20 + $0x358] sm:$0xff] %v4634_v25  ;;  %v4523_v31 = vpop.f32.mrf.mxu2 }
 0x8c6   : > { %v4411_v13 = vadd.f32 %v4410_v20, %v4298_v19 }
 0x8c8   : > { %v4524_v58 = vadd.f32 %v4523_v31, %v4411_v13  ;;  %v4636_v56 = vpop.f32.mrf.mxu3 }
 0x8c9   : > { %v4413_v59 = vpop.f32.mrf.mxu1 }
 0x8ca   : > { %v4637_v48 = vadd.f32 %v4636_v56, %v4524_v58 }
 0x8cb   : > { %v4300_v0 = vpop.f32.mrf.mxu0 }
 0x8cc   : > { %v4301_v52 = vadd.f32 %v4300_v0, %v7639_v1  ;;  %4762 = vst [vmem:[%s6415_s20 + $0x378] sm:$0xff] %v4637_v48  ;;  %v4526_v57 = vpop.f32.mrf.mxu2 }
 0x8ce   : > { %v4414_v42 = vadd.f32 %v4413_v59, %v4301_v52 }
 0x8d0   : > { %v4527_v10 = vadd.f32 %v4526_v57, %v4414_v42  ;;  %v4639_v12 = vpop.f32.mrf.mxu3 }
 0x8d1   : > { %v4416_v18 = vpop.f32.mrf.mxu1 }
 0x8d2   : > { %v4640_v4 = vadd.f32 %v4639_v12, %v4527_v10 }
 0x8d3   : > { %v4303_v53 = vpop.f32.mrf.mxu0 }
 0x8d4   : > { %v4304_v7 = vadd.f32 %v4303_v53, %v7646_v39  ;;  %4766 = vst [vmem:[%s6415_s20 + $0x398] sm:$0xff] %v4640_v4  ;;  %v4529_v61 = vpop.f32.mrf.mxu2 }
 0x8d6   : > { %v4417_v24 = vadd.f32 %v4416_v18, %v4304_v7 }
 0x8d8   : > { %v4530_v23 = vadd.f32 %v4529_v61, %v4417_v24  ;;  %v4642_v54 = vpop.f32.mrf.mxu3 }
 0x8d9   : > { %v4419_v14 = vpop.f32.mrf.mxu1 }
 0x8da   : > { %v4643_v2 = vadd.f32 %v4642_v54, %v4530_v23 }
 0x8db   : > { %v4306_v1 = vpop.f32.mrf.mxu0 }
 0x8dc   : > { %v4307_v62 = vadd.f32 %v4306_v1, %v7653_v37  ;;  %4770 = vst [vmem:[%s6415_s20 + $0x3b8] sm:$0xff] %v4643_v2  ;;  %v4532_v15 = vpop.f32.mrf.mxu2 }
 0x8de   : > { %v4420_v11 = vadd.f32 %v4419_v14, %v4307_v62 }
 0x8e0   : > { %v4533_v39 = vadd.f32 %v4532_v15, %v4420_v11  ;;  %v4645_v8 = vpop.f32.mrf.mxu3 }
 0x8e1   : > { %v4422_v27 = vpop.f32.mrf.mxu1 }
 0x8e2   : > { %v4646_v29 = vadd.f32 %v4645_v8, %v4533_v39 }
 0x8e3   : > { %v4309_v16 = vpop.f32.mrf.mxu0 }
 0x8e4   : > { %v4310_v44 = vadd.f32 %v4309_v16, %v7660_v22  ;;  %4774 = vst [vmem:[%s6415_s20 + $0x3d8] sm:$0xff] %v4646_v29  ;;  %v4535_v43 = vpop.f32.mrf.mxu2 }
 0x8e6   : > { %v4423_v37 = vadd.f32 %v4422_v27, %v4310_v44 }
 0x8e8   : > { %v4536_v34 = vadd.f32 %v4535_v43, %v4423_v37  ;;  %v4648_v47 = vpop.f32.mrf.mxu3 }
 0x8ea   : > { %v4649_v50 = vadd.f32 %v4648_v47, %v4536_v34 }
 0x8ec   : > { %4778 = vst [vmem:[%s6415_s20 + $0x3f8] sm:$0xff] %v4649_v50 }
 0x8ed   : > { %5907 = shalt.err (!%p5904_p0)
}
 0x8ee   : > { %s5974_s11 = smov 512   ;;  %s5975_s26 = smov 32  }
 0x8ef   : > { %4940 = dma.vmem_to_hbm [thread:$0]  (%p6079_p7), %s4796_s30, 16384, %s4798_s4, %s4780_s15, %s5974_s11, %s5974_s11, %s5975_s26  }
 0x8f0 PF: > { %s4812_s28 = sand.u32 1, %s5946_s12   ;;  %p4954_p3 = pnand %p4910_p11, %p6045_p6 }
 0x8f1   : > { %s4813_s1 = scalar_lea.sflag [#allocation4], %s4812_s28 }
 0x8f2   : > { %p4955_p5 = pneg %p4954_p3 }
 0x8f4   : > { %5941 = dma.done.wait (%p4955_p5), %s4813_s1, 16384  }
 0x8f5   : > { %5943 = vsyncadd (%p4955_p5), %s4813_s1, 4294950912  ;;  %s20_s17 = sadd.s32 1, %s5966_s17   ;;  %s7841_s12 = smov %s5950_s13 }
 0x8f6   : > { %p17_p9 = scmp.ge.s32.totalorder %s20_s17, 4   ;;  %s7842_s13 = smov %s5954_s14 }
 0x8f7   : > { %s7843_s14 = smov %s6088_s29  ;;  %s7844_s15 = smov %s5962_s16 }
 0x8f8   : > { %s7845_s16 = smov %s7847_s10  ;;  %19 = sbr.rel (!%p17_p9) target bundleno = 9 (0x9), region = 87 }
 0x8fd   :  { %4819 = vsyncpa [#allocation3], 1 }
 0x8fe   :  { %4821 = vsyncpa [#allocation3 + $0x1], 1 }
 0x8ff   :  { %4822 = vsyncpa [#allocation6], 1 }
 0x900   :  { %4823 = vsyncpa [#allocation4], 1 }
 0x901   :  { %4825 = vsyncpa [#allocation4 + $0x1], 1 }

</bundles_post_ra>
